<compile_context>
chip_gen: v5e
topology: v5e:2x2
jax: 0.10.0
libtpu: 0.0.40
codegen_flags: <defaults>
</compile_context>

<pallas_src>
import jax
import jax.numpy as jnp
from jax.experimental import pallas as pl
from jax.experimental.pallas import tpu as pltpu

N, C_IN_EACH, H, W = 1, 256, 28, 28   # each of the 5 concatenated inputs
NUM_INPUTS = 5
C_IN_TOTAL = NUM_INPUTS * C_IN_EACH   # 1280 after concat
C_OUT = 256
C_OUT_BLK = 128                       # 2 output-channel blocks -> 2 parallel grid steps


def cat_conv1x1_kernel(x0_ref, x1_ref, x2_ref, x3_ref, x4_ref, w_ref,
                       o_ref, acc_ref):
    """Fused channel-concat + 1x1 conv for one (batch, c_out-block) tile.

    x*_ref  : (C_IN_EACH, M)        f32 activations (cast to bf16 on-chip)
    w_ref   : (C_OUT_BLK, C_IN_TOTAL) bf16 weight half, PyTorch layout
    o_ref   : (C_OUT_BLK, M)        f32 output tile
    acc_ref : (C_OUT_BLK, M)        f32 VMEM accumulator scratch
    """
    x_refs = (x0_ref, x1_ref, x2_ref, x3_ref, x4_ref)

    # First partial product initializes the accumulator (no separate zero pass).
    acc_ref[...] = jnp.dot(
        w_ref[:, 0:C_IN_EACH].astype(jnp.bfloat16),
        x_refs[0][...].astype(jnp.bfloat16),
        preferred_element_type=jnp.float32)

    # Remaining partials accumulate into the VMEM scratch (static 128-aligned
    # weight slices -> zero-copy views of the resident weight block).
    for k in range(1, NUM_INPUTS):
        acc_ref[...] += jnp.dot(
            w_ref[:, k * C_IN_EACH:(k + 1) * C_IN_EACH].astype(jnp.bfloat16),
            x_refs[k][...].astype(jnp.bfloat16),
            preferred_element_type=jnp.float32)

    o_ref[...] = acc_ref[...].astype(o_ref.dtype)


@jax.jit
def cat_conv2d(x347, x350, x353, x356, x363, weight):
    """weight: (C_OUT=256, C_IN_TOTAL=1280), ideally pre-cast to bf16 outside jit
    (= PyTorch Conv2d.weight[:, :, 0, 0])."""
    n, c, h, w = x347.shape
    m = h * w  # 784

    # Contiguous (free) reshapes only: NCHW -> (N, C, H*W). No transposes.
    xs = [x.reshape(n, c, m) for x in (x347, x350, x353, x356, x363)]

    # Full-width spatial block; inputs have a constant index over the C_OUT axis
    # so they are fetched once per batch element on a sequential core.
    x_spec = pl.BlockSpec((None, C_IN_EACH, m), lambda b, co: (b, 0, 0))
    w_spec = pl.BlockSpec((C_OUT_BLK, C_IN_TOTAL), lambda b, co: (co, 0))
    o_spec = pl.BlockSpec((None, C_OUT_BLK, m), lambda b, co: (b, co, 0))

    bytes_accessed = (NUM_INPUTS * C_IN_EACH * m * 4      # f32 activations
                      + C_OUT * C_IN_TOTAL * 2            # bf16 weight
                      + C_OUT * m * 4)                    # f32 output

    out = pl.pallas_call(
        cat_conv1x1_kernel,
        out_shape=jax.ShapeDtypeStruct((n, C_OUT, m), jnp.float32),
        grid=(n, C_OUT // C_OUT_BLK),
        in_specs=[x_spec] * NUM_INPUTS + [w_spec],
        out_specs=o_spec,
        scratch_shapes=[pltpu.VMEM((C_OUT_BLK, m), jnp.float32)],
        compiler_params=pltpu.CompilerParams(
            dimension_semantics=("parallel", "parallel"),
            vmem_limit_bytes=32 * 1024 * 1024),
        cost_estimate=pl.CostEstimate(
            flops=2 * C_OUT * C_IN_TOTAL * m,
            transcendentals=0,
            bytes_accessed=bytes_accessed),
    )(*xs, weight)

    return out.reshape(n, C_OUT, h, w)


if __name__ == "__main__":
    key = jax.random.PRNGKey(0)
    ks = jax.random.split(key, 6)
    x347 = jax.random.normal(ks[0], (N, C_IN_EACH, H, W), jnp.float32)
    x350 = jax.random.normal(ks[1], (N, C_IN_EACH, H, W), jnp.float32)
    x353 = jax.random.normal(ks[2], (N, C_IN_EACH, H, W), jnp.float32)
    x356 = jax.random.normal(ks[3], (N, C_IN_EACH, H, W), jnp.float32)
    x363 = jax.random.normal(ks[4], (N, C_IN_EACH, H, W), jnp.float32)
    # Conv2d(1280, 256, 1, bias=False) weight: (256, 1280, 1, 1) -> (256, 1280)
    weight = jax.random.normal(ks[5], (C_OUT, C_IN_TOTAL), jnp.float32) * 0.02

    # One-off parameter prep OUTSIDE the jitted call (no per-call cast op).
    w_bf16 = weight.astype(jnp.bfloat16)

    y = cat_conv2d(x347, x350, x353, x356, x363, w_bf16)
    jax.block_until_ready(y)

    # Reference: concat along channels then 1x1 conv (f32 einsum).
    x_cat = jnp.concatenate([x347, x350, x353, x356, x363], axis=1)
    y_ref = jnp.einsum("nchw,oc->nohw", x_cat, weight)
    assert y.shape == (N, C_OUT, H, W)
    # bf16 MXU inputs with f32 accumulation -> slightly looser tolerance.
    assert jnp.allclose(y, y_ref, atol=3e-2, rtol=3e-2), \
        float(jnp.max(jnp.abs(y - y_ref)))

    print("KERNEL_OK")
</pallas_src>

<mosaic_0001>
module attributes {stable_mosaic.version = 11 : i64} {
  func.func @cat_conv1x1_kernel(%arg0: i32, %arg1: i32, %arg2: memref<1x256x784xf32, #tpu.memory_space<vmem>>, %arg3: memref<1x256x784xf32, #tpu.memory_space<vmem>>, %arg4: memref<1x256x784xf32, #tpu.memory_space<vmem>>, %arg5: memref<1x256x784xf32, #tpu.memory_space<vmem>>, %arg6: memref<1x256x784xf32, #tpu.memory_space<vmem>>, %arg7: memref<128x1280xbf16, #tpu.memory_space<vmem>>, %arg8: memref<1x128x784xf32, #tpu.memory_space<vmem>>, %arg9: memref<128x784xf32, #tpu.memory_space<vmem>>) attributes {dimension_semantics = [#tpu.dimension_semantics<parallel>, #tpu.dimension_semantics<parallel>], iteration_bounds = array<i64: 1, 2>, scalar_prefetch = 0 : i64, scratch_operands = 1 : i64, tpu.core_type = #tpu.core_type<tc>, window_params = [{transform_indices = @transform_0, window_bounds = array<i64: 1, 256, 784>}, {transform_indices = @transform_1, window_bounds = array<i64: 1, 256, 784>}, {transform_indices = @transform_2, window_bounds = array<i64: 1, 256, 784>}, {transform_indices = @transform_3, window_bounds = array<i64: 1, 256, 784>}, {transform_indices = @transform_4, window_bounds = array<i64: 1, 256, 784>}, {transform_indices = @transform_5, window_bounds = array<i64: 128, 1280>}, {transform_indices = @transform_6, window_bounds = array<i64: 1, 128, 784>}]} {
    %c0 = arith.constant 0 : index
    %c0_0 = arith.constant 0 : index
    %0 = vector.load %arg7[%c0, %c0_0] : memref<128x1280xbf16, #tpu.memory_space<vmem>>, vector<128x256xbf16>
    %c0_1 = arith.constant 0 : index
    %c0_2 = arith.constant 0 : index
    %c0_3 = arith.constant 0 : index
    %1 = vector.load %arg2[%c0_1, %c0_2, %c0_3] : memref<1x256x784xf32, #tpu.memory_space<vmem>>, vector<1x256x784xf32>
    %2 = vector.shape_cast %1 : vector<1x256x784xf32> to vector<256x784xf32>
    %3 = arith.truncf %2 : vector<256x784xf32> to vector<256x784xbf16>
    %cst = arith.constant dense<0.000000e+00> : vector<128x784xf32>
    %4 = tpu.matmul %0, %3, %cst {dimension_numbers = #tpu.dot_dimension_numbers<[1], [0], [0], [1], [0, 0, 1, 1], [], []>} : vector<128x256xbf16>, vector<256x784xbf16>, vector<128x784xf32> -> vector<128x784xf32>
    %c0_4 = arith.constant 0 : index
    %c0_5 = arith.constant 0 : index
    %5 = vector.load %arg9[%c0_4, %c0_5] : memref<128x784xf32, #tpu.memory_space<vmem>>, vector<128x784xf32>
    tpu.vector_store %arg9[%c0_4, %c0_5], %4 {strides = array<i32>} : memref<128x784xf32, #tpu.memory_space<vmem>>, vector<128x784xf32>,
    %c0_6 = arith.constant 0 : index
    %c0_7 = arith.constant 0 : index
    %6 = vector.load %arg9[%c0_6, %c0_7] : memref<128x784xf32, #tpu.memory_space<vmem>>, vector<128x784xf32>
    %c0_8 = arith.constant 0 : index
    %c256 = arith.constant 256 : index
    %7 = vector.load %arg7[%c0_8, %c256] : memref<128x1280xbf16, #tpu.memory_space<vmem>>, vector<128x256xbf16>
    %c0_9 = arith.constant 0 : index
    %c0_10 = arith.constant 0 : index
    %c0_11 = arith.constant 0 : index
    %8 = vector.load %arg3[%c0_9, %c0_10, %c0_11] : memref<1x256x784xf32, #tpu.memory_space<vmem>>, vector<1x256x784xf32>
    %9 = vector.shape_cast %8 : vector<1x256x784xf32> to vector<256x784xf32>
    %10 = arith.truncf %9 : vector<256x784xf32> to vector<256x784xbf16>
    %cst_12 = arith.constant dense<0.000000e+00> : vector<128x784xf32>
    %11 = tpu.matmul %7, %10, %cst_12 {dimension_numbers = #tpu.dot_dimension_numbers<[1], [0], [0], [1], [0, 0, 1, 1], [], []>} : vector<128x256xbf16>, vector<256x784xbf16>, vector<128x784xf32> -> vector<128x784xf32>
    %12 = arith.addf %6, %11 : vector<128x784xf32>
    %c0_13 = arith.constant 0 : index
    %c0_14 = arith.constant 0 : index
    %13 = vector.load %arg9[%c0_13, %c0_14] : memref<128x784xf32, #tpu.memory_space<vmem>>, vector<128x784xf32>
    tpu.vector_store %arg9[%c0_13, %c0_14], %12 {strides = array<i32>} : memref<128x784xf32, #tpu.memory_space<vmem>>, vector<128x784xf32>,
    %c0_15 = arith.constant 0 : index
    %c0_16 = arith.constant 0 : index
    %14 = vector.load %arg9[%c0_15, %c0_16] : memref<128x784xf32, #tpu.memory_space<vmem>>, vector<128x784xf32>
    %c0_17 = arith.constant 0 : index
    %c512 = arith.constant 512 : index
    %15 = vector.load %arg7[%c0_17, %c512] : memref<128x1280xbf16, #tpu.memory_space<vmem>>, vector<128x256xbf16>
    %c0_18 = arith.constant 0 : index
    %c0_19 = arith.constant 0 : index
    %c0_20 = arith.constant 0 : index
    %16 = vector.load %arg4[%c0_18, %c0_19, %c0_20] : memref<1x256x784xf32, #tpu.memory_space<vmem>>, vector<1x256x784xf32>
    %17 = vector.shape_cast %16 : vector<1x256x784xf32> to vector<256x784xf32>
    %18 = arith.truncf %17 : vector<256x784xf32> to vector<256x784xbf16>
    %cst_21 = arith.constant dense<0.000000e+00> : vector<128x784xf32>
    %19 = tpu.matmul %15, %18, %cst_21 {dimension_numbers = #tpu.dot_dimension_numbers<[1], [0], [0], [1], [0, 0, 1, 1], [], []>} : vector<128x256xbf16>, vector<256x784xbf16>, vector<128x784xf32> -> vector<128x784xf32>
    %20 = arith.addf %14, %19 : vector<128x784xf32>
    %c0_22 = arith.constant 0 : index
    %c0_23 = arith.constant 0 : index
    %21 = vector.load %arg9[%c0_22, %c0_23] : memref<128x784xf32, #tpu.memory_space<vmem>>, vector<128x784xf32>
    tpu.vector_store %arg9[%c0_22, %c0_23], %20 {strides = array<i32>} : memref<128x784xf32, #tpu.memory_space<vmem>>, vector<128x784xf32>,
    %c0_24 = arith.constant 0 : index
    %c0_25 = arith.constant 0 : index
    %22 = vector.load %arg9[%c0_24, %c0_25] : memref<128x784xf32, #tpu.memory_space<vmem>>, vector<128x784xf32>
    %c0_26 = arith.constant 0 : index
    %c768 = arith.constant 768 : index
    %23 = vector.load %arg7[%c0_26, %c768] : memref<128x1280xbf16, #tpu.memory_space<vmem>>, vector<128x256xbf16>
    %c0_27 = arith.constant 0 : index
    %c0_28 = arith.constant 0 : index
    %c0_29 = arith.constant 0 : index
    %24 = vector.load %arg5[%c0_27, %c0_28, %c0_29] : memref<1x256x784xf32, #tpu.memory_space<vmem>>, vector<1x256x784xf32>
    %25 = vector.shape_cast %24 : vector<1x256x784xf32> to vector<256x784xf32>
    %26 = arith.truncf %25 : vector<256x784xf32> to vector<256x784xbf16>
    %cst_30 = arith.constant dense<0.000000e+00> : vector<128x784xf32>
    %27 = tpu.matmul %23, %26, %cst_30 {dimension_numbers = #tpu.dot_dimension_numbers<[1], [0], [0], [1], [0, 0, 1, 1], [], []>} : vector<128x256xbf16>, vector<256x784xbf16>, vector<128x784xf32> -> vector<128x784xf32>
    %28 = arith.addf %22, %27 : vector<128x784xf32>
    %c0_31 = arith.constant 0 : index
    %c0_32 = arith.constant 0 : index
    %29 = vector.load %arg9[%c0_31, %c0_32] : memref<128x784xf32, #tpu.memory_space<vmem>>, vector<128x784xf32>
    tpu.vector_store %arg9[%c0_31, %c0_32], %28 {strides = array<i32>} : memref<128x784xf32, #tpu.memory_space<vmem>>, vector<128x784xf32>,
    %c0_33 = arith.constant 0 : index
    %c0_34 = arith.constant 0 : index
    %30 = vector.load %arg9[%c0_33, %c0_34] : memref<128x784xf32, #tpu.memory_space<vmem>>, vector<128x784xf32>
    %c0_35 = arith.constant 0 : index
    %c1024 = arith.constant 1024 : index
    %31 = vector.load %arg7[%c0_35, %c1024] : memref<128x1280xbf16, #tpu.memory_space<vmem>>, vector<128x256xbf16>
    %c0_36 = arith.constant 0 : index
    %c0_37 = arith.constant 0 : index
    %c0_38 = arith.constant 0 : index
    %32 = vector.load %arg6[%c0_36, %c0_37, %c0_38] : memref<1x256x784xf32, #tpu.memory_space<vmem>>, vector<1x256x784xf32>
    %33 = vector.shape_cast %32 : vector<1x256x784xf32> to vector<256x784xf32>
    %34 = arith.truncf %33 : vector<256x784xf32> to vector<256x784xbf16>
    %cst_39 = arith.constant dense<0.000000e+00> : vector<128x784xf32>
    %35 = tpu.matmul %31, %34, %cst_39 {dimension_numbers = #tpu.dot_dimension_numbers<[1], [0], [0], [1], [0, 0, 1, 1], [], []>} : vector<128x256xbf16>, vector<256x784xbf16>, vector<128x784xf32> -> vector<128x784xf32>
    %36 = arith.addf %30, %35 : vector<128x784xf32>
    %c0_40 = arith.constant 0 : index
    %c0_41 = arith.constant 0 : index
    %37 = vector.load %arg9[%c0_40, %c0_41] : memref<128x784xf32, #tpu.memory_space<vmem>>, vector<128x784xf32>
    tpu.vector_store %arg9[%c0_40, %c0_41], %36 {strides = array<i32>} : memref<128x784xf32, #tpu.memory_space<vmem>>, vector<128x784xf32>,
    %c0_42 = arith.constant 0 : index
    %c0_43 = arith.constant 0 : index
    %38 = vector.load %arg9[%c0_42, %c0_43] : memref<128x784xf32, #tpu.memory_space<vmem>>, vector<128x784xf32>
    %c0_44 = arith.constant 0 : index
    %c0_45 = arith.constant 0 : index
    %c0_46 = arith.constant 0 : index
    %39 = vector.load %arg8[%c0_44, %c0_45, %c0_46] : memref<1x128x784xf32, #tpu.memory_space<vmem>>, vector<1x128x784xf32>
    %40 = vector.shape_cast %39 : vector<1x128x784xf32> to vector<128x784xf32>
    %41 = vector.shape_cast %38 : vector<128x784xf32> to vector<1x128x784xf32>
    tpu.vector_store %arg8[%c0_44, %c0_45, %c0_46], %41 {strides = array<i32>} : memref<1x128x784xf32, #tpu.memory_space<vmem>>, vector<1x128x784xf32>,
    return
  }
  func.func @transform_0(%arg0: i32, %arg1: i32) -> (i32, i32, i32) {
    %c0_i32 = arith.constant 0 : i32
    %c0_i32_0 = arith.constant 0 : i32
    %c0_i32_1 = arith.constant 0 : i32
    return %arg0, %c0_i32, %c0_i32_0 : i32, i32, i32
  }
  func.func @transform_1(%arg0: i32, %arg1: i32) -> (i32, i32, i32) {
    %c0_i32 = arith.constant 0 : i32
    %c0_i32_0 = arith.constant 0 : i32
    %c0_i32_1 = arith.constant 0 : i32
    return %arg0, %c0_i32, %c0_i32_0 : i32, i32, i32
  }
  func.func @transform_2(%arg0: i32, %arg1: i32) -> (i32, i32, i32) {
    %c0_i32 = arith.constant 0 : i32
    %c0_i32_0 = arith.constant 0 : i32
    %c0_i32_1 = arith.constant 0 : i32
    return %arg0, %c0_i32, %c0_i32_0 : i32, i32, i32
  }
  func.func @transform_3(%arg0: i32, %arg1: i32) -> (i32, i32, i32) {
    %c0_i32 = arith.constant 0 : i32
    %c0_i32_0 = arith.constant 0 : i32
    %c0_i32_1 = arith.constant 0 : i32
    return %arg0, %c0_i32, %c0_i32_0 : i32, i32, i32
  }
  func.func @transform_4(%arg0: i32, %arg1: i32) -> (i32, i32, i32) {
    %c0_i32 = arith.constant 0 : i32
    %c0_i32_0 = arith.constant 0 : i32
    %c0_i32_1 = arith.constant 0 : i32
    return %arg0, %c0_i32, %c0_i32_0 : i32, i32, i32
  }
  func.func @transform_5(%arg0: i32, %arg1: i32) -> (i32, i32) {
    %c0_i32 = arith.constant 0 : i32
    %c0_i32_0 = arith.constant 0 : i32
    return %arg1, %c0_i32 : i32, i32
  }
  func.func @transform_6(%arg0: i32, %arg1: i32) -> (i32, i32, i32) {
    %c0_i32 = arith.constant 0 : i32
    %c0_i32_0 = arith.constant 0 : i32
    return %arg0, %arg1, %c0_i32 : i32, i32, i32
  }
}

</mosaic_0001>

<bundles_post_ra>
// kernel: cat_conv2d.1
= control target key start
LH: loop header
LB: loop body
LE: loop exit
PB: predicated region body
PF: predicated region fallthrough
CT: control target
= control target key end

     0   :  { %s8332_s21 = smov 0   ;;  %s8334_s22 = smov 0   ;;  %s12824_s0 = inlined_call_operand.vmem [shape: f32[1,256,784], index: 0, kind: input, shape index: {}]   ;;  %s12825_s1 = inlined_call_operand.vmem [shape: f32[1,256,784], index: 1, kind: input, shape index: {}]   ;;  %s12826_s2 = inlined_call_operand.vmem [shape: f32[1,256,784], index: 2, kind: input, shape index: {}]   ;;  %s12827_s3 = inlined_call_operand.vmem [shape: f32[1,256,784], index: 3, kind: input, shape index: {}]   ;;  %s12828_s4 = inlined_call_operand.vmem [shape: f32[1,256,784], index: 4, kind: input, shape index: {}]   ;;  %s12829_s5 = inlined_call_operand.vmem [shape: bf16[256,1280], index: 5, kind: input, shape index: {}]   ;;  %s12830_s6 = inlined_call_operand.vmem [shape: f32[1,256,784], index: 6, kind: output, shape index: {}]  }
   0x1   :  { %s8336_s23 = smov 0  }
   0x2 LB: > { %s25_s24 = sadd.s32 1, %s8291_s22  ;;  %p7824_p0 = scmp.ge.s32.totalorder %s8295_s23, 1  ;;  %s8295_s23 = sphi %s8336_s23, %s16_s23   ;;  %s8291_s22 = sphi %s8334_s22, %s12832_s22   ;;  %s8287_s21 = sphi %s8332_s21, %s12831_s21  }
   0x3   : > { %p26_p1 = scmp.ge.s32.totalorder %s25_s24, 2  ;;  %p278_p2 = scmp.lt.s32.totalorder %s8295_s23, 3 }
   0x5   : > { %s12834_s24 = smov (%p26_p1, %s25_s24), 0  ;;  %p279_p3 = pnand %p7824_p0, %p278_p2 }
   0x6   : > { %s7825_s29 = sshll.u32 (!%p279_p3), %s8287_s21, 4 }
   0x7   : > { %282 = sbr.rel (%p279_p3) target bundleno = 2421 (0x975), region = 44  ;;  %p365_p4 = scmp.lt.s32.totalorder (!%p279_p3), %s7825_s29, 31 }
   0xc   : > { %v496_v0 = vld [vmem:[%s12824_s0 + $0x310] sm:$0xff]  ;;  %v503_v1 = vld [vmem:[%s12824_s0 + $0x348] sm:$0xff]  ;;  %v482_v5 = vld [vmem:[%s12824_s0 + $0x2a0] sm:$0xff]  ;;  %s12836_s29 = smov (!%p365_p4, %s7825_s29), 31  ;;  %vm1506_vm0 = vcmask 130048  }
   0xd   : > { %v608_v2 = vld [vmem:[%s12824_s0 + $0x690] sm:$0xff]  ;;  %v671_v3 = vpack.c.bf16 %v503_v1, %v496_v0  ;;  %v615_v4 = vld [vmem:[%s12824_s0 + $0x6c8] sm:$0xff]  ;;  %v489_v6 = vld [vmem:[%s12824_s0 + $0x2d8] sm:$0xff]  ;;  %s8247_s10 = smul.u32 40, %s12836_s29 }
   0xe   : > { %v727_v7 = vpack.c.bf16 %v615_v4, %v608_v2  ;;  %v594_v8 = vld [vmem:[%s12824_s0 + $0x620] sm:$0xff]  ;;  %v601_v9 = vld [vmem:[%s12824_s0 + $0x658] sm:$0xff]  ;;  %v664_v10 = vpack.c.bf16 %v489_v6, %v482_v5  ;;  %v468_v12 = vld [vmem:[%s12824_s0 + $0x230] sm:$0xff]  ;;  %s8248_s25 = smul.u32 56, %s12836_s29 }
   0xf   : > { %814 = vmatpush.bf16.msra.mxu0 %v671_v3  ;;  %8231 = vmatpush.bf16.msra.mxu2 %v671_v3  ;;  %v720_v11 = vpack.c.bf16 %v601_v9, %v594_v8  ;;  %v475_v13 = vld [vmem:[%s12824_s0 + $0x268] sm:$0xff]  ;;  %v580_v14 = vld [vmem:[%s12824_s0 + $0x5b0] sm:$0xff]  ;;  %v454_v18 = vld [vmem:[%s12824_s0 + $0x1c0] sm:$0xff]  ;;  %s8443_s20 = scalar_lea.vmem %s12829_s5, %s8247_s10 }
  0x10   : > { %863 = vmatpush.bf16.msra.mxu1 %v727_v7  ;;  %8239 = vmatpush.bf16.msra.mxu3 %v727_v7  ;;  %v587_v15 = vld [vmem:[%s12824_s0 + $0x5e8] sm:$0xff]  ;;  %v657_v16 = vpack.c.bf16 %v475_v13, %v468_v12  ;;  %v461_v19 = vld [vmem:[%s12824_s0 + $0x1f8] sm:$0xff]  ;;  %v566_v20 = vld [vmem:[%s12824_s0 + $0x540] sm:$0xff]  ;;  %s12223_s29 = scalar_lea.vmem %s12830_s6, %s8248_s25 }
  0x11   : > { %v713_v17 = vpack.c.bf16 %v587_v15, %v580_v14  ;;  %v573_v21 = vld [vmem:[%s12824_s0 + $0x578] sm:$0xff]  ;;  %v650_v22 = vpack.c.bf16 %v461_v19, %v454_v18  ;;  %v440_v24 = vld [vmem:[%s12824_s0 + $0x150] sm:$0xff]  ;;  %v447_v25 = vld [vmem:[%s12824_s0 + $0x188] sm:$0xff] }
  0x12   : > { %v706_v23 = vpack.c.bf16 %v573_v21, %v566_v20  ;;  %v552_v26 = vld [vmem:[%s12824_s0 + $0x4d0] sm:$0xff]  ;;  %v559_v27 = vld [vmem:[%s12824_s0 + $0x508] sm:$0xff]  ;;  %v643_v28 = vpack.c.bf16 %v447_v25, %v440_v24  ;;  %v426_v30 = vld [vmem:[%s12824_s0 + $0xe0] sm:$0xff] }
  0x13   : > { %815 = vmatpush.bf16.msra.mxu0 %v664_v10  ;;  %8232 = vmatpush.bf16.msra.mxu2 %v664_v10  ;;  %v699_v29 = vpack.c.bf16 %v559_v27, %v552_v26  ;;  %v433_v31 = vld [vmem:[%s12824_s0 + $0x118] sm:$0xff]  ;;  %v538_v32 = vld [vmem:[%s12824_s0 + $0x460] sm:$0xff]  ;;  %v412_v36 = vld [vmem:[%s12824_s0 + $0x70] sm:$0xff] }
  0x14   : > { %864 = vmatpush.bf16.msra.mxu1 %v720_v11  ;;  %8240 = vmatpush.bf16.msra.mxu3 %v720_v11  ;;  %v545_v33 = vld [vmem:[%s12824_s0 + $0x498] sm:$0xff]  ;;  %v636_v34 = vpack.c.bf16 %v433_v31, %v426_v30  ;;  %v419_v37 = vld [vmem:[%s12824_s0 + $0xa8] sm:$0xff]  ;;  %v524_v38 = vld [vmem:[%s12824_s0 + $0x3f0] sm:$0xff] }
  0x15   : > { %v692_v35 = vpack.c.bf16 %v545_v33, %v538_v32  ;;  %v531_v39 = vld [vmem:[%s12824_s0 + $0x428] sm:$0xff]  ;;  %v629_v40 = vpack.c.bf16 %v419_v37, %v412_v36  ;;  %v398_v41 = vld [vmem:[%s12824_s0] sm:$0xff]  ;;  %v405_v43 = vld [vmem:[%s12824_s0 + $0x38] sm:$0xff] }
  0x16   : > { %v685_v42 = vpack.c.bf16 %v531_v39, %v524_v38  ;;  %v510_v44 = vld [vmem:[%s12824_s0 + $0x380] sm:$0xff]  ;;  %v517_v45 = vld [vmem:[%s12824_s0 + $0x3b8] sm:$0xff]  ;;  %v8152_v47 = vld [vmem:[%s8443_s20 + $0x24] sm:$0xf0]  ;;  %v622_v54 = vpack.c.bf16 %v405_v43, %v398_v41 }
  0x17   : > { %816 = vmatpush.bf16.msra.mxu0 %v657_v16  ;;  %8233 = vmatpush.bf16.msra.mxu2 %v657_v16  ;;  %v7831_v46 = vld [vmem:[%s8443_s20] sm:$0xf]  ;;  %v8160_v49 = vld [vmem:[%s8443_s20 + $0x164] sm:$0xf0]  ;;  %v497_v50 = vld [vmem:[%s12824_s0 + $0x318] sm:$0xff]  ;;  %v678_v58 = vpack.c.bf16 %v517_v45, %v510_v44 }
  0x18   : > { %865 = vmatpush.bf16.msra.mxu1 %v713_v17  ;;  %8241 = vmatpush.bf16.msra.mxu3 %v713_v17  ;;  %v7863_v48 = vld [vmem:[%s8443_s20 + $0x140] sm:$0xf]  ;;  %v504_v51 = vld [vmem:[%s12824_s0 + $0x350] sm:$0xff]  ;;  %v609_v52 = vld [vmem:[%s12824_s0 + $0x698] sm:$0xff]  ;;  %v8492_v3 = vor.u32 %v8152_v47, %v7831_v46 }
  0x19   : > { %v616_v53 = vld [vmem:[%s12824_s0 + $0x6d0] sm:$0xff]  ;;  %v8151_v55 = vld [vmem:[%s8443_s20 + $0x4] sm:$0xf]  ;;  %v7833_v56 = vld [vmem:[%s8443_s20 + $0x28] sm:$0xf0]  ;;  %v672_v62 = vpack.c.bf16 %v504_v51, %v497_v50  ;;  %v8494_v4 = vor.u32 %v8160_v49, %v7863_v48 }
  0x1a   : > { %v8159_v57 = vld [vmem:[%s8443_s20 + $0x144] sm:$0xf]  ;;  %v7865_v59 = vld [vmem:[%s8443_s20 + $0x168] sm:$0xf0]  ;;  %v505_v61 = vld [vmem:[%s12824_s0 + $0x358] sm:$0xff]  ;;  %v728_v63 = vpack.c.bf16 %v616_v53, %v609_v52  ;;  %v8505_v8 = vor.u32 %v8151_v55, %v7833_v56 }
  0x1b   : > { %817 = vmatpush.bf16.msra.mxu0 %v650_v22  ;;  %8234 = vmatpush.bf16.msra.mxu2 %v650_v22  ;;  %v498_v60 = vld [vmem:[%s12824_s0 + $0x320] sm:$0xff]  ;;  %v617_v1 = vld [vmem:[%s12824_s0 + $0x6d8] sm:$0xff]  ;;  %v483_v2 = vld [vmem:[%s12824_s0 + $0x2a8] sm:$0xff]  ;;  %v8507_v9 = vor.u32 %v8159_v57, %v7865_v59 }
  0x1c   : > { %866 = vmatpush.bf16.msra.mxu1 %v706_v23  ;;  %8242 = vmatpush.bf16.msra.mxu3 %v706_v23  ;;  %v610_v0 = vld [vmem:[%s12824_s0 + $0x6a0] sm:$0xff]  ;;  %v595_v6 = vld [vmem:[%s12824_s0 + $0x628] sm:$0xff]  ;;  %v673_v10 = vpack.c.bf16 %v505_v61, %v498_v60  ;;  %v484_v12 = vld [vmem:[%s12824_s0 + $0x2b0] sm:$0xff] }
  0x1d   : > { %v490_v5 = vld [vmem:[%s12824_s0 + $0x2e0] sm:$0xff]  ;;  %v729_v11 = vpack.c.bf16 %v617_v1, %v610_v0  ;;  %v491_v13 = vld [vmem:[%s12824_s0 + $0x2e8] sm:$0xff]  ;;  %v596_v16 = vld [vmem:[%s12824_s0 + $0x630] sm:$0xff] }
  0x1e   : > { %v602_v7 = vld [vmem:[%s12824_s0 + $0x660] sm:$0xff]  ;;  %v665_v14 = vpack.c.bf16 %v490_v5, %v483_v2  ;;  %v603_v17 = vld [vmem:[%s12824_s0 + $0x668] sm:$0xff]  ;;  %v469_v18 = vld [vmem:[%s12824_s0 + $0x238] sm:$0xff]  ;;  %v666_v22 = vpack.c.bf16 %v491_v13, %v484_v12 }
  0x1f   : > { %818 = vmatpush.bf16.msra.mxu0 %v643_v28  ;;  %8235 = vmatpush.bf16.msra.mxu2 %v643_v28  ;;  %v721_v15 = vpack.c.bf16 %v602_v7, %v595_v6  ;;  %v476_v19 = vld [vmem:[%s12824_s0 + $0x270] sm:$0xff]  ;;  %v581_v20 = vld [vmem:[%s12824_s0 + $0x5b8] sm:$0xff]  ;;  %v722_v23 = vpack.c.bf16 %v603_v17, %v596_v16  ;;  %v470_v24 = vld [vmem:[%s12824_s0 + $0x240] sm:$0xff] }
  0x20   : > { %867 = vmatpush.bf16.msra.mxu1 %v699_v29  ;;  %8243 = vmatpush.bf16.msra.mxu3 %v699_v29  ;;  %v588_v21 = vld [vmem:[%s12824_s0 + $0x5f0] sm:$0xff]  ;;  %v477_v25 = vld [vmem:[%s12824_s0 + $0x278] sm:$0xff]  ;;  %v658_v26 = vpack.c.bf16 %v476_v19, %v469_v18  ;;  %v582_v28 = vld [vmem:[%s12824_s0 + $0x5c0] sm:$0xff] }
  0x21   : > { %v714_v27 = vpack.c.bf16 %v588_v21, %v581_v20  ;;  %v589_v29 = vld [vmem:[%s12824_s0 + $0x5f8] sm:$0xff]  ;;  %v455_v30 = vld [vmem:[%s12824_s0 + $0x1c8] sm:$0xff]  ;;  %v462_v31 = vld [vmem:[%s12824_s0 + $0x200] sm:$0xff] }
  0x22   : > { %v567_v32 = vld [vmem:[%s12824_s0 + $0x548] sm:$0xff]  ;;  %v574_v33 = vld [vmem:[%s12824_s0 + $0x580] sm:$0xff]  ;;  %v456_v36 = vld [vmem:[%s12824_s0 + $0x1d0] sm:$0xff] }
  0x23   : > { %819 = vmatpush.bf16.msra.mxu0 %v636_v34  ;;  %8236 = vmatpush.bf16.msra.mxu2 %v636_v34  ;;  %v659_v34 = vpack.c.bf16 %v477_v25, %v470_v24  ;;  %v463_v37 = vld [vmem:[%s12824_s0 + $0x208] sm:$0xff]  ;;  %v7839_v38 = vld [vmem:[%s8443_s20 + $0x50] sm:$0xf]  ;;  %v8154_v39 = vld [vmem:[%s8443_s20 + $0x74] sm:$0xf0]  ;;  %v707_v43 = vpack.c.bf16 %v574_v33, %v567_v32 }
  0x24   : > { %868 = vmatpush.bf16.msra.mxu1 %v692_v35  ;;  %8244 = vmatpush.bf16.msra.mxu3 %v692_v35  ;;  %v715_v35 = vpack.c.bf16 %v589_v29, %v582_v28  ;;  %v8162_v41 = vld [vmem:[%s8443_s20 + $0x1b4] sm:$0xf0]  ;;  %v568_v44 = vld [vmem:[%s12824_s0 + $0x550] sm:$0xff]  ;;  %v575_v45 = vld [vmem:[%s12824_s0 + $0x588] sm:$0xff] }
  0x25   : > { %v441_v46 = vld [vmem:[%s12824_s0 + $0x158] sm:$0xff]  ;;  %v448_v47 = vld [vmem:[%s12824_s0 + $0x190] sm:$0xff]  ;;  %v708_v55 = vpack.c.bf16 %v575_v45, %v568_v44  ;;  %v442_v56 = vld [vmem:[%s12824_s0 + $0x160] sm:$0xff] }
  0x26   : > { %v553_v48 = vld [vmem:[%s12824_s0 + $0x4d8] sm:$0xff]  ;;  %v560_v49 = vld [vmem:[%s12824_s0 + $0x510] sm:$0xff]  ;;  %v554_v60 = vld [vmem:[%s12824_s0 + $0x4e0] sm:$0xff] }
  0x27   : > { %820 = vmatpush.bf16.msra.mxu0 %v629_v40  ;;  %8237 = vmatpush.bf16.msra.mxu2 %v629_v40  ;;  %v7871_v40 = vld [vmem:[%s8443_s20 + $0x190] sm:$0xf]  ;;  %v8153_v50 = vld [vmem:[%s8443_s20 + $0x54] sm:$0xf]  ;;  %v7841_v51 = vld [vmem:[%s8443_s20 + $0x78] sm:$0xf0]  ;;  %v700_v59 = vpack.c.bf16 %v560_v49, %v553_v48 }
  0x28   : > { %869 = vmatpush.bf16.msra.mxu1 %v685_v42  ;;  %8245 = vmatpush.bf16.msra.mxu3 %v685_v42  ;;  %v651_v42 = vpack.c.bf16 %v462_v31, %v455_v30  ;;  %v8161_v52 = vld [vmem:[%s8443_s20 + $0x194] sm:$0xf]  ;;  %v7873_v53 = vld [vmem:[%s8443_s20 + $0x1b8] sm:$0xf0]  ;;  %v8610_v0 = vor.u32 %v8162_v41, %v7871_v40  ;;  %v434_v1 = vld [vmem:[%s12824_s0 + $0x120] sm:$0xff]  ;;  %v8621_v6 = vor.u32 %v8153_v50, %v7841_v51 }
  0x29   : > { %v449_v57 = vld [vmem:[%s12824_s0 + $0x198] sm:$0xff]  ;;  %v539_v2 = vld [vmem:[%s12824_s0 + $0x468] sm:$0xff]  ;;  %v546_v5 = vld [vmem:[%s12824_s0 + $0x4a0] sm:$0xff]  ;;  %v8623_v7 = vor.u32 %v8161_v52, %v7873_v53 }
  0x2a   : > { %v561_v61 = vld [vmem:[%s12824_s0 + $0x518] sm:$0xff]  ;;  %v428_v12 = vld [vmem:[%s12824_s0 + $0xf0] sm:$0xff]  ;;  %v547_v17 = vld [vmem:[%s12824_s0 + $0x4a8] sm:$0xff] }
  0x2b   : > { %821 = vmatpush.bf16.msra.mxu0 %v622_v54  ;;  %8238 = vmatpush.bf16.msra.mxu2 %v622_v54  ;;  %v652_v54 = vpack.c.bf16 %v463_v37, %v456_v36  ;;  %v540_v16 = vld [vmem:[%s12824_s0 + $0x470] sm:$0xff]  ;;  %v413_v18 = vld [vmem:[%s12824_s0 + $0x78] sm:$0xff]  ;;  %v414_v24 = vld [vmem:[%s12824_s0 + $0x80] sm:$0xff] }
  0x2c   : > { %870 = vmatpush.bf16.msra.mxu1 %v678_v58  ;;  %8246 = vmatpush.bf16.msra.mxu3 %v678_v58  ;;  %v644_v58 = vpack.c.bf16 %v448_v47, %v441_v46  ;;  %v420_v19 = vld [vmem:[%s12824_s0 + $0xb0] sm:$0xff]  ;;  %v525_v20 = vld [vmem:[%s12824_s0 + $0x3f8] sm:$0xff]  ;;  %v526_v28 = vld [vmem:[%s12824_s0 + $0x400] sm:$0xff] }
  0x2d   : > { %v421_v25 = vld [vmem:[%s12824_s0 + $0xb8] sm:$0xff]  ;;  %v399_v30 = vld [vmem:[%s12824_s0 + $0x8] sm:$0xff]  ;;  %v406_v31 = vld [vmem:[%s12824_s0 + $0x40] sm:$0xff] }
  0x2e   : > { %822 = vmatmul.bf16.vlgmr.msra.gmra.mxu0 %v8492_v3  ;;  %842 = vmatmul.bf16.vlgmr.msra.gmra.mxu2 %v8494_v4  ;;  %v533_v29 = vld [vmem:[%s12824_s0 + $0x438] sm:$0xff]  ;;  %v511_v32 = vld [vmem:[%s12824_s0 + $0x388] sm:$0xff]  ;;  %v518_v33 = vld [vmem:[%s12824_s0 + $0x3c0] sm:$0xff]  ;;  %v623_v37 = vpack.c.bf16 %v406_v31, %v399_v30 }
  0x2f   : > { %912 = vmatpush.bf16.msrb.mxu2 %v672_v62  ;;  %871 = vmatmul.bf16.vlgmr.msra.gmra.mxu1 %v8505_v8  ;;  %v427_v62 = vld [vmem:[%s12824_s0 + $0xe8] sm:$0xff]  ;;  %v400_v36 = vld [vmem:[%s12824_s0 + $0x10] sm:$0xff]  ;;  %v7879_v44 = vld [vmem:[%s8443_s20 + $0x1e0] sm:$0xf] }
  0x30   : > { %961 = vmatpush.bf16.msrb.mxu3 %v728_v63  ;;  %1010 = vmatpush.bf16.msrb.mxu0 %v673_v10  ;;  %v8608_v63 = vor.u32 %v8154_v39, %v7839_v38  ;;  %v645_v10 = vpack.c.bf16 %v449_v57, %v442_v56  ;;  %v637_v13 = vpack.c.bf16 %v434_v1, %v427_v62  ;;  %v407_v39 = vld [vmem:[%s12824_s0 + $0x48] sm:$0xff]  ;;  %v512_v40 = vld [vmem:[%s12824_s0 + $0x390] sm:$0xff]  ;;  %v8155_v46 = vld [vmem:[%s8443_s20 + $0xa4] sm:$0xf] }
  0x31   : > { %891 = vmatmul.bf16.vlgmr.msra.gmra.mxu3 %v8507_v9  ;;  %1059 = vmatpush.bf16.msrb.mxu1 %v729_v11  ;;  %v701_v11 = vpack.c.bf16 %v561_v61, %v554_v60  ;;  %v679_v38 = vpack.c.bf16 %v518_v33, %v511_v32  ;;  %v519_v41 = vld [vmem:[%s12824_s0 + $0x3c8] sm:$0xff]  ;;  %v8163_v48 = vld [vmem:[%s8443_s20 + $0x1e4] sm:$0xf]  ;;  %v624_v50 = vpack.c.bf16 %v407_v39, %v400_v36  ;;  %v500_v61 = vld [vmem:[%s12824_s0 + $0x330] sm:$0xff] }
  0x32   : > { %v8164_v45 = vld [vmem:[%s8443_s20 + $0x204] sm:$0xf0]  ;;  %v7849_v47 = vld [vmem:[%s8443_s20 + $0xc8] sm:$0xf0]  ;;  %v680_v51 = vpack.c.bf16 %v519_v41, %v512_v40  ;;  %v506_v57 = vld [vmem:[%s12824_s0 + $0x360] sm:$0xff] }
  0x33   : > { %913 = vmatpush.bf16.msrb.mxu2 %v665_v14  ;;  %v693_v14 = vpack.c.bf16 %v546_v5, %v539_v2  ;;  %v7881_v49 = vld [vmem:[%s8443_s20 + $0x208] sm:$0xf0]  ;;  %v8699_v53 = vor.u32 %v8164_v45, %v7879_v44  ;;  %v618_v60 = vld [vmem:[%s12824_s0 + $0x6e0] sm:$0xff]  ;;  %v612_v5 = vld [vmem:[%s12824_s0 + $0x6b0] sm:$0xff] }
  0x34   : > { %962 = vmatpush.bf16.msrb.mxu3 %v721_v15  ;;  %1011 = vmatpush.bf16.msrb.mxu0 %v666_v22  ;;  %v435_v15 = vld [vmem:[%s12824_s0 + $0x128] sm:$0xff]  ;;  %v694_v22 = vpack.c.bf16 %v547_v17, %v540_v16  ;;  %v8157_v16 = vld [vmem:[%s8443_s20 + $0xf4] sm:$0xf]  ;;  %v7857_v17 = vld [vmem:[%s8443_s20 + $0x118] sm:$0xf0] }
  0x35   : > { %1060 = vmatpush.bf16.msrb.mxu1 %v722_v23  ;;  %v638_v21 = vpack.c.bf16 %v435_v15, %v428_v12  ;;  %v532_v23 = vld [vmem:[%s12824_s0 + $0x430] sm:$0xff]  ;;  %v499_v56 = vld [vmem:[%s12824_s0 + $0x328] sm:$0xff]  ;;  %v8166_v15 = vld [vmem:[%s8443_s20 + $0x254] sm:$0xf0] }
  0x36   : > { %v507_v62 = vld [vmem:[%s12824_s0 + $0x368] sm:$0xff]  ;;  %v7855_v12 = vld [vmem:[%s8443_s20 + $0xf0] sm:$0xf]  ;;  %v493_v30 = vld [vmem:[%s12824_s0 + $0x2f8] sm:$0xff] }
  0x37   : > { %914 = vmatpush.bf16.msrb.mxu2 %v658_v26  ;;  %v630_v26 = vpack.c.bf16 %v420_v19, %v413_v18  ;;  %v675_v2 = vpack.c.bf16 %v507_v62, %v500_v61  ;;  %v8165_v18 = vld [vmem:[%s8443_s20 + $0x234] sm:$0xf]  ;;  %v7889_v19 = vld [vmem:[%s8443_s20 + $0x258] sm:$0xf0]  ;;  %v598_v33 = vld [vmem:[%s12824_s0 + $0x640] sm:$0xff] }
  0x38   : > { %963 = vmatpush.bf16.msrb.mxu3 %v714_v27  ;;  %1012 = vmatpush.bf16.msrb.mxu0 %v659_v34  ;;  %v686_v27 = vpack.c.bf16 %v532_v23, %v525_v20  ;;  %v631_v34 = vpack.c.bf16 %v421_v25, %v414_v24  ;;  %v8747_v23 = vor.u32 %v8165_v18, %v7889_v19  ;;  %v485_v24 = vld [vmem:[%s12824_s0 + $0x2b8] sm:$0xff]  ;;  %v492_v25 = vld [vmem:[%s12824_s0 + $0x2f0] sm:$0xff]  ;;  %v471_v36 = vld [vmem:[%s12824_s0 + $0x248] sm:$0xff] }
  0x39   : > { %1061 = vmatpush.bf16.msrb.mxu1 %v715_v35  ;;  %v687_v35 = vpack.c.bf16 %v533_v29, %v526_v28  ;;  %v604_v28 = vld [vmem:[%s12824_s0 + $0x670] sm:$0xff]  ;;  %v486_v29 = vld [vmem:[%s12824_s0 + $0x2c0] sm:$0xff]  ;;  %v577_v62 = vld [vmem:[%s12824_s0 + $0x598] sm:$0xff] }
  0x3a   : > { %v668_v32 = vpack.c.bf16 %v493_v30, %v486_v29  ;;  %v590_v40 = vld [vmem:[%s12824_s0 + $0x600] sm:$0xff]  ;;  %v472_v41 = vld [vmem:[%s12824_s0 + $0x250] sm:$0xff]  ;;  %v563_v18 = vld [vmem:[%s12824_s0 + $0x528] sm:$0xff] }
  0x3b   : > { %915 = vmatpush.bf16.msrb.mxu2 %v651_v42  ;;  %v7847_v42 = vld [vmem:[%s8443_s20 + $0xa0] sm:$0xf]  ;;  %v584_v45 = vld [vmem:[%s12824_s0 + $0x5d0] sm:$0xff] }
  0x3c   : > { %964 = vmatpush.bf16.msrb.mxu3 %v707_v43  ;;  %1013 = vmatpush.bf16.msrb.mxu0 %v652_v54  ;;  %v8156_v43 = vld [vmem:[%s8443_s20 + $0xc4] sm:$0xf0]  ;;  %v8701_v54 = vor.u32 %v8155_v46, %v7849_v47  ;;  %v570_v61 = vld [vmem:[%s12824_s0 + $0x560] sm:$0xff] }
  0x3d   : > { %1062 = vmatpush.bf16.msrb.mxu1 %v708_v55  ;;  %v8697_v52 = vor.u32 %v8156_v43, %v7847_v42  ;;  %v8703_v55 = vor.u32 %v8163_v48, %v7881_v49  ;;  %v479_v42 = vld [vmem:[%s12824_s0 + $0x288] sm:$0xff]  ;;  %v457_v48 = vld [vmem:[%s12824_s0 + $0x1d8] sm:$0xff]  ;;  %v464_v49 = vld [vmem:[%s12824_s0 + $0x210] sm:$0xff] }
  0x3e   : > { %827 = vmatmul.bf16.gmra.mxu0 %v8608_v63  ;;  %847 = vmatmul.bf16.gmra.mxu2 %v8610_v0  ;;  %v661_v44 = vpack.c.bf16 %v479_v42, %v472_v41  ;;  %v591_v46 = vld [vmem:[%s12824_s0 + $0x608] sm:$0xff]  ;;  %v430_v30 = vld [vmem:[%s12824_s0 + $0x100] sm:$0xff] }
  0x3f   : > { %916 = vmatpush.bf16.msrb.mxu2 %v644_v58  ;;  %876 = vmatmul.bf16.gmra.mxu1 %v8621_v6  ;;  %v611_v58 = vld [vmem:[%s12824_s0 + $0x6a8] sm:$0xff]  ;;  %v717_v47 = vpack.c.bf16 %v591_v46, %v584_v45 }
  0x40   : > { %965 = vmatpush.bf16.msrb.mxu3 %v700_v59  ;;  %1014 = vmatpush.bf16.msrb.mxu0 %v645_v10  ;;  %v674_v59 = vpack.c.bf16 %v506_v57, %v499_v56  ;;  %v730_v1 = vpack.c.bf16 %v618_v60, %v611_v58  ;;  %v619_v10 = vld [vmem:[%s12824_s0 + $0x6e8] sm:$0xff]  ;;  %v576_v56 = vld [vmem:[%s12824_s0 + $0x590] sm:$0xff]  ;;  %v458_v57 = vld [vmem:[%s12824_s0 + $0x1e0] sm:$0xff] }
  0x41   : > { %896 = vmatmul.bf16.gmra.mxu3 %v8623_v7  ;;  %1063 = vmatpush.bf16.msrb.mxu1 %v701_v11  ;;  %v731_v11 = vpack.c.bf16 %v619_v10, %v612_v5  ;;  %v465_v58 = vld [vmem:[%s12824_s0 + $0x218] sm:$0xff]  ;;  %v450_v5 = vld [vmem:[%s12824_s0 + $0x1a0] sm:$0xff]  ;;  %v555_v10 = vld [vmem:[%s12824_s0 + $0x4e8] sm:$0xff] }
  0x42   : > { %v654_v60 = vpack.c.bf16 %v465_v58, %v458_v57  ;;  %v527_v41 = vld [vmem:[%s12824_s0 + $0x408] sm:$0xff]  ;;  %v528_v57 = vld [vmem:[%s12824_s0 + $0x410] sm:$0xff] }
  0x43   : > { %917 = vmatpush.bf16.msrb.mxu2 %v637_v13  ;;  %v8158_v13 = vld [vmem:[%s8443_s20 + $0x114] sm:$0xf0] }
  0x44   : > { %966 = vmatpush.bf16.msrb.mxu3 %v693_v14  ;;  %1015 = vmatpush.bf16.msrb.mxu0 %v638_v21  ;;  %v7887_v14 = vld [vmem:[%s8443_s20 + $0x230] sm:$0xf]  ;;  %v8741_v20 = vor.u32 %v8158_v13, %v7855_v12  ;;  %v562_v12 = vld [vmem:[%s12824_s0 + $0x520] sm:$0xff] }
  0x45   : > { %1064 = vmatpush.bf16.msrb.mxu1 %v694_v22  ;;  %v8743_v21 = vor.u32 %v8166_v15, %v7887_v14  ;;  %v8745_v22 = vor.u32 %v8157_v16, %v7857_v17  ;;  %v702_v13 = vpack.c.bf16 %v562_v12, %v555_v10  ;;  %v444_v14 = vld [vmem:[%s12824_s0 + $0x170] sm:$0xff]  ;;  %v451_v15 = vld [vmem:[%s12824_s0 + $0x1a8] sm:$0xff] }
  0x46   : > { %v556_v16 = vld [vmem:[%s12824_s0 + $0x4f0] sm:$0xff]  ;;  %v647_v17 = vpack.c.bf16 %v451_v15, %v444_v14 }
  0x47   : > { %918 = vmatpush.bf16.msrb.mxu2 %v630_v26  ;;  %v597_v26 = vld [vmem:[%s12824_s0 + $0x638] sm:$0xff]  ;;  %v703_v19 = vpack.c.bf16 %v563_v18, %v556_v16  ;;  %v408_v12 = vld [vmem:[%s12824_s0 + $0x50] sm:$0xff] }
  0x48   : > { %967 = vmatpush.bf16.msrb.mxu3 %v686_v27  ;;  %1016 = vmatpush.bf16.msrb.mxu0 %v631_v34  ;;  %v667_v27 = vpack.c.bf16 %v492_v25, %v485_v24  ;;  %v723_v31 = vpack.c.bf16 %v604_v28, %v597_v26  ;;  %v605_v34 = vld [vmem:[%s12824_s0 + $0x678] sm:$0xff]  ;;  %v436_v25 = vld [vmem:[%s12824_s0 + $0x130] sm:$0xff] }
  0x49   : > { %1065 = vmatpush.bf16.msrb.mxu1 %v687_v35  ;;  %v724_v35 = vpack.c.bf16 %v605_v34, %v598_v33  ;;  %v429_v24 = vld [vmem:[%s12824_s0 + $0xf8] sm:$0xff]  ;;  %v548_v28 = vld [vmem:[%s12824_s0 + $0x4b0] sm:$0xff] }
  0x4a   : > { %v541_v26 = vld [vmem:[%s12824_s0 + $0x478] sm:$0xff]  ;;  %v520_v15 = vld [vmem:[%s12824_s0 + $0x3d0] sm:$0xff] }
  0x4b   : > { %919 = vmatpush.bf16.msrb.mxu2 %v623_v37  ;;  %v478_v37 = vld [vmem:[%s12824_s0 + $0x280] sm:$0xff]  ;;  %v695_v29 = vpack.c.bf16 %v548_v28, %v541_v26  ;;  %v549_v34 = vld [vmem:[%s12824_s0 + $0x4b8] sm:$0xff] }
  0x4c   : > { %968 = vmatpush.bf16.msrb.mxu3 %v679_v38  ;;  %1017 = vmatpush.bf16.msrb.mxu0 %v624_v50  ;;  %v583_v38 = vld [vmem:[%s12824_s0 + $0x5c8] sm:$0xff]  ;;  %v660_v39 = vpack.c.bf16 %v478_v37, %v471_v36  ;;  %v569_v50 = vld [vmem:[%s12824_s0 + $0x558] sm:$0xff] }
  0x4d   : > { %1066 = vmatpush.bf16.msrb.mxu1 %v680_v51  ;;  %v716_v43 = vpack.c.bf16 %v590_v40, %v583_v38  ;;  %v653_v51 = vpack.c.bf16 %v464_v49, %v457_v48  ;;  %v422_v40 = vld [vmem:[%s12824_s0 + $0xc0] sm:$0xff]  ;;  %v409_v28 = vld [vmem:[%s12824_s0 + $0x58] sm:$0xff] }
  0x4e   : > { %832 = vmatmul.bf16.gmra.mxu0 %v8697_v52  ;;  %852 = vmatmul.bf16.gmra.mxu2 %v8699_v53 }
  0x4f   : > { %881 = vmatmul.bf16.gmra.mxu1 %v8701_v54  ;;  %1108 = vmatpush.bf16.msra.mxu2 %v674_v59  ;;  %v709_v59 = vpack.c.bf16 %v576_v56, %v569_v50  ;;  %v423_v56 = vld [vmem:[%s12824_s0 + $0xc8] sm:$0xff] }
  0x50   : > { %1157 = vmatpush.bf16.msra.mxu3 %v730_v1  ;;  %1206 = vmatpush.bf16.msra.mxu0 %v675_v2  ;;  %v710_v1 = vpack.c.bf16 %v577_v62, %v570_v61  ;;  %v443_v2 = vld [vmem:[%s12824_s0 + $0x168] sm:$0xff] }
  0x51   : > { %901 = vmatmul.bf16.gmra.mxu3 %v8703_v55  ;;  %1255 = vmatpush.bf16.msra.mxu1 %v731_v11  ;;  %v646_v11 = vpack.c.bf16 %v450_v5, %v443_v2 }
  0x53   : > { %1109 = vmatpush.bf16.msra.mxu2 %v667_v27  ;;  %v639_v27 = vpack.c.bf16 %v436_v25, %v429_v24 }
  0x54   : > { %1158 = vmatpush.bf16.msra.mxu3 %v723_v31  ;;  %1207 = vmatpush.bf16.msra.mxu0 %v668_v32  ;;  %v437_v31 = vld [vmem:[%s12824_s0 + $0x138] sm:$0xff]  ;;  %v542_v32 = vld [vmem:[%s12824_s0 + $0x480] sm:$0xff] }
  0x55   : > { %1256 = vmatpush.bf16.msra.mxu1 %v724_v35  ;;  %v640_v33 = vpack.c.bf16 %v437_v31, %v430_v30  ;;  %v696_v35 = vpack.c.bf16 %v549_v34, %v542_v32  ;;  %v521_v31 = vld [vmem:[%s12824_s0 + $0x3d8] sm:$0xff] }
  0x57   : > { %1110 = vmatpush.bf16.msra.mxu2 %v660_v39  ;;  %v415_v39 = vld [vmem:[%s12824_s0 + $0x88] sm:$0xff] }
  0x58   : > { %1159 = vmatpush.bf16.msra.mxu3 %v716_v43  ;;  %1208 = vmatpush.bf16.msra.mxu0 %v661_v44  ;;  %v632_v42 = vpack.c.bf16 %v422_v40, %v415_v39  ;;  %v534_v43 = vld [vmem:[%s12824_s0 + $0x440] sm:$0xff]  ;;  %v501_v39 = vld [vmem:[%s12824_s0 + $0x338] sm:$0xff]  ;;  %v508_v40 = vld [vmem:[%s12824_s0 + $0x370] sm:$0xff] }
  0x59   : > { %1257 = vmatpush.bf16.msra.mxu1 %v717_v47  ;;  %v688_v45 = vpack.c.bf16 %v534_v43, %v527_v41  ;;  %v613_v41 = vld [vmem:[%s12824_s0 + $0x6b8] sm:$0xff]  ;;  %v620_v43 = vld [vmem:[%s12824_s0 + $0x6f0] sm:$0xff] }
  0x5b   : > { %1111 = vmatpush.bf16.msra.mxu2 %v653_v51  ;;  %v416_v51 = vld [vmem:[%s12824_s0 + $0x90] sm:$0xff] }
  0x5c   : > { %1160 = vmatpush.bf16.msra.mxu3 %v709_v59  ;;  %1209 = vmatpush.bf16.msra.mxu0 %v654_v60  ;;  %v633_v58 = vpack.c.bf16 %v423_v56, %v416_v51  ;;  %v535_v59 = vld [vmem:[%s12824_s0 + $0x448] sm:$0xff]  ;;  %v502_v51 = vld [vmem:[%s12824_s0 + $0x340] sm:$0xff]  ;;  %v509_v56 = vld [vmem:[%s12824_s0 + $0x378] sm:$0xff] }
  0x5d   : > { %1258 = vmatpush.bf16.msra.mxu1 %v710_v1  ;;  %v689_v61 = vpack.c.bf16 %v535_v59, %v528_v57  ;;  %v614_v57 = vld [vmem:[%s12824_s0 + $0x6c0] sm:$0xff]  ;;  %v621_v59 = vld [vmem:[%s12824_s0 + $0x6f8] sm:$0xff] }
  0x5e   : > { %837 = vmatmul.bf16.gmra.mxu0 %v8741_v20  ;;  %857 = vmatmul.bf16.gmra.mxu2 %v8743_v21 }
  0x5f   : > { %886 = vmatmul.bf16.gmra.mxu1 %v8745_v22  ;;  %1112 = vmatpush.bf16.msra.mxu2 %v646_v11  ;;  %v401_v11 = vld [vmem:[%s12824_s0 + $0x18] sm:$0xff] }
  0x60   : > { %1161 = vmatpush.bf16.msra.mxu3 %v702_v13  ;;  %1210 = vmatpush.bf16.msra.mxu0 %v647_v17  ;;  %v513_v13 = vld [vmem:[%s12824_s0 + $0x398] sm:$0xff]  ;;  %v625_v14 = vpack.c.bf16 %v408_v12, %v401_v11  ;;  %v487_v11 = vld [vmem:[%s12824_s0 + $0x2c8] sm:$0xff]  ;;  %v494_v12 = vld [vmem:[%s12824_s0 + $0x300] sm:$0xff] }
  0x61   : > { %906 = vmatmul.bf16.gmra.mxu3 %v8747_v23  ;;  %1259 = vmatpush.bf16.msra.mxu1 %v703_v19  ;;  %v681_v17 = vpack.c.bf16 %v520_v15, %v513_v13  ;;  %v599_v13 = vld [vmem:[%s12824_s0 + $0x648] sm:$0xff]  ;;  %v606_v15 = vld [vmem:[%s12824_s0 + $0x680] sm:$0xff] }
  0x63   : > { %1113 = vmatpush.bf16.msra.mxu2 %v639_v27  ;;  %v402_v27 = vld [vmem:[%s12824_s0 + $0x20] sm:$0xff] }
  0x64   : > { %1162 = vmatpush.bf16.msra.mxu3 %v695_v29  ;;  %1211 = vmatpush.bf16.msra.mxu0 %v640_v33  ;;  %v514_v29 = vld [vmem:[%s12824_s0 + $0x3a0] sm:$0xff]  ;;  %v626_v30 = vpack.c.bf16 %v409_v28, %v402_v27  ;;  %v488_v27 = vld [vmem:[%s12824_s0 + $0x2d0] sm:$0xff]  ;;  %v495_v28 = vld [vmem:[%s12824_s0 + $0x308] sm:$0xff] }
  0x65   : > { %1260 = vmatpush.bf16.msra.mxu1 %v696_v35  ;;  %v682_v33 = vpack.c.bf16 %v521_v31, %v514_v29  ;;  %v600_v29 = vld [vmem:[%s12824_s0 + $0x650] sm:$0xff]  ;;  %v607_v31 = vld [vmem:[%s12824_s0 + $0x688] sm:$0xff] }
  0x67   : > { %1114 = vmatpush.bf16.msra.mxu2 %v632_v42  ;;  %v676_v42 = vpack.c.bf16 %v508_v40, %v501_v39  ;;  %v473_v39 = vld [vmem:[%s12824_s0 + $0x258] sm:$0xff]  ;;  %v480_v40 = vld [vmem:[%s12824_s0 + $0x290] sm:$0xff] }
  0x68   : > { %1163 = vmatpush.bf16.msra.mxu3 %v688_v45  ;;  %1212 = vmatpush.bf16.msra.mxu0 %v633_v58  ;;  %v732_v45 = vpack.c.bf16 %v620_v43, %v613_v41  ;;  %v677_v58 = vpack.c.bf16 %v509_v56, %v502_v51  ;;  %v585_v41 = vld [vmem:[%s12824_s0 + $0x5d8] sm:$0xff]  ;;  %v592_v43 = vld [vmem:[%s12824_s0 + $0x610] sm:$0xff]  ;;  %v474_v51 = vld [vmem:[%s12824_s0 + $0x260] sm:$0xff] }
  0x69   : > { %1261 = vmatpush.bf16.msra.mxu1 %v689_v61  ;;  %v733_v61 = vpack.c.bf16 %v621_v59, %v614_v57  ;;  %v481_v56 = vld [vmem:[%s12824_s0 + $0x298] sm:$0xff]  ;;  %v586_v57 = vld [vmem:[%s12824_s0 + $0x5e0] sm:$0xff] }
  0x6a   : > { %v593_v59 = vld [vmem:[%s12824_s0 + $0x618] sm:$0xff] }
  0x6b   : > { %1115 = vmatpush.bf16.msra.mxu2 %v625_v14  ;;  %v669_v14 = vpack.c.bf16 %v494_v12, %v487_v11  ;;  %v459_v11 = vld [vmem:[%s12824_s0 + $0x1e8] sm:$0xff]  ;;  %v466_v12 = vld [vmem:[%s12824_s0 + $0x220] sm:$0xff] }
  0x6c   : > { %1164 = vmatpush.bf16.msra.mxu3 %v681_v17  ;;  %1213 = vmatpush.bf16.msra.mxu0 %v626_v30  ;;  %v725_v17 = vpack.c.bf16 %v606_v15, %v599_v13  ;;  %v670_v30 = vpack.c.bf16 %v495_v28, %v488_v27  ;;  %v571_v13 = vld [vmem:[%s12824_s0 + $0x568] sm:$0xff]  ;;  %v578_v15 = vld [vmem:[%s12824_s0 + $0x5a0] sm:$0xff]  ;;  %v460_v27 = vld [vmem:[%s12824_s0 + $0x1f0] sm:$0xff] }
  0x6d   : > { %1262 = vmatpush.bf16.msra.mxu1 %v682_v33  ;;  %v726_v33 = vpack.c.bf16 %v607_v31, %v600_v29  ;;  %v467_v28 = vld [vmem:[%s12824_s0 + $0x228] sm:$0xff]  ;;  %v572_v29 = vld [vmem:[%s12824_s0 + $0x570] sm:$0xff] }
  0x6e   : > { %920 = vmatmul.bf16.vlgmr.msrb.gmra.mxu2 %v8492_v3  ;;  %1018 = vmatmul.bf16.vlgmr.msrb.gmra.mxu0 %v8492_v3  ;;  %v579_v31 = vld [vmem:[%s12824_s0 + $0x5a8] sm:$0xff] }
  0x6f   : > { %1067 = vmatmul.bf16.vlgmr.msrb.gmra.mxu1 %v8505_v8  ;;  %1304 = vmatpush.bf16.msrb.mxu2 %v676_v42  ;;  %v662_v42 = vpack.c.bf16 %v480_v40, %v473_v39  ;;  %v445_v39 = vld [vmem:[%s12824_s0 + $0x178] sm:$0xff]  ;;  %v452_v40 = vld [vmem:[%s12824_s0 + $0x1b0] sm:$0xff] }
  0x70   : > { %1402 = vmatpush.bf16.msrb.mxu0 %v677_v58  ;;  %v663_v58 = vpack.c.bf16 %v481_v56, %v474_v51  ;;  %v446_v51 = vld [vmem:[%s12824_s0 + $0x180] sm:$0xff]  ;;  %v453_v56 = vld [vmem:[%s12824_s0 + $0x1b8] sm:$0xff] }
  0x71   : > { %969 = vmatmul.bf16.vlgmr.msrb.gmra.mxu3 %v8505_v8  ;;  %1451 = vmatpush.bf16.msrb.mxu1 %v733_v61  ;;  %v719_v61 = vpack.c.bf16 %v593_v59, %v586_v57  ;;  %v558_v57 = vld [vmem:[%s12824_s0 + $0x500] sm:$0xff]  ;;  %v565_v59 = vld [vmem:[%s12824_s0 + $0x538] sm:$0xff] }
  0x72   : > { %1353 = vmatpush.bf16.msrb.mxu3 %v732_v45  ;;  %v718_v45 = vpack.c.bf16 %v592_v43, %v585_v41  ;;  %v557_v41 = vld [vmem:[%s12824_s0 + $0x4f8] sm:$0xff]  ;;  %v564_v43 = vld [vmem:[%s12824_s0 + $0x530] sm:$0xff] }
  0x73   : > { %1305 = vmatpush.bf16.msrb.mxu2 %v669_v14  ;;  %v655_v14 = vpack.c.bf16 %v466_v12, %v459_v11  ;;  %v431_v11 = vld [vmem:[%s12824_s0 + $0x108] sm:$0xff]  ;;  %v438_v12 = vld [vmem:[%s12824_s0 + $0x140] sm:$0xff] }
  0x74   : > { %1403 = vmatpush.bf16.msrb.mxu0 %v670_v30  ;;  %v656_v30 = vpack.c.bf16 %v467_v28, %v460_v27  ;;  %v432_v27 = vld [vmem:[%s12824_s0 + $0x110] sm:$0xff]  ;;  %v439_v28 = vld [vmem:[%s12824_s0 + $0x148] sm:$0xff] }
  0x75   : > { %1452 = vmatpush.bf16.msrb.mxu1 %v726_v33  ;;  %v712_v33 = vpack.c.bf16 %v579_v31, %v572_v29  ;;  %v544_v29 = vld [vmem:[%s12824_s0 + $0x490] sm:$0xff]  ;;  %v551_v31 = vld [vmem:[%s12824_s0 + $0x4c8] sm:$0xff] }
  0x76   : > { %1354 = vmatpush.bf16.msrb.mxu3 %v725_v17  ;;  %v711_v17 = vpack.c.bf16 %v578_v15, %v571_v13  ;;  %v543_v13 = vld [vmem:[%s12824_s0 + $0x488] sm:$0xff]  ;;  %v550_v15 = vld [vmem:[%s12824_s0 + $0x4c0] sm:$0xff] }
  0x77   : > { %1306 = vmatpush.bf16.msrb.mxu2 %v662_v42  ;;  %v648_v42 = vpack.c.bf16 %v452_v40, %v445_v39  ;;  %v417_v39 = vld [vmem:[%s12824_s0 + $0x98] sm:$0xff]  ;;  %v424_v40 = vld [vmem:[%s12824_s0 + $0xd0] sm:$0xff] }
  0x78   : > { %1404 = vmatpush.bf16.msrb.mxu0 %v663_v58  ;;  %v649_v58 = vpack.c.bf16 %v453_v56, %v446_v51  ;;  %v418_v51 = vld [vmem:[%s12824_s0 + $0xa0] sm:$0xff]  ;;  %v425_v56 = vld [vmem:[%s12824_s0 + $0xd8] sm:$0xff] }
  0x79   : > { %1453 = vmatpush.bf16.msrb.mxu1 %v719_v61  ;;  %v705_v61 = vpack.c.bf16 %v565_v59, %v558_v57  ;;  %v530_v57 = vld [vmem:[%s12824_s0 + $0x420] sm:$0xff]  ;;  %v537_v59 = vld [vmem:[%s12824_s0 + $0x458] sm:$0xff] }
  0x7a   : > { %1355 = vmatpush.bf16.msrb.mxu3 %v718_v45  ;;  %v704_v45 = vpack.c.bf16 %v564_v43, %v557_v41  ;;  %v529_v41 = vld [vmem:[%s12824_s0 + $0x418] sm:$0xff]  ;;  %v536_v43 = vld [vmem:[%s12824_s0 + $0x450] sm:$0xff] }
  0x7b   : > { %1307 = vmatpush.bf16.msrb.mxu2 %v655_v14  ;;  %v641_v14 = vpack.c.bf16 %v438_v12, %v431_v11  ;;  %v403_v11 = vld [vmem:[%s12824_s0 + $0x28] sm:$0xff]  ;;  %v410_v12 = vld [vmem:[%s12824_s0 + $0x60] sm:$0xff] }
  0x7c   : > { %1405 = vmatpush.bf16.msrb.mxu0 %v656_v30  ;;  %v642_v30 = vpack.c.bf16 %v439_v28, %v432_v27  ;;  %v404_v27 = vld [vmem:[%s12824_s0 + $0x30] sm:$0xff]  ;;  %v411_v28 = vld [vmem:[%s12824_s0 + $0x68] sm:$0xff] }
  0x7d   : > { %1454 = vmatpush.bf16.msrb.mxu1 %v712_v33  ;;  %v698_v33 = vpack.c.bf16 %v551_v31, %v544_v29  ;;  %v516_v29 = vld [vmem:[%s12824_s0 + $0x3b0] sm:$0xff]  ;;  %v523_v31 = vld [vmem:[%s12824_s0 + $0x3e8] sm:$0xff] }
  0x7e   : > { %925 = vmatmul.bf16.gmra.mxu2 %v8608_v63  ;;  %1023 = vmatmul.bf16.gmra.mxu0 %v8608_v63 }
  0x7f   : > { %1072 = vmatmul.bf16.gmra.mxu1 %v8621_v6  ;;  %1356 = vmatpush.bf16.msrb.mxu3 %v711_v17  ;;  %v697_v17 = vpack.c.bf16 %v550_v15, %v543_v13  ;;  %v515_v13 = vld [vmem:[%s12824_s0 + $0x3a8] sm:$0xff]  ;;  %v522_v15 = vld [vmem:[%s12824_s0 + $0x3e0] sm:$0xff] }
  0x80   : > { %1308 = vmatpush.bf16.msrb.mxu2 %v648_v42  ;;  %1406 = vmatpush.bf16.msrb.mxu0 %v649_v58  ;;  %v634_v42 = vpack.c.bf16 %v424_v40, %v417_v39  ;;  %v635_v58 = vpack.c.bf16 %v425_v56, %v418_v51  ;;  %v1839_v39 = vld [vmem:[%s12825_s1 + $0x310] sm:$0xff]  ;;  %v1846_v40 = vld [vmem:[%s12825_s1 + $0x348] sm:$0xff]  ;;  %v1840_v51 = vld [vmem:[%s12825_s1 + $0x318] sm:$0xff] }
  0x81   : > { %974 = vmatmul.bf16.gmra.mxu3 %v8621_v6  ;;  %1455 = vmatpush.bf16.msrb.mxu1 %v705_v61  ;;  %v691_v61 = vpack.c.bf16 %v537_v59, %v530_v57  ;;  %v1847_v56 = vld [vmem:[%s12825_s1 + $0x350] sm:$0xff]  ;;  %v1952_v57 = vld [vmem:[%s12825_s1 + $0x698] sm:$0xff] }
  0x82   : > { %v1959_v59 = vld [vmem:[%s12825_s1 + $0x6d0] sm:$0xff] }
  0x83   : > { %1357 = vmatpush.bf16.msrb.mxu3 %v704_v45  ;;  %v690_v45 = vpack.c.bf16 %v536_v43, %v529_v41  ;;  %v1951_v41 = vld [vmem:[%s12825_s1 + $0x690] sm:$0xff]  ;;  %v1958_v43 = vld [vmem:[%s12825_s1 + $0x6c8] sm:$0xff] }
  0x84   : > { %1309 = vmatpush.bf16.msrb.mxu2 %v641_v14  ;;  %1407 = vmatpush.bf16.msrb.mxu0 %v642_v30  ;;  %v627_v14 = vpack.c.bf16 %v410_v12, %v403_v11  ;;  %v628_v30 = vpack.c.bf16 %v411_v28, %v404_v27  ;;  %v1825_v11 = vld [vmem:[%s12825_s1 + $0x2a0] sm:$0xff]  ;;  %v1832_v12 = vld [vmem:[%s12825_s1 + $0x2d8] sm:$0xff]  ;;  %v1826_v27 = vld [vmem:[%s12825_s1 + $0x2a8] sm:$0xff] }
  0x85   : > { %1456 = vmatpush.bf16.msrb.mxu1 %v698_v33  ;;  %v684_v33 = vpack.c.bf16 %v523_v31, %v516_v29  ;;  %v1833_v28 = vld [vmem:[%s12825_s1 + $0x2e0] sm:$0xff]  ;;  %v1938_v29 = vld [vmem:[%s12825_s1 + $0x628] sm:$0xff] }
  0x86   : > { %v1945_v31 = vld [vmem:[%s12825_s1 + $0x660] sm:$0xff] }
  0x87   : > { %1358 = vmatpush.bf16.msrb.mxu3 %v697_v17  ;;  %v683_v17 = vpack.c.bf16 %v522_v15, %v515_v13  ;;  %v1937_v13 = vld [vmem:[%s12825_s1 + $0x620] sm:$0xff]  ;;  %v1944_v15 = vld [vmem:[%s12825_s1 + $0x658] sm:$0xff] }
  0x88   : > { %1310 = vmatpush.bf16.msrb.mxu2 %v634_v42  ;;  %1408 = vmatpush.bf16.msrb.mxu0 %v635_v58  ;;  %v2014_v42 = vpack.c.bf16 %v1846_v40, %v1839_v39  ;;  %v2015_v58 = vpack.c.bf16 %v1847_v56, %v1840_v51  ;;  %v1811_v39 = vld [vmem:[%s12825_s1 + $0x230] sm:$0xff]  ;;  %v1818_v40 = vld [vmem:[%s12825_s1 + $0x268] sm:$0xff]  ;;  %v1924_v51 = vld [vmem:[%s12825_s1 + $0x5b8] sm:$0xff] }
  0x89   : > { %1457 = vmatpush.bf16.msrb.mxu1 %v691_v61  ;;  %v2071_v61 = vpack.c.bf16 %v1959_v59, %v1952_v57  ;;  %v1931_v57 = vld [vmem:[%s12825_s1 + $0x5f0] sm:$0xff] }
  0x8a   : > { %v2057_v59 = vpack.c.bf16 %v1931_v57, %v1924_v51 }
  0x8b   : > { %1359 = vmatpush.bf16.msrb.mxu3 %v690_v45  ;;  %v2070_v45 = vpack.c.bf16 %v1958_v43, %v1951_v41  ;;  %v1923_v41 = vld [vmem:[%s12825_s1 + $0x5b0] sm:$0xff] }
  0x8c   : > { %1311 = vmatpush.bf16.msrb.mxu2 %v627_v14  ;;  %1409 = vmatpush.bf16.msrb.mxu0 %v628_v30  ;;  %v2007_v14 = vpack.c.bf16 %v1832_v12, %v1825_v11  ;;  %v2008_v30 = vpack.c.bf16 %v1833_v28, %v1826_v27  ;;  %v1909_v11 = vld [vmem:[%s12825_s1 + $0x540] sm:$0xff] }
  0x8d   : > { %1458 = vmatpush.bf16.msrb.mxu1 %v684_v33  ;;  %v2064_v33 = vpack.c.bf16 %v1945_v31, %v1938_v29  ;;  %v1917_v27 = vld [vmem:[%s12825_s1 + $0x580] sm:$0xff] }
  0x8e   : > { %930 = vmatmul.bf16.gmra.mxu2 %v8697_v52  ;;  %1028 = vmatmul.bf16.gmra.mxu0 %v8697_v52 }
  0x8f   : > { %1077 = vmatmul.bf16.gmra.mxu1 %v8701_v54  ;;  %1360 = vmatpush.bf16.msrb.mxu3 %v683_v17  ;;  %v2063_v17 = vpack.c.bf16 %v1944_v15, %v1937_v13 }
  0x91   : > { %979 = vmatmul.bf16.gmra.mxu3 %v8701_v54 }
  0x9e   : > { %935 = vmatmul.bf16.gmra.mxu2 %v8741_v20  ;;  %1033 = vmatmul.bf16.gmra.mxu0 %v8741_v20 }
  0x9f   : > { %1082 = vmatmul.bf16.gmra.mxu1 %v8745_v22 }
  0xa1   : > { %984 = vmatmul.bf16.gmra.mxu3 %v8745_v22 }
  0xab   : > { %v823_v36 = vpop.f32.mrf.mxu0 }
  0xac   : > { %v872_v37 = vpop.f32.mrf.mxu1 }
  0xad   : > { %v873_v38 = vadd.f32 %v872_v37, %v823_v36 }
  0xae   : > { %940 = vmatmul.bf16.gmra.mxu2 %v8494_v4  ;;  %1038 = vmatmul.bf16.gmra.mxu0 %v8494_v4 }
  0xaf   : > { %1500 = vst [vmem:[#allocation2] sm:$0xff] %v873_v38  ;;  %1087 = vmatmul.bf16.gmra.mxu1 %v8507_v9 }
  0xb1   : > { %989 = vmatmul.bf16.gmra.mxu3 %v8507_v9  ;;  %v843_v44 = vpop.f32.mrf.mxu2 }
  0xb3   : > { %v825_v48 = vpop.f32.mrf.mxu0 }
  0xb4   : > { %v892_v46 = vpop.f32.mrf.mxu3  ;;  %v874_v49 = vpop.f32.mrf.mxu1 }
  0xb5   : > { %v893_v47 = vadd.f32 %v892_v46, %v843_v44  ;;  %v875_v50 = vadd.f32 %v874_v49, %v825_v48 }
  0xb7   : > { %1557 = vst [vmem:[#allocation2 + $0x1c0] sm:$0xff] %v893_v47 }
  0xb8   : > { %1508 = vst [vmem:[#allocation2 + $0x38] sm:$0xff] %v875_v50 }
  0xb9   : > { %v845_v60 = vpop.f32.mrf.mxu2 }
  0xbb   : > { %v828_v2 = vpop.f32.mrf.mxu0 }
  0xbc   : > { %v894_v62 = vpop.f32.mrf.mxu3  ;;  %v877_v5 = vpop.f32.mrf.mxu1 }
  0xbd   : > { %v895_v1 = vadd.f32 %v894_v62, %v845_v60  ;;  %v878_v10 = vadd.f32 %v877_v5, %v828_v2 }
  0xbe   : > { %945 = vmatmul.bf16.gmra.mxu2 %v8610_v0  ;;  %1043 = vmatmul.bf16.gmra.mxu0 %v8610_v0 }
  0xbf   : > { %1564 = vst [vmem:[#allocation2 + $0x1f8] sm:$0xff] %v895_v1  ;;  %1092 = vmatmul.bf16.gmra.mxu1 %v8623_v7 }
  0xc0   : > { %1515 = vst [vmem:[#allocation2 + $0x70] sm:$0xff] %v878_v10 }
  0xc1   : > { %994 = vmatmul.bf16.gmra.mxu3 %v8623_v7  ;;  %v848_v16 = vpop.f32.mrf.mxu2 }
  0xc3   : > { %v830_v24 = vpop.f32.mrf.mxu0 }
  0xc4   : > { %v897_v18 = vpop.f32.mrf.mxu3  ;;  %v879_v25 = vpop.f32.mrf.mxu1 }
  0xc5   : > { %v898_v19 = vadd.f32 %v897_v18, %v848_v16  ;;  %v880_v26 = vadd.f32 %v879_v25, %v830_v24 }
  0xc7   : > { %1571 = vst [vmem:[#allocation2 + $0x230] sm:$0xff] %v898_v19 }
  0xc8   : > { %1522 = vst [vmem:[#allocation2 + $0xa8] sm:$0xff] %v880_v26 }
  0xc9   : > { %v850_v32 = vpop.f32.mrf.mxu2 }
  0xcb   : > { %v833_v36 = vpop.f32.mrf.mxu0 }
  0xcc   : > { %v899_v34 = vpop.f32.mrf.mxu3  ;;  %v882_v37 = vpop.f32.mrf.mxu1 }
  0xcd   : > { %v900_v35 = vadd.f32 %v899_v34, %v850_v32  ;;  %v883_v38 = vadd.f32 %v882_v37, %v833_v36 }
  0xce   : > { %950 = vmatmul.bf16.gmra.mxu2 %v8699_v53  ;;  %1048 = vmatmul.bf16.gmra.mxu0 %v8699_v53 }
  0xcf   : > { %1578 = vst [vmem:[#allocation2 + $0x268] sm:$0xff] %v900_v35  ;;  %1097 = vmatmul.bf16.gmra.mxu1 %v8703_v55 }
  0xd0   : > { %1529 = vst [vmem:[#allocation2 + $0xe0] sm:$0xff] %v883_v38 }
  0xd1   : > { %999 = vmatmul.bf16.gmra.mxu3 %v8703_v55  ;;  %v853_v44 = vpop.f32.mrf.mxu2 }
  0xd3   : > { %v835_v48 = vpop.f32.mrf.mxu0 }
  0xd4   : > { %v902_v46 = vpop.f32.mrf.mxu3  ;;  %v884_v49 = vpop.f32.mrf.mxu1 }
  0xd5   : > { %v903_v47 = vadd.f32 %v902_v46, %v853_v44  ;;  %v885_v50 = vadd.f32 %v884_v49, %v835_v48 }
  0xd7   : > { %1585 = vst [vmem:[#allocation2 + $0x2a0] sm:$0xff] %v903_v47 }
  0xd8   : > { %1536 = vst [vmem:[#allocation2 + $0x118] sm:$0xff] %v885_v50 }
  0xd9   : > { %v855_v60 = vpop.f32.mrf.mxu2 }
  0xdb   : > { %v838_v2 = vpop.f32.mrf.mxu0 }
  0xdc   : > { %v904_v62 = vpop.f32.mrf.mxu3  ;;  %v887_v5 = vpop.f32.mrf.mxu1 }
  0xdd   : > { %v905_v1 = vadd.f32 %v904_v62, %v855_v60  ;;  %v888_v10 = vadd.f32 %v887_v5, %v838_v2 }
  0xde   : > { %955 = vmatmul.bf16.gmra.mxu2 %v8743_v21  ;;  %1053 = vmatmul.bf16.gmra.mxu0 %v8743_v21 }
  0xdf   : > { %1592 = vst [vmem:[#allocation2 + $0x2d8] sm:$0xff] %v905_v1  ;;  %1102 = vmatmul.bf16.gmra.mxu1 %v8747_v23 }
  0xe0   : > { %1543 = vst [vmem:[#allocation2 + $0x150] sm:$0xff] %v888_v10 }
  0xe1   : > { %1004 = vmatmul.bf16.gmra.mxu3 %v8747_v23  ;;  %v858_v16 = vpop.f32.mrf.mxu2 }
  0xe3   : > { %v840_v24 = vpop.f32.mrf.mxu0 }
  0xe4   : > { %v907_v18 = vpop.f32.mrf.mxu3  ;;  %v889_v25 = vpop.f32.mrf.mxu1 }
  0xe5   : > { %v908_v19 = vadd.f32 %v907_v18, %v858_v16  ;;  %v890_v26 = vadd.f32 %v889_v25, %v840_v24 }
  0xe7   : > { %1599 = vst [vmem:[#allocation2 + $0x310] sm:$0xff] %v908_v19 }
  0xe8   : > { %1550 = vst [vmem:[#allocation2 + $0x188] sm:$0xff] %v890_v26 }
  0xe9   : > { %v860_v32 = vpop.f32.mrf.mxu2 }
  0xeb   : > { %v1019_v36 = vpop.f32.mrf.mxu0 }
  0xec   : > { %v909_v34 = vpop.f32.mrf.mxu3  ;;  %v1068_v37 = vpop.f32.mrf.mxu1 }
  0xed   : > { %v910_v35 = vadd.f32 %v909_v34, %v860_v32  ;;  %v1069_v38 = vadd.f32 %v1068_v37, %v1019_v36 }
  0xee   : > { %1116 = vmatmul.bf16.vlgmr.msra.gmra.mxu2 %v8492_v3  ;;  %1214 = vmatmul.bf16.vlgmr.msra.gmra.mxu0 %v8492_v3 }
  0xef   : > { %1606 = vst [vmem:[#allocation2 + $0x348] sm:$0xff] %v910_v35  ;;  %1263 = vmatmul.bf16.vlgmr.msra.gmra.mxu1 %v8505_v8  ;;  %2157 = vmatpush.bf16.msra.mxu2 %v2014_v42  ;;  %v2000_v42 = vpack.c.bf16 %v1818_v40, %v1811_v39 }
  0xf0   : > { %1502 = vst [vmem:[#allocation2 + $0x10] sm:$0xff] %v1069_v38  ;;  %2255 = vmatpush.bf16.msra.mxu0 %v2015_v58  ;;  %2304 = vmatpush.bf16.msra.mxu1 %v2071_v61 }
  0xf1   : > { %1165 = vmatmul.bf16.vlgmr.msra.gmra.mxu3 %v8505_v8  ;;  %v921_v44 = vpop.f32.mrf.mxu2 }
  0xf2   : > { %2206 = vmatpush.bf16.msra.mxu3 %v2070_v45 }
  0xf3   : > { %v1021_v48 = vpop.f32.mrf.mxu0  ;;  %2158 = vmatpush.bf16.msra.mxu2 %v2007_v14 }
  0xf4   : > { %v970_v46 = vpop.f32.mrf.mxu3  ;;  %v1070_v49 = vpop.f32.mrf.mxu1  ;;  %2256 = vmatpush.bf16.msra.mxu0 %v2008_v30  ;;  %2305 = vmatpush.bf16.msra.mxu1 %v2064_v33 }
  0xf5   : > { %v971_v47 = vadd.f32 %v970_v46, %v921_v44  ;;  %v1071_v50 = vadd.f32 %v1070_v49, %v1021_v48 }
  0xf6   : > { %2207 = vmatpush.bf16.msra.mxu3 %v2063_v17 }
  0xf7   : > { %1501 = vst [vmem:[#allocation2 + $0x8] sm:$0xff] %v971_v47  ;;  %2159 = vmatpush.bf16.msra.mxu2 %v2000_v42 }
  0xf8   : > { %1510 = vst [vmem:[#allocation2 + $0x48] sm:$0xff] %v1071_v50  ;;  %2306 = vmatpush.bf16.msra.mxu1 %v2057_v59  ;;  %v1769_v59 = vld [vmem:[%s12825_s1 + $0xe0] sm:$0xff] }
  0xf9   : > { %v923_v60 = vpop.f32.mrf.mxu2 }
  0xfb   : > { %v1024_v2 = vpop.f32.mrf.mxu0 }
  0xfc   : > { %v972_v62 = vpop.f32.mrf.mxu3  ;;  %v1073_v5 = vpop.f32.mrf.mxu1 }
  0xfd   : > { %v973_v1 = vadd.f32 %v972_v62, %v923_v60  ;;  %v1074_v10 = vadd.f32 %v1073_v5, %v1024_v2 }
  0xfe   : > { %1121 = vmatmul.bf16.gmra.mxu2 %v8608_v63  ;;  %1219 = vmatmul.bf16.gmra.mxu0 %v8608_v63 }
  0xff   : > { %1509 = vst [vmem:[#allocation2 + $0x40] sm:$0xff] %v973_v1  ;;  %1268 = vmatmul.bf16.gmra.mxu1 %v8621_v6 }
 0x100   : > { %1517 = vst [vmem:[#allocation2 + $0x80] sm:$0xff] %v1074_v10 }
 0x101   : > { %1170 = vmatmul.bf16.gmra.mxu3 %v8621_v6  ;;  %v926_v16 = vpop.f32.mrf.mxu2 }
 0x103   : > { %v1026_v24 = vpop.f32.mrf.mxu0 }
 0x104   : > { %v975_v18 = vpop.f32.mrf.mxu3  ;;  %v1075_v25 = vpop.f32.mrf.mxu1 }
 0x105   : > { %v976_v19 = vadd.f32 %v975_v18, %v926_v16  ;;  %v1076_v26 = vadd.f32 %v1075_v25, %v1026_v24 }
 0x107   : > { %1516 = vst [vmem:[#allocation2 + $0x78] sm:$0xff] %v976_v19 }
 0x108   : > { %1524 = vst [vmem:[#allocation2 + $0xb8] sm:$0xff] %v1076_v26 }
 0x109   : > { %v928_v32 = vpop.f32.mrf.mxu2 }
 0x10b   : > { %v1029_v36 = vpop.f32.mrf.mxu0 }
 0x10c   : > { %v977_v34 = vpop.f32.mrf.mxu3  ;;  %v1078_v37 = vpop.f32.mrf.mxu1 }
 0x10d   : > { %v978_v35 = vadd.f32 %v977_v34, %v928_v32  ;;  %v1079_v38 = vadd.f32 %v1078_v37, %v1029_v36 }
 0x10e   : > { %1126 = vmatmul.bf16.gmra.mxu2 %v8697_v52  ;;  %1224 = vmatmul.bf16.gmra.mxu0 %v8697_v52 }
 0x10f   : > { %1523 = vst [vmem:[#allocation2 + $0xb0] sm:$0xff] %v978_v35  ;;  %1273 = vmatmul.bf16.gmra.mxu1 %v8701_v54 }
 0x110   : > { %1531 = vst [vmem:[#allocation2 + $0xf0] sm:$0xff] %v1079_v38 }
 0x111   : > { %1175 = vmatmul.bf16.gmra.mxu3 %v8701_v54  ;;  %v931_v44 = vpop.f32.mrf.mxu2 }
 0x113   : > { %v1031_v48 = vpop.f32.mrf.mxu0 }
 0x114   : > { %v980_v46 = vpop.f32.mrf.mxu3  ;;  %v1080_v49 = vpop.f32.mrf.mxu1 }
 0x115   : > { %v981_v47 = vadd.f32 %v980_v46, %v931_v44  ;;  %v1081_v50 = vadd.f32 %v1080_v49, %v1031_v48 }
 0x117   : > { %1530 = vst [vmem:[#allocation2 + $0xe8] sm:$0xff] %v981_v47 }
 0x118   : > { %1538 = vst [vmem:[#allocation2 + $0x128] sm:$0xff] %v1081_v50 }
 0x119   : > { %v933_v60 = vpop.f32.mrf.mxu2 }
 0x11b   : > { %v1034_v2 = vpop.f32.mrf.mxu0 }
 0x11c   : > { %v982_v62 = vpop.f32.mrf.mxu3  ;;  %v1083_v5 = vpop.f32.mrf.mxu1 }
 0x11d   : > { %v983_v1 = vadd.f32 %v982_v62, %v933_v60  ;;  %v1084_v10 = vadd.f32 %v1083_v5, %v1034_v2 }
 0x11e   : > { %1131 = vmatmul.bf16.gmra.mxu2 %v8741_v20  ;;  %1229 = vmatmul.bf16.gmra.mxu0 %v8741_v20 }
 0x11f   : > { %1537 = vst [vmem:[#allocation2 + $0x120] sm:$0xff] %v983_v1  ;;  %1278 = vmatmul.bf16.gmra.mxu1 %v8745_v22 }
 0x120   : > { %1545 = vst [vmem:[#allocation2 + $0x160] sm:$0xff] %v1084_v10 }
 0x121   : > { %1180 = vmatmul.bf16.gmra.mxu3 %v8745_v22  ;;  %v936_v16 = vpop.f32.mrf.mxu2 }
 0x123   : > { %v1036_v24 = vpop.f32.mrf.mxu0 }
 0x124   : > { %v985_v18 = vpop.f32.mrf.mxu3  ;;  %v1085_v25 = vpop.f32.mrf.mxu1 }
 0x125   : > { %v986_v19 = vadd.f32 %v985_v18, %v936_v16  ;;  %v1086_v26 = vadd.f32 %v1085_v25, %v1036_v24 }
 0x127   : > { %1544 = vst [vmem:[#allocation2 + $0x158] sm:$0xff] %v986_v19 }
 0x128   : > { %1552 = vst [vmem:[#allocation2 + $0x198] sm:$0xff] %v1086_v26 }
 0x129   : > { %v938_v32 = vpop.f32.mrf.mxu2 }
 0x12b   : > { %v1039_v36 = vpop.f32.mrf.mxu0 }
 0x12c   : > { %v987_v34 = vpop.f32.mrf.mxu3  ;;  %v1088_v37 = vpop.f32.mrf.mxu1 }
 0x12d   : > { %v988_v35 = vadd.f32 %v987_v34, %v938_v32  ;;  %v1089_v38 = vadd.f32 %v1088_v37, %v1039_v36 }
 0x12e   : > { %1136 = vmatmul.bf16.gmra.mxu2 %v8494_v4  ;;  %1234 = vmatmul.bf16.gmra.mxu0 %v8494_v4 }
 0x12f   : > { %1551 = vst [vmem:[#allocation2 + $0x190] sm:$0xff] %v988_v35  ;;  %1283 = vmatmul.bf16.gmra.mxu1 %v8507_v9 }
 0x130   : > { %1559 = vst [vmem:[#allocation2 + $0x1d0] sm:$0xff] %v1089_v38 }
 0x131   : > { %1185 = vmatmul.bf16.gmra.mxu3 %v8507_v9  ;;  %v941_v44 = vpop.f32.mrf.mxu2 }
 0x133   : > { %v1041_v48 = vpop.f32.mrf.mxu0 }
 0x134   : > { %v990_v46 = vpop.f32.mrf.mxu3  ;;  %v1090_v49 = vpop.f32.mrf.mxu1 }
 0x135   : > { %v991_v47 = vadd.f32 %v990_v46, %v941_v44  ;;  %v1091_v50 = vadd.f32 %v1090_v49, %v1041_v48 }
 0x137   : > { %1558 = vst [vmem:[#allocation2 + $0x1c8] sm:$0xff] %v991_v47 }
 0x138   : > { %1566 = vst [vmem:[#allocation2 + $0x208] sm:$0xff] %v1091_v50 }
 0x139   : > { %v943_v60 = vpop.f32.mrf.mxu2 }
 0x13b   : > { %v1044_v2 = vpop.f32.mrf.mxu0 }
 0x13c   : > { %v992_v62 = vpop.f32.mrf.mxu3  ;;  %v1093_v5 = vpop.f32.mrf.mxu1 }
 0x13d   : > { %v993_v1 = vadd.f32 %v992_v62, %v943_v60  ;;  %v1094_v10 = vadd.f32 %v1093_v5, %v1044_v2 }
 0x13e   : > { %1141 = vmatmul.bf16.gmra.mxu2 %v8610_v0  ;;  %1239 = vmatmul.bf16.gmra.mxu0 %v8610_v0 }
 0x13f   : > { %1565 = vst [vmem:[#allocation2 + $0x200] sm:$0xff] %v993_v1  ;;  %1288 = vmatmul.bf16.gmra.mxu1 %v8623_v7 }
 0x140   : > { %1573 = vst [vmem:[#allocation2 + $0x240] sm:$0xff] %v1094_v10 }
 0x141   : > { %1190 = vmatmul.bf16.gmra.mxu3 %v8623_v7  ;;  %v946_v16 = vpop.f32.mrf.mxu2 }
 0x143   : > { %v1046_v24 = vpop.f32.mrf.mxu0 }
 0x144   : > { %v995_v18 = vpop.f32.mrf.mxu3  ;;  %v1095_v25 = vpop.f32.mrf.mxu1 }
 0x145   : > { %v996_v19 = vadd.f32 %v995_v18, %v946_v16  ;;  %v1096_v26 = vadd.f32 %v1095_v25, %v1046_v24 }
 0x147   : > { %1572 = vst [vmem:[#allocation2 + $0x238] sm:$0xff] %v996_v19 }
 0x148   : > { %1580 = vst [vmem:[#allocation2 + $0x278] sm:$0xff] %v1096_v26 }
 0x149   : > { %v948_v32 = vpop.f32.mrf.mxu2 }
 0x14b   : > { %v1049_v36 = vpop.f32.mrf.mxu0 }
 0x14c   : > { %v997_v34 = vpop.f32.mrf.mxu3  ;;  %v1098_v37 = vpop.f32.mrf.mxu1 }
 0x14d   : > { %v998_v35 = vadd.f32 %v997_v34, %v948_v32  ;;  %v1099_v38 = vadd.f32 %v1098_v37, %v1049_v36 }
 0x14e   : > { %1146 = vmatmul.bf16.gmra.mxu2 %v8699_v53  ;;  %1244 = vmatmul.bf16.gmra.mxu0 %v8699_v53 }
 0x14f   : > { %1579 = vst [vmem:[#allocation2 + $0x270] sm:$0xff] %v998_v35  ;;  %1293 = vmatmul.bf16.gmra.mxu1 %v8703_v55 }
 0x150   : > { %1587 = vst [vmem:[#allocation2 + $0x2b0] sm:$0xff] %v1099_v38 }
 0x151   : > { %1195 = vmatmul.bf16.gmra.mxu3 %v8703_v55  ;;  %v951_v44 = vpop.f32.mrf.mxu2 }
 0x153   : > { %v1051_v48 = vpop.f32.mrf.mxu0 }
 0x154   : > { %v1000_v46 = vpop.f32.mrf.mxu3  ;;  %v1100_v49 = vpop.f32.mrf.mxu1 }
 0x155   : > { %v1001_v47 = vadd.f32 %v1000_v46, %v951_v44  ;;  %v1101_v50 = vadd.f32 %v1100_v49, %v1051_v48  ;;  %v1812_v49 = vld [vmem:[%s12825_s1 + $0x238] sm:$0xff] }
 0x157   : > { %1586 = vst [vmem:[#allocation2 + $0x2a8] sm:$0xff] %v1001_v47 }
 0x158   : > { %1594 = vst [vmem:[#allocation2 + $0x2e8] sm:$0xff] %v1101_v50  ;;  %v1819_v50 = vld [vmem:[%s12825_s1 + $0x270] sm:$0xff] }
 0x159   : > { %v953_v60 = vpop.f32.mrf.mxu2  ;;  %v2001_v56 = vpack.c.bf16 %v1819_v50, %v1812_v49 }
 0x15b   : > { %v1054_v2 = vpop.f32.mrf.mxu0  ;;  %2257 = vmatpush.bf16.msra.mxu0 %v2001_v56 }
 0x15c   : > { %v1002_v62 = vpop.f32.mrf.mxu3  ;;  %v1103_v5 = vpop.f32.mrf.mxu1 }
 0x15d   : > { %v1003_v1 = vadd.f32 %v1002_v62, %v953_v60  ;;  %v1104_v10 = vadd.f32 %v1103_v5, %v1054_v2  ;;  %v1797_v5 = vld [vmem:[%s12825_s1 + $0x1c0] sm:$0xff] }
 0x15e   : > { %1151 = vmatmul.bf16.gmra.mxu2 %v8743_v21  ;;  %1249 = vmatmul.bf16.gmra.mxu0 %v8743_v21 }
 0x15f   : > { %1593 = vst [vmem:[#allocation2 + $0x2e0] sm:$0xff] %v1003_v1  ;;  %1298 = vmatmul.bf16.gmra.mxu1 %v8747_v23 }
 0x160   : > { %1601 = vst [vmem:[#allocation2 + $0x320] sm:$0xff] %v1104_v10  ;;  %v1804_v10 = vld [vmem:[%s12825_s1 + $0x1f8] sm:$0xff] }
 0x161   : > { %1200 = vmatmul.bf16.gmra.mxu3 %v8747_v23  ;;  %v956_v16 = vpop.f32.mrf.mxu2  ;;  %v1993_v12 = vpack.c.bf16 %v1804_v10, %v1797_v5 }
 0x163   : > { %v1056_v24 = vpop.f32.mrf.mxu0  ;;  %2160 = vmatpush.bf16.msra.mxu2 %v1993_v12 }
 0x164   : > { %v1005_v18 = vpop.f32.mrf.mxu3  ;;  %v1105_v25 = vpop.f32.mrf.mxu1 }
 0x165   : > { %v1006_v19 = vadd.f32 %v1005_v18, %v956_v16  ;;  %v1106_v26 = vadd.f32 %v1105_v25, %v1056_v24  ;;  %v1805_v24 = vld [vmem:[%s12825_s1 + $0x200] sm:$0xff]  ;;  %v1910_v25 = vld [vmem:[%s12825_s1 + $0x548] sm:$0xff] }
 0x166   : > { %v2050_v29 = vpack.c.bf16 %v1917_v27, %v1910_v25  ;;  %v1755_v27 = vld [vmem:[%s12825_s1 + $0x70] sm:$0xff] }
 0x167   : > { %1600 = vst [vmem:[#allocation2 + $0x318] sm:$0xff] %v1006_v19  ;;  %v1798_v19 = vld [vmem:[%s12825_s1 + $0x1c8] sm:$0xff] }
 0x168   : > { %1608 = vst [vmem:[#allocation2 + $0x358] sm:$0xff] %v1106_v26  ;;  %v1994_v26 = vpack.c.bf16 %v1805_v24, %v1798_v19  ;;  %2307 = vmatpush.bf16.msra.mxu1 %v2050_v29  ;;  %v1867_v29 = vld [vmem:[%s12825_s1 + $0x3f0] sm:$0xff] }
 0x169   : > { %v958_v32 = vpop.f32.mrf.mxu2 }
 0x16a   : > { %2258 = vmatpush.bf16.msra.mxu0 %v1994_v26 }
 0x16b   : > { %v1215_v36 = vpop.f32.mrf.mxu0 }
 0x16c   : > { %v1007_v34 = vpop.f32.mrf.mxu3  ;;  %v1264_v37 = vpop.f32.mrf.mxu1 }
 0x16d   : > { %v1008_v35 = vadd.f32 %v1007_v34, %v958_v32  ;;  %v1265_v38 = vadd.f32 %v1264_v37, %v1215_v36  ;;  %v1790_v36 = vld [vmem:[%s12825_s1 + $0x188] sm:$0xff]  ;;  %v1895_v37 = vld [vmem:[%s12825_s1 + $0x4d0] sm:$0xff] }
 0x16e   : > { %1312 = vmatmul.bf16.vlgmr.msrb.gmra.mxu2 %v8492_v3  ;;  %1410 = vmatmul.bf16.vlgmr.msrb.gmra.mxu0 %v8492_v3  ;;  %v1930_v3 = vld [vmem:[%s12825_s1 + $0x5e8] sm:$0xff] }
 0x16f   : > { %1607 = vst [vmem:[#allocation2 + $0x350] sm:$0xff] %v1008_v35  ;;  %1459 = vmatmul.bf16.vlgmr.msrb.gmra.mxu1 %v8505_v8  ;;  %v2056_v44 = vpack.c.bf16 %v1930_v3, %v1923_v41  ;;  %v1783_v35 = vld [vmem:[%s12825_s1 + $0x150] sm:$0xff] }
 0x170   : > { %1504 = vst [vmem:[#allocation2 + $0x20] sm:$0xff] %v1265_v38  ;;  %v1986_v38 = vpack.c.bf16 %v1790_v36, %v1783_v35 }
 0x171   : > { %1361 = vmatmul.bf16.vlgmr.msrb.gmra.mxu3 %v8505_v8  ;;  %v1117_v43 = vpop.f32.mrf.mxu2 }
 0x172   : > { %2208 = vmatpush.bf16.msra.mxu3 %v2056_v44  ;;  %2161 = vmatpush.bf16.msra.mxu2 %v1986_v38  ;;  %v1784_v44 = vld [vmem:[%s12825_s1 + $0x158] sm:$0xff]  ;;  %v1763_v38 = vld [vmem:[%s12825_s1 + $0xb0] sm:$0xff] }
 0x173   : > { %v1217_v46 = vpop.f32.mrf.mxu0 }
 0x174   : > { %v1166_v8 = vpop.f32.mrf.mxu3  ;;  %v1266_v47 = vpop.f32.mrf.mxu1 }
 0x175   : > { %v1167_v45 = vadd.f32 %v1166_v8, %v1117_v43  ;;  %v1267_v48 = vadd.f32 %v1266_v47, %v1217_v46  ;;  %v1791_v8 = vld [vmem:[%s12825_s1 + $0x190] sm:$0xff] }
 0x176   : > { %v1987_v46 = vpack.c.bf16 %v1791_v8, %v1784_v44  ;;  %v1903_v47 = vld [vmem:[%s12825_s1 + $0x510] sm:$0xff] }
 0x177   : > { %1503 = vst [vmem:[#allocation2 + $0x18] sm:$0xff] %v1167_v45  ;;  %v1896_v45 = vld [vmem:[%s12825_s1 + $0x4d8] sm:$0xff] }
 0x178   : > { %1512 = vst [vmem:[#allocation2 + $0x58] sm:$0xff] %v1267_v48  ;;  %v2043_v49 = vpack.c.bf16 %v1903_v47, %v1896_v45  ;;  %2259 = vmatpush.bf16.msra.mxu0 %v1987_v46  ;;  %v1741_v45 = vld [vmem:[%s12825_s1] sm:$0xff]  ;;  %v1748_v46 = vld [vmem:[%s12825_s1 + $0x38] sm:$0xff] }
 0x179   : > { %v1119_v58 = vpop.f32.mrf.mxu2  ;;  %v1853_v47 = vld [vmem:[%s12825_s1 + $0x380] sm:$0xff] }
 0x17a   : > { %2308 = vmatpush.bf16.msra.mxu1 %v2043_v49 }
 0x17b   : > { %v1220_v62 = vpop.f32.mrf.mxu0 }
 0x17c   : > { %v1168_v60 = vpop.f32.mrf.mxu3  ;;  %v1269_v1 = vpop.f32.mrf.mxu1 }
 0x17d   : > { %v1169_v61 = vadd.f32 %v1168_v60, %v1119_v58  ;;  %v1270_v2 = vadd.f32 %v1269_v1, %v1220_v62  ;;  %v1776_v60 = vld [vmem:[%s12825_s1 + $0x118] sm:$0xff] }
 0x17e   : > { %1317 = vmatmul.bf16.gmra.mxu2 %v8608_v63  ;;  %1415 = vmatmul.bf16.gmra.mxu0 %v8608_v63  ;;  %v1916_v63 = vld [vmem:[%s12825_s1 + $0x578] sm:$0xff]  ;;  %v1979_v62 = vpack.c.bf16 %v1776_v60, %v1769_v59  ;;  %v1742_v59 = vld [vmem:[%s12825_s1 + $0x8] sm:$0xff]  ;;  %v1749_v60 = vld [vmem:[%s12825_s1 + $0x40] sm:$0xff] }
 0x17f   : > { %1511 = vst [vmem:[#allocation2 + $0x50] sm:$0xff] %v1169_v61  ;;  %1464 = vmatmul.bf16.gmra.mxu1 %v8621_v6  ;;  %v2049_v14 = vpack.c.bf16 %v1916_v63, %v1909_v11  ;;  %v1881_v61 = vld [vmem:[%s12825_s1 + $0x460] sm:$0xff]  ;;  %v1770_v63 = vld [vmem:[%s12825_s1 + $0xe8] sm:$0xff] }
 0x180   : > { %1519 = vst [vmem:[#allocation2 + $0x90] sm:$0xff] %v1270_v2  ;;  %2162 = vmatpush.bf16.msra.mxu2 %v1979_v62  ;;  %v1966_v62 = vpack.c.bf16 %v1749_v60, %v1742_v59 }
 0x181   : > { %1366 = vmatmul.bf16.gmra.mxu3 %v8621_v6  ;;  %v1122_v13 = vpop.f32.mrf.mxu2 }
 0x182   : > { %2209 = vmatpush.bf16.msra.mxu3 %v2049_v14  ;;  %v1882_v14 = vld [vmem:[%s12825_s1 + $0x468] sm:$0xff] }
 0x183   : > { %v1222_v16 = vpop.f32.mrf.mxu0 }
 0x184   : > { %v1171_v6 = vpop.f32.mrf.mxu3  ;;  %v1271_v17 = vpop.f32.mrf.mxu1 }
 0x185   : > { %v1172_v15 = vadd.f32 %v1171_v6, %v1122_v13  ;;  %v1272_v18 = vadd.f32 %v1271_v17, %v1222_v16  ;;  %v1777_v13 = vld [vmem:[%s12825_s1 + $0x120] sm:$0xff] }
 0x186   : > { %v1980_v6 = vpack.c.bf16 %v1777_v13, %v1770_v63  ;;  %v1841_v63 = vld [vmem:[%s12825_s1 + $0x320] sm:$0xff]  ;;  %v1848_v13 = vld [vmem:[%s12825_s1 + $0x358] sm:$0xff] }
 0x187   : > { %1518 = vst [vmem:[#allocation2 + $0x88] sm:$0xff] %v1172_v15  ;;  %v1889_v15 = vld [vmem:[%s12825_s1 + $0x4a0] sm:$0xff] }
 0x188   : > { %1526 = vst [vmem:[#allocation2 + $0xc8] sm:$0xff] %v1272_v18  ;;  %v2036_v17 = vpack.c.bf16 %v1889_v15, %v1882_v14  ;;  %2260 = vmatpush.bf16.msra.mxu0 %v1980_v6  ;;  %v1953_v14 = vld [vmem:[%s12825_s1 + $0x6a0] sm:$0xff]  ;;  %v2016_v6 = vpack.c.bf16 %v1848_v13, %v1841_v63 }
 0x189   : > { %v1124_v28 = vpop.f32.mrf.mxu2 }
 0x18a   : > { %2309 = vmatpush.bf16.msra.mxu1 %v2036_v17 }
 0x18b   : > { %v1225_v32 = vpop.f32.mrf.mxu0 }
 0x18c   : > { %v1173_v30 = vpop.f32.mrf.mxu3  ;;  %v1274_v33 = vpop.f32.mrf.mxu1 }
 0x18d   : > { %v1174_v31 = vadd.f32 %v1173_v30, %v1124_v28  ;;  %v1275_v34 = vadd.f32 %v1274_v33, %v1225_v32  ;;  %v1762_v28 = vld [vmem:[%s12825_s1 + $0xa8] sm:$0xff] }
 0x18e   : > { %1322 = vmatmul.bf16.gmra.mxu2 %v8697_v52  ;;  %1420 = vmatmul.bf16.gmra.mxu0 %v8697_v52  ;;  %v1902_v52 = vld [vmem:[%s12825_s1 + $0x508] sm:$0xff]  ;;  %v1972_v30 = vpack.c.bf16 %v1762_v28, %v1755_v27 }
 0x18f   : > { %1525 = vst [vmem:[#allocation2 + $0xc0] sm:$0xff] %v1174_v31  ;;  %1469 = vmatmul.bf16.gmra.mxu1 %v8701_v54  ;;  %v2042_v40 = vpack.c.bf16 %v1902_v52, %v1895_v37  ;;  %v1756_v37 = vld [vmem:[%s12825_s1 + $0x78] sm:$0xff]  ;;  %v1954_v27 = vld [vmem:[%s12825_s1 + $0x6a8] sm:$0xff] }
 0x190   : > { %1533 = vst [vmem:[#allocation2 + $0x100] sm:$0xff] %v1275_v34  ;;  %2163 = vmatpush.bf16.msra.mxu2 %v1972_v30  ;;  %v1868_v52 = vld [vmem:[%s12825_s1 + $0x3f8] sm:$0xff] }
 0x191   : > { %1371 = vmatmul.bf16.gmra.mxu3 %v8701_v54  ;;  %v1127_v39 = vpop.f32.mrf.mxu2 }
 0x192   : > { %2210 = vmatpush.bf16.msra.mxu3 %v2042_v40  ;;  %v1875_v40 = vld [vmem:[%s12825_s1 + $0x430] sm:$0xff] }
 0x193   : > { %v1227_v42 = vpop.f32.mrf.mxu0 }
 0x194   : > { %v1176_v54 = vpop.f32.mrf.mxu3  ;;  %v1276_v3 = vpop.f32.mrf.mxu1 }
 0x195   : > { %v1177_v41 = vadd.f32 %v1176_v54, %v1127_v39  ;;  %v1277_v43 = vadd.f32 %v1276_v3, %v1227_v42  ;;  %v1973_v39 = vpack.c.bf16 %v1763_v38, %v1756_v37  ;;  %v1939_v37 = vld [vmem:[%s12825_s1 + $0x630] sm:$0xff]  ;;  %v1946_v38 = vld [vmem:[%s12825_s1 + $0x668] sm:$0xff] }
 0x197   : > { %1532 = vst [vmem:[#allocation2 + $0xf8] sm:$0xff] %v1177_v41  ;;  %v2029_v41 = vpack.c.bf16 %v1875_v40, %v1868_v52  ;;  %2261 = vmatpush.bf16.msra.mxu0 %v1973_v39  ;;  %v2065_v52 = vpack.c.bf16 %v1946_v38, %v1939_v37 }
 0x198   : > { %1540 = vst [vmem:[#allocation2 + $0x138] sm:$0xff] %v1277_v43 }
 0x199   : > { %v1129_v48 = vpop.f32.mrf.mxu2  ;;  %2310 = vmatpush.bf16.msra.mxu1 %v2029_v41 }
 0x19b   : > { %v1230_v56 = vpop.f32.mrf.mxu0  ;;  %2262 = vmatpush.bf16.msra.mxu0 %v1966_v62  ;;  %v1820_v62 = vld [vmem:[%s12825_s1 + $0x278] sm:$0xff] }
 0x19c   : > { %v1178_v50 = vpop.f32.mrf.mxu3  ;;  %v1279_v57 = vpop.f32.mrf.mxu1 }
 0x19d   : > { %v1179_v51 = vadd.f32 %v1178_v50, %v1129_v48  ;;  %v1280_v58 = vadd.f32 %v1279_v57, %v1230_v56  ;;  %v1965_v48 = vpack.c.bf16 %v1748_v46, %v1741_v45  ;;  %v1940_v45 = vld [vmem:[%s12825_s1 + $0x638] sm:$0xff]  ;;  %v8167_v46 = vld [vmem:[%s8443_s20 + $0xc] sm:$0xf] }
 0x19e   : > { %1327 = vmatmul.bf16.gmra.mxu2 %v8741_v20  ;;  %1425 = vmatmul.bf16.gmra.mxu0 %v8741_v20  ;;  %v1888_v20 = vld [vmem:[%s12825_s1 + $0x498] sm:$0xff] }
 0x19f   : > { %1539 = vst [vmem:[#allocation2 + $0x130] sm:$0xff] %v1179_v51  ;;  %1474 = vmatmul.bf16.gmra.mxu1 %v8745_v22  ;;  %v2035_v2 = vpack.c.bf16 %v1888_v20, %v1881_v61  ;;  %2164 = vmatpush.bf16.msra.mxu2 %v1965_v48  ;;  %v1854_v61 = vld [vmem:[%s12825_s1 + $0x388] sm:$0xff]  ;;  %v1861_v20 = vld [vmem:[%s12825_s1 + $0x3c0] sm:$0xff] }
 0x1a0   : > { %1547 = vst [vmem:[#allocation2 + $0x170] sm:$0xff] %v1280_v58 }
 0x1a1   : > { %1376 = vmatmul.bf16.gmra.mxu3 %v8745_v22  ;;  %v1132_v1 = vpop.f32.mrf.mxu2 }
 0x1a2   : > { %2211 = vmatpush.bf16.msra.mxu3 %v2035_v2  ;;  %v2022_v2 = vpack.c.bf16 %v1861_v20, %v1854_v61  ;;  %v1813_v61 = vld [vmem:[%s12825_s1 + $0x240] sm:$0xff] }
 0x1a3   : > { %v1232_v10 = vpop.f32.mrf.mxu0  ;;  %2353 = vmatpush.bf16.msrb.mxu2 %v2016_v6  ;;  %v1925_v20 = vld [vmem:[%s12825_s1 + $0x5c0] sm:$0xff] }
 0x1a4   : > { %v1181_v22 = vpop.f32.mrf.mxu3  ;;  %v1281_v11 = vpop.f32.mrf.mxu1  ;;  %2311 = vmatpush.bf16.msra.mxu1 %v2022_v2  ;;  %v1932_v2 = vld [vmem:[%s12825_s1 + $0x5f8] sm:$0xff]  ;;  %v8170_v6 = vld [vmem:[%s8443_s20 + $0x7c] sm:$0xf0] }
 0x1a5   : > { %v1182_v5 = vadd.f32 %v1181_v22, %v1132_v1  ;;  %v1282_v12 = vadd.f32 %v1281_v11, %v1232_v10 }
 0x1a7   : > { %1546 = vst [vmem:[#allocation2 + $0x168] sm:$0xff] %v1182_v5 }
 0x1a8   : > { %1554 = vst [vmem:[#allocation2 + $0x1a8] sm:$0xff] %v1282_v12 }
 0x1a9   : > { %v1134_v16 = vpop.f32.mrf.mxu2 }
 0x1ab   : > { %v1235_v24 = vpop.f32.mrf.mxu0 }
 0x1ac   : > { %v1183_v18 = vpop.f32.mrf.mxu3  ;;  %v1284_v25 = vpop.f32.mrf.mxu1 }
 0x1ad   : > { %v1184_v19 = vadd.f32 %v1183_v18, %v1134_v16  ;;  %v1285_v26 = vadd.f32 %v1284_v25, %v1235_v24  ;;  %v1842_v25 = vld [vmem:[%s12825_s1 + $0x328] sm:$0xff] }
 0x1ae   : > { %1332 = vmatmul.bf16.gmra.mxu2 %v8494_v4  ;;  %1430 = vmatmul.bf16.gmra.mxu0 %v8494_v4  ;;  %v1874_v4 = vld [vmem:[%s12825_s1 + $0x428] sm:$0xff] }
 0x1af   : > { %1553 = vst [vmem:[#allocation2 + $0x1a0] sm:$0xff] %v1184_v19  ;;  %1479 = vmatmul.bf16.gmra.mxu1 %v8507_v9  ;;  %v2028_v32 = vpack.c.bf16 %v1874_v4, %v1867_v29  ;;  %v1961_v29 = vld [vmem:[%s12825_s1 + $0x6e0] sm:$0xff] }
 0x1b0   : > { %1561 = vst [vmem:[#allocation2 + $0x1e0] sm:$0xff] %v1285_v26  ;;  %v1849_v26 = vld [vmem:[%s12825_s1 + $0x360] sm:$0xff]  ;;  %v2073_v4 = vpack.c.bf16 %v1961_v29, %v1954_v27 }
 0x1b1   : > { %1381 = vmatmul.bf16.gmra.mxu3 %v8507_v9  ;;  %v1137_v31 = vpop.f32.mrf.mxu2  ;;  %v2017_v28 = vpack.c.bf16 %v1849_v26, %v1842_v25 }
 0x1b2   : > { %2212 = vmatpush.bf16.msra.mxu3 %v2028_v32  ;;  %2500 = vmatpush.bf16.msrb.mxu1 %v2073_v4 }
 0x1b3   : > { %v1237_v34 = vpop.f32.mrf.mxu0  ;;  %2451 = vmatpush.bf16.msrb.mxu0 %v2017_v28 }
 0x1b4   : > { %v1186_v9 = vpop.f32.mrf.mxu3  ;;  %v1286_v35 = vpop.f32.mrf.mxu1 }
 0x1b5   : > { %v1187_v33 = vadd.f32 %v1186_v9, %v1137_v31  ;;  %v1287_v36 = vadd.f32 %v1286_v35, %v1237_v34  ;;  %v1827_v35 = vld [vmem:[%s12825_s1 + $0x2b0] sm:$0xff] }
 0x1b7   : > { %1560 = vst [vmem:[#allocation2 + $0x1d8] sm:$0xff] %v1187_v33 }
 0x1b8   : > { %1568 = vst [vmem:[#allocation2 + $0x218] sm:$0xff] %v1287_v36  ;;  %v1834_v36 = vld [vmem:[%s12825_s1 + $0x2e8] sm:$0xff] }
 0x1b9   : > { %v1139_v54 = vpop.f32.mrf.mxu2 }
 0x1bb   : > { %v1240_v43 = vpop.f32.mrf.mxu0 }
 0x1bc   : > { %v1188_v42 = vpop.f32.mrf.mxu3  ;;  %v1289_v44 = vpop.f32.mrf.mxu1 }
 0x1bd   : > { %v1189_v3 = vadd.f32 %v1188_v42, %v1139_v54  ;;  %v1290_v8 = vadd.f32 %v1289_v44, %v1240_v43  ;;  %v8168_v43 = vld [vmem:[%s8443_s20 + $0x2c] sm:$0xf0]  ;;  %v1828_v44 = vld [vmem:[%s12825_s1 + $0x2b8] sm:$0xff] }
 0x1be   : > { %1337 = vmatmul.bf16.gmra.mxu2 %v8610_v0  ;;  %1435 = vmatmul.bf16.gmra.mxu0 %v8610_v0  ;;  %v1860_v0 = vld [vmem:[%s12825_s1 + $0x3b8] sm:$0xff] }
 0x1bf   : > { %1567 = vst [vmem:[#allocation2 + $0x210] sm:$0xff] %v1189_v3  ;;  %1484 = vmatmul.bf16.gmra.mxu1 %v8623_v7  ;;  %v2021_v50 = vpack.c.bf16 %v1860_v0, %v1853_v47  ;;  %v7895_v3 = vld [vmem:[%s8443_s20 + $0x8] sm:$0xf]  ;;  %v7897_v47 = vld [vmem:[%s8443_s20 + $0x30] sm:$0xf0] }
 0x1c0   : > { %1575 = vst [vmem:[#allocation2 + $0x250] sm:$0xff] %v1290_v8  ;;  %v1835_v8 = vld [vmem:[%s12825_s1 + $0x2f0] sm:$0xff] }
 0x1c1   : > { %1386 = vmatmul.bf16.gmra.mxu3 %v8623_v7  ;;  %v1142_v49 = vpop.f32.mrf.mxu2  ;;  %v2010_v48 = vpack.c.bf16 %v1835_v8, %v1828_v44  ;;  %v1947_v0 = vld [vmem:[%s12825_s1 + $0x670] sm:$0xff] }
 0x1c2   : > { %2213 = vmatpush.bf16.msra.mxu3 %v2021_v50  ;;  %v2066_v50 = vpack.c.bf16 %v1947_v0, %v1940_v45  ;;  %v7913_v44 = vld [vmem:[%s8443_s20 + $0xd0] sm:$0xf0] }
 0x1c3   : > { %v1242_v56 = vpop.f32.mrf.mxu0  ;;  %2452 = vmatpush.bf16.msrb.mxu0 %v2010_v48  ;;  %v1919_v45 = vld [vmem:[%s12825_s1 + $0x590] sm:$0xff] }
 0x1c4   : > { %v1191_v7 = vpop.f32.mrf.mxu3  ;;  %v1291_v57 = vpop.f32.mrf.mxu1  ;;  %2501 = vmatpush.bf16.msrb.mxu1 %v2066_v50 }
 0x1c5   : > { %v1192_v51 = vadd.f32 %v1191_v7, %v1142_v49  ;;  %v1292_v58 = vadd.f32 %v1291_v57, %v1242_v56 }
 0x1c7   : > { %1574 = vst [vmem:[#allocation2 + $0x248] sm:$0xff] %v1192_v51  ;;  %v9453_v51 = vor.u32 %v8168_v43, %v7895_v3  ;;  %v1912_v3 = vld [vmem:[%s12825_s1 + $0x558] sm:$0xff]  ;;  %v8171_v43 = vld [vmem:[%s8443_s20 + $0xac] sm:$0xf] }
 0x1c8   : > { %1582 = vst [vmem:[#allocation2 + $0x288] sm:$0xff] %v1292_v58  ;;  %v9455_v58 = vor.u32 %v8167_v46, %v7897_v47  ;;  %v2052_v47 = vpack.c.bf16 %v1919_v45, %v1912_v3  ;;  %v1884_v3 = vld [vmem:[%s12825_s1 + $0x478] sm:$0xff]  ;;  %v1891_v45 = vld [vmem:[%s12825_s1 + $0x4b0] sm:$0xff] }
 0x1c9   : > { %v1144_v1 = vpop.f32.mrf.mxu2 }
 0x1cb   : > { %v1245_v10 = vpop.f32.mrf.mxu0 }
 0x1cc   : > { %v1193_v22 = vpop.f32.mrf.mxu3  ;;  %v1294_v11 = vpop.f32.mrf.mxu1 }
 0x1cd   : > { %v1194_v5 = vadd.f32 %v1193_v22, %v1144_v1  ;;  %v1295_v12 = vadd.f32 %v1294_v11, %v1245_v10  ;;  %v2002_v1 = vpack.c.bf16 %v1820_v62, %v1813_v61  ;;  %v1897_v61 = vld [vmem:[%s12825_s1 + $0x4e0] sm:$0xff] }
 0x1ce   : > { %1342 = vmatmul.bf16.gmra.mxu2 %v8699_v53  ;;  %1440 = vmatmul.bf16.gmra.mxu0 %v8699_v53  ;;  %v1960_v53 = vld [vmem:[%s12825_s1 + $0x6d8] sm:$0xff] }
 0x1cf   : > { %1581 = vst [vmem:[#allocation2 + $0x280] sm:$0xff] %v1194_v5  ;;  %1489 = vmatmul.bf16.gmra.mxu1 %v8703_v55  ;;  %v2072_v16 = vpack.c.bf16 %v1960_v53, %v1953_v14  ;;  %v2058_v5 = vpack.c.bf16 %v1932_v2, %v1925_v20  ;;  %v7903_v14 = vld [vmem:[%s8443_s20 + $0x58] sm:$0xf]  ;;  %v1814_v53 = vld [vmem:[%s12825_s1 + $0x248] sm:$0xff] }
 0x1d0   : > { %1589 = vst [vmem:[#allocation2 + $0x2c0] sm:$0xff] %v1295_v12  ;;  %v9491_v27 = vor.u32 %v8170_v6, %v7903_v14  ;;  %v1904_v20 = vld [vmem:[%s12825_s1 + $0x518] sm:$0xff]  ;;  %v1786_v14 = vld [vmem:[%s12825_s1 + $0x168] sm:$0xff]  ;;  %v1793_v6 = vld [vmem:[%s12825_s1 + $0x1a0] sm:$0xff] }
 0x1d1   : > { %1391 = vmatmul.bf16.gmra.mxu3 %v8703_v55  ;;  %v1147_v15 = vpop.f32.mrf.mxu2  ;;  %v2044_v2 = vpack.c.bf16 %v1904_v20, %v1897_v61  ;;  %v1757_v61 = vld [vmem:[%s12825_s1 + $0x80] sm:$0xff] }
 0x1d2   : > { %2402 = vmatpush.bf16.msrb.mxu3 %v2072_v16  ;;  %v1926_v16 = vld [vmem:[%s12825_s1 + $0x5c8] sm:$0xff]  ;;  %v1869_v20 = vld [vmem:[%s12825_s1 + $0x400] sm:$0xff] }
 0x1d3   : > { %v1247_v18 = vpop.f32.mrf.mxu0 }
 0x1d4   : > { %v1196_v55 = vpop.f32.mrf.mxu3  ;;  %v1296_v19 = vpop.f32.mrf.mxu1 }
 0x1d5   : > { %v1197_v17 = vadd.f32 %v1196_v55, %v1147_v15  ;;  %v1297_v24 = vadd.f32 %v1296_v19, %v1247_v18  ;;  %v1821_v15 = vld [vmem:[%s12825_s1 + $0x280] sm:$0xff]  ;;  %v8169_v55 = vld [vmem:[%s8443_s20 + $0x5c] sm:$0xf] }
 0x1d6   : > { %2403 = vmatpush.bf16.msrb.mxu3 %v2065_v52  ;;  %v2003_v18 = vpack.c.bf16 %v1821_v15, %v1814_v53  ;;  %v1933_v19 = vld [vmem:[%s12825_s1 + $0x600] sm:$0xff]  ;;  %v1898_v53 = vld [vmem:[%s12825_s1 + $0x4e8] sm:$0xff]  ;;  %v8173_v15 = vld [vmem:[%s8443_s20 + $0xfc] sm:$0xf] }
 0x1d7   : > { %1588 = vst [vmem:[#allocation2 + $0x2b8] sm:$0xff] %v1197_v17  ;;  %v7905_v17 = vld [vmem:[%s8443_s20 + $0x80] sm:$0xf0]  ;;  %v2059_v25 = vpack.c.bf16 %v1933_v19, %v1926_v16 }
 0x1d8   : > { %1596 = vst [vmem:[#allocation2 + $0x2f8] sm:$0xff] %v1297_v24  ;;  %2453 = vmatpush.bf16.msrb.mxu0 %v2003_v18  ;;  %v7921_v16 = vld [vmem:[%s8443_s20 + $0x120] sm:$0xf0] }
 0x1d9   : > { %v1149_v30 = vpop.f32.mrf.mxu2  ;;  %2502 = vmatpush.bf16.msrb.mxu1 %v2059_v25 }
 0x1da   : > { %2404 = vmatpush.bf16.msrb.mxu3 %v2058_v5 }
 0x1db   : > { %v1250_v9 = vpop.f32.mrf.mxu0 }
 0x1dc   : > { %v1198_v31 = vpop.f32.mrf.mxu3  ;;  %v1299_v33 = vpop.f32.mrf.mxu1 }
 0x1dd   : > { %v1199_v32 = vadd.f32 %v1198_v31, %v1149_v30  ;;  %v1300_v34 = vadd.f32 %v1299_v33, %v1250_v9  ;;  %v9493_v30 = vor.u32 %v8169_v55, %v7905_v17  ;;  %v1806_v9 = vld [vmem:[%s12825_s1 + $0x208] sm:$0xff]  ;;  %v1911_v33 = vld [vmem:[%s12825_s1 + $0x550] sm:$0xff]  ;;  %2503 = vmatpush.bf16.msrb.mxu1 %v2052_v47  ;;  %v1989_v55 = vpack.c.bf16 %v1793_v6, %v1786_v14  ;;  %v1905_v17 = vld [vmem:[%s12825_s1 + $0x520] sm:$0xff] }
 0x1de   : > { %1347 = vmatmul.bf16.gmra.mxu2 %v8743_v21  ;;  %1445 = vmatmul.bf16.gmra.mxu0 %v8743_v21  ;;  %v2009_v21 = vpack.c.bf16 %v1834_v36, %v1827_v35  ;;  %v1918_v35 = vld [vmem:[%s12825_s1 + $0x588] sm:$0xff]  ;;  %v2045_v19 = vpack.c.bf16 %v1905_v17, %v1898_v53  ;;  %v2038_v47 = vpack.c.bf16 %v1891_v45, %v1884_v3  ;;  %v7935_v14 = vld [vmem:[%s8443_s20 + $0x198] sm:$0xf]  ;;  %v8178_v6 = vld [vmem:[%s8443_s20 + $0x1bc] sm:$0xf0] }
 0x1df   : > { %1595 = vst [vmem:[#allocation2 + $0x2f0] sm:$0xff] %v1199_v32  ;;  %1494 = vmatmul.bf16.gmra.mxu1 %v8747_v23  ;;  %v1799_v32 = vld [vmem:[%s12825_s1 + $0x1d0] sm:$0xff]  ;;  %v2051_v37 = vpack.c.bf16 %v1918_v35, %v1911_v33  ;;  %v1890_v35 = vld [vmem:[%s12825_s1 + $0x4a8] sm:$0xff]  ;;  %v7937_v17 = vld [vmem:[%s8443_s20 + $0x1c0] sm:$0xf0] }
 0x1e0   : > { %1603 = vst [vmem:[#allocation2 + $0x330] sm:$0xff] %v1300_v34  ;;  %2354 = vmatpush.bf16.msrb.mxu2 %v2009_v21  ;;  %v1995_v34 = vpack.c.bf16 %v1806_v9, %v1799_v32  ;;  %v1771_v32 = vld [vmem:[%s12825_s1 + $0xf0] sm:$0xff]  ;;  %v1778_v9 = vld [vmem:[%s12825_s1 + $0x128] sm:$0xff]  ;;  %v1856_v45 = vld [vmem:[%s12825_s1 + $0x398] sm:$0xff] }
 0x1e1   : > { %1396 = vmatmul.bf16.gmra.mxu3 %v8747_v23  ;;  %v1152_v23 = vpop.f32.mrf.mxu2  ;;  %2504 = vmatpush.bf16.msrb.mxu1 %v2045_v19  ;;  %v1883_v33 = vld [vmem:[%s12825_s1 + $0x470] sm:$0xff]  ;;  %v1758_v53 = vld [vmem:[%s12825_s1 + $0x88] sm:$0xff]  ;;  %v1877_v19 = vld [vmem:[%s12825_s1 + $0x440] sm:$0xff] }
 0x1e2   : > { %2405 = vmatpush.bf16.msrb.mxu3 %v2051_v37  ;;  %v2037_v37 = vpack.c.bf16 %v1890_v35, %v1883_v33  ;;  %v1743_v35 = vld [vmem:[%s12825_s1 + $0x10] sm:$0xff]  ;;  %v7943_v3 = vld [vmem:[%s8443_s20 + $0x1e8] sm:$0xf] }
 0x1e3   : > { %v1252_v54 = vpop.f32.mrf.mxu0 }
 0x1e4   : > { %v1201_v39 = vpop.f32.mrf.mxu3  ;;  %v1301_v41 = vpop.f32.mrf.mxu1  ;;  %2355 = vmatpush.bf16.msrb.mxu2 %v2002_v1 }
 0x1e5   : > { %v1202_v40 = vadd.f32 %v1201_v39, %v1152_v23  ;;  %v1302_v42 = vadd.f32 %v1301_v41, %v1252_v54  ;;  %v8172_v54 = vld [vmem:[%s8443_s20 + $0xcc] sm:$0xf0]  ;;  %v1800_v41 = vld [vmem:[%s12825_s1 + $0x1d8] sm:$0xff]  ;;  %2505 = vmatpush.bf16.msrb.mxu1 %v2038_v47  ;;  %v7945_v47 = vld [vmem:[%s8443_s20 + $0x210] sm:$0xf0] }
 0x1e6   : > { %2406 = vmatpush.bf16.msrb.mxu3 %v2044_v2  ;;  %v1876_v2 = vld [vmem:[%s12825_s1 + $0x438] sm:$0xff] }
 0x1e7   : > { %1602 = vst [vmem:[#allocation2 + $0x328] sm:$0xff] %v1202_v40  ;;  %v7911_v40 = vld [vmem:[%s8443_s20 + $0xa8] sm:$0xf] }
 0x1e8   : > { %1610 = vst [vmem:[#allocation2 + $0x368] sm:$0xff] %v1302_v42  ;;  %2356 = vmatpush.bf16.msrb.mxu2 %v1995_v34  ;;  %v1807_v42 = vld [vmem:[%s12825_s1 + $0x210] sm:$0xff]  ;;  %v9529_v0 = vor.u32 %v8172_v54, %v7911_v40  ;;  %v1981_v34 = vpack.c.bf16 %v1778_v9, %v1771_v32  ;;  %v7927_v40 = vld [vmem:[%s8443_s20 + $0x148] sm:$0xf] }
 0x1e9   : > { %v1154_v49 = vpop.f32.mrf.mxu2  ;;  %v1996_v8 = vpack.c.bf16 %v1807_v42, %v1800_v41  ;;  %v8176_v54 = vld [vmem:[%s8443_s20 + $0x16c] sm:$0xf0]  ;;  %v1772_v41 = vld [vmem:[%s12825_s1 + $0xf8] sm:$0xff] }
 0x1ea   : > { %2407 = vmatpush.bf16.msrb.mxu3 %v2037_v37  ;;  %v1779_v42 = vld [vmem:[%s12825_s1 + $0x130] sm:$0xff] }
 0x1eb   : > { %v1411_v57 = vpop.f32.mrf.mxu0  ;;  %2454 = vmatpush.bf16.msrb.mxu0 %v1996_v8  ;;  %v1982_v8 = vpack.c.bf16 %v1779_v42, %v1772_v41  ;;  %v1855_v37 = vld [vmem:[%s12825_s1 + $0x390] sm:$0xff] }
 0x1ec   : > { %v1203_v7 = vpop.f32.mrf.mxu3  ;;  %v1460_v59 = vpop.f32.mrf.mxu1 }
 0x1ed   : > { %v1204_v56 = vadd.f32 %v1203_v7, %v1154_v49  ;;  %v1461_v60 = vadd.f32 %v1460_v59, %v1411_v57  ;;  %v9531_v7 = vor.u32 %v8171_v43, %v7913_v44  ;;  %v1785_v59 = vld [vmem:[%s12825_s1 + $0x160] sm:$0xff]  ;;  %v8175_v43 = vld [vmem:[%s8443_s20 + $0x14c] sm:$0xf]  ;;  %v7929_v44 = vld [vmem:[%s8443_s20 + $0x170] sm:$0xf0] }
 0x1ee   : > { %2165 = vmatmul.bf16.vlgmr.msra.gmra.mxu2 %v9453_v51  ;;  %2263 = vmatmul.bf16.vlgmr.msra.gmra.mxu0 %v9453_v51 }
 0x1ef   : > { %1609 = vst [vmem:[#allocation2 + $0x360] sm:$0xff] %v1204_v56  ;;  %2312 = vmatmul.bf16.vlgmr.msra.gmra.mxu1 %v9455_v58  ;;  %2455 = vmatpush.bf16.msrb.mxu0 %v1989_v55  ;;  %v8177_v55 = vld [vmem:[%s8443_s20 + $0x19c] sm:$0xf] }
 0x1f0   : > { %1507 = vst.msk [vmem:[#allocation2 + $0x30] sm:$0xff] %vm1506_vm0, %v1461_v60  ;;  %v1792_v60 = vld [vmem:[%s12825_s1 + $0x198] sm:$0xff]  ;;  %v9645_v9 = vor.u32 %v8177_v55, %v7937_v17 }
 0x1f1   : > { %2214 = vmatmul.bf16.vlgmr.msra.gmra.mxu3 %v9455_v58  ;;  %v1313_v22 = vpop.f32.mrf.mxu2  ;;  %v1988_v62 = vpack.c.bf16 %v1792_v60, %v1785_v59  ;;  %v7951_v17 = vld [vmem:[%s8443_s20 + $0x238] sm:$0xf] }
 0x1f3   : > { %v1413_v12 = vpop.f32.mrf.mxu0  ;;  %2357 = vmatpush.bf16.msrb.mxu2 %v1988_v62  ;;  %2456 = vmatpush.bf16.msrb.mxu0 %v1982_v8  ;;  %v1764_v62 = vld [vmem:[%s12825_s1 + $0xb8] sm:$0xff]  ;;  %v1751_v8 = vld [vmem:[%s12825_s1 + $0x50] sm:$0xff] }
 0x1f4   : > { %v1362_v10 = vpop.f32.mrf.mxu3  ;;  %v1462_v63 = vpop.f32.mrf.mxu1 }
 0x1f5   : > { %v1363_v11 = vadd.f32 %v1362_v10, %v1313_v22  ;;  %v1463_v13 = vadd.f32 %v1462_v63, %v1413_v12  ;;  %v7919_v63 = vld [vmem:[%s8443_s20 + $0xf8] sm:$0xf] }
 0x1f7   : > { %1505 = vst [vmem:[#allocation2 + $0x28] sm:$0xff] %v1363_v11  ;;  %2358 = vmatpush.bf16.msrb.mxu2 %v1981_v34 }
 0x1f8   : > { %1514 = vst.msk [vmem:[#allocation2 + $0x68] sm:$0xff] %vm1506_vm0, %v1463_v13  ;;  %v8174_v13 = vld [vmem:[%s8443_s20 + $0x11c] sm:$0xf0] }
 0x1f9   : > { %v1315_v24 = vpop.f32.mrf.mxu2  ;;  %v9567_v25 = vor.u32 %v8174_v13, %v7919_v63 }
 0x1fb   : > { %v1416_v29 = vpop.f32.mrf.mxu0 }
 0x1fc   : > { %v1364_v26 = vpop.f32.mrf.mxu3  ;;  %v1465_v4 = vpop.f32.mrf.mxu1 }
 0x1fd   : > { %v1365_v28 = vadd.f32 %v1364_v26, %v1315_v24  ;;  %v1466_v31 = vadd.f32 %v1465_v4, %v1416_v29  ;;  %v9569_v29 = vor.u32 %v8173_v15, %v7921_v16  ;;  %v1765_v15 = vld [vmem:[%s12825_s1 + $0xc0] sm:$0xff]  ;;  %v1870_v16 = vld [vmem:[%s12825_s1 + $0x408] sm:$0xff] }
 0x1fe   : > { %2170 = vmatmul.bf16.gmra.mxu2 %v9491_v27  ;;  %2268 = vmatmul.bf16.gmra.mxu0 %v9491_v27 }
 0x1ff   : > { %1513 = vst [vmem:[#allocation2 + $0x60] sm:$0xff] %v1365_v28  ;;  %2317 = vmatmul.bf16.gmra.mxu1 %v9493_v30 }
 0x200   : > { %1521 = vst.msk [vmem:[#allocation2 + $0xa0] sm:$0xff] %vm1506_vm0, %v1466_v31 }
 0x201   : > { %2219 = vmatmul.bf16.gmra.mxu3 %v9493_v30  ;;  %v1318_v36 = vpop.f32.mrf.mxu2 }
 0x203   : > { %v1418_v23 = vpop.f32.mrf.mxu0 }
 0x204   : > { %v1367_v21 = vpop.f32.mrf.mxu3  ;;  %v1467_v52 = vpop.f32.mrf.mxu1 }
 0x205   : > { %v1368_v38 = vadd.f32 %v1367_v21, %v1318_v36  ;;  %v1468_v39 = vadd.f32 %v1467_v52, %v1418_v23 }
 0x207   : > { %1520 = vst [vmem:[#allocation2 + $0x98] sm:$0xff] %v1368_v38 }
 0x208   : > { %1528 = vst.msk [vmem:[#allocation2 + $0xd8] sm:$0xff] %vm1506_vm0, %v1468_v39 }
 0x209   : > { %v1320_v46 = vpop.f32.mrf.mxu2 }
 0x20b   : > { %v1421_v50 = vpop.f32.mrf.mxu0 }
 0x20c   : > { %v1369_v48 = vpop.f32.mrf.mxu3  ;;  %v1470_v56 = vpop.f32.mrf.mxu1 }
 0x20d   : > { %v1370_v49 = vadd.f32 %v1369_v48, %v1320_v46  ;;  %v1471_v57 = vadd.f32 %v1470_v56, %v1421_v50 }
 0x20e   : > { %2175 = vmatmul.bf16.gmra.mxu2 %v9529_v0  ;;  %2273 = vmatmul.bf16.gmra.mxu0 %v9529_v0 }
 0x20f   : > { %1527 = vst [vmem:[#allocation2 + $0xd0] sm:$0xff] %v1370_v49  ;;  %2322 = vmatmul.bf16.gmra.mxu1 %v9531_v7  ;;  %v9605_v49 = vor.u32 %v8176_v54, %v7927_v40 }
 0x210   : > { %1535 = vst.msk [vmem:[#allocation2 + $0x110] sm:$0xff] %vm1506_vm0, %v1471_v57  ;;  %v9607_v57 = vor.u32 %v8175_v43, %v7929_v44  ;;  %v8180_v43 = vld [vmem:[%s8443_s20 + $0x20c] sm:$0xf0]  ;;  %v1744_v44 = vld [vmem:[%s12825_s1 + $0x18] sm:$0xff] }
 0x211   : > { %2224 = vmatmul.bf16.gmra.mxu3 %v9531_v7  ;;  %v1323_v1 = vpop.f32.mrf.mxu2 }
 0x213   : > { %v1423_v10 = vpop.f32.mrf.mxu0 }
 0x214   : > { %v1372_v22 = vpop.f32.mrf.mxu3  ;;  %v1472_v11 = vpop.f32.mrf.mxu1 }
 0x215   : > { %v1373_v5 = vadd.f32 %v1372_v22, %v1323_v1  ;;  %v1473_v12 = vadd.f32 %v1472_v11, %v1423_v10  ;;  %v1974_v1 = vpack.c.bf16 %v1764_v62, %v1757_v61  ;;  %v9681_v61 = vor.u32 %v8180_v43, %v7943_v3 }
 0x217   : > { %1534 = vst [vmem:[#allocation2 + $0x108] sm:$0xff] %v1373_v5  ;;  %v2030_v5 = vpack.c.bf16 %v1876_v2, %v1869_v20  ;;  %2359 = vmatpush.bf16.msrb.mxu2 %v1974_v1 }
 0x218   : > { %1542 = vst.msk [vmem:[#allocation2 + $0x148] sm:$0xff] %vm1506_vm0, %v1473_v12 }
 0x219   : > { %v1325_v18 = vpop.f32.mrf.mxu2  ;;  %2408 = vmatpush.bf16.msrb.mxu3 %v2030_v5 }
 0x21b   : > { %v1426_v28 = vpop.f32.mrf.mxu0 }
 0x21c   : > { %v1374_v24 = vpop.f32.mrf.mxu3  ;;  %v1475_v4 = vpop.f32.mrf.mxu1 }
 0x21d   : > { %v1375_v26 = vadd.f32 %v1374_v24, %v1325_v18  ;;  %v1476_v31 = vadd.f32 %v1475_v4, %v1426_v28  ;;  %v1975_v18 = vpack.c.bf16 %v1765_v15, %v1758_v53  ;;  %v9643_v4 = vor.u32 %v8178_v6, %v7935_v14  ;;  %v1962_v14 = vld [vmem:[%s12825_s1 + $0x6e8] sm:$0xff] }
 0x21e   : > { %2180 = vmatmul.bf16.gmra.mxu2 %v9567_v25  ;;  %2278 = vmatmul.bf16.gmra.mxu0 %v9567_v25 }
 0x21f   : > { %1541 = vst [vmem:[#allocation2 + $0x140] sm:$0xff] %v1375_v26  ;;  %2327 = vmatmul.bf16.gmra.mxu1 %v9569_v29  ;;  %v2031_v26 = vpack.c.bf16 %v1877_v19, %v1870_v16  ;;  %2457 = vmatpush.bf16.msrb.mxu0 %v1975_v18  ;;  %v8182_v18 = vld [vmem:[%s8443_s20 + $0x25c] sm:$0xf0]  ;;  %v8181_v19 = vld [vmem:[%s8443_s20 + $0x23c] sm:$0xf] }
 0x220   : > { %1549 = vst.msk [vmem:[#allocation2 + $0x180] sm:$0xff] %vm1506_vm0, %v1476_v31 }
 0x221   : > { %2229 = vmatmul.bf16.gmra.mxu3 %v9569_v29  ;;  %v1328_v36 = vpop.f32.mrf.mxu2  ;;  %2506 = vmatpush.bf16.msrb.mxu1 %v2031_v26 }
 0x223   : > { %v1428_v23 = vpop.f32.mrf.mxu0 }
 0x224   : > { %v1377_v21 = vpop.f32.mrf.mxu3  ;;  %v1477_v52 = vpop.f32.mrf.mxu1 }
 0x225   : > { %v1378_v38 = vadd.f32 %v1377_v21, %v1328_v36  ;;  %v1478_v39 = vadd.f32 %v1477_v52, %v1428_v23  ;;  %v1750_v36 = vld [vmem:[%s12825_s1 + $0x48] sm:$0xff] }
 0x226   : > { %v1967_v21 = vpack.c.bf16 %v1750_v36, %v1743_v35  ;;  %v1963_v36 = vld [vmem:[%s12825_s1 + $0x6f0] sm:$0xff] }
 0x227   : > { %1548 = vst [vmem:[#allocation2 + $0x178] sm:$0xff] %v1378_v38  ;;  %v1862_v38 = vld [vmem:[%s12825_s1 + $0x3c8] sm:$0xff] }
 0x228   : > { %1556 = vst.msk [vmem:[#allocation2 + $0x1b8] sm:$0xff] %vm1506_vm0, %v1478_v39  ;;  %v2023_v52 = vpack.c.bf16 %v1862_v38, %v1855_v37  ;;  %2360 = vmatpush.bf16.msrb.mxu2 %v1967_v21 }
 0x229   : > { %v1330_v46 = vpop.f32.mrf.mxu2 }
 0x22a   : > { %2409 = vmatpush.bf16.msrb.mxu3 %v2023_v52 }
 0x22b   : > { %v1431_v56 = vpop.f32.mrf.mxu0 }
 0x22c   : > { %v1379_v48 = vpop.f32.mrf.mxu3  ;;  %v1480_v59 = vpop.f32.mrf.mxu1 }
 0x22d   : > { %v1380_v50 = vadd.f32 %v1379_v48, %v1330_v46  ;;  %v1481_v60 = vadd.f32 %v1480_v59, %v1431_v56  ;;  %v8179_v46 = vld [vmem:[%s8443_s20 + $0x1ec] sm:$0xf]  ;;  %v1968_v48 = vpack.c.bf16 %v1751_v8, %v1744_v44  ;;  %v1948_v44 = vld [vmem:[%s12825_s1 + $0x678] sm:$0xff] }
 0x22e   : > { %2185 = vmatmul.bf16.gmra.mxu2 %v9605_v49  ;;  %2283 = vmatmul.bf16.gmra.mxu0 %v9605_v49  ;;  %v9683_v1 = vor.u32 %v8179_v46, %v7945_v47 }
 0x22f   : > { %1555 = vst [vmem:[#allocation2 + $0x1b0] sm:$0xff] %v1380_v50  ;;  %2332 = vmatmul.bf16.gmra.mxu1 %v9607_v57  ;;  %v1863_v50 = vld [vmem:[%s12825_s1 + $0x3d0] sm:$0xff]  ;;  %2458 = vmatpush.bf16.msrb.mxu0 %v1968_v48 }
 0x230   : > { %1563 = vst.msk [vmem:[#allocation2 + $0x1f0] sm:$0xff] %vm1506_vm0, %v1481_v60  ;;  %v2024_v59 = vpack.c.bf16 %v1863_v50, %v1856_v45 }
 0x231   : > { %2234 = vmatmul.bf16.gmra.mxu3 %v9607_v57  ;;  %v1333_v22 = vpop.f32.mrf.mxu2 }
 0x232   : > { %2507 = vmatpush.bf16.msrb.mxu1 %v2024_v59  ;;  %v1837_v59 = vld [vmem:[%s12825_s1 + $0x300] sm:$0xff] }
 0x233   : > { %v1433_v12 = vpop.f32.mrf.mxu0 }
 0x234   : > { %v1382_v10 = vpop.f32.mrf.mxu3  ;;  %v1482_v63 = vpop.f32.mrf.mxu1 }
 0x235   : > { %v1383_v11 = vadd.f32 %v1382_v10, %v1333_v22  ;;  %v1483_v13 = vadd.f32 %v1482_v63, %v1433_v12  ;;  %v1843_v10 = vld [vmem:[%s12825_s1 + $0x330] sm:$0xff] }
 0x236   : > { %v1955_v12 = vld [vmem:[%s12825_s1 + $0x6b0] sm:$0xff] }
 0x237   : > { %1562 = vst [vmem:[#allocation2 + $0x1e8] sm:$0xff] %v1383_v11  ;;  %v1850_v11 = vld [vmem:[%s12825_s1 + $0x368] sm:$0xff]  ;;  %v2074_v15 = vpack.c.bf16 %v1962_v14, %v1955_v12 }
 0x238   : > { %1570 = vst.msk [vmem:[#allocation2 + $0x228] sm:$0xff] %vm1506_vm0, %v1483_v13  ;;  %v2018_v13 = vpack.c.bf16 %v1850_v11, %v1843_v10 }
 0x239   : > { %v1335_v24 = vpop.f32.mrf.mxu2  ;;  %2598 = vmatpush.bf16.msra.mxu3 %v2074_v15  ;;  %v1927_v15 = vld [vmem:[%s12825_s1 + $0x5d0] sm:$0xff] }
 0x23a   : > { %2549 = vmatpush.bf16.msra.mxu2 %v2018_v13 }
 0x23b   : > { %v1436_v32 = vpop.f32.mrf.mxu0 }
 0x23c   : > { %v1384_v28 = vpop.f32.mrf.mxu3  ;;  %v1485_v33 = vpop.f32.mrf.mxu1 }
 0x23d   : > { %v1385_v31 = vadd.f32 %v1384_v28, %v1335_v24  ;;  %v1486_v34 = vadd.f32 %v1485_v33, %v1436_v32  ;;  %v7953_v24 = vld [vmem:[%s8443_s20 + $0x260] sm:$0xf0]  ;;  %v1844_v28 = vld [vmem:[%s12825_s1 + $0x338] sm:$0xff] }
 0x23e   : > { %2190 = vmatmul.bf16.gmra.mxu2 %v9643_v4  ;;  %2288 = vmatmul.bf16.gmra.mxu0 %v9643_v4  ;;  %v1956_v32 = vld [vmem:[%s12825_s1 + $0x6b8] sm:$0xff]  ;;  %v9721_v38 = vor.u32 %v8181_v19, %v7953_v24 }
 0x23f   : > { %1569 = vst [vmem:[#allocation2 + $0x220] sm:$0xff] %v1385_v31  ;;  %2337 = vmatmul.bf16.gmra.mxu1 %v9645_v9  ;;  %v1851_v31 = vld [vmem:[%s12825_s1 + $0x370] sm:$0xff] }
 0x240   : > { %1577 = vst.msk [vmem:[#allocation2 + $0x260] sm:$0xff] %vm1506_vm0, %v1486_v34  ;;  %v9716_v34 = vor.u32 %v8182_v18, %v7951_v17  ;;  %v2019_v35 = vpack.c.bf16 %v1851_v31, %v1844_v28  ;;  %v1934_v17 = vld [vmem:[%s12825_s1 + $0x608] sm:$0xff] }
 0x241   : > { %2239 = vmatmul.bf16.gmra.mxu3 %v9645_v9  ;;  %v1338_v23 = vpop.f32.mrf.mxu2  ;;  %v2060_v24 = vpack.c.bf16 %v1934_v17, %v1927_v15  ;;  %v1914_v15 = vld [vmem:[%s12825_s1 + $0x568] sm:$0xff]  ;;  %v1921_v17 = vld [vmem:[%s12825_s1 + $0x5a0] sm:$0xff] }
 0x242   : > { %2647 = vmatpush.bf16.msra.mxu0 %v2019_v35 }
 0x243   : > { %v1438_v54 = vpop.f32.mrf.mxu0 }
 0x244   : > { %v1387_v39 = vpop.f32.mrf.mxu3  ;;  %v1487_v41 = vpop.f32.mrf.mxu1 }
 0x245   : > { %v1388_v40 = vadd.f32 %v1387_v39, %v1338_v23  ;;  %v1488_v42 = vadd.f32 %v1487_v41, %v1438_v54  ;;  %v2075_v23 = vpack.c.bf16 %v1963_v36, %v1956_v32  ;;  %v1829_v54 = vld [vmem:[%s12825_s1 + $0x2c0] sm:$0xff]  ;;  %v1836_v41 = vld [vmem:[%s12825_s1 + $0x2f8] sm:$0xff] }
 0x246   : > { %v2011_v43 = vpack.c.bf16 %v1836_v41, %v1829_v54 }
 0x247   : > { %1576 = vst [vmem:[#allocation2 + $0x258] sm:$0xff] %v1388_v40  ;;  %2696 = vmatpush.bf16.msra.mxu1 %v2075_v23  ;;  %v1928_v23 = vld [vmem:[%s12825_s1 + $0x5d8] sm:$0xff] }
 0x248   : > { %1584 = vst.msk [vmem:[#allocation2 + $0x298] sm:$0xff] %vm1506_vm0, %v1488_v42  ;;  %v1941_v42 = vld [vmem:[%s12825_s1 + $0x640] sm:$0xff]  ;;  %2550 = vmatpush.bf16.msra.mxu2 %v2011_v43 }
 0x249   : > { %v1340_v56 = vpop.f32.mrf.mxu2  ;;  %v2067_v46 = vpack.c.bf16 %v1948_v44, %v1941_v42 }
 0x24b   : > { %v1441_v20 = vpop.f32.mrf.mxu0  ;;  %2599 = vmatpush.bf16.msra.mxu3 %v2067_v46 }
 0x24c   : > { %v1389_v60 = vpop.f32.mrf.mxu3  ;;  %v1490_v2 = vpop.f32.mrf.mxu1 }
 0x24d   : > { %v1390_v62 = vadd.f32 %v1389_v60, %v1340_v56  ;;  %v1491_v22 = vadd.f32 %v1490_v2, %v1441_v20  ;;  %v1830_v56 = vld [vmem:[%s12825_s1 + $0x2c8] sm:$0xff]  ;;  %v1949_v2 = vld [vmem:[%s12825_s1 + $0x680] sm:$0xff] }
 0x24e   : > { %2195 = vmatmul.bf16.gmra.mxu2 %v9681_v61  ;;  %2293 = vmatmul.bf16.gmra.mxu0 %v9681_v61  ;;  %v1942_v60 = vld [vmem:[%s12825_s1 + $0x648] sm:$0xff]  ;;  %v2012_v20 = vpack.c.bf16 %v1837_v59, %v1830_v56  ;;  %v1913_v56 = vld [vmem:[%s12825_s1 + $0x560] sm:$0xff] }
 0x24f   : > { %1583 = vst [vmem:[#allocation2 + $0x290] sm:$0xff] %v1390_v62  ;;  %2342 = vmatmul.bf16.gmra.mxu1 %v9683_v1  ;;  %v2068_v10 = vpack.c.bf16 %v1949_v2, %v1942_v60  ;;  %2600 = vmatpush.bf16.msra.mxu3 %v2060_v24  ;;  %v2054_v24 = vpack.c.bf16 %v1921_v17, %v1914_v15  ;;  %v1885_v15 = vld [vmem:[%s12825_s1 + $0x480] sm:$0xff]  ;;  %v1892_v17 = vld [vmem:[%s12825_s1 + $0x4b8] sm:$0xff] }
 0x250   : > { %1591 = vst.msk [vmem:[#allocation2 + $0x2d0] sm:$0xff] %vm1506_vm0, %v1491_v22  ;;  %2648 = vmatpush.bf16.msra.mxu0 %v2012_v20 }
 0x251   : > { %2244 = vmatmul.bf16.gmra.mxu3 %v9683_v1  ;;  %v1343_v5 = vpop.f32.mrf.mxu2  ;;  %2697 = vmatpush.bf16.msra.mxu1 %v2068_v10 }
 0x253   : > { %v1443_v53 = vpop.f32.mrf.mxu0 }
 0x254   : > { %v1392_v63 = vpop.f32.mrf.mxu3  ;;  %v1492_v16 = vpop.f32.mrf.mxu1 }
 0x255   : > { %v1393_v6 = vadd.f32 %v1392_v63, %v1343_v5  ;;  %v1493_v55 = vadd.f32 %v1492_v16, %v1443_v53  ;;  %v1614_v63 = vld [vmem:[#allocation2 + $0x8] sm:$0xff] }
 0x256   : > { %v1822_v53 = vld [vmem:[%s12825_s1 + $0x288] sm:$0xff] }
 0x257   : > { %1590 = vst [vmem:[#allocation2 + $0x2c8] sm:$0xff] %v1393_v6  ;;  %v1815_v6 = vld [vmem:[%s12825_s1 + $0x250] sm:$0xff] }
 0x258   : > { %1598 = vst.msk [vmem:[#allocation2 + $0x308] sm:$0xff] %vm1506_vm0, %v1493_v55  ;;  %v2004_v55 = vpack.c.bf16 %v1822_v53, %v1815_v6  ;;  %v1802_v6 = vld [vmem:[%s12825_s1 + $0x1e8] sm:$0xff]  ;;  %v1809_v53 = vld [vmem:[%s12825_s1 + $0x220] sm:$0xff] }
 0x259   : > { %v1345_v26 = vpop.f32.mrf.mxu2 }
 0x25a   : > { %2551 = vmatpush.bf16.msra.mxu2 %v2004_v55  ;;  %v1998_v55 = vpack.c.bf16 %v1809_v53, %v1802_v6  ;;  %v1773_v6 = vld [vmem:[%s12825_s1 + $0x100] sm:$0xff]  ;;  %v1780_v53 = vld [vmem:[%s12825_s1 + $0x138] sm:$0xff] }
 0x25b   : > { %v1446_v21 = vpop.f32.mrf.mxu0 }
 0x25c   : > { %v1394_v33 = vpop.f32.mrf.mxu3  ;;  %v1495_v52 = vpop.f32.mrf.mxu1 }
 0x25d   : > { %v1395_v37 = vadd.f32 %v1394_v33, %v1345_v26  ;;  %v1496_v39 = vadd.f32 %v1495_v52, %v1446_v21  ;;  %v1613_v26 = vld [vmem:[#allocation2] sm:$0xff]  ;;  %v1823_v21 = vld [vmem:[%s12825_s1 + $0x290] sm:$0xff] }
 0x25e   : > { %2200 = vmatmul.bf16.gmra.mxu2 %v9716_v34  ;;  %2298 = vmatmul.bf16.gmra.mxu0 %v9716_v34  ;;  %v1621_v33 = vld [vmem:[#allocation2 + $0x40] sm:$0xff] }
 0x25f   : > { %1597 = vst [vmem:[#allocation2 + $0x300] sm:$0xff] %v1395_v37  ;;  %2347 = vmatmul.bf16.gmra.mxu1 %v9721_v38  ;;  %v1816_v37 = vld [vmem:[%s12825_s1 + $0x258] sm:$0xff] }
 0x260   : > { %1605 = vst.msk [vmem:[#allocation2 + $0x340] sm:$0xff] %vm1506_vm0, %v1496_v39  ;;  %v2005_v39 = vpack.c.bf16 %v1823_v21, %v1816_v37  ;;  %v1787_v37 = vld [vmem:[%s12825_s1 + $0x170] sm:$0xff]  ;;  %v1794_v21 = vld [vmem:[%s12825_s1 + $0x1a8] sm:$0xff] }
 0x261   : > { %2249 = vmatmul.bf16.gmra.mxu3 %v9721_v38  ;;  %v1348_v40 = vpop.f32.mrf.mxu2 }
 0x262   : > { %2649 = vmatpush.bf16.msra.mxu0 %v2005_v39  ;;  %v1990_v39 = vpack.c.bf16 %v1794_v21, %v1787_v37  ;;  %v1774_v37 = vld [vmem:[%s12825_s1 + $0x108] sm:$0xff]  ;;  %v1781_v21 = vld [vmem:[%s12825_s1 + $0x140] sm:$0xff] }
 0x263   : > { %v1448_v45 = vpop.f32.mrf.mxu0 }
 0x264   : > { %v1397_v3 = vpop.f32.mrf.mxu3  ;;  %v1497_v47 = vpop.f32.mrf.mxu1 }
 0x265   : > { %v1398_v8 = vadd.f32 %v1397_v3, %v1348_v40  ;;  %v1498_v48 = vadd.f32 %v1497_v47, %v1448_v45  ;;  %v1935_v40 = vld [vmem:[%s12825_s1 + $0x610] sm:$0xff]  ;;  %v1620_v3 = vld [vmem:[#allocation2 + $0x38] sm:$0xff] }
 0x266   : > { %v2061_v42 = vpack.c.bf16 %v1935_v40, %v1928_v23  ;;  %v1628_v45 = vld [vmem:[#allocation2 + $0x78] sm:$0xff]  ;;  %2650 = vmatpush.bf16.msra.mxu0 %v1998_v55  ;;  %v1899_v23 = vld [vmem:[%s12825_s1 + $0x4f0] sm:$0xff]  ;;  %v1906_v40 = vld [vmem:[%s12825_s1 + $0x528] sm:$0xff]  ;;  %v1983_v55 = vpack.c.bf16 %v1780_v53, %v1773_v6 }
 0x267   : > { %1604 = vst [vmem:[#allocation2 + $0x338] sm:$0xff] %v1398_v8  ;;  %v1760_v6 = vld [vmem:[%s12825_s1 + $0x98] sm:$0xff]  ;;  %v1767_v53 = vld [vmem:[%s12825_s1 + $0xd0] sm:$0xff] }
 0x268   : > { %1612 = vst.msk [vmem:[#allocation2 + $0x378] sm:$0xff] %vm1506_vm0, %v1498_v48  ;;  %2698 = vmatpush.bf16.msra.mxu1 %v2061_v42  ;;  %v1801_v48 = vld [vmem:[%s12825_s1 + $0x1e0] sm:$0xff]  ;;  %v2046_v42 = vpack.c.bf16 %v1906_v40, %v1899_v23  ;;  %v1886_v23 = vld [vmem:[%s12825_s1 + $0x488] sm:$0xff] }
 0x269   : > { %v1350_v50 = vpop.f32.mrf.mxu2  ;;  %v1893_v40 = vld [vmem:[%s12825_s1 + $0x4c0] sm:$0xff] }
 0x26b   : > { %v2264_v5 = vpop.f32.mrf.mxu0 }
 0x26c   : > { %v1399_v62 = vpop.f32.mrf.mxu3  ;;  %v2313_v11 = vpop.f32.mrf.mxu1  ;;  %2699 = vmatpush.bf16.msra.mxu1 %v2054_v24  ;;  %v2039_v24 = vpack.c.bf16 %v1892_v17, %v1885_v15  ;;  %v1872_v15 = vld [vmem:[%s12825_s1 + $0x418] sm:$0xff]  ;;  %v1879_v17 = vld [vmem:[%s12825_s1 + $0x450] sm:$0xff] }
 0x26d   : > { %v1400_v22 = vadd.f32 %v1399_v62, %v1350_v50  ;;  %v2314_v12 = vadd.f32 %v2313_v11, %v2264_v5  ;;  %v1808_v50 = vld [vmem:[%s12825_s1 + $0x218] sm:$0xff]  ;;  %v1627_v5 = vld [vmem:[#allocation2 + $0x70] sm:$0xff] }
 0x26e   : > { %2361 = vmatmul.bf16.vlgmr.msrb.gmra.mxu2 %v9453_v51  ;;  %2459 = vmatmul.bf16.vlgmr.msrb.gmra.mxu0 %v9453_v51  ;;  %v1997_v60 = vpack.c.bf16 %v1808_v50, %v1801_v48  ;;  %v1920_v62 = vld [vmem:[%s12825_s1 + $0x598] sm:$0xff]  ;;  %v1795_v50 = vld [vmem:[%s12825_s1 + $0x1b0] sm:$0xff] }
 0x26f   : > { %1611 = vst [vmem:[#allocation2 + $0x370] sm:$0xff] %v1400_v22  ;;  %v2844_v13 = vadd.f32 %v2314_v12, %v1614_v63  ;;  %2508 = vmatmul.bf16.vlgmr.msrb.gmra.mxu1 %v9455_v58  ;;  %v2053_v22 = vpack.c.bf16 %v1920_v62, %v1913_v56  ;;  %v1635_v63 = vld [vmem:[#allocation2 + $0xb0] sm:$0xff]  ;;  %v1788_v48 = vld [vmem:[%s12825_s1 + $0x178] sm:$0xff] }
 0x270   : > { %2552 = vmatpush.bf16.msra.mxu2 %v1997_v60  ;;  %v1900_v56 = vld [vmem:[%s12825_s1 + $0x4f8] sm:$0xff]  ;;  %v1991_v60 = vpack.c.bf16 %v1795_v50, %v1788_v48  ;;  %v1907_v62 = vld [vmem:[%s12825_s1 + $0x530] sm:$0xff]  ;;  %v1766_v50 = vld [vmem:[%s12825_s1 + $0xc8] sm:$0xff] }
 0x271   : > { %2410 = vmatmul.bf16.vlgmr.msrb.gmra.mxu3 %v9455_v58  ;;  %2956 = vst [vmem:[#allocation2 + $0x8] sm:$0xff] %v2844_v13  ;;  %v2166_v14 = vpop.f32.mrf.mxu2  ;;  %v1759_v48 = vld [vmem:[%s12825_s1 + $0x90] sm:$0xff] }
 0x272   : > { %2601 = vmatpush.bf16.msra.mxu3 %v2053_v22  ;;  %v2047_v22 = vpack.c.bf16 %v1907_v62, %v1900_v56  ;;  %2651 = vmatpush.bf16.msra.mxu0 %v1991_v60  ;;  %v1871_v56 = vld [vmem:[%s12825_s1 + $0x410] sm:$0xff]  ;;  %v1976_v60 = vpack.c.bf16 %v1766_v50, %v1759_v48  ;;  %v1878_v62 = vld [vmem:[%s12825_s1 + $0x448] sm:$0xff]  ;;  %v1753_v50 = vld [vmem:[%s12825_s1 + $0x60] sm:$0xff] }
 0x273   : > { %v2266_v19 = vpop.f32.mrf.mxu0  ;;  %v1746_v48 = vld [vmem:[%s12825_s1 + $0x28] sm:$0xff] }
 0x274   : > { %v2215_v16 = vpop.f32.mrf.mxu3  ;;  %v2315_v28 = vpop.f32.mrf.mxu1  ;;  %2553 = vmatpush.bf16.msra.mxu2 %v1990_v39  ;;  %2700 = vmatpush.bf16.msra.mxu1 %v2047_v22  ;;  %v1984_v39 = vpack.c.bf16 %v1781_v21, %v1774_v37  ;;  %v2032_v22 = vpack.c.bf16 %v1878_v62, %v1871_v56  ;;  %v1745_v37 = vld [vmem:[%s12825_s1 + $0x20] sm:$0xff]  ;;  %v1752_v21 = vld [vmem:[%s12825_s1 + $0x58] sm:$0xff]  ;;  %v1858_v56 = vld [vmem:[%s12825_s1 + $0x3a8] sm:$0xff] }
 0x275   : > { %v2216_v18 = vadd.f32 %v2215_v16, %v2166_v14  ;;  %v2316_v32 = vadd.f32 %v2315_v28, %v2266_v19  ;;  %v1865_v62 = vld [vmem:[%s12825_s1 + $0x3e0] sm:$0xff] }
 0x276   : > { %2602 = vmatpush.bf16.msra.mxu3 %v2046_v42  ;;  %v2040_v42 = vpack.c.bf16 %v1893_v40, %v1886_v23  ;;  %2652 = vmatpush.bf16.msra.mxu0 %v1984_v39  ;;  %v1857_v23 = vld [vmem:[%s12825_s1 + $0x3a0] sm:$0xff]  ;;  %v1969_v39 = vpack.c.bf16 %v1752_v21, %v1745_v37  ;;  %v1864_v40 = vld [vmem:[%s12825_s1 + $0x3d8] sm:$0xff]  ;;  %v3293_v37 = vld [vmem:[%s12826_s2 + $0x310] sm:$0xff] }
 0x277   : > { %v2843_v31 = vadd.f32 %v2216_v18, %v1613_v26  ;;  %v2851_v35 = vadd.f32 %v2316_v32, %v1621_v33  ;;  %v1634_v26 = vld [vmem:[#allocation2 + $0xa8] sm:$0xff] }
 0x278   : > { %v1642_v33 = vld [vmem:[#allocation2 + $0xe8] sm:$0xff]  ;;  %2554 = vmatpush.bf16.msra.mxu2 %v1983_v55  ;;  %2701 = vmatpush.bf16.msra.mxu1 %v2040_v42  ;;  %v1977_v55 = vpack.c.bf16 %v1767_v53, %v1760_v6  ;;  %v2025_v42 = vpack.c.bf16 %v1864_v40, %v1857_v23  ;;  %v1845_v6 = vld [vmem:[%s12825_s1 + $0x340] sm:$0xff]  ;;  %v1852_v53 = vld [vmem:[%s12825_s1 + $0x378] sm:$0xff] }
 0x279   : > { %2955 = vst [vmem:[#allocation2] sm:$0xff] %v2843_v31  ;;  %v2168_v36 = vpop.f32.mrf.mxu2  ;;  %v3300_v21 = vld [vmem:[%s12826_s2 + $0x348] sm:$0xff]  ;;  %v3405_v23 = vld [vmem:[%s12826_s2 + $0x690] sm:$0xff] }
 0x27a   : > { %2963 = vst [vmem:[#allocation2 + $0x40] sm:$0xff] %v2851_v35  ;;  %2603 = vmatpush.bf16.msra.mxu3 %v2039_v24  ;;  %v2033_v24 = vpack.c.bf16 %v1879_v17, %v1872_v15  ;;  %2653 = vmatpush.bf16.msra.mxu0 %v1977_v55  ;;  %v1957_v15 = vld [vmem:[%s12825_s1 + $0x6c0] sm:$0xff]  ;;  %v2020_v55 = vpack.c.bf16 %v1852_v53, %v1845_v6  ;;  %v1964_v17 = vld [vmem:[%s12825_s1 + $0x6f8] sm:$0xff]  ;;  %v3412_v40 = vld [vmem:[%s12826_s2 + $0x6c8] sm:$0xff] }
 0x27b   : > { %v2269_v41 = vpop.f32.mrf.mxu0  ;;  %v3279_v6 = vld [vmem:[%s12826_s2 + $0x2a0] sm:$0xff]  ;;  %v3286_v53 = vld [vmem:[%s12826_s2 + $0x2d8] sm:$0xff] }
 0x27c   : > { %v2217_v52 = vpop.f32.mrf.mxu3  ;;  %v2318_v43 = vpop.f32.mrf.mxu1  ;;  %2555 = vmatpush.bf16.msra.mxu2 %v1976_v60  ;;  %2702 = vmatpush.bf16.msra.mxu1 %v2033_v24  ;;  %v1970_v60 = vpack.c.bf16 %v1753_v50, %v1746_v48  ;;  %v2076_v24 = vpack.c.bf16 %v1964_v17, %v1957_v15  ;;  %v1831_v48 = vld [vmem:[%s12825_s1 + $0x2d0] sm:$0xff]  ;;  %v1838_v50 = vld [vmem:[%s12825_s1 + $0x308] sm:$0xff]  ;;  %v3391_v15 = vld [vmem:[%s12826_s2 + $0x620] sm:$0xff] }
 0x27d   : > { %v2218_v54 = vadd.f32 %v2217_v52, %v2168_v36  ;;  %v2319_v8 = vadd.f32 %v2318_v43, %v2269_v41  ;;  %v3398_v17 = vld [vmem:[%s12826_s2 + $0x658] sm:$0xff] }
 0x27e   : > { %2366 = vmatmul.bf16.gmra.mxu2 %v9491_v27  ;;  %2464 = vmatmul.bf16.gmra.mxu0 %v9491_v27 }
 0x27f   : > { %v2850_v44 = vadd.f32 %v2218_v54, %v1620_v3  ;;  %v2858_v46 = vadd.f32 %v2319_v8, %v1628_v45  ;;  %2513 = vmatmul.bf16.gmra.mxu1 %v9493_v30  ;;  %v1641_v3 = vld [vmem:[#allocation2 + $0xe0] sm:$0xff]  ;;  %2604 = vmatpush.bf16.msra.mxu3 %v2032_v22  ;;  %v2026_v22 = vpack.c.bf16 %v1865_v62, %v1858_v56  ;;  %v1943_v56 = vld [vmem:[%s12825_s1 + $0x650] sm:$0xff]  ;;  %v1950_v62 = vld [vmem:[%s12825_s1 + $0x688] sm:$0xff] }
 0x280   : > { %v1649_v45 = vld [vmem:[#allocation2 + $0x120] sm:$0xff]  ;;  %2556 = vmatpush.bf16.msra.mxu2 %v1969_v39  ;;  %2654 = vmatpush.bf16.msra.mxu0 %v1970_v60  ;;  %v3468_v39 = vpack.c.bf16 %v3300_v21, %v3293_v37  ;;  %v2013_v60 = vpack.c.bf16 %v1838_v50, %v1831_v48  ;;  %v1824_v21 = vld [vmem:[%s12825_s1 + $0x298] sm:$0xff]  ;;  %v3265_v48 = vld [vmem:[%s12826_s2 + $0x230] sm:$0xff] }
 0x281   : > { %2962 = vst [vmem:[#allocation2 + $0x38] sm:$0xff] %v2850_v44  ;;  %2415 = vmatmul.bf16.gmra.mxu3 %v9493_v30  ;;  %v2171_v47 = vpop.f32.mrf.mxu2  ;;  %2703 = vmatpush.bf16.msra.mxu1 %v2026_v22  ;;  %v2069_v22 = vpack.c.bf16 %v1950_v62, %v1943_v56  ;;  %v1817_v37 = vld [vmem:[%s12825_s1 + $0x260] sm:$0xff]  ;;  %v3272_v50 = vld [vmem:[%s12826_s2 + $0x268] sm:$0xff]  ;;  %v3377_v56 = vld [vmem:[%s12826_s2 + $0x5b0] sm:$0xff] }
 0x282   : > { %2970 = vst [vmem:[#allocation2 + $0x78] sm:$0xff] %v2858_v46  ;;  %v3384_v62 = vld [vmem:[%s12826_s2 + $0x5e8] sm:$0xff] }
 0x283   : > { %v2271_v2 = vpop.f32.mrf.mxu0  ;;  %2605 = vmatpush.bf16.msra.mxu3 %v2025_v42  ;;  %v3524_v42 = vpack.c.bf16 %v3412_v40, %v3405_v23  ;;  %v1929_v23 = vld [vmem:[%s12825_s1 + $0x5e0] sm:$0xff]  ;;  %v1936_v40 = vld [vmem:[%s12825_s1 + $0x618] sm:$0xff] }
 0x284   : > { %v2220_v59 = vpop.f32.mrf.mxu3  ;;  %v2320_v10 = vpop.f32.mrf.mxu1  ;;  %2745 = vmatpush.bf16.msrb.mxu2 %v2020_v55  ;;  %3611 = vmatpush.bf16.msrb.mxu0 %v3468_v39  ;;  %v3461_v55 = vpack.c.bf16 %v3286_v53, %v3279_v6  ;;  %v2006_v39 = vpack.c.bf16 %v1824_v21, %v1817_v37  ;;  %v1803_v6 = vld [vmem:[%s12825_s1 + $0x1f0] sm:$0xff]  ;;  %v1810_v53 = vld [vmem:[%s12825_s1 + $0x228] sm:$0xff]  ;;  %v3251_v37 = vld [vmem:[%s12826_s2 + $0x1c0] sm:$0xff] }
 0x285   : > { %v2221_v20 = vadd.f32 %v2220_v59, %v2171_v47  ;;  %v2321_v12 = vadd.f32 %v2320_v10, %v2271_v2  ;;  %3660 = vmatpush.bf16.msrb.mxu1 %v3524_v42  ;;  %v2062_v42 = vpack.c.bf16 %v1936_v40, %v1929_v23  ;;  %v3258_v21 = vld [vmem:[%s12826_s2 + $0x1f8] sm:$0xff]  ;;  %v3363_v23 = vld [vmem:[%s12826_s2 + $0x540] sm:$0xff] }
 0x286   : > { %v3370_v40 = vld [vmem:[%s12826_s2 + $0x578] sm:$0xff] }
 0x287   : > { %v2857_v11 = vadd.f32 %v2221_v20, %v1627_v5  ;;  %v2865_v13 = vadd.f32 %v2321_v12, %v1635_v63  ;;  %v1648_v5 = vld [vmem:[#allocation2 + $0x118] sm:$0xff]  ;;  %2794 = vmatpush.bf16.msrb.mxu3 %v2076_v24  ;;  %v3517_v24 = vpack.c.bf16 %v3398_v17, %v3391_v15  ;;  %v1915_v15 = vld [vmem:[%s12825_s1 + $0x570] sm:$0xff]  ;;  %v1922_v17 = vld [vmem:[%s12825_s1 + $0x5a8] sm:$0xff] }
 0x288   : > { %v1656_v63 = vld [vmem:[#allocation2 + $0x158] sm:$0xff]  ;;  %2746 = vmatpush.bf16.msrb.mxu2 %v2013_v60  ;;  %3612 = vmatpush.bf16.msrb.mxu0 %v3461_v55  ;;  %v3454_v60 = vpack.c.bf16 %v3272_v50, %v3265_v48  ;;  %v1999_v55 = vpack.c.bf16 %v1810_v53, %v1803_v6  ;;  %v1789_v48 = vld [vmem:[%s12825_s1 + $0x180] sm:$0xff]  ;;  %v3237_v6 = vld [vmem:[%s12826_s2 + $0x150] sm:$0xff] }
 0x289   : > { %2969 = vst [vmem:[#allocation2 + $0x70] sm:$0xff] %v2857_v11  ;;  %v2173_v14 = vpop.f32.mrf.mxu2  ;;  %3661 = vmatpush.bf16.msrb.mxu1 %v3517_v24  ;;  %v2055_v24 = vpack.c.bf16 %v1922_v17, %v1915_v15  ;;  %v1796_v50 = vld [vmem:[%s12825_s1 + $0x1b8] sm:$0xff]  ;;  %v3244_v53 = vld [vmem:[%s12826_s2 + $0x188] sm:$0xff]  ;;  %v3349_v15 = vld [vmem:[%s12826_s2 + $0x4d0] sm:$0xff] }
 0x28a   : > { %2977 = vst [vmem:[#allocation2 + $0xb0] sm:$0xff] %v2865_v13  ;;  %v3356_v17 = vld [vmem:[%s12826_s2 + $0x508] sm:$0xff] }
 0x28b   : > { %v2274_v19 = vpop.f32.mrf.mxu0  ;;  %2795 = vmatpush.bf16.msrb.mxu3 %v2069_v22  ;;  %v3510_v22 = vpack.c.bf16 %v3384_v62, %v3377_v56  ;;  %v1901_v56 = vld [vmem:[%s12825_s1 + $0x500] sm:$0xff]  ;;  %v1908_v62 = vld [vmem:[%s12825_s1 + $0x538] sm:$0xff] }
 0x28c   : > { %v2222_v16 = vpop.f32.mrf.mxu3  ;;  %v2323_v28 = vpop.f32.mrf.mxu1  ;;  %2747 = vmatpush.bf16.msrb.mxu2 %v2006_v39  ;;  %3613 = vmatpush.bf16.msrb.mxu0 %v3454_v60  ;;  %v3447_v39 = vpack.c.bf16 %v3258_v21, %v3251_v37  ;;  %v1992_v60 = vpack.c.bf16 %v1796_v50, %v1789_v48  ;;  %v1775_v37 = vld [vmem:[%s12825_s1 + $0x110] sm:$0xff]  ;;  %v1782_v21 = vld [vmem:[%s12825_s1 + $0x148] sm:$0xff]  ;;  %v3223_v48 = vld [vmem:[%s12826_s2 + $0xe0] sm:$0xff] }
 0x28d   : > { %v2223_v18 = vadd.f32 %v2222_v16, %v2173_v14  ;;  %v2324_v32 = vadd.f32 %v2323_v28, %v2274_v19  ;;  %3662 = vmatpush.bf16.msrb.mxu1 %v3510_v22  ;;  %v2048_v22 = vpack.c.bf16 %v1908_v62, %v1901_v56  ;;  %v3230_v50 = vld [vmem:[%s12826_s2 + $0x118] sm:$0xff]  ;;  %v3335_v56 = vld [vmem:[%s12826_s2 + $0x460] sm:$0xff] }
 0x28e   : > { %2371 = vmatmul.bf16.gmra.mxu2 %v9529_v0  ;;  %2469 = vmatmul.bf16.gmra.mxu0 %v9529_v0  ;;  %v3342_v62 = vld [vmem:[%s12826_s2 + $0x498] sm:$0xff] }
 0x28f   : > { %v2864_v31 = vadd.f32 %v2223_v18, %v1634_v26  ;;  %v2872_v35 = vadd.f32 %v2324_v32, %v1642_v33  ;;  %2518 = vmatmul.bf16.gmra.mxu1 %v9531_v7  ;;  %v1655_v26 = vld [vmem:[#allocation2 + $0x150] sm:$0xff]  ;;  %2796 = vmatpush.bf16.msrb.mxu3 %v2062_v42  ;;  %v3503_v42 = vpack.c.bf16 %v3370_v40, %v3363_v23  ;;  %v1894_v40 = vld [vmem:[%s12825_s1 + $0x4c8] sm:$0xff] }
 0x290   : > { %v1663_v33 = vld [vmem:[#allocation2 + $0x190] sm:$0xff]  ;;  %2748 = vmatpush.bf16.msrb.mxu2 %v1999_v55  ;;  %3614 = vmatpush.bf16.msrb.mxu0 %v3447_v39  ;;  %v3440_v55 = vpack.c.bf16 %v3244_v53, %v3237_v6  ;;  %v1985_v39 = vpack.c.bf16 %v1782_v21, %v1775_v37  ;;  %v1761_v6 = vld [vmem:[%s12825_s1 + $0xa0] sm:$0xff]  ;;  %v1768_v53 = vld [vmem:[%s12825_s1 + $0xd8] sm:$0xff] }
 0x291   : > { %2976 = vst [vmem:[#allocation2 + $0xa8] sm:$0xff] %v2864_v31  ;;  %2420 = vmatmul.bf16.gmra.mxu3 %v9531_v7  ;;  %v2176_v36 = vpop.f32.mrf.mxu2  ;;  %3663 = vmatpush.bf16.msrb.mxu1 %v3503_v42  ;;  %v1887_v23 = vld [vmem:[%s12825_s1 + $0x490] sm:$0xff]  ;;  %v3216_v21 = vld [vmem:[%s12826_s2 + $0xa8] sm:$0xff] }
 0x292   : > { %2984 = vst [vmem:[#allocation2 + $0xe8] sm:$0xff] %v2872_v35  ;;  %v2041_v42 = vpack.c.bf16 %v1894_v40, %v1887_v23  ;;  %v3209_v37 = vld [vmem:[%s12826_s2 + $0x70] sm:$0xff]  ;;  %v3328_v40 = vld [vmem:[%s12826_s2 + $0x428] sm:$0xff] }
 0x293   : > { %v2276_v41 = vpop.f32.mrf.mxu0  ;;  %2797 = vmatpush.bf16.msrb.mxu3 %v2055_v24  ;;  %v3496_v24 = vpack.c.bf16 %v3356_v17, %v3349_v15  ;;  %v1873_v15 = vld [vmem:[%s12825_s1 + $0x420] sm:$0xff]  ;;  %v1880_v17 = vld [vmem:[%s12825_s1 + $0x458] sm:$0xff]  ;;  %v3321_v23 = vld [vmem:[%s12826_s2 + $0x3f0] sm:$0xff] }
 0x294   : > { %v2225_v52 = vpop.f32.mrf.mxu3  ;;  %v2325_v43 = vpop.f32.mrf.mxu1  ;;  %2749 = vmatpush.bf16.msrb.mxu2 %v1992_v60  ;;  %3615 = vmatpush.bf16.msrb.mxu0 %v3440_v55  ;;  %v3433_v60 = vpack.c.bf16 %v3230_v50, %v3223_v48  ;;  %v1978_v55 = vpack.c.bf16 %v1768_v53, %v1761_v6  ;;  %v1747_v48 = vld [vmem:[%s12825_s1 + $0x30] sm:$0xff]  ;;  %v1754_v50 = vld [vmem:[%s12825_s1 + $0x68] sm:$0xff]  ;;  %v3195_v6 = vld [vmem:[%s12826_s2] sm:$0xff] }
 0x295   : > { %v2226_v54 = vadd.f32 %v2225_v52, %v2176_v36  ;;  %v2326_v8 = vadd.f32 %v2325_v43, %v2276_v41  ;;  %3664 = vmatpush.bf16.msrb.mxu1 %v3496_v24  ;;  %v2034_v24 = vpack.c.bf16 %v1880_v17, %v1873_v15  ;;  %v3202_v53 = vld [vmem:[%s12826_s2 + $0x38] sm:$0xff]  ;;  %v3307_v15 = vld [vmem:[%s12826_s2 + $0x380] sm:$0xff] }
 0x296   : > { %v3314_v17 = vld [vmem:[%s12826_s2 + $0x3b8] sm:$0xff] }
 0x297   : > { %v2871_v44 = vadd.f32 %v2226_v54, %v1641_v3  ;;  %v2879_v46 = vadd.f32 %v2326_v8, %v1649_v45  ;;  %v1662_v3 = vld [vmem:[#allocation2 + $0x188] sm:$0xff]  ;;  %2798 = vmatpush.bf16.msrb.mxu3 %v2048_v22  ;;  %v3489_v22 = vpack.c.bf16 %v3342_v62, %v3335_v56  ;;  %v1859_v56 = vld [vmem:[%s12825_s1 + $0x3b0] sm:$0xff] }
 0x298   : > { %v1670_v45 = vld [vmem:[#allocation2 + $0x1c8] sm:$0xff]  ;;  %2750 = vmatpush.bf16.msrb.mxu2 %v1985_v39  ;;  %3616 = vmatpush.bf16.msrb.mxu0 %v3433_v60  ;;  %v3426_v39 = vpack.c.bf16 %v3216_v21, %v3209_v37  ;;  %v1971_v60 = vpack.c.bf16 %v1754_v50, %v1747_v48  ;;  %v3294_v37 = vld [vmem:[%s12826_s2 + $0x318] sm:$0xff]  ;;  %v3301_v21 = vld [vmem:[%s12826_s2 + $0x350] sm:$0xff] }
 0x299   : > { %2983 = vst [vmem:[#allocation2 + $0xe0] sm:$0xff] %v2871_v44  ;;  %v2178_v47 = vpop.f32.mrf.mxu2  ;;  %3665 = vmatpush.bf16.msrb.mxu1 %v3489_v22  ;;  %v1866_v62 = vld [vmem:[%s12825_s1 + $0x3e8] sm:$0xff]  ;;  %v3295_v48 = vld [vmem:[%s12826_s2 + $0x320] sm:$0xff]  ;;  %v3302_v50 = vld [vmem:[%s12826_s2 + $0x358] sm:$0xff] }
 0x29a   : > { %2991 = vst [vmem:[#allocation2 + $0x120] sm:$0xff] %v2879_v46  ;;  %v2027_v22 = vpack.c.bf16 %v1866_v62, %v1859_v56  ;;  %v3407_v56 = vld [vmem:[%s12826_s2 + $0x6a0] sm:$0xff]  ;;  %v3414_v62 = vld [vmem:[%s12826_s2 + $0x6d8] sm:$0xff] }
 0x29b   : > { %v2279_v2 = vpop.f32.mrf.mxu0  ;;  %2799 = vmatpush.bf16.msrb.mxu3 %v2041_v42  ;;  %v3482_v42 = vpack.c.bf16 %v3328_v40, %v3321_v23  ;;  %v3406_v23 = vld [vmem:[%s12826_s2 + $0x698] sm:$0xff]  ;;  %v3413_v40 = vld [vmem:[%s12826_s2 + $0x6d0] sm:$0xff] }
 0x29c   : > { %v2227_v59 = vpop.f32.mrf.mxu3  ;;  %v2328_v10 = vpop.f32.mrf.mxu1  ;;  %2751 = vmatpush.bf16.msrb.mxu2 %v1978_v55  ;;  %3617 = vmatpush.bf16.msrb.mxu0 %v3426_v39  ;;  %v3419_v55 = vpack.c.bf16 %v3202_v53, %v3195_v6  ;;  %v3469_v39 = vpack.c.bf16 %v3301_v21, %v3294_v37  ;;  %v3280_v6 = vld [vmem:[%s12826_s2 + $0x2a8] sm:$0xff]  ;;  %v3287_v53 = vld [vmem:[%s12826_s2 + $0x2e0] sm:$0xff]  ;;  %v8184_v37 = vld [vmem:[%s8443_s20 + $0x34] sm:$0xf0] }
 0x29d   : > { %v2228_v20 = vadd.f32 %v2227_v59, %v2178_v47  ;;  %v2329_v12 = vadd.f32 %v2328_v10, %v2279_v2  ;;  %3666 = vmatpush.bf16.msrb.mxu1 %v3482_v42  ;;  %v3525_v42 = vpack.c.bf16 %v3413_v40, %v3406_v23  ;;  %v8183_v21 = vld [vmem:[%s8443_s20 + $0x14] sm:$0xf]  ;;  %v7961_v23 = vld [vmem:[%s8443_s20 + $0x38] sm:$0xf0]  ;;  %v3288_v40 = vld [vmem:[%s12826_s2 + $0x2e8] sm:$0xff] }
 0x29e   : > { %2376 = vmatmul.bf16.gmra.mxu2 %v9567_v25  ;;  %2474 = vmatmul.bf16.gmra.mxu0 %v9567_v25 }
 0x29f   : > { %v2878_v11 = vadd.f32 %v2228_v20, %v1648_v5  ;;  %v2886_v13 = vadd.f32 %v2329_v12, %v1656_v63  ;;  %2523 = vmatmul.bf16.gmra.mxu1 %v9569_v29  ;;  %v1669_v5 = vld [vmem:[#allocation2 + $0x1c0] sm:$0xff]  ;;  %2800 = vmatpush.bf16.msrb.mxu3 %v2034_v24  ;;  %v3475_v24 = vpack.c.bf16 %v3314_v17, %v3307_v15  ;;  %v3392_v15 = vld [vmem:[%s12826_s2 + $0x628] sm:$0xff] }
 0x2a0   : > { %v1677_v63 = vld [vmem:[#allocation2 + $0x200] sm:$0xff]  ;;  %2752 = vmatpush.bf16.msrb.mxu2 %v1971_v60  ;;  %3618 = vmatpush.bf16.msrb.mxu0 %v3419_v55  ;;  %v3470_v60 = vpack.c.bf16 %v3302_v50, %v3295_v48  ;;  %v3462_v55 = vpack.c.bf16 %v3287_v53, %v3280_v6 }
 0x2a1   : > { %2990 = vst [vmem:[#allocation2 + $0x118] sm:$0xff] %v2878_v11  ;;  %2425 = vmatmul.bf16.gmra.mxu3 %v9569_v29  ;;  %v2181_v14 = vpop.f32.mrf.mxu2  ;;  %3667 = vmatpush.bf16.msrb.mxu1 %v3475_v24  ;;  %v3399_v17 = vld [vmem:[%s12826_s2 + $0x660] sm:$0xff] }
 0x2a2   : > { %2998 = vst [vmem:[#allocation2 + $0x158] sm:$0xff] %v2886_v13  ;;  %v3518_v24 = vpack.c.bf16 %v3399_v17, %v3392_v15  ;;  %v1625_v53 = vld [vmem:[#allocation2 + $0x60] sm:$0xff] }
 0x2a3   : > { %v2281_v19 = vpop.f32.mrf.mxu0  ;;  %2801 = vmatpush.bf16.msrb.mxu3 %v2027_v22  ;;  %v3526_v22 = vpack.c.bf16 %v3414_v62, %v3407_v56  ;;  %v8185_v17 = vld [vmem:[%s8443_s20 + $0x64] sm:$0xf] }
 0x2a4   : > { %v2230_v16 = vpop.f32.mrf.mxu3  ;;  %v2330_v28 = vpop.f32.mrf.mxu1 }
 0x2a5   : > { %v2231_v18 = vadd.f32 %v2230_v16, %v2181_v14  ;;  %v2331_v32 = vadd.f32 %v2330_v28, %v2281_v19 }
 0x2a7   : > { %v2885_v31 = vadd.f32 %v2231_v18, %v1655_v26  ;;  %v2893_v35 = vadd.f32 %v2331_v32, %v1663_v33  ;;  %v1676_v26 = vld [vmem:[#allocation2 + $0x1f8] sm:$0xff] }
 0x2a8   : > { %v1684_v33 = vld [vmem:[#allocation2 + $0x238] sm:$0xff] }
 0x2a9   : > { %2997 = vst [vmem:[#allocation2 + $0x150] sm:$0xff] %v2885_v31  ;;  %v2183_v36 = vpop.f32.mrf.mxu2 }
 0x2aa   : > { %3005 = vst [vmem:[#allocation2 + $0x190] sm:$0xff] %v2893_v35 }
 0x2ab   : > { %v2284_v41 = vpop.f32.mrf.mxu0 }
 0x2ac   : > { %v2232_v52 = vpop.f32.mrf.mxu3  ;;  %v2333_v43 = vpop.f32.mrf.mxu1 }
 0x2ad   : > { %v2233_v54 = vadd.f32 %v2232_v52, %v2183_v36  ;;  %v2334_v8 = vadd.f32 %v2333_v43, %v2284_v41 }
 0x2ae   : > { %2381 = vmatmul.bf16.gmra.mxu2 %v9605_v49  ;;  %2479 = vmatmul.bf16.gmra.mxu0 %v9605_v49 }
 0x2af   : > { %v2892_v44 = vadd.f32 %v2233_v54, %v1662_v3  ;;  %v2900_v46 = vadd.f32 %v2334_v8, %v1670_v45  ;;  %2528 = vmatmul.bf16.gmra.mxu1 %v9607_v57  ;;  %v1683_v3 = vld [vmem:[#allocation2 + $0x230] sm:$0xff] }
 0x2b0   : > { %v1691_v45 = vld [vmem:[#allocation2 + $0x270] sm:$0xff] }
 0x2b1   : > { %3004 = vst [vmem:[#allocation2 + $0x188] sm:$0xff] %v2892_v44  ;;  %2430 = vmatmul.bf16.gmra.mxu3 %v9607_v57  ;;  %v2186_v47 = vpop.f32.mrf.mxu2 }
 0x2b2   : > { %3012 = vst [vmem:[#allocation2 + $0x1c8] sm:$0xff] %v2900_v46 }
 0x2b3   : > { %v2286_v2 = vpop.f32.mrf.mxu0 }
 0x2b4   : > { %v2235_v59 = vpop.f32.mrf.mxu3  ;;  %v2335_v10 = vpop.f32.mrf.mxu1 }
 0x2b5   : > { %v2236_v20 = vadd.f32 %v2235_v59, %v2186_v47  ;;  %v2336_v12 = vadd.f32 %v2335_v10, %v2286_v2 }
 0x2b7   : > { %v2899_v11 = vadd.f32 %v2236_v20, %v1669_v5  ;;  %v2907_v13 = vadd.f32 %v2336_v12, %v1677_v63  ;;  %v1690_v5 = vld [vmem:[#allocation2 + $0x268] sm:$0xff] }
 0x2b8   : > { %v1698_v63 = vld [vmem:[#allocation2 + $0x2a8] sm:$0xff] }
 0x2b9   : > { %3011 = vst [vmem:[#allocation2 + $0x1c0] sm:$0xff] %v2899_v11  ;;  %v2188_v14 = vpop.f32.mrf.mxu2 }
 0x2ba   : > { %3019 = vst [vmem:[#allocation2 + $0x200] sm:$0xff] %v2907_v13 }
 0x2bb   : > { %v2289_v19 = vpop.f32.mrf.mxu0 }
 0x2bc   : > { %v2237_v16 = vpop.f32.mrf.mxu3  ;;  %v2338_v28 = vpop.f32.mrf.mxu1 }
 0x2bd   : > { %v2238_v18 = vadd.f32 %v2237_v16, %v2188_v14  ;;  %v2339_v32 = vadd.f32 %v2338_v28, %v2289_v19 }
 0x2be   : > { %2386 = vmatmul.bf16.gmra.mxu2 %v9643_v4  ;;  %2484 = vmatmul.bf16.gmra.mxu0 %v9643_v4 }
 0x2bf   : > { %v2906_v31 = vadd.f32 %v2238_v18, %v1676_v26  ;;  %v2914_v35 = vadd.f32 %v2339_v32, %v1684_v33  ;;  %2533 = vmatmul.bf16.gmra.mxu1 %v9645_v9  ;;  %v1697_v26 = vld [vmem:[#allocation2 + $0x2a0] sm:$0xff] }
 0x2c0   : > { %v1705_v33 = vld [vmem:[#allocation2 + $0x2e0] sm:$0xff] }
 0x2c1   : > { %3018 = vst [vmem:[#allocation2 + $0x1f8] sm:$0xff] %v2906_v31  ;;  %2435 = vmatmul.bf16.gmra.mxu3 %v9645_v9  ;;  %v2191_v36 = vpop.f32.mrf.mxu2 }
 0x2c2   : > { %3026 = vst [vmem:[#allocation2 + $0x238] sm:$0xff] %v2914_v35 }
 0x2c3   : > { %v2291_v41 = vpop.f32.mrf.mxu0 }
 0x2c4   : > { %v2240_v52 = vpop.f32.mrf.mxu3  ;;  %v2340_v43 = vpop.f32.mrf.mxu1 }
 0x2c5   : > { %v2241_v54 = vadd.f32 %v2240_v52, %v2191_v36  ;;  %v2341_v8 = vadd.f32 %v2340_v43, %v2291_v41 }
 0x2c7   : > { %v2913_v44 = vadd.f32 %v2241_v54, %v1683_v3  ;;  %v2921_v46 = vadd.f32 %v2341_v8, %v1691_v45  ;;  %v1704_v3 = vld [vmem:[#allocation2 + $0x2d8] sm:$0xff] }
 0x2c8   : > { %v1712_v45 = vld [vmem:[#allocation2 + $0x318] sm:$0xff] }
 0x2c9   : > { %3025 = vst [vmem:[#allocation2 + $0x230] sm:$0xff] %v2913_v44  ;;  %v2193_v47 = vpop.f32.mrf.mxu2 }
 0x2ca   : > { %3033 = vst [vmem:[#allocation2 + $0x270] sm:$0xff] %v2921_v46 }
 0x2cb   : > { %v2294_v2 = vpop.f32.mrf.mxu0 }
 0x2cc   : > { %v2242_v59 = vpop.f32.mrf.mxu3  ;;  %v2343_v10 = vpop.f32.mrf.mxu1 }
 0x2cd   : > { %v2243_v20 = vadd.f32 %v2242_v59, %v2193_v47  ;;  %v2344_v12 = vadd.f32 %v2343_v10, %v2294_v2 }
 0x2ce   : > { %2391 = vmatmul.bf16.gmra.mxu2 %v9681_v61  ;;  %2489 = vmatmul.bf16.gmra.mxu0 %v9681_v61 }
 0x2cf   : > { %v2920_v11 = vadd.f32 %v2243_v20, %v1690_v5  ;;  %v2928_v13 = vadd.f32 %v2344_v12, %v1698_v63  ;;  %2538 = vmatmul.bf16.gmra.mxu1 %v9683_v1  ;;  %v1711_v5 = vld [vmem:[#allocation2 + $0x310] sm:$0xff] }
 0x2d0   : > { %v1719_v63 = vld [vmem:[#allocation2 + $0x350] sm:$0xff] }
 0x2d1   : > { %3032 = vst [vmem:[#allocation2 + $0x268] sm:$0xff] %v2920_v11  ;;  %2440 = vmatmul.bf16.gmra.mxu3 %v9683_v1  ;;  %v2196_v14 = vpop.f32.mrf.mxu2 }
 0x2d2   : > { %3040 = vst [vmem:[#allocation2 + $0x2a8] sm:$0xff] %v2928_v13 }
 0x2d3   : > { %v2296_v19 = vpop.f32.mrf.mxu0 }
 0x2d4   : > { %v2245_v16 = vpop.f32.mrf.mxu3  ;;  %v2345_v28 = vpop.f32.mrf.mxu1 }
 0x2d5   : > { %v2246_v18 = vadd.f32 %v2245_v16, %v2196_v14  ;;  %v2346_v32 = vadd.f32 %v2345_v28, %v2296_v19 }
 0x2d7   : > { %v2927_v31 = vadd.f32 %v2246_v18, %v1697_v26  ;;  %v2935_v35 = vadd.f32 %v2346_v32, %v1705_v33  ;;  %v1718_v26 = vld [vmem:[#allocation2 + $0x348] sm:$0xff]  ;;  %v1616_v33 = vld [vmem:[#allocation2 + $0x18] sm:$0xff] }
 0x2d9   : > { %3039 = vst [vmem:[#allocation2 + $0x2a0] sm:$0xff] %v2927_v31  ;;  %v2198_v36 = vpop.f32.mrf.mxu2 }
 0x2da   : > { %3047 = vst [vmem:[#allocation2 + $0x2e0] sm:$0xff] %v2935_v35 }
 0x2db   : > { %v2299_v41 = vpop.f32.mrf.mxu0 }
 0x2dc   : > { %v2247_v52 = vpop.f32.mrf.mxu3  ;;  %v2348_v43 = vpop.f32.mrf.mxu1 }
 0x2dd   : > { %v2248_v54 = vadd.f32 %v2247_v52, %v2198_v36  ;;  %v2349_v8 = vadd.f32 %v2348_v43, %v2299_v41 }
 0x2de   : > { %2396 = vmatmul.bf16.gmra.mxu2 %v9716_v34  ;;  %2494 = vmatmul.bf16.gmra.mxu0 %v9716_v34 }
 0x2df   : > { %v2934_v44 = vadd.f32 %v2248_v54, %v1704_v3  ;;  %v2942_v46 = vadd.f32 %v2349_v8, %v1712_v45  ;;  %2543 = vmatmul.bf16.gmra.mxu1 %v9721_v38  ;;  %v1615_v3 = vld [vmem:[#allocation2 + $0x10] sm:$0xff] }
 0x2e0   : > { %v1623_v45 = vld [vmem:[#allocation2 + $0x50] sm:$0xff] }
 0x2e1   : > { %3046 = vst [vmem:[#allocation2 + $0x2d8] sm:$0xff] %v2934_v44  ;;  %2445 = vmatmul.bf16.gmra.mxu3 %v9721_v38  ;;  %v2201_v47 = vpop.f32.mrf.mxu2 }
 0x2e2   : > { %3054 = vst [vmem:[#allocation2 + $0x318] sm:$0xff] %v2942_v46 }
 0x2e3   : > { %v2301_v2 = vpop.f32.mrf.mxu0 }
 0x2e4   : > { %v2250_v59 = vpop.f32.mrf.mxu3  ;;  %v2350_v10 = vpop.f32.mrf.mxu1 }
 0x2e5   : > { %v2251_v20 = vadd.f32 %v2250_v59, %v2201_v47  ;;  %v2351_v12 = vadd.f32 %v2350_v10, %v2301_v2 }
 0x2e7   : > { %v2941_v11 = vadd.f32 %v2251_v20, %v1711_v5  ;;  %v2949_v13 = vadd.f32 %v2351_v12, %v1719_v63  ;;  %v1622_v5 = vld [vmem:[#allocation2 + $0x48] sm:$0xff] }
 0x2e8   : > { %v1630_v63 = vld [vmem:[#allocation2 + $0x88] sm:$0xff] }
 0x2e9   : > { %3053 = vst [vmem:[#allocation2 + $0x310] sm:$0xff] %v2941_v11  ;;  %v2203_v14 = vpop.f32.mrf.mxu2 }
 0x2ea   : > { %3061 = vst [vmem:[#allocation2 + $0x350] sm:$0xff] %v2949_v13 }
 0x2eb   : > { %v2460_v19 = vpop.f32.mrf.mxu0 }
 0x2ec   : > { %v2252_v16 = vpop.f32.mrf.mxu3  ;;  %v2509_v28 = vpop.f32.mrf.mxu1 }
 0x2ed   : > { %v2253_v18 = vadd.f32 %v2252_v16, %v2203_v14  ;;  %v2510_v32 = vadd.f32 %v2509_v28, %v2460_v19 }
 0x2ee   : > { %2557 = vmatmul.bf16.vlgmr.msra.gmra.mxu2 %v9453_v51  ;;  %2655 = vmatmul.bf16.vlgmr.msra.gmra.mxu0 %v9453_v51 }
 0x2ef   : > { %v2948_v31 = vadd.f32 %v2253_v18, %v1718_v26  ;;  %v2846_v35 = vadd.f32 %v2510_v32, %v1616_v33  ;;  %2704 = vmatmul.bf16.vlgmr.msra.gmra.mxu1 %v9455_v58  ;;  %v1629_v26 = vld [vmem:[#allocation2 + $0x80] sm:$0xff]  ;;  %3709 = vmatpush.bf16.msra.mxu2 %v3469_v39  ;;  %v3281_v39 = vld [vmem:[%s12826_s2 + $0x2b0] sm:$0xff] }
 0x2f0   : > { %v1637_v33 = vld [vmem:[#allocation2 + $0xc0] sm:$0xff]  ;;  %3807 = vmatpush.bf16.msra.mxu0 %v3470_v60  ;;  %3856 = vmatpush.bf16.msra.mxu1 %v3526_v22 }
 0x2f1   : > { %3060 = vst [vmem:[#allocation2 + $0x348] sm:$0xff] %v2948_v31  ;;  %2606 = vmatmul.bf16.vlgmr.msra.gmra.mxu3 %v9455_v58  ;;  %v2362_v36 = vpop.f32.mrf.mxu2 }
 0x2f2   : > { %2958 = vst [vmem:[#allocation2 + $0x18] sm:$0xff] %v2846_v35  ;;  %3758 = vmatpush.bf16.msra.mxu3 %v3525_v42 }
 0x2f3   : > { %v2462_v41 = vpop.f32.mrf.mxu0  ;;  %3710 = vmatpush.bf16.msra.mxu2 %v3462_v55  ;;  %v8186_v55 = vld [vmem:[%s8443_s20 + $0x84] sm:$0xf0] }
 0x2f4   : > { %v2411_v52 = vpop.f32.mrf.mxu3  ;;  %v2511_v43 = vpop.f32.mrf.mxu1 }
 0x2f5   : > { %v2412_v54 = vadd.f32 %v2411_v52, %v2362_v36  ;;  %v2512_v8 = vadd.f32 %v2511_v43, %v2462_v41 }
 0x2f6   : > { %3759 = vmatpush.bf16.msra.mxu3 %v3518_v24  ;;  %v3267_v24 = vld [vmem:[%s12826_s2 + $0x240] sm:$0xff] }
 0x2f7   : > { %v2845_v44 = vadd.f32 %v2412_v54, %v1615_v3  ;;  %v2853_v46 = vadd.f32 %v2512_v8, %v1623_v45  ;;  %v1636_v3 = vld [vmem:[#allocation2 + $0xb8] sm:$0xff] }
 0x2f8   : > { %v1644_v45 = vld [vmem:[#allocation2 + $0xf8] sm:$0xff] }
 0x2f9   : > { %2957 = vst [vmem:[#allocation2 + $0x10] sm:$0xff] %v2845_v44  ;;  %v2364_v47 = vpop.f32.mrf.mxu2 }
 0x2fa   : > { %2965 = vst [vmem:[#allocation2 + $0x50] sm:$0xff] %v2853_v46 }
 0x2fb   : > { %v2465_v2 = vpop.f32.mrf.mxu0 }
 0x2fc   : > { %v2413_v59 = vpop.f32.mrf.mxu3  ;;  %v2514_v10 = vpop.f32.mrf.mxu1 }
 0x2fd   : > { %v2414_v20 = vadd.f32 %v2413_v59, %v2364_v47  ;;  %v2515_v12 = vadd.f32 %v2514_v10, %v2465_v2 }
 0x2fe   : > { %2562 = vmatmul.bf16.gmra.mxu2 %v9491_v27  ;;  %2660 = vmatmul.bf16.gmra.mxu0 %v9491_v27 }
 0x2ff   : > { %v2852_v11 = vadd.f32 %v2414_v20, %v1622_v5  ;;  %v2860_v13 = vadd.f32 %v2515_v12, %v1630_v63  ;;  %2709 = vmatmul.bf16.gmra.mxu1 %v9493_v30  ;;  %v1643_v5 = vld [vmem:[#allocation2 + $0xf0] sm:$0xff] }
 0x300   : > { %v1651_v63 = vld [vmem:[#allocation2 + $0x130] sm:$0xff] }
 0x301   : > { %2964 = vst [vmem:[#allocation2 + $0x48] sm:$0xff] %v2852_v11  ;;  %2611 = vmatmul.bf16.gmra.mxu3 %v9493_v30  ;;  %v2367_v14 = vpop.f32.mrf.mxu2 }
 0x302   : > { %2972 = vst [vmem:[#allocation2 + $0x88] sm:$0xff] %v2860_v13 }
 0x303   : > { %v2467_v19 = vpop.f32.mrf.mxu0 }
 0x304   : > { %v2416_v16 = vpop.f32.mrf.mxu3  ;;  %v2516_v28 = vpop.f32.mrf.mxu1 }
 0x305   : > { %v2417_v18 = vadd.f32 %v2416_v16, %v2367_v14  ;;  %v2517_v32 = vadd.f32 %v2516_v28, %v2467_v19 }
 0x307   : > { %v2859_v31 = vadd.f32 %v2417_v18, %v1629_v26  ;;  %v2867_v35 = vadd.f32 %v2517_v32, %v1637_v33  ;;  %v1650_v26 = vld [vmem:[#allocation2 + $0x128] sm:$0xff] }
 0x308   : > { %v1658_v33 = vld [vmem:[#allocation2 + $0x168] sm:$0xff] }
 0x309   : > { %2971 = vst [vmem:[#allocation2 + $0x80] sm:$0xff] %v2859_v31  ;;  %v2369_v36 = vpop.f32.mrf.mxu2 }
 0x30a   : > { %2979 = vst [vmem:[#allocation2 + $0xc0] sm:$0xff] %v2867_v35 }
 0x30b   : > { %v2470_v41 = vpop.f32.mrf.mxu0 }
 0x30c   : > { %v2418_v52 = vpop.f32.mrf.mxu3  ;;  %v2519_v43 = vpop.f32.mrf.mxu1 }
 0x30d   : > { %v2419_v54 = vadd.f32 %v2418_v52, %v2369_v36  ;;  %v2520_v8 = vadd.f32 %v2519_v43, %v2470_v41 }
 0x30e   : > { %2567 = vmatmul.bf16.gmra.mxu2 %v9529_v0  ;;  %2665 = vmatmul.bf16.gmra.mxu0 %v9529_v0 }
 0x30f   : > { %v2866_v44 = vadd.f32 %v2419_v54, %v1636_v3  ;;  %v2874_v46 = vadd.f32 %v2520_v8, %v1644_v45  ;;  %2714 = vmatmul.bf16.gmra.mxu1 %v9531_v7  ;;  %v1657_v3 = vld [vmem:[#allocation2 + $0x160] sm:$0xff] }
 0x310   : > { %v1665_v45 = vld [vmem:[#allocation2 + $0x1a0] sm:$0xff] }
 0x311   : > { %2978 = vst [vmem:[#allocation2 + $0xb8] sm:$0xff] %v2866_v44  ;;  %2616 = vmatmul.bf16.gmra.mxu3 %v9531_v7  ;;  %v2372_v47 = vpop.f32.mrf.mxu2 }
 0x312   : > { %2986 = vst [vmem:[#allocation2 + $0xf8] sm:$0xff] %v2874_v46 }
 0x313   : > { %v2472_v2 = vpop.f32.mrf.mxu0 }
 0x314   : > { %v2421_v59 = vpop.f32.mrf.mxu3  ;;  %v2521_v10 = vpop.f32.mrf.mxu1 }
 0x315   : > { %v2422_v20 = vadd.f32 %v2421_v59, %v2372_v47  ;;  %v2522_v12 = vadd.f32 %v2521_v10, %v2472_v2 }
 0x317   : > { %v2873_v11 = vadd.f32 %v2422_v20, %v1643_v5  ;;  %v2881_v13 = vadd.f32 %v2522_v12, %v1651_v63  ;;  %v1664_v5 = vld [vmem:[#allocation2 + $0x198] sm:$0xff] }
 0x318   : > { %v1672_v63 = vld [vmem:[#allocation2 + $0x1d8] sm:$0xff] }
 0x319   : > { %2985 = vst [vmem:[#allocation2 + $0xf0] sm:$0xff] %v2873_v11  ;;  %v2374_v14 = vpop.f32.mrf.mxu2 }
 0x31a   : > { %2993 = vst [vmem:[#allocation2 + $0x130] sm:$0xff] %v2881_v13 }
 0x31b   : > { %v2475_v19 = vpop.f32.mrf.mxu0 }
 0x31c   : > { %v2423_v16 = vpop.f32.mrf.mxu3  ;;  %v2524_v28 = vpop.f32.mrf.mxu1 }
 0x31d   : > { %v2424_v18 = vadd.f32 %v2423_v16, %v2374_v14  ;;  %v2525_v32 = vadd.f32 %v2524_v28, %v2475_v19 }
 0x31e   : > { %2572 = vmatmul.bf16.gmra.mxu2 %v9567_v25  ;;  %2670 = vmatmul.bf16.gmra.mxu0 %v9567_v25 }
 0x31f   : > { %v2880_v31 = vadd.f32 %v2424_v18, %v1650_v26  ;;  %v2888_v35 = vadd.f32 %v2525_v32, %v1658_v33  ;;  %2719 = vmatmul.bf16.gmra.mxu1 %v9569_v29  ;;  %v1671_v26 = vld [vmem:[#allocation2 + $0x1d0] sm:$0xff] }
 0x320   : > { %v1679_v33 = vld [vmem:[#allocation2 + $0x210] sm:$0xff] }
 0x321   : > { %2992 = vst [vmem:[#allocation2 + $0x128] sm:$0xff] %v2880_v31  ;;  %2621 = vmatmul.bf16.gmra.mxu3 %v9569_v29  ;;  %v2377_v36 = vpop.f32.mrf.mxu2 }
 0x322   : > { %3000 = vst [vmem:[#allocation2 + $0x168] sm:$0xff] %v2888_v35 }
 0x323   : > { %v2477_v41 = vpop.f32.mrf.mxu0 }
 0x324   : > { %v2426_v52 = vpop.f32.mrf.mxu3  ;;  %v2526_v43 = vpop.f32.mrf.mxu1 }
 0x325   : > { %v2427_v54 = vadd.f32 %v2426_v52, %v2377_v36  ;;  %v2527_v8 = vadd.f32 %v2526_v43, %v2477_v41 }
 0x327   : > { %v2887_v44 = vadd.f32 %v2427_v54, %v1657_v3  ;;  %v2895_v46 = vadd.f32 %v2527_v8, %v1665_v45  ;;  %v1678_v3 = vld [vmem:[#allocation2 + $0x208] sm:$0xff] }
 0x328   : > { %v1686_v45 = vld [vmem:[#allocation2 + $0x248] sm:$0xff] }
 0x329   : > { %2999 = vst [vmem:[#allocation2 + $0x160] sm:$0xff] %v2887_v44  ;;  %v2379_v47 = vpop.f32.mrf.mxu2 }
 0x32a   : > { %3007 = vst [vmem:[#allocation2 + $0x1a0] sm:$0xff] %v2895_v46 }
 0x32b   : > { %v2480_v2 = vpop.f32.mrf.mxu0 }
 0x32c   : > { %v2428_v59 = vpop.f32.mrf.mxu3  ;;  %v2529_v10 = vpop.f32.mrf.mxu1 }
 0x32d   : > { %v2429_v20 = vadd.f32 %v2428_v59, %v2379_v47  ;;  %v2530_v12 = vadd.f32 %v2529_v10, %v2480_v2 }
 0x32e   : > { %2577 = vmatmul.bf16.gmra.mxu2 %v9605_v49  ;;  %2675 = vmatmul.bf16.gmra.mxu0 %v9605_v49 }
 0x32f   : > { %v2894_v11 = vadd.f32 %v2429_v20, %v1664_v5  ;;  %v2902_v13 = vadd.f32 %v2530_v12, %v1672_v63  ;;  %2724 = vmatmul.bf16.gmra.mxu1 %v9607_v57  ;;  %v1685_v5 = vld [vmem:[#allocation2 + $0x240] sm:$0xff] }
 0x330   : > { %v1693_v63 = vld [vmem:[#allocation2 + $0x280] sm:$0xff] }
 0x331   : > { %3006 = vst [vmem:[#allocation2 + $0x198] sm:$0xff] %v2894_v11  ;;  %2626 = vmatmul.bf16.gmra.mxu3 %v9607_v57  ;;  %v2382_v14 = vpop.f32.mrf.mxu2 }
 0x332   : > { %3014 = vst [vmem:[#allocation2 + $0x1d8] sm:$0xff] %v2902_v13 }
 0x333   : > { %v2482_v19 = vpop.f32.mrf.mxu0 }
 0x334   : > { %v2431_v16 = vpop.f32.mrf.mxu3  ;;  %v2531_v28 = vpop.f32.mrf.mxu1 }
 0x335   : > { %v2432_v18 = vadd.f32 %v2431_v16, %v2382_v14  ;;  %v2532_v32 = vadd.f32 %v2531_v28, %v2482_v19 }
 0x337   : > { %v2901_v31 = vadd.f32 %v2432_v18, %v1671_v26  ;;  %v2909_v35 = vadd.f32 %v2532_v32, %v1679_v33  ;;  %v1692_v26 = vld [vmem:[#allocation2 + $0x278] sm:$0xff] }
 0x338   : > { %v1700_v33 = vld [vmem:[#allocation2 + $0x2b8] sm:$0xff] }
 0x339   : > { %3013 = vst [vmem:[#allocation2 + $0x1d0] sm:$0xff] %v2901_v31  ;;  %v2384_v36 = vpop.f32.mrf.mxu2 }
 0x33a   : > { %3021 = vst [vmem:[#allocation2 + $0x210] sm:$0xff] %v2909_v35 }
 0x33b   : > { %v2485_v41 = vpop.f32.mrf.mxu0 }
 0x33c   : > { %v2433_v52 = vpop.f32.mrf.mxu3  ;;  %v2534_v43 = vpop.f32.mrf.mxu1 }
 0x33d   : > { %v2434_v54 = vadd.f32 %v2433_v52, %v2384_v36  ;;  %v2535_v8 = vadd.f32 %v2534_v43, %v2485_v41 }
 0x33e   : > { %2582 = vmatmul.bf16.gmra.mxu2 %v9643_v4  ;;  %2680 = vmatmul.bf16.gmra.mxu0 %v9643_v4 }
 0x33f   : > { %v2908_v44 = vadd.f32 %v2434_v54, %v1678_v3  ;;  %v2916_v46 = vadd.f32 %v2535_v8, %v1686_v45  ;;  %2729 = vmatmul.bf16.gmra.mxu1 %v9645_v9  ;;  %v1699_v3 = vld [vmem:[#allocation2 + $0x2b0] sm:$0xff] }
 0x340   : > { %v1707_v45 = vld [vmem:[#allocation2 + $0x2f0] sm:$0xff] }
 0x341   : > { %3020 = vst [vmem:[#allocation2 + $0x208] sm:$0xff] %v2908_v44  ;;  %2631 = vmatmul.bf16.gmra.mxu3 %v9645_v9  ;;  %v2387_v47 = vpop.f32.mrf.mxu2 }
 0x342   : > { %3028 = vst [vmem:[#allocation2 + $0x248] sm:$0xff] %v2916_v46 }
 0x343   : > { %v2487_v2 = vpop.f32.mrf.mxu0 }
 0x344   : > { %v2436_v59 = vpop.f32.mrf.mxu3  ;;  %v2536_v10 = vpop.f32.mrf.mxu1 }
 0x345   : > { %v2437_v20 = vadd.f32 %v2436_v59, %v2387_v47  ;;  %v2537_v12 = vadd.f32 %v2536_v10, %v2487_v2 }
 0x347   : > { %v2915_v11 = vadd.f32 %v2437_v20, %v1685_v5  ;;  %v2923_v13 = vadd.f32 %v2537_v12, %v1693_v63  ;;  %v1706_v5 = vld [vmem:[#allocation2 + $0x2e8] sm:$0xff] }
 0x348   : > { %v1714_v63 = vld [vmem:[#allocation2 + $0x328] sm:$0xff] }
 0x349   : > { %3027 = vst [vmem:[#allocation2 + $0x240] sm:$0xff] %v2915_v11  ;;  %v2389_v14 = vpop.f32.mrf.mxu2 }
 0x34a   : > { %3035 = vst [vmem:[#allocation2 + $0x280] sm:$0xff] %v2923_v13 }
 0x34b   : > { %v2490_v19 = vpop.f32.mrf.mxu0 }
 0x34c   : > { %v2438_v16 = vpop.f32.mrf.mxu3  ;;  %v2539_v28 = vpop.f32.mrf.mxu1 }
 0x34d   : > { %v2439_v18 = vadd.f32 %v2438_v16, %v2389_v14  ;;  %v2540_v32 = vadd.f32 %v2539_v28, %v2490_v19 }
 0x34e   : > { %2587 = vmatmul.bf16.gmra.mxu2 %v9681_v61  ;;  %2685 = vmatmul.bf16.gmra.mxu0 %v9681_v61 }
 0x34f   : > { %v2922_v31 = vadd.f32 %v2439_v18, %v1692_v26  ;;  %v2930_v35 = vadd.f32 %v2540_v32, %v1700_v33  ;;  %2734 = vmatmul.bf16.gmra.mxu1 %v9683_v1  ;;  %v1713_v26 = vld [vmem:[#allocation2 + $0x320] sm:$0xff] }
 0x350   : > { %v1721_v33 = vld [vmem:[#allocation2 + $0x360] sm:$0xff] }
 0x351   : > { %3034 = vst [vmem:[#allocation2 + $0x278] sm:$0xff] %v2922_v31  ;;  %2636 = vmatmul.bf16.gmra.mxu3 %v9683_v1  ;;  %v2392_v36 = vpop.f32.mrf.mxu2 }
 0x352   : > { %3042 = vst [vmem:[#allocation2 + $0x2b8] sm:$0xff] %v2930_v35 }
 0x353   : > { %v2492_v41 = vpop.f32.mrf.mxu0 }
 0x354   : > { %v2441_v52 = vpop.f32.mrf.mxu3  ;;  %v2541_v43 = vpop.f32.mrf.mxu1 }
 0x355   : > { %v2442_v54 = vadd.f32 %v2441_v52, %v2392_v36  ;;  %v2542_v8 = vadd.f32 %v2541_v43, %v2492_v41  ;;  %v7959_v36 = vld [vmem:[%s8443_s20 + $0x10] sm:$0xf]  ;;  %v3400_v43 = vld [vmem:[%s12826_s2 + $0x668] sm:$0xff] }
 0x356   : > { %v10202_v42 = vor.u32 %v8184_v37, %v7959_v36 }
 0x357   : > { %v2929_v44 = vadd.f32 %v2442_v54, %v1699_v3  ;;  %v2937_v46 = vadd.f32 %v2542_v8, %v1707_v45  ;;  %v3393_v54 = vld [vmem:[%s12826_s2 + $0x630] sm:$0xff]  ;;  %v3463_v3 = vpack.c.bf16 %v3288_v40, %v3281_v39  ;;  %v10207_v45 = vor.u32 %v8183_v21, %v7961_v23 }
 0x359   : > { %3041 = vst [vmem:[#allocation2 + $0x2b0] sm:$0xff] %v2929_v44  ;;  %v2394_v47 = vpop.f32.mrf.mxu2  ;;  %3808 = vmatpush.bf16.msra.mxu0 %v3463_v3 }
 0x35a   : > { %3049 = vst [vmem:[#allocation2 + $0x2f0] sm:$0xff] %v2937_v46  ;;  %v3519_v46 = vpack.c.bf16 %v3400_v43, %v3393_v54 }
 0x35b   : > { %v2495_v2 = vpop.f32.mrf.mxu0 }
 0x35c   : > { %v2443_v59 = vpop.f32.mrf.mxu3  ;;  %v2544_v10 = vpop.f32.mrf.mxu1  ;;  %3857 = vmatpush.bf16.msra.mxu1 %v3519_v46 }
 0x35d   : > { %v2444_v20 = vadd.f32 %v2443_v59, %v2394_v47  ;;  %v2545_v12 = vadd.f32 %v2544_v10, %v2495_v2  ;;  %v1720_v47 = vld [vmem:[#allocation2 + $0x358] sm:$0xff]  ;;  %v1618_v59 = vld [vmem:[#allocation2 + $0x28] sm:$0xff]  ;;  %v3273_v2 = vld [vmem:[%s12826_s2 + $0x270] sm:$0xff] }
 0x35e   : > { %2592 = vmatmul.bf16.gmra.mxu2 %v9716_v34  ;;  %2690 = vmatmul.bf16.gmra.mxu0 %v9716_v34 }
 0x35f   : > { %v2936_v11 = vadd.f32 %v2444_v20, %v1706_v5  ;;  %v2944_v13 = vadd.f32 %v2545_v12, %v1714_v63  ;;  %2739 = vmatmul.bf16.gmra.mxu1 %v9721_v38  ;;  %v3266_v20 = vld [vmem:[%s12826_s2 + $0x238] sm:$0xff]  ;;  %v3385_v5 = vld [vmem:[%s12826_s2 + $0x5f0] sm:$0xff]  ;;  %v1617_v63 = vld [vmem:[#allocation2 + $0x20] sm:$0xff] }
 0x361   : > { %3048 = vst [vmem:[#allocation2 + $0x2e8] sm:$0xff] %v2936_v11  ;;  %2641 = vmatmul.bf16.gmra.mxu3 %v9721_v38  ;;  %v2397_v14 = vpop.f32.mrf.mxu2 }
 0x362   : > { %3056 = vst [vmem:[#allocation2 + $0x328] sm:$0xff] %v2944_v13 }
 0x363   : > { %v2497_v19 = vpop.f32.mrf.mxu0 }
 0x364   : > { %v2446_v16 = vpop.f32.mrf.mxu3  ;;  %v2546_v28 = vpop.f32.mrf.mxu1 }
 0x365   : > { %v2447_v18 = vadd.f32 %v2446_v16, %v2397_v14  ;;  %v2547_v32 = vadd.f32 %v2546_v28, %v2497_v19  ;;  %v7967_v16 = vld [vmem:[%s8443_s20 + $0x60] sm:$0xf] }
 0x366   : > { %v3379_v28 = vld [vmem:[%s12826_s2 + $0x5c0] sm:$0xff] }
 0x367   : > { %v2943_v31 = vadd.f32 %v2447_v18, %v1713_v26  ;;  %v2951_v35 = vadd.f32 %v2547_v32, %v1721_v33  ;;  %v7969_v18 = vld [vmem:[%s8443_s20 + $0x88] sm:$0xf0]  ;;  %v3274_v26 = vld [vmem:[%s12826_s2 + $0x278] sm:$0xff]  ;;  %v10238_v32 = vor.u32 %v8186_v55, %v7967_v16 }
 0x368   : > { %v3456_v33 = vpack.c.bf16 %v3274_v26, %v3267_v24  ;;  %v10243_v21 = vor.u32 %v8185_v17, %v7969_v18 }
 0x369   : > { %3055 = vst [vmem:[#allocation2 + $0x320] sm:$0xff] %v2943_v31  ;;  %v2399_v52 = vpop.f32.mrf.mxu2 }
 0x36a   : > { %3063 = vst [vmem:[#allocation2 + $0x360] sm:$0xff] %v2951_v35  ;;  %v3386_v35 = vld [vmem:[%s12826_s2 + $0x5f8] sm:$0xff]  ;;  %3809 = vmatpush.bf16.msra.mxu0 %v3456_v33 }
 0x36b   : > { %v2656_v8 = vpop.f32.mrf.mxu0  ;;  %v3512_v23 = vpack.c.bf16 %v3386_v35, %v3379_v28 }
 0x36c   : > { %v2448_v41 = vpop.f32.mrf.mxu3  ;;  %v2705_v48 = vpop.f32.mrf.mxu1 }
 0x36d   : > { %v2449_v44 = vadd.f32 %v2448_v41, %v2399_v52  ;;  %v2706_v56 = vadd.f32 %v2705_v48, %v2656_v8  ;;  %v1624_v52 = vld [vmem:[#allocation2 + $0x58] sm:$0xff]  ;;  %3858 = vmatpush.bf16.msra.mxu1 %v3512_v23  ;;  %v3259_v8 = vld [vmem:[%s12826_s2 + $0x200] sm:$0xff] }
 0x36e   : > { %2753 = vmatmul.bf16.vlgmr.msrb.gmra.mxu2 %v9453_v51  ;;  %3619 = vmatmul.bf16.vlgmr.msrb.gmra.mxu0 %v10202_v42  ;;  %v3378_v51 = vld [vmem:[%s12826_s2 + $0x5b8] sm:$0xff] }
 0x36f   : > { %v2950_v50 = vadd.f32 %v2449_v44, %v1720_v47  ;;  %v2848_v60 = vadd.f32 %v2706_v56, %v1618_v59  ;;  %3668 = vmatmul.bf16.vlgmr.msrb.gmra.mxu1 %v10207_v45  ;;  %v3511_v12 = vpack.c.bf16 %v3385_v5, %v3378_v51  ;;  %v1632_v41 = vld [vmem:[#allocation2 + $0x98] sm:$0xff]  ;;  %v3252_v44 = vld [vmem:[%s12826_s2 + $0x1c8] sm:$0xff]  ;;  %v3371_v47 = vld [vmem:[%s12826_s2 + $0x580] sm:$0xff] }
 0x370   : > { %v1631_v59 = vld [vmem:[#allocation2 + $0x90] sm:$0xff] }
 0x371   : > { %3062 = vst [vmem:[#allocation2 + $0x358] sm:$0xff] %v2950_v50  ;;  %2802 = vmatmul.bf16.vlgmr.msrb.gmra.mxu3 %v9455_v58  ;;  %v2558_v62 = vpop.f32.mrf.mxu2  ;;  %v3455_v58 = vpack.c.bf16 %v3273_v2, %v3266_v20  ;;  %v1639_v2 = vld [vmem:[#allocation2 + $0xd0] sm:$0xff] }
 0x372   : > { %2960 = vst [vmem:[#allocation2 + $0x28] sm:$0xff] %v2848_v60  ;;  %3760 = vmatpush.bf16.msra.mxu3 %v3511_v12  ;;  %v8187_v5 = vld [vmem:[%s8443_s20 + $0xb4] sm:$0xf] }
 0x373   : > { %v2658_v11 = vpop.f32.mrf.mxu0  ;;  %3711 = vmatpush.bf16.msra.mxu2 %v3455_v58  ;;  %v8188_v58 = vld [vmem:[%s8443_s20 + $0xd4] sm:$0xf0]  ;;  %v3253_v12 = vld [vmem:[%s12826_s2 + $0x1d0] sm:$0xff] }
 0x374   : > { %v2607_v22 = vpop.f32.mrf.mxu3  ;;  %v2707_v13 = vpop.f32.mrf.mxu1 }
 0x375   : > { %v2608_v10 = vadd.f32 %v2607_v22, %v2558_v62  ;;  %v2708_v6 = vadd.f32 %v2707_v13, %v2658_v11  ;;  %v7975_v22 = vld [vmem:[%s8443_s20 + $0xb0] sm:$0xf] }
 0x376   : > { %v3365_v13 = vld [vmem:[%s12826_s2 + $0x550] sm:$0xff] }
 0x377   : > { %v2847_v14 = vadd.f32 %v2608_v10, %v1617_v63  ;;  %v2855_v15 = vadd.f32 %v2708_v6, %v1625_v53  ;;  %v7977_v10 = vld [vmem:[%s8443_s20 + $0xd8] sm:$0xf0]  ;;  %v3260_v63 = vld [vmem:[%s12826_s2 + $0x208] sm:$0xff]  ;;  %v10274_v6 = vor.u32 %v8188_v58, %v7975_v22 }
 0x378   : > { %v3449_v53 = vpack.c.bf16 %v3260_v63, %v3253_v12  ;;  %v10279_v17 = vor.u32 %v8187_v5, %v7977_v10 }
 0x379   : > { %2959 = vst [vmem:[#allocation2 + $0x20] sm:$0xff] %v2847_v14  ;;  %v2560_v19 = vpop.f32.mrf.mxu2 }
 0x37a   : > { %2967 = vst [vmem:[#allocation2 + $0x60] sm:$0xff] %v2855_v15  ;;  %v3372_v15 = vld [vmem:[%s12826_s2 + $0x588] sm:$0xff]  ;;  %3810 = vmatpush.bf16.msra.mxu0 %v3449_v53 }
 0x37b   : > { %v2661_v37 = vpop.f32.mrf.mxu0  ;;  %v3505_v18 = vpack.c.bf16 %v3372_v15, %v3365_v13 }
 0x37c   : > { %v2609_v31 = vpop.f32.mrf.mxu3  ;;  %v2710_v39 = vpop.f32.mrf.mxu1 }
 0x37d   : > { %v2610_v36 = vadd.f32 %v2609_v31, %v2560_v19  ;;  %v2711_v54 = vadd.f32 %v2710_v39, %v2661_v37  ;;  %v1638_v19 = vld [vmem:[#allocation2 + $0xc8] sm:$0xff]  ;;  %3859 = vmatpush.bf16.msra.mxu1 %v3505_v18  ;;  %v3245_v37 = vld [vmem:[%s12826_s2 + $0x190] sm:$0xff] }
 0x37e   : > { %2758 = vmatmul.bf16.gmra.mxu2 %v9491_v27  ;;  %3624 = vmatmul.bf16.gmra.mxu0 %v10238_v32  ;;  %v3364_v27 = vld [vmem:[%s12826_s2 + $0x548] sm:$0xff] }
 0x37f   : > { %v2854_v40 = vadd.f32 %v2610_v36, %v1624_v52  ;;  %v2862_v3 = vadd.f32 %v2711_v54, %v1632_v41  ;;  %3673 = vmatmul.bf16.gmra.mxu1 %v10243_v21  ;;  %v3504_v56 = vpack.c.bf16 %v3371_v47, %v3364_v27  ;;  %v1646_v31 = vld [vmem:[#allocation2 + $0x108] sm:$0xff]  ;;  %v3238_v36 = vld [vmem:[%s12826_s2 + $0x158] sm:$0xff]  ;;  %v3357_v52 = vld [vmem:[%s12826_s2 + $0x510] sm:$0xff] }
 0x380   : > { %v1645_v41 = vld [vmem:[#allocation2 + $0x100] sm:$0xff] }
 0x381   : > { %2966 = vst [vmem:[#allocation2 + $0x58] sm:$0xff] %v2854_v40  ;;  %2807 = vmatmul.bf16.gmra.mxu3 %v9493_v30  ;;  %v2563_v43 = vpop.f32.mrf.mxu2  ;;  %v3448_v30 = vpack.c.bf16 %v3259_v8, %v3252_v44  ;;  %v1653_v8 = vld [vmem:[#allocation2 + $0x140] sm:$0xff] }
 0x382   : > { %2974 = vst [vmem:[#allocation2 + $0x98] sm:$0xff] %v2862_v3  ;;  %3761 = vmatpush.bf16.msra.mxu3 %v3504_v56  ;;  %v8189_v47 = vld [vmem:[%s8443_s20 + $0x104] sm:$0xf] }
 0x383   : > { %v2663_v50 = vpop.f32.mrf.mxu0  ;;  %3712 = vmatpush.bf16.msra.mxu2 %v3448_v30  ;;  %v8190_v30 = vld [vmem:[%s8443_s20 + $0x124] sm:$0xf0]  ;;  %v3239_v56 = vld [vmem:[%s12826_s2 + $0x160] sm:$0xff] }
 0x384   : > { %v2612_v46 = vpop.f32.mrf.mxu3  ;;  %v2712_v60 = vpop.f32.mrf.mxu1 }
 0x385   : > { %v2613_v48 = vadd.f32 %v2612_v46, %v2563_v43  ;;  %v2713_v20 = vadd.f32 %v2712_v60, %v2663_v50  ;;  %v7983_v46 = vld [vmem:[%s8443_s20 + $0x100] sm:$0xf] }
 0x386   : > { %v3351_v60 = vld [vmem:[%s12826_s2 + $0x4e0] sm:$0xff] }
 0x387   : > { %v2861_v62 = vadd.f32 %v2613_v48, %v1631_v59  ;;  %v2869_v51 = vadd.f32 %v2713_v20, %v1639_v2  ;;  %v7985_v48 = vld [vmem:[%s8443_s20 + $0x128] sm:$0xf0]  ;;  %v3246_v59 = vld [vmem:[%s12826_s2 + $0x198] sm:$0xff]  ;;  %v10310_v20 = vor.u32 %v8190_v30, %v7983_v46 }
 0x388   : > { %v3442_v2 = vpack.c.bf16 %v3246_v59, %v3239_v56  ;;  %v10315_v5 = vor.u32 %v8189_v47, %v7985_v48 }
 0x389   : > { %2973 = vst [vmem:[#allocation2 + $0x90] sm:$0xff] %v2861_v62  ;;  %v2565_v11 = vpop.f32.mrf.mxu2 }
 0x38a   : > { %2981 = vst [vmem:[#allocation2 + $0xd0] sm:$0xff] %v2869_v51  ;;  %v3358_v51 = vld [vmem:[%s12826_s2 + $0x518] sm:$0xff]  ;;  %3811 = vmatpush.bf16.msra.mxu0 %v3442_v2 }
 0x38b   : > { %v2666_v55 = vpop.f32.mrf.mxu0  ;;  %v3498_v10 = vpack.c.bf16 %v3358_v51, %v3351_v60 }
 0x38c   : > { %v2614_v14 = vpop.f32.mrf.mxu3  ;;  %v2715_v24 = vpop.f32.mrf.mxu1 }
 0x38d   : > { %v2615_v16 = vadd.f32 %v2614_v14, %v2565_v11  ;;  %v2716_v28 = vadd.f32 %v2715_v24, %v2666_v55  ;;  %v1652_v11 = vld [vmem:[#allocation2 + $0x138] sm:$0xff]  ;;  %3860 = vmatpush.bf16.msra.mxu1 %v3498_v10  ;;  %v3231_v55 = vld [vmem:[%s12826_s2 + $0x120] sm:$0xff] }
 0x38e   : > { %2763 = vmatmul.bf16.gmra.mxu2 %v9529_v0  ;;  %3629 = vmatmul.bf16.gmra.mxu0 %v10274_v6  ;;  %v3350_v0 = vld [vmem:[%s12826_s2 + $0x4d8] sm:$0xff] }
 0x38f   : > { %v2868_v26 = vadd.f32 %v2615_v16, %v1638_v19  ;;  %v2876_v33 = vadd.f32 %v2716_v28, %v1646_v31  ;;  %3678 = vmatmul.bf16.gmra.mxu1 %v10279_v17  ;;  %v3497_v54 = vpack.c.bf16 %v3357_v52, %v3350_v0  ;;  %v1660_v14 = vld [vmem:[#allocation2 + $0x178] sm:$0xff]  ;;  %v3224_v16 = vld [vmem:[%s12826_s2 + $0xe8] sm:$0xff]  ;;  %v3343_v19 = vld [vmem:[%s12826_s2 + $0x4a0] sm:$0xff] }
 0x390   : > { %v1659_v31 = vld [vmem:[#allocation2 + $0x170] sm:$0xff] }
 0x391   : > { %2980 = vst [vmem:[#allocation2 + $0xc8] sm:$0xff] %v2868_v26  ;;  %2812 = vmatmul.bf16.gmra.mxu3 %v9531_v7  ;;  %v2568_v35 = vpop.f32.mrf.mxu2  ;;  %v3441_v7 = vpack.c.bf16 %v3245_v37, %v3238_v36  ;;  %v1667_v37 = vld [vmem:[#allocation2 + $0x1b0] sm:$0xff] }
 0x392   : > { %2988 = vst [vmem:[#allocation2 + $0x108] sm:$0xff] %v2876_v33  ;;  %3762 = vmatpush.bf16.msra.mxu3 %v3497_v54  ;;  %v8191_v52 = vld [vmem:[%s8443_s20 + $0x154] sm:$0xf] }
 0x393   : > { %v2668_v40 = vpop.f32.mrf.mxu0  ;;  %3713 = vmatpush.bf16.msra.mxu2 %v3441_v7  ;;  %v8192_v7 = vld [vmem:[%s8443_s20 + $0x174] sm:$0xf0]  ;;  %v3225_v54 = vld [vmem:[%s12826_s2 + $0xf0] sm:$0xff] }
 0x394   : > { %v2617_v23 = vpop.f32.mrf.mxu3  ;;  %v2717_v3 = vpop.f32.mrf.mxu1 }
 0x395   : > { %v2618_v39 = vadd.f32 %v2617_v23, %v2568_v35  ;;  %v2718_v44 = vadd.f32 %v2717_v3, %v2668_v40  ;;  %v7991_v23 = vld [vmem:[%s8443_s20 + $0x150] sm:$0xf] }
 0x396   : > { %v3337_v3 = vld [vmem:[%s12826_s2 + $0x470] sm:$0xff] }
 0x397   : > { %v2875_v43 = vadd.f32 %v2618_v39, %v1645_v41  ;;  %v2883_v27 = vadd.f32 %v2718_v44, %v1653_v8  ;;  %v7993_v39 = vld [vmem:[%s8443_s20 + $0x178] sm:$0xf0]  ;;  %v3232_v41 = vld [vmem:[%s12826_s2 + $0x128] sm:$0xff]  ;;  %v10346_v44 = vor.u32 %v8192_v7, %v7991_v23 }
 0x398   : > { %v3435_v8 = vpack.c.bf16 %v3232_v41, %v3225_v54  ;;  %v10351_v47 = vor.u32 %v8191_v52, %v7993_v39 }
 0x399   : > { %2987 = vst [vmem:[#allocation2 + $0x100] sm:$0xff] %v2875_v43  ;;  %v2570_v50 = vpop.f32.mrf.mxu2 }
 0x39a   : > { %2995 = vst [vmem:[#allocation2 + $0x140] sm:$0xff] %v2883_v27  ;;  %v3344_v27 = vld [vmem:[%s12826_s2 + $0x4a8] sm:$0xff]  ;;  %3812 = vmatpush.bf16.msra.mxu0 %v3435_v8 }
 0x39b   : > { %v2671_v58 = vpop.f32.mrf.mxu0  ;;  %v3491_v48 = vpack.c.bf16 %v3344_v27, %v3337_v3 }
 0x39c   : > { %v2619_v62 = vpop.f32.mrf.mxu3  ;;  %v2720_v12 = vpop.f32.mrf.mxu1 }
 0x39d   : > { %v2620_v22 = vadd.f32 %v2619_v62, %v2570_v50  ;;  %v2721_v13 = vadd.f32 %v2720_v12, %v2671_v58  ;;  %v1666_v50 = vld [vmem:[#allocation2 + $0x1a8] sm:$0xff]  ;;  %3861 = vmatpush.bf16.msra.mxu1 %v3491_v48  ;;  %v3217_v58 = vld [vmem:[%s12826_s2 + $0xb0] sm:$0xff] }
 0x39e   : > { %2768 = vmatmul.bf16.gmra.mxu2 %v9567_v25  ;;  %3634 = vmatmul.bf16.gmra.mxu0 %v10310_v20  ;;  %v3336_v25 = vld [vmem:[%s12826_s2 + $0x468] sm:$0xff] }
 0x39f   : > { %v2882_v63 = vadd.f32 %v2620_v22, %v1652_v11  ;;  %v2890_v53 = vadd.f32 %v2721_v13, %v1660_v14  ;;  %3683 = vmatmul.bf16.gmra.mxu1 %v10315_v5  ;;  %v3490_v28 = vpack.c.bf16 %v3343_v19, %v3336_v25  ;;  %v1674_v62 = vld [vmem:[#allocation2 + $0x1e8] sm:$0xff]  ;;  %v3210_v22 = vld [vmem:[%s12826_s2 + $0x78] sm:$0xff]  ;;  %v3329_v11 = vld [vmem:[%s12826_s2 + $0x430] sm:$0xff] }
 0x3a0   : > { %v1673_v14 = vld [vmem:[#allocation2 + $0x1e0] sm:$0xff] }
 0x3a1   : > { %2994 = vst [vmem:[#allocation2 + $0x138] sm:$0xff] %v2882_v63  ;;  %2817 = vmatmul.bf16.gmra.mxu3 %v9569_v29  ;;  %v2573_v15 = vpop.f32.mrf.mxu2  ;;  %v3434_v29 = vpack.c.bf16 %v3231_v55, %v3224_v16  ;;  %v1681_v55 = vld [vmem:[#allocation2 + $0x220] sm:$0xff] }
 0x3a2   : > { %3002 = vst [vmem:[#allocation2 + $0x178] sm:$0xff] %v2890_v53  ;;  %3763 = vmatpush.bf16.msra.mxu3 %v3490_v28  ;;  %v8193_v19 = vld [vmem:[%s8443_s20 + $0x1a4] sm:$0xf] }
 0x3a3   : > { %v2673_v26 = vpop.f32.mrf.mxu0  ;;  %3714 = vmatpush.bf16.msra.mxu2 %v3434_v29  ;;  %v8194_v29 = vld [vmem:[%s8443_s20 + $0x1c4] sm:$0xf0]  ;;  %v3211_v28 = vld [vmem:[%s12826_s2 + $0x80] sm:$0xff] }
 0x3a4   : > { %v2622_v18 = vpop.f32.mrf.mxu3  ;;  %v2722_v33 = vpop.f32.mrf.mxu1 }
 0x3a5   : > { %v2623_v24 = vadd.f32 %v2622_v18, %v2573_v15  ;;  %v2723_v36 = vadd.f32 %v2722_v33, %v2673_v26  ;;  %v7999_v18 = vld [vmem:[%s8443_s20 + $0x1a0] sm:$0xf] }
 0x3a6   : > { %v3323_v33 = vld [vmem:[%s12826_s2 + $0x400] sm:$0xff] }
 0x3a7   : > { %v2889_v35 = vadd.f32 %v2623_v24, %v1659_v31  ;;  %v2897_v0 = vadd.f32 %v2723_v36, %v1667_v37  ;;  %v8001_v24 = vld [vmem:[%s8443_s20 + $0x1c8] sm:$0xf0]  ;;  %v3218_v31 = vld [vmem:[%s12826_s2 + $0xb8] sm:$0xff]  ;;  %v10382_v36 = vor.u32 %v8194_v29, %v7999_v18 }
 0x3a8   : > { %v3428_v37 = vpack.c.bf16 %v3218_v31, %v3211_v28  ;;  %v10387_v52 = vor.u32 %v8193_v19, %v8001_v24 }
 0x3a9   : > { %3001 = vst [vmem:[#allocation2 + $0x170] sm:$0xff] %v2889_v35  ;;  %v2575_v40 = vpop.f32.mrf.mxu2 }
 0x3aa   : > { %3009 = vst [vmem:[#allocation2 + $0x1b0] sm:$0xff] %v2897_v0  ;;  %v3330_v0 = vld [vmem:[%s12826_s2 + $0x438] sm:$0xff]  ;;  %3813 = vmatpush.bf16.msra.mxu0 %v3428_v37 }
 0x3ab   : > { %v2676_v30 = vpop.f32.mrf.mxu0  ;;  %v3484_v39 = vpack.c.bf16 %v3330_v0, %v3323_v33 }
 0x3ac   : > { %v2624_v43 = vpop.f32.mrf.mxu3  ;;  %v2725_v56 = vpop.f32.mrf.mxu1 }
 0x3ad   : > { %v2625_v46 = vadd.f32 %v2624_v43, %v2575_v40  ;;  %v2726_v60 = vadd.f32 %v2725_v56, %v2676_v30  ;;  %v1680_v40 = vld [vmem:[#allocation2 + $0x218] sm:$0xff]  ;;  %3862 = vmatpush.bf16.msra.mxu1 %v3484_v39  ;;  %v3203_v30 = vld [vmem:[%s12826_s2 + $0x40] sm:$0xff] }
 0x3ae   : > { %2773 = vmatmul.bf16.gmra.mxu2 %v9605_v49  ;;  %3639 = vmatmul.bf16.gmra.mxu0 %v10346_v44  ;;  %v3322_v49 = vld [vmem:[%s12826_s2 + $0x3f8] sm:$0xff] }
 0x3af   : > { %v2896_v59 = vadd.f32 %v2625_v46, %v1666_v50  ;;  %v2904_v2 = vadd.f32 %v2726_v60, %v1674_v62  ;;  %3688 = vmatmul.bf16.gmra.mxu1 %v10351_v47  ;;  %v3483_v13 = vpack.c.bf16 %v3329_v11, %v3322_v49  ;;  %v1688_v43 = vld [vmem:[#allocation2 + $0x258] sm:$0xff]  ;;  %v3196_v46 = vld [vmem:[%s12826_s2 + $0x8] sm:$0xff]  ;;  %v3315_v50 = vld [vmem:[%s12826_s2 + $0x3c0] sm:$0xff] }
 0x3b0   : > { %v1687_v62 = vld [vmem:[#allocation2 + $0x250] sm:$0xff] }
 0x3b1   : > { %3008 = vst [vmem:[#allocation2 + $0x1a8] sm:$0xff] %v2896_v59  ;;  %2822 = vmatmul.bf16.gmra.mxu3 %v9607_v57  ;;  %v2578_v51 = vpop.f32.mrf.mxu2  ;;  %v3427_v57 = vpack.c.bf16 %v3217_v58, %v3210_v22  ;;  %v1695_v58 = vld [vmem:[#allocation2 + $0x290] sm:$0xff] }
 0x3b2   : > { %3016 = vst [vmem:[#allocation2 + $0x1e8] sm:$0xff] %v2904_v2  ;;  %3764 = vmatpush.bf16.msra.mxu3 %v3483_v13  ;;  %v8195_v11 = vld [vmem:[%s8443_s20 + $0x1f4] sm:$0xf] }
 0x3b3   : > { %v2678_v63 = vpop.f32.mrf.mxu0  ;;  %3715 = vmatpush.bf16.msra.mxu2 %v3427_v57  ;;  %v8196_v57 = vld [vmem:[%s8443_s20 + $0x214] sm:$0xf0]  ;;  %v3197_v13 = vld [vmem:[%s12826_s2 + $0x10] sm:$0xff] }
 0x3b4   : > { %v2627_v10 = vpop.f32.mrf.mxu3  ;;  %v2727_v53 = vpop.f32.mrf.mxu1 }
 0x3b5   : > { %v2628_v12 = vadd.f32 %v2627_v10, %v2578_v51  ;;  %v2728_v16 = vadd.f32 %v2727_v53, %v2678_v63  ;;  %v8007_v10 = vld [vmem:[%s8443_s20 + $0x1f0] sm:$0xf] }
 0x3b6   : > { %v3309_v53 = vld [vmem:[%s12826_s2 + $0x390] sm:$0xff] }
 0x3b7   : > { %v2903_v15 = vadd.f32 %v2628_v12, %v1673_v14  ;;  %v2911_v25 = vadd.f32 %v2728_v16, %v1681_v55  ;;  %v8009_v12 = vld [vmem:[%s8443_s20 + $0x218] sm:$0xf0]  ;;  %v3204_v14 = vld [vmem:[%s12826_s2 + $0x48] sm:$0xff]  ;;  %v10418_v16 = vor.u32 %v8196_v57, %v8007_v10 }
 0x3b8   : > { %v3421_v55 = vpack.c.bf16 %v3204_v14, %v3197_v13  ;;  %v10423_v19 = vor.u32 %v8195_v11, %v8009_v12 }
 0x3b9   : > { %3015 = vst [vmem:[#allocation2 + $0x1e0] sm:$0xff] %v2903_v15  ;;  %v2580_v26 = vpop.f32.mrf.mxu2 }
 0x3ba   : > { %3023 = vst [vmem:[#allocation2 + $0x220] sm:$0xff] %v2911_v25  ;;  %v3316_v25 = vld [vmem:[%s12826_s2 + $0x3c8] sm:$0xff]  ;;  %3814 = vmatpush.bf16.msra.mxu0 %v3421_v55 }
 0x3bb   : > { %v2681_v7 = vpop.f32.mrf.mxu0  ;;  %v3477_v24 = vpack.c.bf16 %v3316_v25, %v3309_v53 }
 0x3bc   : > { %v2629_v35 = vpop.f32.mrf.mxu3  ;;  %v2730_v54 = vpop.f32.mrf.mxu1 }
 0x3bd   : > { %v2630_v23 = vadd.f32 %v2629_v35, %v2580_v26  ;;  %v2731_v3 = vadd.f32 %v2730_v54, %v2681_v7  ;;  %v1694_v26 = vld [vmem:[#allocation2 + $0x288] sm:$0xff]  ;;  %3863 = vmatpush.bf16.msra.mxu1 %v3477_v24  ;;  %v3303_v7 = vld [vmem:[%s12826_s2 + $0x360] sm:$0xff] }
 0x3be   : > { %2778 = vmatmul.bf16.gmra.mxu2 %v9643_v4  ;;  %3644 = vmatmul.bf16.gmra.mxu0 %v10382_v36  ;;  %v3308_v4 = vld [vmem:[%s12826_s2 + $0x388] sm:$0xff] }
 0x3bf   : > { %v2910_v41 = vadd.f32 %v2630_v23, %v1680_v40  ;;  %v2918_v8 = vadd.f32 %v2731_v3, %v1688_v43  ;;  %3693 = vmatmul.bf16.gmra.mxu1 %v10387_v52  ;;  %v3476_v60 = vpack.c.bf16 %v3315_v50, %v3308_v4  ;;  %v1702_v35 = vld [vmem:[#allocation2 + $0x2c8] sm:$0xff]  ;;  %v3415_v40 = vld [vmem:[%s12826_s2 + $0x6e0] sm:$0xff] }
 0x3c0   : > { %v3296_v23 = vld [vmem:[%s12826_s2 + $0x328] sm:$0xff]  ;;  %v1701_v43 = vld [vmem:[#allocation2 + $0x2c0] sm:$0xff] }
 0x3c1   : > { %3022 = vst [vmem:[#allocation2 + $0x218] sm:$0xff] %v2910_v41  ;;  %2827 = vmatmul.bf16.gmra.mxu3 %v9645_v9  ;;  %v2583_v27 = vpop.f32.mrf.mxu2  ;;  %v3420_v9 = vpack.c.bf16 %v3203_v30, %v3196_v46  ;;  %v1709_v30 = vld [vmem:[#allocation2 + $0x300] sm:$0xff] }
 0x3c2   : > { %3030 = vst [vmem:[#allocation2 + $0x258] sm:$0xff] %v2918_v8  ;;  %3765 = vmatpush.bf16.msra.mxu3 %v3476_v60  ;;  %v8197_v50 = vld [vmem:[%s8443_s20 + $0x244] sm:$0xf]  ;;  %v3297_v60 = vld [vmem:[%s12826_s2 + $0x330] sm:$0xff] }
 0x3c3   : > { %v2683_v59 = vpop.f32.mrf.mxu0  ;;  %3716 = vmatpush.bf16.msra.mxu2 %v3420_v9  ;;  %v8198_v9 = vld [vmem:[%s8443_s20 + $0x264] sm:$0xf0] }
 0x3c4   : > { %v2632_v48 = vpop.f32.mrf.mxu3  ;;  %v2732_v2 = vpop.f32.mrf.mxu1 }
 0x3c5   : > { %v2633_v56 = vadd.f32 %v2632_v48, %v2583_v27  ;;  %v2733_v22 = vadd.f32 %v2732_v2, %v2683_v59  ;;  %v8015_v48 = vld [vmem:[%s8443_s20 + $0x240] sm:$0xf]  ;;  %v3409_v2 = vld [vmem:[%s12826_s2 + $0x6b0] sm:$0xff] }
 0x3c7   : > { %v2917_v51 = vadd.f32 %v2633_v56, %v1687_v62  ;;  %v2925_v49 = vadd.f32 %v2733_v22, %v1695_v58  ;;  %v8017_v56 = vld [vmem:[%s8443_s20 + $0x268] sm:$0xf0]  ;;  %v10454_v22 = vor.u32 %v8198_v9, %v8015_v48 }
 0x3c8   : > { %v3304_v62 = vld [vmem:[%s12826_s2 + $0x368] sm:$0xff]  ;;  %v10459_v11 = vor.u32 %v8197_v50, %v8017_v56  ;;  %v3067_v50 = vld [vmem:[#allocation2] sm:$0xff] }
 0x3c9   : > { %3029 = vst [vmem:[#allocation2 + $0x250] sm:$0xff] %v2917_v51  ;;  %v2585_v63 = vpop.f32.mrf.mxu2  ;;  %v3472_v58 = vpack.c.bf16 %v3304_v62, %v3297_v60  ;;  %v3268_v60 = vld [vmem:[%s12826_s2 + $0x248] sm:$0xff]  ;;  %v3275_v62 = vld [vmem:[%s12826_s2 + $0x280] sm:$0xff] }
 0x3ca   : > { %3037 = vst [vmem:[#allocation2 + $0x290] sm:$0xff] %v2925_v49  ;;  %v3416_v49 = vld [vmem:[%s12826_s2 + $0x6e8] sm:$0xff] }
 0x3cb   : > { %v2686_v29 = vpop.f32.mrf.mxu0  ;;  %v3528_v12 = vpack.c.bf16 %v3416_v49, %v3409_v2  ;;  %4003 = vmatpush.bf16.msrb.mxu0 %v3472_v58  ;;  %v3380_v2 = vld [vmem:[%s12826_s2 + $0x5c8] sm:$0xff]  ;;  %v3457_v58 = vpack.c.bf16 %v3275_v62, %v3268_v60  ;;  %v3387_v49 = vld [vmem:[%s12826_s2 + $0x600] sm:$0xff]  ;;  %v3262_v62 = vld [vmem:[%s12826_s2 + $0x218] sm:$0xff] }
 0x3cc   : > { %v2634_v15 = vpop.f32.mrf.mxu3  ;;  %v2735_v28 = vpop.f32.mrf.mxu1  ;;  %v3255_v60 = vld [vmem:[%s12826_s2 + $0x1e0] sm:$0xff] }
 0x3cd   : > { %v2635_v18 = vadd.f32 %v2634_v15, %v2585_v63  ;;  %v2736_v33 = vadd.f32 %v2735_v28, %v2686_v29  ;;  %v1708_v63 = vld [vmem:[#allocation2 + $0x2f8] sm:$0xff]  ;;  %4052 = vmatpush.bf16.msrb.mxu1 %v3528_v12  ;;  %v3289_v29 = vld [vmem:[%s12826_s2 + $0x2f0] sm:$0xff]  ;;  %v3513_v12 = vpack.c.bf16 %v3387_v49, %v3380_v2  ;;  %v3367_v2 = vld [vmem:[%s12826_s2 + $0x560] sm:$0xff] }
 0x3ce   : > { %2783 = vmatmul.bf16.gmra.mxu2 %v9681_v61  ;;  %3649 = vmatmul.bf16.gmra.mxu0 %v10418_v16  ;;  %v3408_v61 = vld [vmem:[%s12826_s2 + $0x6a8] sm:$0xff]  ;;  %v1716_v15 = vld [vmem:[#allocation2 + $0x338] sm:$0xff] }
 0x3cf   : > { %v2924_v31 = vadd.f32 %v2635_v18, %v1694_v26  ;;  %v2932_v37 = vadd.f32 %v2736_v33, %v1702_v35  ;;  %3698 = vmatmul.bf16.gmra.mxu1 %v10423_v19  ;;  %v3527_v3 = vpack.c.bf16 %v3415_v40, %v3408_v61  ;;  %v3282_v18 = vld [vmem:[%s12826_s2 + $0x2b8] sm:$0xff]  ;;  %v1715_v35 = vld [vmem:[#allocation2 + $0x330] sm:$0xff] }
 0x3d0   : > { %v3464_v26 = vpack.c.bf16 %v3289_v29, %v3282_v18  ;;  %v3290_v40 = vld [vmem:[%s12826_s2 + $0x2f8] sm:$0xff]  ;;  %v3269_v18 = vld [vmem:[%s12826_s2 + $0x250] sm:$0xff]  ;;  %v3276_v29 = vld [vmem:[%s12826_s2 + $0x288] sm:$0xff] }
 0x3d1   : > { %3036 = vst [vmem:[#allocation2 + $0x288] sm:$0xff] %v2924_v31  ;;  %2832 = vmatmul.bf16.gmra.mxu3 %v9683_v1  ;;  %v2588_v0 = vpop.f32.mrf.mxu2  ;;  %v3471_v1 = vpack.c.bf16 %v3303_v7, %v3296_v23  ;;  %v1723_v7 = vld [vmem:[#allocation2 + $0x370] sm:$0xff]  ;;  %v3374_v49 = vld [vmem:[%s12826_s2 + $0x598] sm:$0xff] }
 0x3d2   : > { %3044 = vst [vmem:[#allocation2 + $0x2c8] sm:$0xff] %v2932_v37  ;;  %3954 = vmatpush.bf16.msrb.mxu3 %v3527_v3 }
 0x3d3   : > { %v2688_v41 = vpop.f32.mrf.mxu0  ;;  %3905 = vmatpush.bf16.msrb.mxu2 %v3471_v1  ;;  %v3283_v1 = vld [vmem:[%s12826_s2 + $0x2c0] sm:$0xff] }
 0x3d4   : > { %v2637_v39 = vpop.f32.mrf.mxu3  ;;  %v2737_v8 = vpop.f32.mrf.mxu1  ;;  %v3465_v3 = vpack.c.bf16 %v3290_v40, %v3283_v1  ;;  %v3254_v1 = vld [vmem:[%s12826_s2 + $0x1d8] sm:$0xff]  ;;  %v3261_v40 = vld [vmem:[%s12826_s2 + $0x210] sm:$0xff] }
 0x3d5   : > { %v2638_v54 = vadd.f32 %v2637_v39, %v2588_v0  ;;  %v2738_v46 = vadd.f32 %v2737_v8, %v2688_v41 }
 0x3d6   : > { %4004 = vmatpush.bf16.msrb.mxu0 %v3465_v3  ;;  %v3450_v3 = vpack.c.bf16 %v3261_v40, %v3254_v1  ;;  %v3241_v1 = vld [vmem:[%s12826_s2 + $0x170] sm:$0xff]  ;;  %v3248_v40 = vld [vmem:[%s12826_s2 + $0x1a8] sm:$0xff] }
 0x3d7   : > { %v2931_v27 = vadd.f32 %v2638_v54, %v1701_v43  ;;  %v2939_v4 = vadd.f32 %v2738_v46, %v1709_v30  ;;  %3906 = vmatpush.bf16.msrb.mxu2 %v3464_v26  ;;  %v3395_v54 = vld [vmem:[%s12826_s2 + $0x640] sm:$0xff]  ;;  %v3402_v43 = vld [vmem:[%s12826_s2 + $0x678] sm:$0xff]  ;;  %v1722_v30 = vld [vmem:[#allocation2 + $0x368] sm:$0xff]  ;;  %v3458_v26 = vpack.c.bf16 %v3276_v29, %v3269_v18 }
 0x3d8   : > { %v3521_v46 = vpack.c.bf16 %v3402_v43, %v3395_v54  ;;  %v3366_v54 = vld [vmem:[%s12826_s2 + $0x558] sm:$0xff]  ;;  %v3373_v43 = vld [vmem:[%s12826_s2 + $0x590] sm:$0xff]  ;;  %v3240_v18 = vld [vmem:[%s12826_s2 + $0x168] sm:$0xff] }
 0x3d9   : > { %3043 = vst [vmem:[#allocation2 + $0x2c0] sm:$0xff] %v2931_v27  ;;  %v2590_v59 = vpop.f32.mrf.mxu2  ;;  %v3247_v29 = vld [vmem:[%s12826_s2 + $0x1a0] sm:$0xff] }
 0x3da   : > { %3051 = vst [vmem:[#allocation2 + $0x300] sm:$0xff] %v2939_v4  ;;  %4053 = vmatpush.bf16.msrb.mxu1 %v3521_v46  ;;  %4005 = vmatpush.bf16.msrb.mxu0 %v3458_v26  ;;  %v3506_v46 = vpack.c.bf16 %v3373_v43, %v3366_v54  ;;  %v3443_v26 = vpack.c.bf16 %v3247_v29, %v3240_v18  ;;  %v3353_v54 = vld [vmem:[%s12826_s2 + $0x4f0] sm:$0xff]  ;;  %v3360_v43 = vld [vmem:[%s12826_s2 + $0x528] sm:$0xff]  ;;  %v3227_v18 = vld [vmem:[%s12826_s2 + $0x100] sm:$0xff] }
 0x3db   : > { %v2691_v57 = vpop.f32.mrf.mxu0  ;;  %3907 = vmatpush.bf16.msrb.mxu2 %v3457_v58  ;;  %v3451_v58 = vpack.c.bf16 %v3262_v62, %v3255_v60  ;;  %v3226_v60 = vld [vmem:[%s12826_s2 + $0xf8] sm:$0xff]  ;;  %v3233_v62 = vld [vmem:[%s12826_s2 + $0x130] sm:$0xff] }
 0x3dc   : > { %v2639_v51 = vpop.f32.mrf.mxu3  ;;  %v2740_v13 = vpop.f32.mrf.mxu1  ;;  %v3234_v29 = vld [vmem:[%s12826_s2 + $0x138] sm:$0xff] }
 0x3dd   : > { %v2640_v10 = vadd.f32 %v2639_v51, %v2590_v59  ;;  %v2741_v53 = vadd.f32 %v2740_v13, %v2691_v57 }
 0x3de   : > { %2788 = vmatmul.bf16.gmra.mxu2 %v9716_v34  ;;  %3654 = vmatmul.bf16.gmra.mxu0 %v10454_v22  ;;  %v3394_v34 = vld [vmem:[%s12826_s2 + $0x638] sm:$0xff] }
 0x3df   : > { %v2938_v14 = vadd.f32 %v2640_v10, %v1708_v63  ;;  %v2946_v55 = vadd.f32 %v2741_v53, %v1716_v15  ;;  %3703 = vmatmul.bf16.gmra.mxu1 %v10459_v11  ;;  %v1619_v63 = vld [vmem:[#allocation2 + $0x30] sm:$0xff]  ;;  %v3074_v15 = vld [vmem:[#allocation2 + $0x38] sm:$0xff]  ;;  %3908 = vmatpush.bf16.msrb.mxu2 %v3450_v3  ;;  %v3444_v3 = vpack.c.bf16 %v3248_v40, %v3241_v1  ;;  %v3212_v1 = vld [vmem:[%s12826_s2 + $0x88] sm:$0xff] }
 0x3e0   : > { %4006 = vmatpush.bf16.msrb.mxu0 %v3451_v58  ;;  %v3436_v58 = vpack.c.bf16 %v3233_v62, %v3226_v60  ;;  %v3219_v40 = vld [vmem:[%s12826_s2 + $0xc0] sm:$0xff]  ;;  %v3213_v60 = vld [vmem:[%s12826_s2 + $0x90] sm:$0xff]  ;;  %v3220_v62 = vld [vmem:[%s12826_s2 + $0xc8] sm:$0xff] }
 0x3e1   : > { %3050 = vst [vmem:[#allocation2 + $0x2f8] sm:$0xff] %v2938_v14  ;;  %2837 = vmatmul.bf16.gmra.mxu3 %v9721_v38  ;;  %v2593_v25 = vpop.f32.mrf.mxu2  ;;  %v3401_v38 = vld [vmem:[%s12826_s2 + $0x670] sm:$0xff] }
 0x3e2   : > { %3058 = vst [vmem:[#allocation2 + $0x338] sm:$0xff] %v2946_v55  ;;  %v3520_v33 = vpack.c.bf16 %v3401_v38, %v3394_v34  ;;  %v3381_v34 = vld [vmem:[%s12826_s2 + $0x5d0] sm:$0xff]  ;;  %v3388_v38 = vld [vmem:[%s12826_s2 + $0x608] sm:$0xff] }
 0x3e3   : > { %v2693_v31 = vpop.f32.mrf.mxu0  ;;  %3909 = vmatpush.bf16.msrb.mxu2 %v3443_v26  ;;  %v3437_v26 = vpack.c.bf16 %v3234_v29, %v3227_v18  ;;  %v3198_v18 = vld [vmem:[%s12826_s2 + $0x18] sm:$0xff]  ;;  %v3205_v29 = vld [vmem:[%s12826_s2 + $0x50] sm:$0xff] }
 0x3e4   : > { %v2642_v24 = vpop.f32.mrf.mxu3  ;;  %v2742_v37 = vpop.f32.mrf.mxu1  ;;  %3955 = vmatpush.bf16.msrb.mxu3 %v3520_v33  ;;  %v3514_v33 = vpack.c.bf16 %v3388_v38, %v3381_v34  ;;  %v3352_v34 = vld [vmem:[%s12826_s2 + $0x4e8] sm:$0xff]  ;;  %v3359_v38 = vld [vmem:[%s12826_s2 + $0x520] sm:$0xff]  ;;  %4007 = vmatpush.bf16.msrb.mxu0 %v3444_v3  ;;  %v3429_v3 = vpack.c.bf16 %v3219_v40, %v3212_v1  ;;  %v3206_v40 = vld [vmem:[%s12826_s2 + $0x58] sm:$0xff] }
 0x3e5   : > { %v2643_v28 = vadd.f32 %v2642_v24, %v2593_v25  ;;  %v2743_v23 = vadd.f32 %v2742_v37, %v2693_v31  ;;  %v3199_v1 = vld [vmem:[%s12826_s2 + $0x20] sm:$0xff] }
 0x3e6   : > { %4054 = vmatpush.bf16.msrb.mxu1 %v3514_v33  ;;  %v3499_v33 = vpack.c.bf16 %v3359_v38, %v3352_v34  ;;  %v3339_v34 = vld [vmem:[%s12826_s2 + $0x480] sm:$0xff]  ;;  %v3346_v38 = vld [vmem:[%s12826_s2 + $0x4b8] sm:$0xff] }
 0x3e7   : > { %v2945_v0 = vadd.f32 %v2643_v28, %v1715_v35  ;;  %v2953_v61 = vadd.f32 %v2743_v23, %v1723_v7  ;;  %v1626_v35 = vld [vmem:[#allocation2 + $0x68] sm:$0xff]  ;;  %v3081_v7 = vld [vmem:[#allocation2 + $0x70] sm:$0xff]  ;;  %3910 = vmatpush.bf16.msrb.mxu2 %v3436_v58  ;;  %v3430_v58 = vpack.c.bf16 %v3220_v62, %v3213_v60  ;;  %v3298_v60 = vld [vmem:[%s12826_s2 + $0x338] sm:$0xff] }
 0x3e8   : > { %3956 = vmatpush.bf16.msrb.mxu3 %v3513_v12  ;;  %v3507_v12 = vpack.c.bf16 %v3374_v49, %v3367_v2  ;;  %v3338_v2 = vld [vmem:[%s12826_s2 + $0x478] sm:$0xff]  ;;  %v3345_v49 = vld [vmem:[%s12826_s2 + $0x4b0] sm:$0xff]  ;;  %4008 = vmatpush.bf16.msrb.mxu0 %v3437_v26  ;;  %v3422_v26 = vpack.c.bf16 %v3205_v29, %v3198_v18  ;;  %v3299_v18 = vld [vmem:[%s12826_s2 + $0x340] sm:$0xff] }
 0x3e9   : > { %3057 = vst [vmem:[#allocation2 + $0x330] sm:$0xff] %v2945_v0  ;;  %v2595_v39 = vpop.f32.mrf.mxu2  ;;  %v3305_v62 = vld [vmem:[%s12826_s2 + $0x370] sm:$0xff]  ;;  %v3306_v29 = vld [vmem:[%s12826_s2 + $0x378] sm:$0xff] }
 0x3ea   : > { %3065 = vst [vmem:[#allocation2 + $0x370] sm:$0xff] %v2953_v61  ;;  %4055 = vmatpush.bf16.msrb.mxu1 %v3507_v12  ;;  %v3492_v12 = vpack.c.bf16 %v3345_v49, %v3338_v2  ;;  %v3325_v2 = vld [vmem:[%s12826_s2 + $0x410] sm:$0xff]  ;;  %v3332_v49 = vld [vmem:[%s12826_s2 + $0x448] sm:$0xff] }
 0x3eb   : > { %v3620_v27 = vpop.f32.mrf.mxu0  ;;  %3911 = vmatpush.bf16.msrb.mxu2 %v3429_v3  ;;  %v3423_v3 = vpack.c.bf16 %v3206_v40, %v3199_v1  ;;  %v3284_v1 = vld [vmem:[%s12826_s2 + $0x2c8] sm:$0xff]  ;;  %v3291_v40 = vld [vmem:[%s12826_s2 + $0x300] sm:$0xff] }
 0x3ec   : > { %v2644_v41 = vpop.f32.mrf.mxu3  ;;  %v3669_v4 = vpop.f32.mrf.mxu1  ;;  %3957 = vmatpush.bf16.msrb.mxu3 %v3506_v46  ;;  %v3500_v46 = vpack.c.bf16 %v3360_v43, %v3353_v54  ;;  %v3324_v54 = vld [vmem:[%s12826_s2 + $0x408] sm:$0xff]  ;;  %v3331_v43 = vld [vmem:[%s12826_s2 + $0x440] sm:$0xff]  ;;  %4009 = vmatpush.bf16.msrb.mxu0 %v3430_v58  ;;  %v3473_v58 = vpack.c.bf16 %v3305_v62, %v3298_v60  ;;  %v3285_v60 = vld [vmem:[%s12826_s2 + $0x2d0] sm:$0xff] }
 0x3ed   : > { %v2645_v8 = vadd.f32 %v2644_v41, %v2595_v39  ;;  %v3670_v9 = vadd.f32 %v3669_v4, %v3620_v27  ;;  %v3292_v62 = vld [vmem:[%s12826_s2 + $0x308] sm:$0xff] }
 0x3ee   : > { %3717 = vmatmul.bf16.vlgmr.msra.gmra.mxu2 %v10202_v42  ;;  %3815 = vmatmul.bf16.vlgmr.msra.gmra.mxu0 %v10202_v42 }
 0x3ef   : > { %v2952_v48 = vadd.f32 %v2645_v8, %v1722_v30  ;;  %v4297_v56 = vadd.f32 %v3670_v9, %v3067_v50  ;;  %3864 = vmatmul.bf16.vlgmr.msra.gmra.mxu1 %v10207_v45  ;;  %v1633_v30 = vld [vmem:[#allocation2 + $0xa0] sm:$0xff]  ;;  %v3088_v50 = vld [vmem:[#allocation2 + $0xa8] sm:$0xff]  ;;  %3912 = vmatpush.bf16.msrb.mxu2 %v3422_v26  ;;  %v3474_v26 = vpack.c.bf16 %v3306_v29, %v3299_v18  ;;  %v3270_v18 = vld [vmem:[%s12826_s2 + $0x258] sm:$0xff] }
 0x3f0   : > { %3958 = vmatpush.bf16.msrb.mxu3 %v3499_v33  ;;  %4056 = vmatpush.bf16.msrb.mxu1 %v3500_v46  ;;  %v3493_v33 = vpack.c.bf16 %v3346_v38, %v3339_v34  ;;  %v3485_v46 = vpack.c.bf16 %v3331_v43, %v3324_v54  ;;  %v3310_v34 = vld [vmem:[%s12826_s2 + $0x398] sm:$0xff]  ;;  %v3317_v38 = vld [vmem:[%s12826_s2 + $0x3d0] sm:$0xff]  ;;  %v3311_v54 = vld [vmem:[%s12826_s2 + $0x3a0] sm:$0xff] }
 0x3f1   : > { %3064 = vst [vmem:[#allocation2 + $0x368] sm:$0xff] %v2952_v48  ;;  %3766 = vmatmul.bf16.vlgmr.msra.gmra.mxu3 %v10207_v45  ;;  %v2754_v59 = vpop.f32.mrf.mxu2  ;;  %v3318_v43 = vld [vmem:[%s12826_s2 + $0x3d8] sm:$0xff]  ;;  %4010 = vmatpush.bf16.msrb.mxu0 %v3423_v3  ;;  %v3466_v3 = vpack.c.bf16 %v3291_v40, %v3284_v1  ;;  %v3277_v29 = vld [vmem:[%s12826_s2 + $0x290] sm:$0xff]  ;;  %v3271_v1 = vld [vmem:[%s12826_s2 + $0x260] sm:$0xff] }
 0x3f2   : > { %4409 = vst [vmem:[#allocation2] sm:$0xff] %v4297_v56  ;;  %v3278_v40 = vld [vmem:[%s12826_s2 + $0x298] sm:$0xff] }
 0x3f3   : > { %v3622_v57 = vpop.f32.mrf.mxu0  ;;  %4101 = vmatpush.bf16.msra.mxu2 %v3473_v58  ;;  %v3467_v58 = vpack.c.bf16 %v3292_v62, %v3285_v60  ;;  %v3256_v60 = vld [vmem:[%s12826_s2 + $0x1e8] sm:$0xff]  ;;  %v3263_v62 = vld [vmem:[%s12826_s2 + $0x220] sm:$0xff] }
 0x3f4   : > { %v2803_v51 = vpop.f32.mrf.mxu3  ;;  %v3671_v13 = vpop.f32.mrf.mxu1  ;;  %3959 = vmatpush.bf16.msrb.mxu3 %v3492_v12  ;;  %4057 = vmatpush.bf16.msrb.mxu1 %v3493_v33  ;;  %v3486_v12 = vpack.c.bf16 %v3332_v49, %v3325_v2  ;;  %v3478_v33 = vpack.c.bf16 %v3317_v38, %v3310_v34  ;;  %v3410_v2 = vld [vmem:[%s12826_s2 + $0x6b8] sm:$0xff]  ;;  %v3417_v49 = vld [vmem:[%s12826_s2 + $0x6f0] sm:$0xff]  ;;  %v3411_v34 = vld [vmem:[%s12826_s2 + $0x6c0] sm:$0xff] }
 0x3f5   : > { %v2804_v10 = vadd.f32 %v2803_v51, %v2754_v59  ;;  %v3672_v53 = vadd.f32 %v3671_v13, %v3622_v57  ;;  %v3418_v38 = vld [vmem:[%s12826_s2 + $0x6f8] sm:$0xff]  ;;  %4199 = vmatpush.bf16.msra.mxu0 %v3474_v26  ;;  %v3459_v26 = vpack.c.bf16 %v3277_v29, %v3270_v18  ;;  %v3257_v18 = vld [vmem:[%s12826_s2 + $0x1f0] sm:$0xff]  ;;  %v3264_v29 = vld [vmem:[%s12826_s2 + $0x228] sm:$0xff] }
 0x3f7   : > { %v2849_v14 = vadd.f32 %v2804_v10, %v1619_v63  ;;  %v4304_v55 = vadd.f32 %v3672_v53, %v3074_v15  ;;  %v1640_v63 = vld [vmem:[#allocation2 + $0xd8] sm:$0xff]  ;;  %v3095_v15 = vld [vmem:[#allocation2 + $0xe0] sm:$0xff]  ;;  %4102 = vmatpush.bf16.msra.mxu2 %v3466_v3  ;;  %v3460_v3 = vpack.c.bf16 %v3278_v40, %v3271_v1  ;;  %v3249_v40 = vld [vmem:[%s12826_s2 + $0x1b0] sm:$0xff] }
 0x3f8   : > { %3960 = vmatpush.bf16.msrb.mxu3 %v3485_v46  ;;  %4058 = vmatpush.bf16.msrb.mxu1 %v3486_v12  ;;  %v3479_v46 = vpack.c.bf16 %v3318_v43, %v3311_v54  ;;  %v3529_v12 = vpack.c.bf16 %v3417_v49, %v3410_v2  ;;  %v3396_v54 = vld [vmem:[%s12826_s2 + $0x648] sm:$0xff]  ;;  %v3403_v43 = vld [vmem:[%s12826_s2 + $0x680] sm:$0xff]  ;;  %v3397_v2 = vld [vmem:[%s12826_s2 + $0x650] sm:$0xff] }
 0x3f9   : > { %2961 = vst.msk [vmem:[#allocation2 + $0x30] sm:$0xff] %vm1506_vm0, %v2849_v14  ;;  %v2756_v25 = vpop.f32.mrf.mxu2  ;;  %v3404_v49 = vld [vmem:[%s12826_s2 + $0x688] sm:$0xff]  ;;  %4200 = vmatpush.bf16.msra.mxu0 %v3467_v58  ;;  %v3452_v58 = vpack.c.bf16 %v3263_v62, %v3256_v60  ;;  %v3242_v1 = vld [vmem:[%s12826_s2 + $0x178] sm:$0xff]  ;;  %v3243_v60 = vld [vmem:[%s12826_s2 + $0x180] sm:$0xff] }
 0x3fa   : > { %4416 = vst [vmem:[#allocation2 + $0x38] sm:$0xff] %v4304_v55  ;;  %v3250_v62 = vld [vmem:[%s12826_s2 + $0x1b8] sm:$0xff] }
 0x3fb   : > { %v3625_v31 = vpop.f32.mrf.mxu0  ;;  %4103 = vmatpush.bf16.msra.mxu2 %v3459_v26  ;;  %v3453_v26 = vpack.c.bf16 %v3264_v29, %v3257_v18  ;;  %v3228_v18 = vld [vmem:[%s12826_s2 + $0x108] sm:$0xff]  ;;  %v3235_v29 = vld [vmem:[%s12826_s2 + $0x140] sm:$0xff] }
 0x3fc   : > { %v2805_v24 = vpop.f32.mrf.mxu3  ;;  %v3674_v37 = vpop.f32.mrf.mxu1  ;;  %3961 = vmatpush.bf16.msrb.mxu3 %v3478_v33  ;;  %4059 = vmatpush.bf16.msrb.mxu1 %v3479_v46  ;;  %v3530_v33 = vpack.c.bf16 %v3418_v38, %v3411_v34  ;;  %v3522_v46 = vpack.c.bf16 %v3403_v43, %v3396_v54  ;;  %v3382_v34 = vld [vmem:[%s12826_s2 + $0x5d8] sm:$0xff]  ;;  %v3389_v38 = vld [vmem:[%s12826_s2 + $0x610] sm:$0xff]  ;;  %v3383_v54 = vld [vmem:[%s12826_s2 + $0x5e0] sm:$0xff] }
 0x3fd   : > { %v2806_v28 = vadd.f32 %v2805_v24, %v2756_v25  ;;  %v3675_v23 = vadd.f32 %v3674_v37, %v3625_v31  ;;  %v3390_v43 = vld [vmem:[%s12826_s2 + $0x618] sm:$0xff]  ;;  %4201 = vmatpush.bf16.msra.mxu0 %v3460_v3  ;;  %v3445_v3 = vpack.c.bf16 %v3249_v40, %v3242_v1  ;;  %v3229_v1 = vld [vmem:[%s12826_s2 + $0x110] sm:$0xff]  ;;  %v3236_v40 = vld [vmem:[%s12826_s2 + $0x148] sm:$0xff] }
 0x3fe   : > { %3722 = vmatmul.bf16.gmra.mxu2 %v10238_v32  ;;  %3820 = vmatmul.bf16.gmra.mxu0 %v10238_v32 }
 0x3ff   : > { %v2856_v0 = vadd.f32 %v2806_v28, %v1626_v35  ;;  %v4311_v61 = vadd.f32 %v3675_v23, %v3081_v7  ;;  %3869 = vmatmul.bf16.gmra.mxu1 %v10243_v21  ;;  %v1647_v35 = vld [vmem:[#allocation2 + $0x110] sm:$0xff]  ;;  %v3102_v7 = vld [vmem:[#allocation2 + $0x118] sm:$0xff]  ;;  %4104 = vmatpush.bf16.msra.mxu2 %v3452_v58  ;;  %v3446_v58 = vpack.c.bf16 %v3250_v62, %v3243_v60 }
 0x400   : > { %4150 = vmatpush.bf16.msra.mxu3 %v3529_v12  ;;  %4248 = vmatpush.bf16.msra.mxu1 %v3530_v33  ;;  %v3523_v12 = vpack.c.bf16 %v3404_v49, %v3397_v2  ;;  %v3515_v33 = vpack.c.bf16 %v3389_v38, %v3382_v34  ;;  %v3368_v2 = vld [vmem:[%s12826_s2 + $0x568] sm:$0xff]  ;;  %v3375_v49 = vld [vmem:[%s12826_s2 + $0x5a0] sm:$0xff]  ;;  %v3369_v34 = vld [vmem:[%s12826_s2 + $0x570] sm:$0xff] }
 0x401   : > { %2968 = vst.msk [vmem:[#allocation2 + $0x68] sm:$0xff] %vm1506_vm0, %v2856_v0  ;;  %3771 = vmatmul.bf16.gmra.mxu3 %v10243_v21  ;;  %v2759_v39 = vpop.f32.mrf.mxu2  ;;  %v3376_v38 = vld [vmem:[%s12826_s2 + $0x5a8] sm:$0xff]  ;;  %4202 = vmatpush.bf16.msra.mxu0 %v3453_v26  ;;  %v3438_v26 = vpack.c.bf16 %v3235_v29, %v3228_v18  ;;  %v3214_v60 = vld [vmem:[%s12826_s2 + $0x98] sm:$0xff]  ;;  %v3221_v62 = vld [vmem:[%s12826_s2 + $0xd0] sm:$0xff] }
 0x402   : > { %4423 = vst [vmem:[#allocation2 + $0x70] sm:$0xff] %v4311_v61  ;;  %v3215_v18 = vld [vmem:[%s12826_s2 + $0xa0] sm:$0xff]  ;;  %v3222_v29 = vld [vmem:[%s12826_s2 + $0xd8] sm:$0xff] }
 0x403   : > { %v3627_v27 = vpop.f32.mrf.mxu0  ;;  %4105 = vmatpush.bf16.msra.mxu2 %v3445_v3  ;;  %v3439_v3 = vpack.c.bf16 %v3236_v40, %v3229_v1  ;;  %v3200_v1 = vld [vmem:[%s12826_s2 + $0x28] sm:$0xff]  ;;  %v3207_v40 = vld [vmem:[%s12826_s2 + $0x60] sm:$0xff] }
 0x404   : > { %v2808_v41 = vpop.f32.mrf.mxu3  ;;  %v3676_v4 = vpop.f32.mrf.mxu1  ;;  %4151 = vmatpush.bf16.msra.mxu3 %v3522_v46  ;;  %4249 = vmatpush.bf16.msra.mxu1 %v3523_v12  ;;  %v3516_v46 = vpack.c.bf16 %v3390_v43, %v3383_v54  ;;  %v3508_v12 = vpack.c.bf16 %v3375_v49, %v3368_v2  ;;  %v3354_v54 = vld [vmem:[%s12826_s2 + $0x4f8] sm:$0xff]  ;;  %v3361_v43 = vld [vmem:[%s12826_s2 + $0x530] sm:$0xff]  ;;  %v3355_v2 = vld [vmem:[%s12826_s2 + $0x500] sm:$0xff] }
 0x405   : > { %v2809_v8 = vadd.f32 %v2808_v41, %v2759_v39  ;;  %v3677_v9 = vadd.f32 %v3676_v4, %v3627_v27  ;;  %v3362_v49 = vld [vmem:[%s12826_s2 + $0x538] sm:$0xff]  ;;  %4203 = vmatpush.bf16.msra.mxu0 %v3446_v58  ;;  %v3431_v58 = vpack.c.bf16 %v3221_v62, %v3214_v60  ;;  %v3201_v60 = vld [vmem:[%s12826_s2 + $0x30] sm:$0xff]  ;;  %v3208_v62 = vld [vmem:[%s12826_s2 + $0x68] sm:$0xff] }
 0x407   : > { %v2863_v48 = vadd.f32 %v2809_v8, %v1633_v30  ;;  %v4318_v56 = vadd.f32 %v3677_v9, %v3088_v50  ;;  %v1654_v30 = vld [vmem:[#allocation2 + $0x148] sm:$0xff]  ;;  %v3109_v50 = vld [vmem:[#allocation2 + $0x150] sm:$0xff]  ;;  %4106 = vmatpush.bf16.msra.mxu2 %v3438_v26  ;;  %v3432_v26 = vpack.c.bf16 %v3222_v29, %v3215_v18 }
 0x408   : > { %4152 = vmatpush.bf16.msra.mxu3 %v3515_v33  ;;  %4250 = vmatpush.bf16.msra.mxu1 %v3516_v46  ;;  %v3509_v33 = vpack.c.bf16 %v3376_v38, %v3369_v34  ;;  %v3501_v46 = vpack.c.bf16 %v3361_v43, %v3354_v54  ;;  %v3340_v34 = vld [vmem:[%s12826_s2 + $0x488] sm:$0xff]  ;;  %v3347_v38 = vld [vmem:[%s12826_s2 + $0x4c0] sm:$0xff]  ;;  %v3341_v54 = vld [vmem:[%s12826_s2 + $0x490] sm:$0xff] }
 0x409   : > { %2975 = vst.msk [vmem:[#allocation2 + $0xa0] sm:$0xff] %vm1506_vm0, %v2863_v48  ;;  %v2761_v59 = vpop.f32.mrf.mxu2  ;;  %v3348_v43 = vld [vmem:[%s12826_s2 + $0x4c8] sm:$0xff]  ;;  %4204 = vmatpush.bf16.msra.mxu0 %v3439_v3  ;;  %v3424_v3 = vpack.c.bf16 %v3207_v40, %v3200_v1  ;;  %v4747_v18 = vld [vmem:[%s12827_s3 + $0x310] sm:$0xff]  ;;  %v4748_v1 = vld [vmem:[%s12827_s3 + $0x318] sm:$0xff] }
 0x40a   : > { %4430 = vst [vmem:[#allocation2 + $0xa8] sm:$0xff] %v4318_v56  ;;  %v4754_v29 = vld [vmem:[%s12827_s3 + $0x348] sm:$0xff]  ;;  %v4755_v40 = vld [vmem:[%s12827_s3 + $0x350] sm:$0xff] }
 0x40b   : > { %v3630_v57 = vpop.f32.mrf.mxu0  ;;  %4107 = vmatpush.bf16.msra.mxu2 %v3431_v58  ;;  %v3425_v58 = vpack.c.bf16 %v3208_v62, %v3201_v60  ;;  %v4733_v60 = vld [vmem:[%s12827_s3 + $0x2a0] sm:$0xff]  ;;  %v4740_v62 = vld [vmem:[%s12827_s3 + $0x2d8] sm:$0xff] }
 0x40c   : > { %v2810_v51 = vpop.f32.mrf.mxu3  ;;  %v3679_v13 = vpop.f32.mrf.mxu1  ;;  %4153 = vmatpush.bf16.msra.mxu3 %v3508_v12  ;;  %4251 = vmatpush.bf16.msra.mxu1 %v3509_v33  ;;  %v3502_v12 = vpack.c.bf16 %v3362_v49, %v3355_v2  ;;  %v3494_v33 = vpack.c.bf16 %v3347_v38, %v3340_v34  ;;  %v3326_v2 = vld [vmem:[%s12826_s2 + $0x418] sm:$0xff]  ;;  %v3333_v49 = vld [vmem:[%s12826_s2 + $0x450] sm:$0xff]  ;;  %v3327_v34 = vld [vmem:[%s12826_s2 + $0x420] sm:$0xff] }
 0x40d   : > { %v2811_v10 = vadd.f32 %v2810_v51, %v2761_v59  ;;  %v3680_v53 = vadd.f32 %v3679_v13, %v3630_v57  ;;  %v3334_v38 = vld [vmem:[%s12826_s2 + $0x458] sm:$0xff]  ;;  %4205 = vmatpush.bf16.msra.mxu0 %v3432_v26  ;;  %v4922_v26 = vpack.c.bf16 %v4754_v29, %v4747_v18  ;;  %v4734_v18 = vld [vmem:[%s12827_s3 + $0x2a8] sm:$0xff]  ;;  %v4741_v29 = vld [vmem:[%s12827_s3 + $0x2e0] sm:$0xff] }
 0x40e   : > { %3727 = vmatmul.bf16.gmra.mxu2 %v10274_v6  ;;  %3825 = vmatmul.bf16.gmra.mxu0 %v10274_v6 }
 0x40f   : > { %v2870_v14 = vadd.f32 %v2811_v10, %v1640_v63  ;;  %v4325_v55 = vadd.f32 %v3680_v53, %v3095_v15  ;;  %3874 = vmatmul.bf16.gmra.mxu1 %v10279_v17  ;;  %v1661_v63 = vld [vmem:[#allocation2 + $0x180] sm:$0xff]  ;;  %v3116_v15 = vld [vmem:[#allocation2 + $0x188] sm:$0xff]  ;;  %4108 = vmatpush.bf16.msra.mxu2 %v3424_v3  ;;  %v4923_v3 = vpack.c.bf16 %v4755_v40, %v4748_v1  ;;  %v4719_v1 = vld [vmem:[%s12827_s3 + $0x230] sm:$0xff] }
 0x410   : > { %4154 = vmatpush.bf16.msra.mxu3 %v3501_v46  ;;  %4252 = vmatpush.bf16.msra.mxu1 %v3502_v12  ;;  %v3495_v46 = vpack.c.bf16 %v3348_v43, %v3341_v54  ;;  %v3487_v12 = vpack.c.bf16 %v3333_v49, %v3326_v2  ;;  %v3312_v54 = vld [vmem:[%s12826_s2 + $0x3a8] sm:$0xff]  ;;  %v3319_v43 = vld [vmem:[%s12826_s2 + $0x3e0] sm:$0xff]  ;;  %v3313_v2 = vld [vmem:[%s12826_s2 + $0x3b0] sm:$0xff] }
 0x411   : > { %2982 = vst.msk [vmem:[#allocation2 + $0xd8] sm:$0xff] %vm1506_vm0, %v2870_v14  ;;  %3776 = vmatmul.bf16.gmra.mxu3 %v10279_v17  ;;  %v2764_v25 = vpop.f32.mrf.mxu2  ;;  %v3320_v49 = vld [vmem:[%s12826_s2 + $0x3e8] sm:$0xff]  ;;  %4206 = vmatpush.bf16.msra.mxu0 %v3425_v58  ;;  %v4915_v58 = vpack.c.bf16 %v4740_v62, %v4733_v60  ;;  %v4832_v60 = vld [vmem:[%s12827_s3 + $0x5b8] sm:$0xff] }
 0x412   : > { %4437 = vst [vmem:[#allocation2 + $0xe0] sm:$0xff] %v4325_v55  ;;  %v4726_v40 = vld [vmem:[%s12827_s3 + $0x268] sm:$0xff] }
 0x413   : > { %v3632_v31 = vpop.f32.mrf.mxu0 }
 0x414   : > { %v2813_v24 = vpop.f32.mrf.mxu3  ;;  %v3681_v37 = vpop.f32.mrf.mxu1  ;;  %4155 = vmatpush.bf16.msra.mxu3 %v3494_v33  ;;  %4253 = vmatpush.bf16.msra.mxu1 %v3495_v46  ;;  %v3488_v33 = vpack.c.bf16 %v3334_v38, %v3327_v34  ;;  %v3480_v46 = vpack.c.bf16 %v3319_v43, %v3312_v54  ;;  %v4859_v34 = vld [vmem:[%s12827_s3 + $0x690] sm:$0xff]  ;;  %v4866_v38 = vld [vmem:[%s12827_s3 + $0x6c8] sm:$0xff]  ;;  %v4860_v54 = vld [vmem:[%s12827_s3 + $0x698] sm:$0xff] }
 0x415   : > { %v2814_v28 = vadd.f32 %v2813_v24, %v2764_v25  ;;  %v3682_v23 = vadd.f32 %v3681_v37, %v3632_v31  ;;  %v4867_v43 = vld [vmem:[%s12827_s3 + $0x6d0] sm:$0xff] }
 0x417   : > { %v2877_v0 = vadd.f32 %v2814_v28, %v1647_v35  ;;  %v4332_v61 = vadd.f32 %v3682_v23, %v3102_v7  ;;  %v1668_v35 = vld [vmem:[#allocation2 + $0x1b8] sm:$0xff]  ;;  %v3123_v7 = vld [vmem:[#allocation2 + $0x1c0] sm:$0xff] }
 0x418   : > { %4156 = vmatpush.bf16.msra.mxu3 %v3487_v12  ;;  %4254 = vmatpush.bf16.msra.mxu1 %v3488_v33  ;;  %v3481_v12 = vpack.c.bf16 %v3320_v49, %v3313_v2  ;;  %v4978_v33 = vpack.c.bf16 %v4866_v38, %v4859_v34  ;;  %v4845_v2 = vld [vmem:[%s12827_s3 + $0x620] sm:$0xff]  ;;  %v4852_v49 = vld [vmem:[%s12827_s3 + $0x658] sm:$0xff]  ;;  %v4846_v34 = vld [vmem:[%s12827_s3 + $0x628] sm:$0xff] }
 0x419   : > { %2989 = vst.msk [vmem:[#allocation2 + $0x110] sm:$0xff] %vm1506_vm0, %v2877_v0  ;;  %v2766_v39 = vpop.f32.mrf.mxu2  ;;  %v4853_v38 = vld [vmem:[%s12827_s3 + $0x660] sm:$0xff] }
 0x41a   : > { %4444 = vst [vmem:[#allocation2 + $0x118] sm:$0xff] %v4332_v61 }
 0x41b   : > { %v3635_v27 = vpop.f32.mrf.mxu0 }
 0x41c   : > { %v2815_v41 = vpop.f32.mrf.mxu3  ;;  %v3684_v4 = vpop.f32.mrf.mxu1  ;;  %4157 = vmatpush.bf16.msra.mxu3 %v3480_v46  ;;  %4255 = vmatpush.bf16.msra.mxu1 %v3481_v12  ;;  %v4979_v46 = vpack.c.bf16 %v4867_v43, %v4860_v54  ;;  %v4971_v12 = vpack.c.bf16 %v4852_v49, %v4845_v2 }
 0x41d   : > { %v2816_v8 = vadd.f32 %v2815_v41, %v2766_v39  ;;  %v3685_v9 = vadd.f32 %v3684_v4, %v3635_v27 }
 0x41e   : > { %3732 = vmatmul.bf16.gmra.mxu2 %v10310_v20  ;;  %3830 = vmatmul.bf16.gmra.mxu0 %v10310_v20 }
 0x41f   : > { %v2884_v48 = vadd.f32 %v2816_v8, %v1654_v30  ;;  %v4339_v56 = vadd.f32 %v3685_v9, %v3109_v50  ;;  %3879 = vmatmul.bf16.gmra.mxu1 %v10315_v5  ;;  %v1675_v30 = vld [vmem:[#allocation2 + $0x1f0] sm:$0xff]  ;;  %v3130_v50 = vld [vmem:[#allocation2 + $0x1f8] sm:$0xff] }
 0x421   : > { %2996 = vst.msk [vmem:[#allocation2 + $0x148] sm:$0xff] %vm1506_vm0, %v2884_v48  ;;  %3781 = vmatmul.bf16.gmra.mxu3 %v10315_v5  ;;  %v2769_v59 = vpop.f32.mrf.mxu2 }
 0x422   : > { %4451 = vst [vmem:[#allocation2 + $0x150] sm:$0xff] %v4339_v56 }
 0x423   : > { %v3637_v57 = vpop.f32.mrf.mxu0 }
 0x424   : > { %v2818_v51 = vpop.f32.mrf.mxu3  ;;  %v3686_v13 = vpop.f32.mrf.mxu1 }
 0x425   : > { %v2819_v10 = vadd.f32 %v2818_v51, %v2769_v59  ;;  %v3687_v53 = vadd.f32 %v3686_v13, %v3637_v57 }
 0x427   : > { %v2891_v14 = vadd.f32 %v2819_v10, %v1661_v63  ;;  %v4346_v55 = vadd.f32 %v3687_v53, %v3116_v15  ;;  %v1682_v63 = vld [vmem:[#allocation2 + $0x228] sm:$0xff]  ;;  %v3137_v15 = vld [vmem:[#allocation2 + $0x230] sm:$0xff] }
 0x429   : > { %3003 = vst.msk [vmem:[#allocation2 + $0x180] sm:$0xff] %vm1506_vm0, %v2891_v14  ;;  %v2771_v25 = vpop.f32.mrf.mxu2 }
 0x42a   : > { %4458 = vst [vmem:[#allocation2 + $0x188] sm:$0xff] %v4346_v55 }
 0x42b   : > { %v3640_v31 = vpop.f32.mrf.mxu0 }
 0x42c   : > { %v2820_v24 = vpop.f32.mrf.mxu3  ;;  %v3689_v37 = vpop.f32.mrf.mxu1 }
 0x42d   : > { %v2821_v28 = vadd.f32 %v2820_v24, %v2771_v25  ;;  %v3690_v23 = vadd.f32 %v3689_v37, %v3640_v31 }
 0x42e   : > { %3737 = vmatmul.bf16.gmra.mxu2 %v10346_v44  ;;  %3835 = vmatmul.bf16.gmra.mxu0 %v10346_v44 }
 0x42f   : > { %v2898_v0 = vadd.f32 %v2821_v28, %v1668_v35  ;;  %v4353_v61 = vadd.f32 %v3690_v23, %v3123_v7  ;;  %3884 = vmatmul.bf16.gmra.mxu1 %v10351_v47  ;;  %v1689_v35 = vld [vmem:[#allocation2 + $0x260] sm:$0xff]  ;;  %v3144_v7 = vld [vmem:[#allocation2 + $0x268] sm:$0xff] }
 0x431   : > { %3010 = vst.msk [vmem:[#allocation2 + $0x1b8] sm:$0xff] %vm1506_vm0, %v2898_v0  ;;  %3786 = vmatmul.bf16.gmra.mxu3 %v10351_v47  ;;  %v2774_v39 = vpop.f32.mrf.mxu2 }
 0x432   : > { %4465 = vst [vmem:[#allocation2 + $0x1c0] sm:$0xff] %v4353_v61 }
 0x433   : > { %v3642_v27 = vpop.f32.mrf.mxu0 }
 0x434   : > { %v2823_v41 = vpop.f32.mrf.mxu3  ;;  %v3691_v4 = vpop.f32.mrf.mxu1 }
 0x435   : > { %v2824_v8 = vadd.f32 %v2823_v41, %v2774_v39  ;;  %v3692_v9 = vadd.f32 %v3691_v4, %v3642_v27 }
 0x437   : > { %v2905_v48 = vadd.f32 %v2824_v8, %v1675_v30  ;;  %v4360_v56 = vadd.f32 %v3692_v9, %v3130_v50  ;;  %v1696_v30 = vld [vmem:[#allocation2 + $0x298] sm:$0xff]  ;;  %v3151_v50 = vld [vmem:[#allocation2 + $0x2a0] sm:$0xff] }
 0x439   : > { %3017 = vst.msk [vmem:[#allocation2 + $0x1f0] sm:$0xff] %vm1506_vm0, %v2905_v48  ;;  %v2776_v59 = vpop.f32.mrf.mxu2 }
 0x43a   : > { %4472 = vst [vmem:[#allocation2 + $0x1f8] sm:$0xff] %v4360_v56 }
 0x43b   : > { %v3645_v57 = vpop.f32.mrf.mxu0 }
 0x43c   : > { %v2825_v51 = vpop.f32.mrf.mxu3  ;;  %v3694_v13 = vpop.f32.mrf.mxu1 }
 0x43d   : > { %v2826_v10 = vadd.f32 %v2825_v51, %v2776_v59  ;;  %v3695_v53 = vadd.f32 %v3694_v13, %v3645_v57 }
 0x43e   : > { %3742 = vmatmul.bf16.gmra.mxu2 %v10382_v36  ;;  %3840 = vmatmul.bf16.gmra.mxu0 %v10382_v36 }
 0x43f   : > { %v2912_v14 = vadd.f32 %v2826_v10, %v1682_v63  ;;  %v4367_v55 = vadd.f32 %v3695_v53, %v3137_v15  ;;  %3889 = vmatmul.bf16.gmra.mxu1 %v10387_v52  ;;  %v1703_v63 = vld [vmem:[#allocation2 + $0x2d0] sm:$0xff]  ;;  %v3158_v15 = vld [vmem:[#allocation2 + $0x2d8] sm:$0xff] }
 0x441   : > { %3024 = vst.msk [vmem:[#allocation2 + $0x228] sm:$0xff] %vm1506_vm0, %v2912_v14  ;;  %3791 = vmatmul.bf16.gmra.mxu3 %v10387_v52  ;;  %v2779_v25 = vpop.f32.mrf.mxu2 }
 0x442   : > { %4479 = vst [vmem:[#allocation2 + $0x230] sm:$0xff] %v4367_v55 }
 0x443   : > { %v3647_v31 = vpop.f32.mrf.mxu0 }
 0x444   : > { %v2828_v24 = vpop.f32.mrf.mxu3  ;;  %v3696_v37 = vpop.f32.mrf.mxu1 }
 0x445   : > { %v2829_v28 = vadd.f32 %v2828_v24, %v2779_v25  ;;  %v3697_v23 = vadd.f32 %v3696_v37, %v3647_v31 }
 0x447   : > { %v2919_v0 = vadd.f32 %v2829_v28, %v1689_v35  ;;  %v4374_v61 = vadd.f32 %v3697_v23, %v3144_v7  ;;  %v1710_v35 = vld [vmem:[#allocation2 + $0x308] sm:$0xff]  ;;  %v3165_v7 = vld [vmem:[#allocation2 + $0x310] sm:$0xff] }
 0x449   : > { %3031 = vst.msk [vmem:[#allocation2 + $0x260] sm:$0xff] %vm1506_vm0, %v2919_v0  ;;  %v2781_v39 = vpop.f32.mrf.mxu2 }
 0x44a   : > { %4486 = vst [vmem:[#allocation2 + $0x268] sm:$0xff] %v4374_v61 }
 0x44b   : > { %v3650_v27 = vpop.f32.mrf.mxu0 }
 0x44c   : > { %v2830_v41 = vpop.f32.mrf.mxu3  ;;  %v3699_v4 = vpop.f32.mrf.mxu1 }
 0x44d   : > { %v2831_v8 = vadd.f32 %v2830_v41, %v2781_v39  ;;  %v3700_v9 = vadd.f32 %v3699_v4, %v3650_v27 }
 0x44e   : > { %3747 = vmatmul.bf16.gmra.mxu2 %v10418_v16  ;;  %3845 = vmatmul.bf16.gmra.mxu0 %v10418_v16 }
 0x44f   : > { %v2926_v48 = vadd.f32 %v2831_v8, %v1696_v30  ;;  %v4381_v56 = vadd.f32 %v3700_v9, %v3151_v50  ;;  %3894 = vmatmul.bf16.gmra.mxu1 %v10423_v19  ;;  %v1717_v30 = vld [vmem:[#allocation2 + $0x340] sm:$0xff]  ;;  %v3172_v50 = vld [vmem:[#allocation2 + $0x348] sm:$0xff] }
 0x451   : > { %3038 = vst.msk [vmem:[#allocation2 + $0x298] sm:$0xff] %vm1506_vm0, %v2926_v48  ;;  %3796 = vmatmul.bf16.gmra.mxu3 %v10423_v19  ;;  %v2784_v59 = vpop.f32.mrf.mxu2 }
 0x452   : > { %4493 = vst [vmem:[#allocation2 + $0x2a0] sm:$0xff] %v4381_v56 }
 0x453   : > { %v3652_v57 = vpop.f32.mrf.mxu0 }
 0x454   : > { %v2833_v51 = vpop.f32.mrf.mxu3  ;;  %v3701_v13 = vpop.f32.mrf.mxu1 }
 0x455   : > { %v2834_v10 = vadd.f32 %v2833_v51, %v2784_v59  ;;  %v3702_v53 = vadd.f32 %v3701_v13, %v3652_v57 }
 0x457   : > { %v2933_v14 = vadd.f32 %v2834_v10, %v1703_v63  ;;  %v4388_v55 = vadd.f32 %v3702_v53, %v3158_v15  ;;  %v1724_v63 = vld [vmem:[#allocation2 + $0x378] sm:$0xff]  ;;  %v3069_v15 = vld [vmem:[#allocation2 + $0x10] sm:$0xff] }
 0x459   : > { %3045 = vst.msk [vmem:[#allocation2 + $0x2d0] sm:$0xff] %vm1506_vm0, %v2933_v14  ;;  %v2786_v25 = vpop.f32.mrf.mxu2 }
 0x45a   : > { %4500 = vst [vmem:[#allocation2 + $0x2d8] sm:$0xff] %v4388_v55 }
 0x45b   : > { %v3655_v31 = vpop.f32.mrf.mxu0 }
 0x45c   : > { %v2835_v24 = vpop.f32.mrf.mxu3  ;;  %v3704_v37 = vpop.f32.mrf.mxu1 }
 0x45d   : > { %v2836_v28 = vadd.f32 %v2835_v24, %v2786_v25  ;;  %v3705_v23 = vadd.f32 %v3704_v37, %v3655_v31 }
 0x45e   : > { %3752 = vmatmul.bf16.gmra.mxu2 %v10454_v22  ;;  %3850 = vmatmul.bf16.gmra.mxu0 %v10454_v22 }
 0x45f   : > { %v2940_v0 = vadd.f32 %v2836_v28, %v1710_v35  ;;  %v4395_v61 = vadd.f32 %v3705_v23, %v3165_v7  ;;  %3899 = vmatmul.bf16.gmra.mxu1 %v10459_v11  ;;  %v3068_v35 = vld [vmem:[#allocation2 + $0x8] sm:$0xff] }
 0x460   : > { %v3076_v7 = vld [vmem:[#allocation2 + $0x48] sm:$0xff] }
 0x461   : > { %3052 = vst.msk [vmem:[#allocation2 + $0x308] sm:$0xff] %vm1506_vm0, %v2940_v0  ;;  %3801 = vmatmul.bf16.gmra.mxu3 %v10459_v11  ;;  %v2789_v39 = vpop.f32.mrf.mxu2 }
 0x462   : > { %4507 = vst [vmem:[#allocation2 + $0x310] sm:$0xff] %v4395_v61 }
 0x463   : > { %v3657_v27 = vpop.f32.mrf.mxu0 }
 0x464   : > { %v2838_v41 = vpop.f32.mrf.mxu3  ;;  %v3706_v4 = vpop.f32.mrf.mxu1 }
 0x465   : > { %v2839_v8 = vadd.f32 %v2838_v41, %v2789_v39  ;;  %v3707_v9 = vadd.f32 %v3706_v4, %v3657_v27 }
 0x467   : > { %v2947_v48 = vadd.f32 %v2839_v8, %v1717_v30  ;;  %v4402_v56 = vadd.f32 %v3707_v9, %v3172_v50  ;;  %v3075_v30 = vld [vmem:[#allocation2 + $0x40] sm:$0xff] }
 0x468   : > { %v3083_v50 = vld [vmem:[#allocation2 + $0x80] sm:$0xff] }
 0x469   : > { %3059 = vst.msk [vmem:[#allocation2 + $0x340] sm:$0xff] %vm1506_vm0, %v2947_v48  ;;  %v2791_v59 = vpop.f32.mrf.mxu2 }
 0x46a   : > { %4514 = vst [vmem:[#allocation2 + $0x348] sm:$0xff] %v4402_v56 }
 0x46b   : > { %v3816_v57 = vpop.f32.mrf.mxu0 }
 0x46c   : > { %v2840_v51 = vpop.f32.mrf.mxu3  ;;  %v3865_v13 = vpop.f32.mrf.mxu1 }
 0x46d   : > { %v2841_v10 = vadd.f32 %v2840_v51, %v2791_v59  ;;  %v3866_v53 = vadd.f32 %v3865_v13, %v3816_v57 }
 0x46e   : > { %3913 = vmatmul.bf16.vlgmr.msrb.gmra.mxu2 %v10202_v42  ;;  %4011 = vmatmul.bf16.vlgmr.msrb.gmra.mxu0 %v10202_v42 }
 0x46f   : > { %v2954_v14 = vadd.f32 %v2841_v10, %v1724_v63  ;;  %v4299_v55 = vadd.f32 %v3866_v53, %v3069_v15  ;;  %4060 = vmatmul.bf16.vlgmr.msrb.gmra.mxu1 %v10207_v45  ;;  %v3082_v63 = vld [vmem:[#allocation2 + $0x78] sm:$0xff]  ;;  %5065 = vmatpush.bf16.msrb.mxu2 %v4922_v26  ;;  %v4916_v26 = vpack.c.bf16 %v4741_v29, %v4734_v18 }
 0x470   : > { %v3090_v15 = vld [vmem:[#allocation2 + $0xb8] sm:$0xff]  ;;  %5163 = vmatpush.bf16.msrb.mxu0 %v4923_v3  ;;  %5212 = vmatpush.bf16.msrb.mxu1 %v4979_v46 }
 0x471   : > { %3066 = vst.msk [vmem:[#allocation2 + $0x378] sm:$0xff] %vm1506_vm0, %v2954_v14  ;;  %3962 = vmatmul.bf16.vlgmr.msrb.gmra.mxu3 %v10207_v45  ;;  %v3718_v25 = vpop.f32.mrf.mxu2 }
 0x472   : > { %4411 = vst [vmem:[#allocation2 + $0x10] sm:$0xff] %v4299_v55  ;;  %5114 = vmatpush.bf16.msrb.mxu3 %v4978_v33  ;;  %v4972_v33 = vpack.c.bf16 %v4853_v38, %v4846_v34  ;;  %v3084_v38 = vld [vmem:[#allocation2 + $0x88] sm:$0xff] }
 0x473   : > { %v3818_v31 = vpop.f32.mrf.mxu0  ;;  %5066 = vmatpush.bf16.msrb.mxu2 %v4915_v58 }
 0x474   : > { %v3767_v24 = vpop.f32.mrf.mxu3  ;;  %v3867_v37 = vpop.f32.mrf.mxu1  ;;  %5164 = vmatpush.bf16.msrb.mxu0 %v4916_v26  ;;  %5213 = vmatpush.bf16.msrb.mxu1 %v4972_v33 }
 0x475   : > { %v3768_v28 = vadd.f32 %v3767_v24, %v3718_v25  ;;  %v3868_v23 = vadd.f32 %v3867_v37, %v3818_v31 }
 0x476   : > { %5115 = vmatpush.bf16.msrb.mxu3 %v4971_v12 }
 0x477   : > { %v4298_v0 = vadd.f32 %v3768_v28, %v3068_v35  ;;  %v4306_v61 = vadd.f32 %v3868_v23, %v3076_v7  ;;  %v3089_v35 = vld [vmem:[#allocation2 + $0xb0] sm:$0xff] }
 0x478   : > { %v3097_v7 = vld [vmem:[#allocation2 + $0xf0] sm:$0xff] }
 0x479   : > { %4410 = vst [vmem:[#allocation2 + $0x8] sm:$0xff] %v4298_v0  ;;  %v3720_v39 = vpop.f32.mrf.mxu2 }
 0x47a   : > { %4418 = vst [vmem:[#allocation2 + $0x48] sm:$0xff] %v4306_v61 }
 0x47b   : > { %v3821_v27 = vpop.f32.mrf.mxu0 }
 0x47c   : > { %v3769_v41 = vpop.f32.mrf.mxu3  ;;  %v3870_v4 = vpop.f32.mrf.mxu1 }
 0x47d   : > { %v3770_v8 = vadd.f32 %v3769_v41, %v3720_v39  ;;  %v3871_v9 = vadd.f32 %v3870_v4, %v3821_v27 }
 0x47e   : > { %3918 = vmatmul.bf16.gmra.mxu2 %v10238_v32  ;;  %4016 = vmatmul.bf16.gmra.mxu0 %v10238_v32 }
 0x47f   : > { %v4305_v48 = vadd.f32 %v3770_v8, %v3075_v30  ;;  %v4313_v56 = vadd.f32 %v3871_v9, %v3083_v50  ;;  %4065 = vmatmul.bf16.gmra.mxu1 %v10243_v21  ;;  %v3096_v30 = vld [vmem:[#allocation2 + $0xe8] sm:$0xff] }
 0x480   : > { %v3104_v50 = vld [vmem:[#allocation2 + $0x128] sm:$0xff] }
 0x481   : > { %4417 = vst [vmem:[#allocation2 + $0x40] sm:$0xff] %v4305_v48  ;;  %3967 = vmatmul.bf16.gmra.mxu3 %v10243_v21  ;;  %v3723_v59 = vpop.f32.mrf.mxu2 }
 0x482   : > { %4425 = vst [vmem:[#allocation2 + $0x80] sm:$0xff] %v4313_v56 }
 0x483   : > { %v3823_v57 = vpop.f32.mrf.mxu0 }
 0x484   : > { %v3772_v51 = vpop.f32.mrf.mxu3  ;;  %v3872_v13 = vpop.f32.mrf.mxu1 }
 0x485   : > { %v3773_v10 = vadd.f32 %v3772_v51, %v3723_v59  ;;  %v3873_v53 = vadd.f32 %v3872_v13, %v3823_v57 }
 0x487   : > { %v4312_v14 = vadd.f32 %v3773_v10, %v3082_v63  ;;  %v4320_v55 = vadd.f32 %v3873_v53, %v3090_v15  ;;  %v3103_v63 = vld [vmem:[#allocation2 + $0x120] sm:$0xff] }
 0x488   : > { %v3111_v15 = vld [vmem:[#allocation2 + $0x160] sm:$0xff] }
 0x489   : > { %4424 = vst [vmem:[#allocation2 + $0x78] sm:$0xff] %v4312_v14  ;;  %v3725_v25 = vpop.f32.mrf.mxu2 }
 0x48a   : > { %4432 = vst [vmem:[#allocation2 + $0xb8] sm:$0xff] %v4320_v55 }
 0x48b   : > { %v3826_v31 = vpop.f32.mrf.mxu0 }
 0x48c   : > { %v3774_v24 = vpop.f32.mrf.mxu3  ;;  %v3875_v37 = vpop.f32.mrf.mxu1 }
 0x48d   : > { %v3775_v28 = vadd.f32 %v3774_v24, %v3725_v25  ;;  %v3876_v23 = vadd.f32 %v3875_v37, %v3826_v31 }
 0x48e   : > { %3923 = vmatmul.bf16.gmra.mxu2 %v10274_v6  ;;  %4021 = vmatmul.bf16.gmra.mxu0 %v10274_v6 }
 0x48f   : > { %v4319_v0 = vadd.f32 %v3775_v28, %v3089_v35  ;;  %v4327_v61 = vadd.f32 %v3876_v23, %v3097_v7  ;;  %4070 = vmatmul.bf16.gmra.mxu1 %v10279_v17  ;;  %v3110_v35 = vld [vmem:[#allocation2 + $0x158] sm:$0xff] }
 0x490   : > { %v3118_v7 = vld [vmem:[#allocation2 + $0x198] sm:$0xff] }
 0x491   : > { %4431 = vst [vmem:[#allocation2 + $0xb0] sm:$0xff] %v4319_v0  ;;  %3972 = vmatmul.bf16.gmra.mxu3 %v10279_v17  ;;  %v3728_v39 = vpop.f32.mrf.mxu2 }
 0x492   : > { %4439 = vst [vmem:[#allocation2 + $0xf0] sm:$0xff] %v4327_v61 }
 0x493   : > { %v3828_v27 = vpop.f32.mrf.mxu0 }
 0x494   : > { %v3777_v41 = vpop.f32.mrf.mxu3  ;;  %v3877_v4 = vpop.f32.mrf.mxu1 }
 0x495   : > { %v3778_v8 = vadd.f32 %v3777_v41, %v3728_v39  ;;  %v3878_v9 = vadd.f32 %v3877_v4, %v3828_v27 }
 0x497   : > { %v4326_v48 = vadd.f32 %v3778_v8, %v3096_v30  ;;  %v4334_v56 = vadd.f32 %v3878_v9, %v3104_v50  ;;  %v3117_v30 = vld [vmem:[#allocation2 + $0x190] sm:$0xff] }
 0x498   : > { %v3125_v50 = vld [vmem:[#allocation2 + $0x1d0] sm:$0xff] }
 0x499   : > { %4438 = vst [vmem:[#allocation2 + $0xe8] sm:$0xff] %v4326_v48  ;;  %v3730_v59 = vpop.f32.mrf.mxu2 }
 0x49a   : > { %4446 = vst [vmem:[#allocation2 + $0x128] sm:$0xff] %v4334_v56 }
 0x49b   : > { %v3831_v57 = vpop.f32.mrf.mxu0 }
 0x49c   : > { %v3779_v51 = vpop.f32.mrf.mxu3  ;;  %v3880_v13 = vpop.f32.mrf.mxu1 }
 0x49d   : > { %v3780_v10 = vadd.f32 %v3779_v51, %v3730_v59  ;;  %v3881_v53 = vadd.f32 %v3880_v13, %v3831_v57 }
 0x49e   : > { %3928 = vmatmul.bf16.gmra.mxu2 %v10310_v20  ;;  %4026 = vmatmul.bf16.gmra.mxu0 %v10310_v20 }
 0x49f   : > { %v4333_v14 = vadd.f32 %v3780_v10, %v3103_v63  ;;  %v4341_v55 = vadd.f32 %v3881_v53, %v3111_v15  ;;  %4075 = vmatmul.bf16.gmra.mxu1 %v10315_v5  ;;  %v3124_v63 = vld [vmem:[#allocation2 + $0x1c8] sm:$0xff] }
 0x4a0   : > { %v3132_v15 = vld [vmem:[#allocation2 + $0x208] sm:$0xff] }
 0x4a1   : > { %4445 = vst [vmem:[#allocation2 + $0x120] sm:$0xff] %v4333_v14  ;;  %3977 = vmatmul.bf16.gmra.mxu3 %v10315_v5  ;;  %v3733_v25 = vpop.f32.mrf.mxu2 }
 0x4a2   : > { %4453 = vst [vmem:[#allocation2 + $0x160] sm:$0xff] %v4341_v55 }
 0x4a3   : > { %v3833_v31 = vpop.f32.mrf.mxu0 }
 0x4a4   : > { %v3782_v24 = vpop.f32.mrf.mxu3  ;;  %v3882_v37 = vpop.f32.mrf.mxu1 }
 0x4a5   : > { %v3783_v28 = vadd.f32 %v3782_v24, %v3733_v25  ;;  %v3883_v23 = vadd.f32 %v3882_v37, %v3833_v31 }
 0x4a7   : > { %v4340_v0 = vadd.f32 %v3783_v28, %v3110_v35  ;;  %v4348_v61 = vadd.f32 %v3883_v23, %v3118_v7  ;;  %v3131_v35 = vld [vmem:[#allocation2 + $0x200] sm:$0xff] }
 0x4a8   : > { %v3139_v7 = vld [vmem:[#allocation2 + $0x240] sm:$0xff] }
 0x4a9   : > { %4452 = vst [vmem:[#allocation2 + $0x158] sm:$0xff] %v4340_v0  ;;  %v3735_v39 = vpop.f32.mrf.mxu2 }
 0x4aa   : > { %4460 = vst [vmem:[#allocation2 + $0x198] sm:$0xff] %v4348_v61 }
 0x4ab   : > { %v3836_v27 = vpop.f32.mrf.mxu0 }
 0x4ac   : > { %v3784_v41 = vpop.f32.mrf.mxu3  ;;  %v3885_v4 = vpop.f32.mrf.mxu1 }
 0x4ad   : > { %v3785_v8 = vadd.f32 %v3784_v41, %v3735_v39  ;;  %v3886_v9 = vadd.f32 %v3885_v4, %v3836_v27 }
 0x4ae   : > { %3933 = vmatmul.bf16.gmra.mxu2 %v10346_v44  ;;  %4031 = vmatmul.bf16.gmra.mxu0 %v10346_v44 }
 0x4af   : > { %v4347_v48 = vadd.f32 %v3785_v8, %v3117_v30  ;;  %v4355_v56 = vadd.f32 %v3886_v9, %v3125_v50  ;;  %4080 = vmatmul.bf16.gmra.mxu1 %v10351_v47  ;;  %v3138_v30 = vld [vmem:[#allocation2 + $0x238] sm:$0xff] }
 0x4b0   : > { %v3146_v50 = vld [vmem:[#allocation2 + $0x278] sm:$0xff] }
 0x4b1   : > { %4459 = vst [vmem:[#allocation2 + $0x190] sm:$0xff] %v4347_v48  ;;  %3982 = vmatmul.bf16.gmra.mxu3 %v10351_v47  ;;  %v3738_v59 = vpop.f32.mrf.mxu2 }
 0x4b2   : > { %4467 = vst [vmem:[#allocation2 + $0x1d0] sm:$0xff] %v4355_v56 }
 0x4b3   : > { %v3838_v57 = vpop.f32.mrf.mxu0 }
 0x4b4   : > { %v3787_v51 = vpop.f32.mrf.mxu3  ;;  %v3887_v13 = vpop.f32.mrf.mxu1 }
 0x4b5   : > { %v3788_v10 = vadd.f32 %v3787_v51, %v3738_v59  ;;  %v3888_v53 = vadd.f32 %v3887_v13, %v3838_v57 }
 0x4b7   : > { %v4354_v14 = vadd.f32 %v3788_v10, %v3124_v63  ;;  %v4362_v55 = vadd.f32 %v3888_v53, %v3132_v15  ;;  %v3145_v63 = vld [vmem:[#allocation2 + $0x270] sm:$0xff] }
 0x4b8   : > { %v3153_v15 = vld [vmem:[#allocation2 + $0x2b0] sm:$0xff] }
 0x4b9   : > { %4466 = vst [vmem:[#allocation2 + $0x1c8] sm:$0xff] %v4354_v14  ;;  %v3740_v25 = vpop.f32.mrf.mxu2 }
 0x4ba   : > { %4474 = vst [vmem:[#allocation2 + $0x208] sm:$0xff] %v4362_v55 }
 0x4bb   : > { %v3841_v31 = vpop.f32.mrf.mxu0 }
 0x4bc   : > { %v3789_v24 = vpop.f32.mrf.mxu3  ;;  %v3890_v37 = vpop.f32.mrf.mxu1 }
 0x4bd   : > { %v3790_v28 = vadd.f32 %v3789_v24, %v3740_v25  ;;  %v3891_v23 = vadd.f32 %v3890_v37, %v3841_v31 }
 0x4be   : > { %3938 = vmatmul.bf16.gmra.mxu2 %v10382_v36  ;;  %4036 = vmatmul.bf16.gmra.mxu0 %v10382_v36 }
 0x4bf   : > { %v4361_v0 = vadd.f32 %v3790_v28, %v3131_v35  ;;  %v4369_v61 = vadd.f32 %v3891_v23, %v3139_v7  ;;  %4085 = vmatmul.bf16.gmra.mxu1 %v10387_v52  ;;  %v3152_v35 = vld [vmem:[#allocation2 + $0x2a8] sm:$0xff] }
 0x4c0   : > { %v3160_v7 = vld [vmem:[#allocation2 + $0x2e8] sm:$0xff] }
 0x4c1   : > { %4473 = vst [vmem:[#allocation2 + $0x200] sm:$0xff] %v4361_v0  ;;  %3987 = vmatmul.bf16.gmra.mxu3 %v10387_v52  ;;  %v3743_v39 = vpop.f32.mrf.mxu2 }
 0x4c2   : > { %4481 = vst [vmem:[#allocation2 + $0x240] sm:$0xff] %v4369_v61 }
 0x4c3   : > { %v3843_v27 = vpop.f32.mrf.mxu0 }
 0x4c4   : > { %v3792_v41 = vpop.f32.mrf.mxu3  ;;  %v3892_v4 = vpop.f32.mrf.mxu1 }
 0x4c5   : > { %v3793_v8 = vadd.f32 %v3792_v41, %v3743_v39  ;;  %v3893_v9 = vadd.f32 %v3892_v4, %v3843_v27 }
 0x4c7   : > { %v4368_v48 = vadd.f32 %v3793_v8, %v3138_v30  ;;  %v4376_v56 = vadd.f32 %v3893_v9, %v3146_v50  ;;  %v3159_v30 = vld [vmem:[#allocation2 + $0x2e0] sm:$0xff] }
 0x4c8   : > { %v3167_v50 = vld [vmem:[#allocation2 + $0x320] sm:$0xff] }
 0x4c9   : > { %4480 = vst [vmem:[#allocation2 + $0x238] sm:$0xff] %v4368_v48  ;;  %v3745_v59 = vpop.f32.mrf.mxu2 }
 0x4ca   : > { %4488 = vst [vmem:[#allocation2 + $0x278] sm:$0xff] %v4376_v56 }
 0x4cb   : > { %v3846_v57 = vpop.f32.mrf.mxu0 }
 0x4cc   : > { %v3794_v51 = vpop.f32.mrf.mxu3  ;;  %v3895_v13 = vpop.f32.mrf.mxu1 }
 0x4cd   : > { %v3795_v10 = vadd.f32 %v3794_v51, %v3745_v59  ;;  %v3896_v53 = vadd.f32 %v3895_v13, %v3846_v57 }
 0x4ce   : > { %3943 = vmatmul.bf16.gmra.mxu2 %v10418_v16  ;;  %4041 = vmatmul.bf16.gmra.mxu0 %v10418_v16 }
 0x4cf   : > { %v4375_v14 = vadd.f32 %v3795_v10, %v3145_v63  ;;  %v4383_v55 = vadd.f32 %v3896_v53, %v3153_v15  ;;  %4090 = vmatmul.bf16.gmra.mxu1 %v10423_v19  ;;  %v3166_v63 = vld [vmem:[#allocation2 + $0x318] sm:$0xff] }
 0x4d0   : > { %v3174_v15 = vld [vmem:[#allocation2 + $0x358] sm:$0xff] }
 0x4d1   : > { %4487 = vst [vmem:[#allocation2 + $0x270] sm:$0xff] %v4375_v14  ;;  %3992 = vmatmul.bf16.gmra.mxu3 %v10423_v19  ;;  %v3748_v25 = vpop.f32.mrf.mxu2 }
 0x4d2   : > { %4495 = vst [vmem:[#allocation2 + $0x2b0] sm:$0xff] %v4383_v55 }
 0x4d3   : > { %v3848_v31 = vpop.f32.mrf.mxu0 }
 0x4d4   : > { %v3797_v24 = vpop.f32.mrf.mxu3  ;;  %v3897_v37 = vpop.f32.mrf.mxu1 }
 0x4d5   : > { %v3798_v28 = vadd.f32 %v3797_v24, %v3748_v25  ;;  %v3898_v23 = vadd.f32 %v3897_v37, %v3848_v31 }
 0x4d7   : > { %v4382_v0 = vadd.f32 %v3798_v28, %v3152_v35  ;;  %v4390_v61 = vadd.f32 %v3898_v23, %v3160_v7  ;;  %v3173_v35 = vld [vmem:[#allocation2 + $0x350] sm:$0xff]  ;;  %v3071_v7 = vld [vmem:[#allocation2 + $0x20] sm:$0xff] }
 0x4d9   : > { %4494 = vst [vmem:[#allocation2 + $0x2a8] sm:$0xff] %v4382_v0  ;;  %v3750_v39 = vpop.f32.mrf.mxu2 }
 0x4da   : > { %4502 = vst [vmem:[#allocation2 + $0x2e8] sm:$0xff] %v4390_v61 }
 0x4db   : > { %v3851_v27 = vpop.f32.mrf.mxu0 }
 0x4dc   : > { %v3799_v41 = vpop.f32.mrf.mxu3  ;;  %v3900_v4 = vpop.f32.mrf.mxu1 }
 0x4dd   : > { %v3800_v8 = vadd.f32 %v3799_v41, %v3750_v39  ;;  %v3901_v9 = vadd.f32 %v3900_v4, %v3851_v27  ;;  %v4908_v41 = vpack.c.bf16 %v4726_v40, %v4719_v1  ;;  %v3070_v27 = vld [vmem:[#allocation2 + $0x18] sm:$0xff]  ;;  %v4825_v40 = vld [vmem:[%s12827_s3 + $0x580] sm:$0xff] }
 0x4de   : > { %3948 = vmatmul.bf16.gmra.mxu2 %v10454_v22  ;;  %4046 = vmatmul.bf16.gmra.mxu0 %v10454_v22 }
 0x4df   : > { %v4389_v48 = vadd.f32 %v3800_v8, %v3159_v30  ;;  %v4397_v56 = vadd.f32 %v3901_v9, %v3167_v50  ;;  %4095 = vmatmul.bf16.gmra.mxu1 %v10459_v11  ;;  %5067 = vmatpush.bf16.msrb.mxu2 %v4908_v41 }
 0x4e1   : > { %4501 = vst [vmem:[#allocation2 + $0x2e0] sm:$0xff] %v4389_v48  ;;  %3997 = vmatmul.bf16.gmra.mxu3 %v10459_v11  ;;  %v3753_v59 = vpop.f32.mrf.mxu2  ;;  %v3078_v48 = vld [vmem:[#allocation2 + $0x58] sm:$0xff] }
 0x4e2   : > { %4509 = vst [vmem:[#allocation2 + $0x320] sm:$0xff] %v4397_v56  ;;  %v4720_v56 = vld [vmem:[%s12827_s3 + $0x238] sm:$0xff] }
 0x4e3   : > { %v3853_v57 = vpop.f32.mrf.mxu0 }
 0x4e4   : > { %v3802_v51 = vpop.f32.mrf.mxu3  ;;  %v3902_v13 = vpop.f32.mrf.mxu1 }
 0x4e5   : > { %v3803_v10 = vadd.f32 %v3802_v51, %v3753_v59  ;;  %v3903_v53 = vadd.f32 %v3902_v13, %v3853_v57  ;;  %v4727_v59 = vld [vmem:[%s12827_s3 + $0x270] sm:$0xff] }
 0x4e6   : > { %v4909_v2 = vpack.c.bf16 %v4727_v59, %v4720_v56  ;;  %v4839_v51 = vld [vmem:[%s12827_s3 + $0x5f0] sm:$0xff] }
 0x4e7   : > { %v4396_v14 = vadd.f32 %v3803_v10, %v3166_v63  ;;  %v4404_v55 = vadd.f32 %v3903_v53, %v3174_v15  ;;  %v4965_v10 = vpack.c.bf16 %v4839_v51, %v4832_v60  ;;  %v3077_v57 = vld [vmem:[#allocation2 + $0x50] sm:$0xff] }
 0x4e8   : > { %5165 = vmatpush.bf16.msrb.mxu0 %v4909_v2 }
 0x4e9   : > { %4508 = vst [vmem:[#allocation2 + $0x318] sm:$0xff] %v4396_v14  ;;  %v3755_v25 = vpop.f32.mrf.mxu2  ;;  %5214 = vmatpush.bf16.msrb.mxu1 %v4965_v10  ;;  %v3085_v14 = vld [vmem:[#allocation2 + $0x90] sm:$0xff] }
 0x4ea   : > { %4516 = vst [vmem:[#allocation2 + $0x358] sm:$0xff] %v4404_v55  ;;  %v4705_v55 = vld [vmem:[%s12827_s3 + $0x1c0] sm:$0xff] }
 0x4eb   : > { %v4012_v31 = vpop.f32.mrf.mxu0 }
 0x4ec   : > { %v3804_v24 = vpop.f32.mrf.mxu3  ;;  %v4061_v37 = vpop.f32.mrf.mxu1 }
 0x4ed   : > { %v3805_v28 = vadd.f32 %v3804_v24, %v3755_v25  ;;  %v4062_v23 = vadd.f32 %v4061_v37, %v4012_v31  ;;  %v4712_v25 = vld [vmem:[%s12827_s3 + $0x1f8] sm:$0xff] }
 0x4ee   : > { %4109 = vmatmul.bf16.vlgmr.msra.gmra.mxu2 %v10202_v42  ;;  %4207 = vmatmul.bf16.vlgmr.msra.gmra.mxu0 %v10202_v42  ;;  %v4831_v42 = vld [vmem:[%s12827_s3 + $0x5b0] sm:$0xff]  ;;  %v4901_v29 = vpack.c.bf16 %v4712_v25, %v4705_v55 }
 0x4ef   : > { %v4403_v0 = vadd.f32 %v3805_v28, %v3173_v35  ;;  %v4301_v61 = vadd.f32 %v4062_v23, %v3071_v7  ;;  %4256 = vmatmul.bf16.vlgmr.msra.gmra.mxu1 %v10207_v45  ;;  %v3092_v35 = vld [vmem:[#allocation2 + $0xc8] sm:$0xff]  ;;  %v4713_v7 = vld [vmem:[%s12827_s3 + $0x200] sm:$0xff] }
 0x4f0   : > { %5068 = vmatpush.bf16.msrb.mxu2 %v4901_v29  ;;  %v4706_v23 = vld [vmem:[%s12827_s3 + $0x1c8] sm:$0xff] }
 0x4f1   : > { %4515 = vst [vmem:[#allocation2 + $0x350] sm:$0xff] %v4403_v0  ;;  %4158 = vmatmul.bf16.vlgmr.msra.gmra.mxu3 %v10207_v45  ;;  %v3914_v39 = vpop.f32.mrf.mxu2  ;;  %v4838_v45 = vld [vmem:[%s12827_s3 + $0x5e8] sm:$0xff]  ;;  %v4902_v1 = vpack.c.bf16 %v4713_v7, %v4706_v23 }
 0x4f2   : > { %4413 = vst [vmem:[#allocation2 + $0x20] sm:$0xff] %v4301_v61  ;;  %v4964_v8 = vpack.c.bf16 %v4838_v45, %v4831_v42  ;;  %v4818_v61 = vld [vmem:[%s12827_s3 + $0x548] sm:$0xff]  ;;  %v3091_v45 = vld [vmem:[#allocation2 + $0xc0] sm:$0xff] }
 0x4f3   : > { %v4014_v43 = vpop.f32.mrf.mxu0  ;;  %v4958_v41 = vpack.c.bf16 %v4825_v40, %v4818_v61  ;;  %5166 = vmatpush.bf16.msrb.mxu0 %v4902_v1  ;;  %v3112_v7 = vld [vmem:[#allocation2 + $0x168] sm:$0xff] }
 0x4f4   : > { %v3963_v54 = vpop.f32.mrf.mxu3  ;;  %v4063_v46 = vpop.f32.mrf.mxu1  ;;  %5116 = vmatpush.bf16.msrb.mxu3 %v4964_v8  ;;  %v3120_v40 = vld [vmem:[#allocation2 + $0x1a8] sm:$0xff] }
 0x4f5   : > { %v3964_v3 = vadd.f32 %v3963_v54, %v3914_v39  ;;  %v4064_v4 = vadd.f32 %v4063_v46, %v4014_v43  ;;  %5215 = vmatpush.bf16.msrb.mxu1 %v4958_v41  ;;  %v4678_v41 = vld [vmem:[%s12827_s3 + $0xe8] sm:$0xff] }
 0x4f7   : > { %v4300_v30 = vadd.f32 %v3964_v3, %v3070_v27  ;;  %v4308_v9 = vadd.f32 %v4064_v4, %v3078_v48  ;;  %v3099_v27 = vld [vmem:[#allocation2 + $0x100] sm:$0xff]  ;;  %v4691_v4 = vld [vmem:[%s12827_s3 + $0x150] sm:$0xff]  ;;  %v4698_v48 = vld [vmem:[%s12827_s3 + $0x188] sm:$0xff] }
 0x4f9   : > { %4412 = vst [vmem:[#allocation2 + $0x18] sm:$0xff] %v4300_v30  ;;  %v3916_v50 = vpop.f32.mrf.mxu2 }
 0x4fa   : > { %4420 = vst [vmem:[#allocation2 + $0x58] sm:$0xff] %v4308_v9 }
 0x4fb   : > { %v4017_v49 = vpop.f32.mrf.mxu0 }
 0x4fc   : > { %v3965_v62 = vpop.f32.mrf.mxu3  ;;  %v4066_v12 = vpop.f32.mrf.mxu1 }
 0x4fd   : > { %v3966_v58 = vadd.f32 %v3965_v62, %v3916_v50  ;;  %v4067_v13 = vadd.f32 %v4066_v12, %v4017_v49  ;;  %v4894_v50 = vpack.c.bf16 %v4698_v48, %v4691_v4  ;;  %v3098_v62 = vld [vmem:[#allocation2 + $0xf8] sm:$0xff]  ;;  %v3119_v48 = vld [vmem:[#allocation2 + $0x1a0] sm:$0xff] }
 0x4fe   : > { %4114 = vmatmul.bf16.gmra.mxu2 %v10238_v32  ;;  %4212 = vmatmul.bf16.gmra.mxu0 %v10238_v32  ;;  %v4817_v32 = vld [vmem:[%s12827_s3 + $0x540] sm:$0xff]  ;;  %v3106_v49 = vld [vmem:[#allocation2 + $0x138] sm:$0xff] }
 0x4ff   : > { %v4307_v63 = vadd.f32 %v3966_v58, %v3077_v57  ;;  %v4315_v53 = vadd.f32 %v4067_v13, %v3085_v14  ;;  %4261 = vmatmul.bf16.gmra.mxu1 %v10243_v21  ;;  %5069 = vmatpush.bf16.msrb.mxu2 %v4894_v50  ;;  %v4692_v12 = vld [vmem:[%s12827_s3 + $0x158] sm:$0xff] }
 0x500   : > { %v4804_v13 = vld [vmem:[%s12827_s3 + $0x4d8] sm:$0xff] }
 0x501   : > { %4419 = vst [vmem:[#allocation2 + $0x50] sm:$0xff] %v4307_v63  ;;  %4163 = vmatmul.bf16.gmra.mxu3 %v10243_v21  ;;  %v3919_v15 = vpop.f32.mrf.mxu2  ;;  %v4824_v21 = vld [vmem:[%s12827_s3 + $0x578] sm:$0xff]  ;;  %v4699_v63 = vld [vmem:[%s12827_s3 + $0x190] sm:$0xff] }
 0x502   : > { %4427 = vst [vmem:[#allocation2 + $0x90] sm:$0xff] %v4315_v53  ;;  %v4957_v26 = vpack.c.bf16 %v4824_v21, %v4817_v32  ;;  %v4895_v53 = vpack.c.bf16 %v4699_v63, %v4692_v12 }
 0x503   : > { %v4019_v24 = vpop.f32.mrf.mxu0 }
 0x504   : > { %v3968_v18 = vpop.f32.mrf.mxu3  ;;  %v4068_v28 = vpop.f32.mrf.mxu1  ;;  %5117 = vmatpush.bf16.msrb.mxu3 %v4957_v26  ;;  %5167 = vmatpush.bf16.msrb.mxu0 %v4895_v53 }
 0x505   : > { %v3969_v34 = vadd.f32 %v3968_v18, %v3919_v15  ;;  %v4069_v33 = vadd.f32 %v4068_v28, %v4019_v24  ;;  %v4811_v15 = vld [vmem:[%s12827_s3 + $0x510] sm:$0xff]  ;;  %v4677_v28 = vld [vmem:[%s12827_s3 + $0xe0] sm:$0xff] }
 0x506   : > { %v4951_v32 = vpack.c.bf16 %v4811_v15, %v4804_v13  ;;  %v3105_v18 = vld [vmem:[#allocation2 + $0x130] sm:$0xff] }
 0x507   : > { %v4314_v31 = vadd.f32 %v3969_v34, %v3084_v38  ;;  %v4322_v37 = vadd.f32 %v4069_v33, %v3092_v35  ;;  %v3113_v24 = vld [vmem:[#allocation2 + $0x170] sm:$0xff] }
 0x508   : > { %5216 = vmatpush.bf16.msrb.mxu1 %v4951_v32  ;;  %v4776_v32 = vld [vmem:[%s12827_s3 + $0x3f8] sm:$0xff] }
 0x509   : > { %4426 = vst [vmem:[#allocation2 + $0x88] sm:$0xff] %v4314_v31  ;;  %v3921_v0 = vpop.f32.mrf.mxu2  ;;  %v4684_v31 = vld [vmem:[%s12827_s3 + $0x118] sm:$0xff] }
 0x50a   : > { %4434 = vst [vmem:[#allocation2 + $0xc8] sm:$0xff] %v4322_v37  ;;  %v4887_v35 = vpack.c.bf16 %v4684_v31, %v4677_v28 }
 0x50b   : > { %v4022_v54 = vpop.f32.mrf.mxu0 }
 0x50c   : > { %v3970_v39 = vpop.f32.mrf.mxu3  ;;  %v4071_v3 = vpop.f32.mrf.mxu1  ;;  %5070 = vmatpush.bf16.msrb.mxu2 %v4887_v35 }
 0x50d   : > { %v3971_v42 = vadd.f32 %v3970_v39, %v3921_v0  ;;  %v4072_v8 = vadd.f32 %v4071_v3, %v4022_v54  ;;  %v4790_v3 = vld [vmem:[%s12827_s3 + $0x468] sm:$0xff] }
 0x50e   : > { %4119 = vmatmul.bf16.gmra.mxu2 %v10274_v6  ;;  %4217 = vmatmul.bf16.gmra.mxu0 %v10274_v6  ;;  %v4803_v6 = vld [vmem:[%s12827_s3 + $0x4d0] sm:$0xff] }
 0x50f   : > { %v4321_v43 = vadd.f32 %v3971_v42, %v3091_v45  ;;  %v4329_v46 = vadd.f32 %v4072_v8, %v3099_v27  ;;  %4266 = vmatmul.bf16.gmra.mxu1 %v10279_v17  ;;  %v4685_v45 = vld [vmem:[%s12827_s3 + $0x120] sm:$0xff] }
 0x510   : > { %v4888_v8 = vpack.c.bf16 %v4685_v45, %v4678_v41  ;;  %v4797_v27 = vld [vmem:[%s12827_s3 + $0x4a0] sm:$0xff]  ;;  %v3148_v45 = vld [vmem:[#allocation2 + $0x288] sm:$0xff] }
 0x511   : > { %4433 = vst [vmem:[#allocation2 + $0xc0] sm:$0xff] %v4321_v43  ;;  %4168 = vmatmul.bf16.gmra.mxu3 %v10279_v17  ;;  %v3924_v30 = vpop.f32.mrf.mxu2  ;;  %v4810_v17 = vld [vmem:[%s12827_s3 + $0x508] sm:$0xff]  ;;  %v4944_v4 = vpack.c.bf16 %v4797_v27, %v4790_v3  ;;  %v4657_v27 = vld [vmem:[%s12827_s3 + $0x40] sm:$0xff] }
 0x512   : > { %4441 = vst [vmem:[#allocation2 + $0x100] sm:$0xff] %v4329_v46  ;;  %v4950_v60 = vpack.c.bf16 %v4810_v17, %v4803_v6  ;;  %5168 = vmatpush.bf16.msrb.mxu0 %v4888_v8  ;;  %v3127_v17 = vld [vmem:[#allocation2 + $0x1e0] sm:$0xff]  ;;  %v4650_v8 = vld [vmem:[%s12827_s3 + $0x8] sm:$0xff] }
 0x513   : > { %v4024_v59 = vpop.f32.mrf.mxu0  ;;  %5217 = vmatpush.bf16.msrb.mxu1 %v4944_v4  ;;  %v4874_v4 = vpack.c.bf16 %v4657_v27, %v4650_v8  ;;  %v8200_v8 = vld [vmem:[%s8443_s20 + $0x3c] sm:$0xf0]  ;;  %v8199_v27 = vld [vmem:[%s8443_s20 + $0x1c] sm:$0xf] }
 0x514   : > { %v3973_v9 = vpop.f32.mrf.mxu3  ;;  %v4073_v2 = vpop.f32.mrf.mxu1  ;;  %5118 = vmatpush.bf16.msrb.mxu3 %v4950_v60  ;;  %v4663_v60 = vld [vmem:[%s12827_s3 + $0x70] sm:$0xff] }
 0x515   : > { %v3974_v56 = vadd.f32 %v3973_v9, %v3924_v30  ;;  %v4074_v58 = vadd.f32 %v4073_v2, %v4024_v59 }
 0x517   : > { %v4328_v51 = vadd.f32 %v3974_v56, %v3098_v62  ;;  %v4336_v10 = vadd.f32 %v4074_v58, %v3106_v49  ;;  %v4670_v62 = vld [vmem:[%s12827_s3 + $0xa8] sm:$0xff] }
 0x519   : > { %4440 = vst [vmem:[#allocation2 + $0xf8] sm:$0xff] %v4328_v51  ;;  %v3926_v57 = vpop.f32.mrf.mxu2  ;;  %v4880_v51 = vpack.c.bf16 %v4670_v62, %v4663_v60  ;;  %v3155_v62 = vld [vmem:[#allocation2 + $0x2c0] sm:$0xff] }
 0x51a   : > { %4448 = vst [vmem:[#allocation2 + $0x138] sm:$0xff] %v4336_v10 }
 0x51b   : > { %v4027_v25 = vpop.f32.mrf.mxu0  ;;  %5071 = vmatpush.bf16.msrb.mxu2 %v4880_v51  ;;  %v4749_v51 = vld [vmem:[%s12827_s3 + $0x320] sm:$0xff] }
 0x51c   : > { %v3975_v14 = vpop.f32.mrf.mxu3  ;;  %v4076_v29 = vpop.f32.mrf.mxu1 }
 0x51d   : > { %v3976_v55 = vadd.f32 %v3975_v14, %v3926_v57  ;;  %v4077_v34 = vadd.f32 %v4076_v29, %v4027_v25  ;;  %v3126_v57 = vld [vmem:[#allocation2 + $0x1d8] sm:$0xff]  ;;  %v4671_v25 = vld [vmem:[%s12827_s3 + $0xb0] sm:$0xff] }
 0x51e   : > { %4124 = vmatmul.bf16.gmra.mxu2 %v10310_v20  ;;  %4222 = vmatmul.bf16.gmra.mxu0 %v10310_v20  ;;  %v4789_v20 = vld [vmem:[%s12827_s3 + $0x460] sm:$0xff]  ;;  %v3134_v14 = vld [vmem:[#allocation2 + $0x218] sm:$0xff] }
 0x51f   : > { %v4335_v21 = vadd.f32 %v3976_v55, %v3105_v18  ;;  %v4343_v26 = vadd.f32 %v4077_v34, %v3113_v24  ;;  %4271 = vmatmul.bf16.gmra.mxu1 %v10315_v5  ;;  %v4664_v55 = vld [vmem:[%s12827_s3 + $0x78] sm:$0xff] }
 0x520   : > { %v4881_v29 = vpack.c.bf16 %v4671_v25, %v4664_v55 }
 0x521   : > { %4447 = vst [vmem:[#allocation2 + $0x130] sm:$0xff] %v4335_v21  ;;  %4173 = vmatmul.bf16.gmra.mxu3 %v10315_v5  ;;  %v3929_v38 = vpop.f32.mrf.mxu2  ;;  %v4796_v5 = vld [vmem:[%s12827_s3 + $0x498] sm:$0xff]  ;;  %v4783_v21 = vld [vmem:[%s12827_s3 + $0x430] sm:$0xff] }
 0x522   : > { %4455 = vst [vmem:[#allocation2 + $0x170] sm:$0xff] %v4343_v26  ;;  %v4943_v23 = vpack.c.bf16 %v4796_v5, %v4789_v20  ;;  %v4937_v26 = vpack.c.bf16 %v4783_v21, %v4776_v32  ;;  %5169 = vmatpush.bf16.msrb.mxu0 %v4881_v29  ;;  %v4750_v32 = vld [vmem:[%s12827_s3 + $0x328] sm:$0xff] }
 0x523   : > { %v4029_v0 = vpop.f32.mrf.mxu0  ;;  %v4862_v29 = vld [vmem:[%s12827_s3 + $0x6a8] sm:$0xff] }
 0x524   : > { %v3978_v33 = vpop.f32.mrf.mxu3  ;;  %v4078_v61 = vpop.f32.mrf.mxu1  ;;  %5119 = vmatpush.bf16.msrb.mxu3 %v4943_v23  ;;  %5218 = vmatpush.bf16.msrb.mxu1 %v4937_v26 }
 0x525   : > { %v3979_v37 = vadd.f32 %v3978_v33, %v3929_v38  ;;  %v4079_v1 = vadd.f32 %v4078_v61, %v4029_v0  ;;  %v3133_v38 = vld [vmem:[#allocation2 + $0x210] sm:$0xff]  ;;  %v4656_v0 = vld [vmem:[%s12827_s3 + $0x38] sm:$0xff] }
 0x526   : > { %v3141_v33 = vld [vmem:[#allocation2 + $0x250] sm:$0xff]  ;;  %5170 = vmatpush.bf16.msrb.mxu0 %v4874_v4  ;;  %v4736_v4 = vld [vmem:[%s12827_s3 + $0x2b8] sm:$0xff] }
 0x527   : > { %v4342_v39 = vadd.f32 %v3979_v37, %v3112_v7  ;;  %v4350_v42 = vadd.f32 %v4079_v1, %v3120_v40  ;;  %v4649_v37 = vld [vmem:[%s12827_s3] sm:$0xff]  ;;  %v3140_v40 = vld [vmem:[#allocation2 + $0x248] sm:$0xff] }
 0x528   : > { %v4873_v7 = vpack.c.bf16 %v4656_v0, %v4649_v37 }
 0x529   : > { %4454 = vst [vmem:[#allocation2 + $0x168] sm:$0xff] %v4342_v39  ;;  %v3931_v54 = vpop.f32.mrf.mxu2 }
 0x52a   : > { %4462 = vst [vmem:[#allocation2 + $0x1a8] sm:$0xff] %v4350_v42  ;;  %5072 = vmatpush.bf16.msrb.mxu2 %v4873_v7 }
 0x52b   : > { %v4032_v30 = vpop.f32.mrf.mxu0 }
 0x52c   : > { %v3980_v43 = vpop.f32.mrf.mxu3  ;;  %v4081_v6 = vpop.f32.mrf.mxu1 }
 0x52d   : > { %v3981_v46 = vadd.f32 %v3980_v43, %v3931_v54  ;;  %v4082_v50 = vadd.f32 %v4081_v6, %v4032_v30 }
 0x52e   : > { %4129 = vmatmul.bf16.gmra.mxu2 %v10346_v44  ;;  %4227 = vmatmul.bf16.gmra.mxu0 %v10346_v44  ;;  %v4775_v44 = vld [vmem:[%s12827_s3 + $0x3f0] sm:$0xff] }
 0x52f   : > { %v4349_v9 = vadd.f32 %v3981_v46, %v3119_v48  ;;  %v4357_v56 = vadd.f32 %v4082_v50, %v3127_v17  ;;  %4276 = vmatmul.bf16.gmra.mxu1 %v10351_v47  ;;  %v4762_v46 = vld [vmem:[%s12827_s3 + $0x388] sm:$0xff]  ;;  %v4769_v48 = vld [vmem:[%s12827_s3 + $0x3c0] sm:$0xff] }
 0x530   : > { %v4930_v50 = vpack.c.bf16 %v4769_v48, %v4762_v46  ;;  %v3147_v17 = vld [vmem:[#allocation2 + $0x280] sm:$0xff]  ;;  %v4743_v48 = vld [vmem:[%s12827_s3 + $0x2f0] sm:$0xff] }
 0x531   : > { %4461 = vst [vmem:[#allocation2 + $0x1a0] sm:$0xff] %v4349_v9  ;;  %4178 = vmatmul.bf16.gmra.mxu3 %v10351_v47  ;;  %v3934_v59 = vpop.f32.mrf.mxu2  ;;  %v4782_v47 = vld [vmem:[%s12827_s3 + $0x428] sm:$0xff]  ;;  %v8025_v46 = vld [vmem:[%s8443_s20 + $0x40] sm:$0xf0] }
 0x532   : > { %4469 = vst [vmem:[#allocation2 + $0x1e0] sm:$0xff] %v4357_v56  ;;  %v4936_v10 = vpack.c.bf16 %v4782_v47, %v4775_v44  ;;  %5219 = vmatpush.bf16.msrb.mxu1 %v4930_v50  ;;  %v4756_v47 = vld [vmem:[%s12827_s3 + $0x358] sm:$0xff] }
 0x533   : > { %v4034_v49 = vpop.f32.mrf.mxu0 }
 0x534   : > { %v3983_v2 = vpop.f32.mrf.mxu3  ;;  %v4083_v12 = vpop.f32.mrf.mxu1  ;;  %5120 = vmatpush.bf16.msrb.mxu3 %v4936_v10 }
 0x535   : > { %v3984_v58 = vadd.f32 %v3983_v2, %v3934_v59  ;;  %v4084_v13 = vadd.f32 %v4083_v12, %v4034_v49  ;;  %v4924_v49 = vpack.c.bf16 %v4756_v47, %v4749_v51 }
 0x537   : > { %v4356_v63 = vadd.f32 %v3984_v58, %v3126_v57  ;;  %v4364_v53 = vadd.f32 %v4084_v13, %v3134_v14  ;;  %5261 = vmatpush.bf16.msra.mxu2 %v4924_v49 }
 0x539   : > { %4468 = vst [vmem:[#allocation2 + $0x1d8] sm:$0xff] %v4356_v63  ;;  %v3936_v15 = vpop.f32.mrf.mxu2  ;;  %v3154_v63 = vld [vmem:[#allocation2 + $0x2b8] sm:$0xff] }
 0x53a   : > { %4476 = vst [vmem:[#allocation2 + $0x218] sm:$0xff] %v4364_v53 }
 0x53b   : > { %v4037_v24 = vpop.f32.mrf.mxu0 }
 0x53c   : > { %v3985_v18 = vpop.f32.mrf.mxu3  ;;  %v4086_v28 = vpop.f32.mrf.mxu1 }
 0x53d   : > { %v3986_v34 = vadd.f32 %v3985_v18, %v3936_v15  ;;  %v4087_v20 = vadd.f32 %v4086_v28, %v4037_v24  ;;  %v3162_v15 = vld [vmem:[#allocation2 + $0x2f8] sm:$0xff]  ;;  %v4757_v18 = vld [vmem:[%s12827_s3 + $0x360] sm:$0xff] }
 0x53e   : > { %4134 = vmatmul.bf16.gmra.mxu2 %v10382_v36  ;;  %4232 = vmatmul.bf16.gmra.mxu0 %v10382_v36  ;;  %v4761_v36 = vld [vmem:[%s12827_s3 + $0x380] sm:$0xff] }
 0x53f   : > { %v4363_v31 = vadd.f32 %v3986_v34, %v3133_v38  ;;  %v4371_v35 = vadd.f32 %v4087_v20, %v3141_v33  ;;  %4281 = vmatmul.bf16.gmra.mxu1 %v10387_v52  ;;  %v4925_v34 = vpack.c.bf16 %v4757_v18, %v4750_v32  ;;  %v4869_v24 = vld [vmem:[%s12827_s3 + $0x6e0] sm:$0xff] }
 0x540   : > { %v4981_v28 = vpack.c.bf16 %v4869_v24, %v4862_v29  ;;  %v8031_v24 = vld [vmem:[%s8443_s20 + $0x68] sm:$0xf] }
 0x541   : > { %4475 = vst [vmem:[#allocation2 + $0x210] sm:$0xff] %v4363_v31  ;;  %4183 = vmatmul.bf16.gmra.mxu3 %v10387_v52  ;;  %v3939_v5 = vpop.f32.mrf.mxu2  ;;  %v4768_v52 = vld [vmem:[%s12827_s3 + $0x3b8] sm:$0xff]  ;;  %v3161_v31 = vld [vmem:[#allocation2 + $0x2f0] sm:$0xff]  ;;  %5359 = vmatpush.bf16.msra.mxu0 %v4925_v34 }
 0x542   : > { %4483 = vst [vmem:[#allocation2 + $0x250] sm:$0xff] %v4371_v35  ;;  %v4929_v1 = vpack.c.bf16 %v4768_v52, %v4761_v36  ;;  %5408 = vmatpush.bf16.msra.mxu1 %v4981_v28  ;;  %v4735_v36 = vld [vmem:[%s12827_s3 + $0x2b0] sm:$0xff] }
 0x543   : > { %v4039_v39 = vpop.f32.mrf.mxu0  ;;  %v8033_v28 = vld [vmem:[%s8443_s20 + $0x90] sm:$0xf0] }
 0x544   : > { %v3988_v23 = vpop.f32.mrf.mxu3  ;;  %v4088_v42 = vpop.f32.mrf.mxu1  ;;  %5121 = vmatpush.bf16.msrb.mxu3 %v4929_v1 }
 0x545   : > { %v3989_v61 = vadd.f32 %v3988_v23, %v3939_v5  ;;  %v4089_v41 = vadd.f32 %v4088_v42, %v4039_v39  ;;  %v3169_v5 = vld [vmem:[#allocation2 + $0x330] sm:$0xff]  ;;  %v4742_v23 = vld [vmem:[%s12827_s3 + $0x2e8] sm:$0xff] }
 0x546   : > { %v4917_v52 = vpack.c.bf16 %v4742_v23, %v4735_v36  ;;  %v4841_v36 = vld [vmem:[%s12827_s3 + $0x600] sm:$0xff] }
 0x547   : > { %v4370_v54 = vadd.f32 %v3989_v61, %v3140_v40  ;;  %v4378_v3 = vadd.f32 %v4089_v41, %v3148_v45  ;;  %v3168_v40 = vld [vmem:[#allocation2 + $0x328] sm:$0xff] }
 0x548   : > { %5262 = vmatpush.bf16.msra.mxu2 %v4917_v52  ;;  %v3176_v45 = vld [vmem:[#allocation2 + $0x368] sm:$0xff] }
 0x549   : > { %4482 = vst [vmem:[#allocation2 + $0x248] sm:$0xff] %v4370_v54  ;;  %v3941_v43 = vpop.f32.mrf.mxu2 }
 0x54a   : > { %4490 = vst [vmem:[#allocation2 + $0x288] sm:$0xff] %v4378_v3 }
 0x54b   : > { %v4042_v9 = vpop.f32.mrf.mxu0 }
 0x54c   : > { %v3990_v30 = vpop.f32.mrf.mxu3  ;;  %v4091_v56 = vpop.f32.mrf.mxu1 }
 0x54d   : > { %v3991_v6 = vadd.f32 %v3990_v30, %v3941_v43  ;;  %v4092_v60 = vadd.f32 %v4091_v56, %v4042_v9  ;;  %v8023_v43 = vld [vmem:[%s8443_s20 + $0x18] sm:$0xf]  ;;  %v4855_v56 = vld [vmem:[%s12827_s3 + $0x670] sm:$0xff] }
 0x54e   : > { %4139 = vmatmul.bf16.gmra.mxu2 %v10418_v16  ;;  %4237 = vmatmul.bf16.gmra.mxu0 %v10418_v16  ;;  %v4861_v16 = vld [vmem:[%s12827_s3 + $0x6a0] sm:$0xff]  ;;  %v11178_v50 = vor.u32 %v8200_v8, %v8023_v43 }
 0x54f   : > { %v4377_v59 = vadd.f32 %v3991_v6, %v3147_v17  ;;  %v4385_v44 = vadd.f32 %v4092_v60, %v3155_v62  ;;  %4286 = vmatmul.bf16.gmra.mxu1 %v10423_v19  ;;  %v4848_v6 = vld [vmem:[%s12827_s3 + $0x638] sm:$0xff]  ;;  %v4918_v17 = vpack.c.bf16 %v4743_v48, %v4736_v4  ;;  %v11183_v62 = vor.u32 %v8199_v27, %v8025_v46  ;;  %v4826_v27 = vld [vmem:[%s12827_s3 + $0x588] sm:$0xff] }
 0x550   : > { %v3086_v48 = vld [vmem:[#allocation2 + $0x98] sm:$0xff] }
 0x551   : > { %4489 = vst [vmem:[#allocation2 + $0x280] sm:$0xff] %v4377_v59  ;;  %4188 = vmatmul.bf16.gmra.mxu3 %v10423_v19  ;;  %v3944_v2 = vpop.f32.mrf.mxu2  ;;  %v4868_v19 = vld [vmem:[%s12827_s3 + $0x6d8] sm:$0xff]  ;;  %5360 = vmatpush.bf16.msra.mxu0 %v4918_v17 }
 0x552   : > { %4497 = vst [vmem:[#allocation2 + $0x2c0] sm:$0xff] %v4385_v44  ;;  %v4980_v12 = vpack.c.bf16 %v4868_v19, %v4861_v16  ;;  %v4974_v44 = vpack.c.bf16 %v4855_v56, %v4848_v6  ;;  %v3094_v56 = vld [vmem:[#allocation2 + $0xd8] sm:$0xff] }
 0x553   : > { %v4044_v57 = vpop.f32.mrf.mxu0 }
 0x554   : > { %v3993_v58 = vpop.f32.mrf.mxu3  ;;  %v4093_v13 = vpop.f32.mrf.mxu1  ;;  %5310 = vmatpush.bf16.msra.mxu3 %v4980_v12  ;;  %5409 = vmatpush.bf16.msra.mxu1 %v4974_v44  ;;  %v4833_v12 = vld [vmem:[%s12827_s3 + $0x5c0] sm:$0xff] }
 0x555   : > { %v3994_v10 = vadd.f32 %v3993_v58, %v3944_v2  ;;  %v4094_v53 = vadd.f32 %v4093_v13, %v4044_v57  ;;  %v3175_v2 = vld [vmem:[#allocation2 + $0x360] sm:$0xff]  ;;  %v3073_v58 = vld [vmem:[#allocation2 + $0x30] sm:$0xff]  ;;  %v4728_v57 = vld [vmem:[%s12827_s3 + $0x278] sm:$0xff] }
 0x556   : > { %v8204_v44 = vld [vmem:[%s8443_s20 + $0xdc] sm:$0xf0] }
 0x557   : > { %v4384_v14 = vadd.f32 %v3994_v10, %v3154_v63  ;;  %v4392_v55 = vadd.f32 %v4094_v53, %v3162_v15  ;;  %v4721_v10 = vld [vmem:[%s12827_s3 + $0x240] sm:$0xff] }
 0x558   : > { %v4910_v13 = vpack.c.bf16 %v4728_v57, %v4721_v10 }
 0x559   : > { %4496 = vst [vmem:[#allocation2 + $0x2b8] sm:$0xff] %v4384_v14  ;;  %v3946_v25 = vpop.f32.mrf.mxu2  ;;  %v4840_v14 = vld [vmem:[%s12827_s3 + $0x5f8] sm:$0xff] }
 0x55a   : > { %4504 = vst [vmem:[#allocation2 + $0x2f8] sm:$0xff] %v4392_v55  ;;  %v4966_v55 = vpack.c.bf16 %v4840_v14, %v4833_v12  ;;  %5263 = vmatpush.bf16.msra.mxu2 %v4910_v13  ;;  %v4827_v12 = vld [vmem:[%s12827_s3 + $0x590] sm:$0xff] }
 0x55b   : > { %v4047_v38 = vpop.f32.mrf.mxu0 }
 0x55c   : > { %v3995_v21 = vpop.f32.mrf.mxu3  ;;  %v4096_v20 = vpop.f32.mrf.mxu1 }
 0x55d   : > { %v3996_v26 = vadd.f32 %v3995_v21, %v3946_v25  ;;  %v4097_v35 = vadd.f32 %v4096_v20, %v4047_v38  ;;  %v3072_v25 = vld [vmem:[#allocation2 + $0x28] sm:$0xff] }
 0x55e   : > { %4144 = vmatmul.bf16.gmra.mxu2 %v10454_v22  ;;  %4242 = vmatmul.bf16.gmra.mxu0 %v10454_v22  ;;  %v4847_v22 = vld [vmem:[%s12827_s3 + $0x630] sm:$0xff]  ;;  %v3080_v21 = vld [vmem:[#allocation2 + $0x68] sm:$0xff] }
 0x55f   : > { %v4391_v33 = vadd.f32 %v3996_v26, %v3161_v31  ;;  %v4399_v37 = vadd.f32 %v4097_v35, %v3169_v5  ;;  %4291 = vmatmul.bf16.gmra.mxu1 %v10459_v11  ;;  %v8202_v26 = vld [vmem:[%s8443_s20 + $0x8c] sm:$0xf0]  ;;  %v8201_v38 = vld [vmem:[%s8443_s20 + $0x6c] sm:$0xf] }
 0x560   : > { %v4722_v20 = vld [vmem:[%s12827_s3 + $0x248] sm:$0xff] }
 0x561   : > { %4503 = vst [vmem:[#allocation2 + $0x2f0] sm:$0xff] %v4391_v33  ;;  %4193 = vmatmul.bf16.gmra.mxu3 %v10459_v11  ;;  %v3949_v0 = vpop.f32.mrf.mxu2  ;;  %v4854_v11 = vld [vmem:[%s12827_s3 + $0x668] sm:$0xff]  ;;  %v4729_v33 = vld [vmem:[%s12827_s3 + $0x280] sm:$0xff] }
 0x562   : > { %4511 = vst [vmem:[#allocation2 + $0x330] sm:$0xff] %v4399_v37  ;;  %v4973_v1 = vpack.c.bf16 %v4854_v11, %v4847_v22  ;;  %v4834_v35 = vld [vmem:[%s12827_s3 + $0x5c8] sm:$0xff]  ;;  %v11216_v37 = vor.u32 %v8202_v26, %v8031_v24  ;;  %v3079_v11 = vld [vmem:[#allocation2 + $0x60] sm:$0xff]  ;;  %v4700_v24 = vld [vmem:[%s12827_s3 + $0x198] sm:$0xff] }
 0x563   : > { %v4049_v39 = vpop.f32.mrf.mxu0  ;;  %v4967_v52 = vpack.c.bf16 %v4841_v36, %v4834_v35  ;;  %v4805_v26 = vld [vmem:[%s12827_s3 + $0x4e0] sm:$0xff] }
 0x564   : > { %v3998_v7 = vpop.f32.mrf.mxu3  ;;  %v4098_v42 = vpop.f32.mrf.mxu1  ;;  %5311 = vmatpush.bf16.msra.mxu3 %v4973_v1 }
 0x565   : > { %v3999_v61 = vadd.f32 %v3998_v7, %v3949_v0  ;;  %v4099_v41 = vadd.f32 %v4098_v42, %v4049_v39  ;;  %v4911_v0 = vpack.c.bf16 %v4729_v33, %v4722_v20  ;;  %v11221_v7 = vor.u32 %v8201_v38, %v8033_v28  ;;  %5410 = vmatpush.bf16.msra.mxu1 %v4967_v52 }
 0x567   : > { %v4398_v54 = vadd.f32 %v3999_v61, %v3168_v40  ;;  %v4406_v3 = vadd.f32 %v4099_v41, %v3176_v45  ;;  %5361 = vmatpush.bf16.msra.mxu0 %v4911_v0  ;;  %v3087_v40 = vld [vmem:[#allocation2 + $0xa0] sm:$0xff]  ;;  %v4707_v41 = vld [vmem:[%s12827_s3 + $0x1d0] sm:$0xff]  ;;  %v4714_v45 = vld [vmem:[%s12827_s3 + $0x208] sm:$0xff] }
 0x568   : > { %5312 = vmatpush.bf16.msra.mxu3 %v4966_v55  ;;  %v4903_v8 = vpack.c.bf16 %v4714_v45, %v4707_v41  ;;  %v4806_v41 = vld [vmem:[%s12827_s3 + $0x4e8] sm:$0xff] }
 0x569   : > { %4510 = vst [vmem:[#allocation2 + $0x328] sm:$0xff] %v4398_v54  ;;  %v3951_v30 = vpop.f32.mrf.mxu2 }
 0x56a   : > { %4518 = vst [vmem:[#allocation2 + $0x368] sm:$0xff] %v4406_v3  ;;  %v4819_v3 = vld [vmem:[%s12827_s3 + $0x550] sm:$0xff]  ;;  %5264 = vmatpush.bf16.msra.mxu2 %v4903_v8  ;;  %v4813_v8 = vld [vmem:[%s12827_s3 + $0x520] sm:$0xff] }
 0x56b   : > { %v4208_v60 = vpop.f32.mrf.mxu0  ;;  %v4959_v4 = vpack.c.bf16 %v4826_v27, %v4819_v3 }
 0x56c   : > { %v4000_v9 = vpop.f32.mrf.mxu3  ;;  %v4257_v51 = vpop.f32.mrf.mxu1 }
 0x56d   : > { %v4001_v59 = vadd.f32 %v4000_v9, %v3951_v30  ;;  %v4258_v16 = vadd.f32 %v4257_v51, %v4208_v60  ;;  %5313 = vmatpush.bf16.msra.mxu3 %v4959_v4  ;;  %v8039_v60 = vld [vmem:[%s8443_s20 + $0xb8] sm:$0xf]  ;;  %v8041_v51 = vld [vmem:[%s8443_s20 + $0xe0] sm:$0xf0]  ;;  %v4953_v4 = vpack.c.bf16 %v4813_v8, %v4806_v41 }
 0x56e   : > { %5073 = vmatmul.bf16.vlgmr.msrb.gmra.mxu2 %v11178_v50  ;;  %5171 = vmatmul.bf16.vlgmr.msrb.gmra.mxu0 %v11178_v50  ;;  %v11254_v10 = vor.u32 %v8204_v44, %v8039_v60  ;;  %v4679_v44 = vld [vmem:[%s12827_s3 + $0xf0] sm:$0xff] }
 0x56f   : > { %v4405_v47 = vadd.f32 %v4001_v59, %v3175_v2  ;;  %v4303_v49 = vadd.f32 %v4258_v16, %v3073_v58  ;;  %5220 = vmatmul.bf16.vlgmr.msrb.gmra.mxu1 %v11183_v62  ;;  %v8203_v2 = vld [vmem:[%s8443_s20 + $0xbc] sm:$0xf]  ;;  %v4715_v58 = vld [vmem:[%s12827_s3 + $0x210] sm:$0xff] }
 0x570   : > { %v4708_v16 = vld [vmem:[%s12827_s3 + $0x1d8] sm:$0xff]  ;;  %v11259_v14 = vor.u32 %v8203_v2, %v8041_v51  ;;  %v4686_v2 = vld [vmem:[%s12827_s3 + $0x128] sm:$0xff]  ;;  %v4791_v51 = vld [vmem:[%s12827_s3 + $0x470] sm:$0xff] }
 0x571   : > { %4517 = vst [vmem:[#allocation2 + $0x360] sm:$0xff] %v4405_v47  ;;  %5122 = vmatmul.bf16.vlgmr.msrb.gmra.mxu3 %v11183_v62  ;;  %v4110_v19 = vpop.f32.mrf.mxu2  ;;  %v4904_v57 = vpack.c.bf16 %v4715_v58, %v4708_v16  ;;  %v4889_v16 = vpack.c.bf16 %v4686_v2, %v4679_v44  ;;  %v4798_v58 = vld [vmem:[%s12827_s3 + $0x4a8] sm:$0xff]  ;;  %v8065_v44 = vld [vmem:[%s8443_s20 + $0x1d0] sm:$0xf0] }
 0x572   : > { %4415 = vst.msk [vmem:[#allocation2 + $0x30] sm:$0xff] %vm1506_vm0, %v4303_v49  ;;  %v4820_v49 = vld [vmem:[%s12827_s3 + $0x558] sm:$0xff] }
 0x573   : > { %v4210_v15 = vpop.f32.mrf.mxu0  ;;  %5362 = vmatpush.bf16.msra.mxu0 %v4904_v57  ;;  %v4945_v57 = vpack.c.bf16 %v4798_v58, %v4791_v51  ;;  %v4666_v51 = vld [vmem:[%s12827_s3 + $0x88] sm:$0xff] }
 0x574   : > { %v4159_v63 = vpop.f32.mrf.mxu3  ;;  %v4259_v32 = vpop.f32.mrf.mxu1 }
 0x575   : > { %v4160_v53 = vadd.f32 %v4159_v63, %v4110_v19  ;;  %v4260_v29 = vadd.f32 %v4259_v32, %v4210_v15  ;;  %v3093_v15 = vld [vmem:[#allocation2 + $0xd0] sm:$0xff] }
 0x577   : > { %v4302_v18 = vadd.f32 %v4160_v53, %v3072_v25  ;;  %v4310_v34 = vadd.f32 %v4260_v29, %v3080_v21  ;;  %v4960_v53 = vpack.c.bf16 %v4827_v12, %v4820_v49  ;;  %v3114_v12 = vld [vmem:[#allocation2 + $0x178] sm:$0xff] }
 0x579   : > { %4414 = vst [vmem:[#allocation2 + $0x28] sm:$0xff] %v4302_v18  ;;  %v4112_v31 = vpop.f32.mrf.mxu2  ;;  %5411 = vmatpush.bf16.msra.mxu1 %v4960_v53  ;;  %v3101_v18 = vld [vmem:[#allocation2 + $0x110] sm:$0xff] }
 0x57a   : > { %4422 = vst.msk [vmem:[#allocation2 + $0x68] sm:$0xff] %vm1506_vm0, %v4310_v34  ;;  %v4693_v34 = vld [vmem:[%s12827_s3 + $0x160] sm:$0xff] }
 0x57b   : > { %v4213_v22 = vpop.f32.mrf.mxu0  ;;  %v4896_v28 = vpack.c.bf16 %v4700_v24, %v4693_v34  ;;  %v4680_v34 = vld [vmem:[%s12827_s3 + $0xf8] sm:$0xff]  ;;  %v4687_v24 = vld [vmem:[%s12827_s3 + $0x130] sm:$0xff] }
 0x57c   : > { %v4161_v5 = vpop.f32.mrf.mxu3  ;;  %v4262_v61 = vpop.f32.mrf.mxu1 }
 0x57d   : > { %v4162_v23 = vadd.f32 %v4161_v5, %v4112_v31  ;;  %v4263_v1 = vadd.f32 %v4262_v61, %v4213_v22  ;;  %v4812_v31 = vld [vmem:[%s12827_s3 + $0x518] sm:$0xff]  ;;  %v3100_v5 = vld [vmem:[#allocation2 + $0x108] sm:$0xff]  ;;  %5265 = vmatpush.bf16.msra.mxu2 %v4896_v28  ;;  %v8206_v61 = vld [vmem:[%s8443_s20 + $0x12c] sm:$0xf0]  ;;  %5412 = vmatpush.bf16.msra.mxu1 %v4953_v4 }
 0x57e   : > { %5078 = vmatmul.bf16.gmra.mxu2 %v11216_v37  ;;  %5176 = vmatmul.bf16.gmra.mxu0 %v11216_v37  ;;  %v4952_v35 = vpack.c.bf16 %v4812_v31, %v4805_v26  ;;  %v3108_v22 = vld [vmem:[#allocation2 + $0x148] sm:$0xff]  ;;  %v4792_v26 = vld [vmem:[%s12827_s3 + $0x478] sm:$0xff]  ;;  %v4890_v31 = vpack.c.bf16 %v4687_v24, %v4680_v34  ;;  %v4651_v34 = vld [vmem:[%s12827_s3 + $0x10] sm:$0xff] }
 0x57f   : > { %v4309_v39 = vadd.f32 %v4162_v23, %v3079_v11  ;;  %v4317_v42 = vadd.f32 %v4263_v1, %v3087_v40  ;;  %5225 = vmatmul.bf16.gmra.mxu1 %v11221_v7  ;;  %v8047_v11 = vld [vmem:[%s8443_s20 + $0x108] sm:$0xf]  ;;  %v8049_v1 = vld [vmem:[%s8443_s20 + $0x130] sm:$0xf0] }
 0x580   : > { %5314 = vmatpush.bf16.msra.mxu3 %v4952_v35  ;;  %v11292_v3 = vor.u32 %v8206_v61, %v8047_v11  ;;  %v3129_v11 = vld [vmem:[#allocation2 + $0x1f0] sm:$0xff]  ;;  %v4658_v24 = vld [vmem:[%s12827_s3 + $0x48] sm:$0xff] }
 0x581   : > { %4421 = vst [vmem:[#allocation2 + $0x60] sm:$0xff] %v4309_v39  ;;  %5127 = vmatmul.bf16.gmra.mxu3 %v11221_v7  ;;  %v4115_v54 = vpop.f32.mrf.mxu2  ;;  %v8205_v39 = vld [vmem:[%s8443_s20 + $0x10c] sm:$0xf]  ;;  %5266 = vmatpush.bf16.msra.mxu2 %v4889_v16 }
 0x582   : > { %4429 = vst.msk [vmem:[#allocation2 + $0xa0] sm:$0xff] %vm1506_vm0, %v4317_v42  ;;  %v4694_v42 = vld [vmem:[%s12827_s3 + $0x168] sm:$0xff] }
 0x583   : > { %v4215_v30 = vpop.f32.mrf.mxu0  ;;  %v4778_v16 = vld [vmem:[%s12827_s3 + $0x408] sm:$0xff] }
 0x584   : > { %v4164_v43 = vpop.f32.mrf.mxu3  ;;  %v4264_v6 = vpop.f32.mrf.mxu1  ;;  %5315 = vmatpush.bf16.msra.mxu3 %v4945_v57  ;;  %v4785_v57 = vld [vmem:[%s12827_s3 + $0x440] sm:$0xff] }
 0x585   : > { %v4165_v46 = vadd.f32 %v4164_v43, %v4115_v54  ;;  %v4265_v17 = vadd.f32 %v4264_v6, %v4215_v30  ;;  %v4701_v54 = vld [vmem:[%s12827_s3 + $0x1a0] sm:$0xff]  ;;  %v11297_v30 = vor.u32 %v8205_v39, %v8049_v1 }
 0x586   : > { %v4897_v43 = vpack.c.bf16 %v4701_v54, %v4694_v42  ;;  %v4665_v1 = vld [vmem:[%s12827_s3 + $0x80] sm:$0xff] }
 0x587   : > { %v4316_v9 = vadd.f32 %v4165_v46, %v3086_v48  ;;  %v4324_v59 = vadd.f32 %v4265_v17, %v3094_v56  ;;  %v3107_v48 = vld [vmem:[#allocation2 + $0x140] sm:$0xff] }
 0x588   : > { %5363 = vmatpush.bf16.msra.mxu0 %v4897_v43  ;;  %v3115_v56 = vld [vmem:[#allocation2 + $0x180] sm:$0xff] }
 0x589   : > { %4428 = vst [vmem:[#allocation2 + $0x98] sm:$0xff] %v4316_v9  ;;  %v4117_v47 = vpop.f32.mrf.mxu2  ;;  %v4777_v42 = vld [vmem:[%s12827_s3 + $0x400] sm:$0xff] }
 0x58a   : > { %4436 = vst.msk [vmem:[#allocation2 + $0xd8] sm:$0xff] %vm1506_vm0, %v4324_v59 }
 0x58b   : > { %v4218_v13 = vpop.f32.mrf.mxu0 }
 0x58c   : > { %v4166_v19 = vpop.f32.mrf.mxu3  ;;  %v4267_v55 = vpop.f32.mrf.mxu1  ;;  %5364 = vmatpush.bf16.msra.mxu0 %v4890_v31  ;;  %v4875_v31 = vpack.c.bf16 %v4658_v24, %v4651_v34  ;;  %v8079_v24 = vld [vmem:[%s8443_s20 + $0x248] sm:$0xf] }
 0x58d   : > { %v4167_v63 = vadd.f32 %v4166_v19, %v4117_v47  ;;  %v4268_v32 = vadd.f32 %v4267_v55, %v4218_v13 }
 0x58e   : > { %5083 = vmatmul.bf16.gmra.mxu2 %v11254_v10  ;;  %5181 = vmatmul.bf16.gmra.mxu0 %v11254_v10 }
 0x58f   : > { %v4323_v25 = vadd.f32 %v4167_v63, %v3093_v15  ;;  %v4331_v29 = vadd.f32 %v4268_v32, %v3101_v18  ;;  %5230 = vmatmul.bf16.gmra.mxu1 %v11259_v14  ;;  %v3122_v15 = vld [vmem:[#allocation2 + $0x1b8] sm:$0xff]  ;;  %v8208_v32 = vld [vmem:[%s8443_s20 + $0x17c] sm:$0xf0] }
 0x590   : > { %v8207_v18 = vld [vmem:[%s8443_s20 + $0x15c] sm:$0xf] }
 0x591   : > { %4435 = vst [vmem:[#allocation2 + $0xd0] sm:$0xff] %v4323_v25  ;;  %5132 = vmatmul.bf16.gmra.mxu3 %v11259_v14  ;;  %v4120_v21 = vpop.f32.mrf.mxu2  ;;  %v8055_v25 = vld [vmem:[%s8443_s20 + $0x158] sm:$0xf] }
 0x592   : > { %4443 = vst.msk [vmem:[#allocation2 + $0x110] sm:$0xff] %vm1506_vm0, %v4331_v29  ;;  %v8057_v29 = vld [vmem:[%s8443_s20 + $0x180] sm:$0xf0]  ;;  %v11330_v28 = vor.u32 %v8208_v32, %v8055_v25 }
 0x593   : > { %v4220_v33 = vpop.f32.mrf.mxu0 }
 0x594   : > { %v4169_v38 = vpop.f32.mrf.mxu3  ;;  %v4269_v0 = vpop.f32.mrf.mxu1 }
 0x595   : > { %v4170_v20 = vadd.f32 %v4169_v38, %v4120_v21  ;;  %v4270_v23 = vadd.f32 %v4269_v0, %v4220_v33 }
 0x597   : > { %v4330_v36 = vadd.f32 %v4170_v20, %v3100_v5  ;;  %v4338_v52 = vadd.f32 %v4270_v23, %v3108_v22  ;;  %v4799_v20 = vld [vmem:[%s12827_s3 + $0x4b0] sm:$0xff]  ;;  %v11335_v5 = vor.u32 %v8207_v18, %v8057_v29  ;;  %v3143_v18 = vld [vmem:[#allocation2 + $0x260] sm:$0xff] }
 0x598   : > { %v4946_v0 = vpack.c.bf16 %v4799_v20, %v4792_v26  ;;  %v4763_v26 = vld [vmem:[%s12827_s3 + $0x390] sm:$0xff]  ;;  %v4770_v20 = vld [vmem:[%s12827_s3 + $0x3c8] sm:$0xff] }
 0x599   : > { %4442 = vst [vmem:[#allocation2 + $0x108] sm:$0xff] %v4330_v36  ;;  %v4122_v40 = vpop.f32.mrf.mxu2  ;;  %v3121_v36 = vld [vmem:[#allocation2 + $0x1b0] sm:$0xff] }
 0x59a   : > { %4450 = vst.msk [vmem:[#allocation2 + $0x148] sm:$0xff] %vm1506_vm0, %v4338_v52  ;;  %5413 = vmatpush.bf16.msra.mxu1 %v4946_v0  ;;  %v4931_v0 = vpack.c.bf16 %v4770_v20, %v4763_v26  ;;  %v8214_v26 = vld [vmem:[%s8443_s20 + $0x26c] sm:$0xf0] }
 0x59b   : > { %v4223_v46 = vpop.f32.mrf.mxu0 }
 0x59c   : > { %v4171_v45 = vpop.f32.mrf.mxu3  ;;  %v4272_v6 = vpop.f32.mrf.mxu1 }
 0x59d   : > { %v4172_v27 = vadd.f32 %v4171_v45, %v4122_v40  ;;  %v4273_v17 = vadd.f32 %v4272_v6, %v4223_v46  ;;  %v4672_v40 = vld [vmem:[%s12827_s3 + $0xb8] sm:$0xff]  ;;  %v3128_v46 = vld [vmem:[#allocation2 + $0x1e8] sm:$0xff] }
 0x59e   : > { %5088 = vmatmul.bf16.gmra.mxu2 %v11292_v3  ;;  %5186 = vmatmul.bf16.gmra.mxu0 %v11292_v3  ;;  %v4882_v41 = vpack.c.bf16 %v4672_v40, %v4665_v1  ;;  %v4784_v45 = vld [vmem:[%s12827_s3 + $0x438] sm:$0xff]  ;;  %v8212_v1 = vld [vmem:[%s8443_s20 + $0x21c] sm:$0xf0] }
 0x59f   : > { %v4337_v9 = vadd.f32 %v4172_v27, %v3107_v48  ;;  %v4345_v59 = vadd.f32 %v4273_v17, %v3115_v56  ;;  %5235 = vmatmul.bf16.gmra.mxu1 %v11297_v30  ;;  %v4938_v27 = vpack.c.bf16 %v4784_v45, %v4777_v42  ;;  %v8063_v56 = vld [vmem:[%s8443_s20 + $0x1a8] sm:$0xf]  ;;  %v8211_v40 = vld [vmem:[%s8443_s20 + $0x1fc] sm:$0xf]  ;;  %v8073_v42 = vld [vmem:[%s8443_s20 + $0x220] sm:$0xf0] }
 0x5a0   : > { %5267 = vmatpush.bf16.msra.mxu2 %v4882_v41  ;;  %v4652_v41 = vld [vmem:[%s12827_s3 + $0x18] sm:$0xff]  ;;  %v4659_v45 = vld [vmem:[%s12827_s3 + $0x50] sm:$0xff] }
 0x5a1   : > { %4449 = vst [vmem:[#allocation2 + $0x140] sm:$0xff] %v4337_v9  ;;  %5137 = vmatmul.bf16.gmra.mxu3 %v11297_v30  ;;  %v4125_v60 = vpop.f32.mrf.mxu2  ;;  %v3136_v9 = vld [vmem:[#allocation2 + $0x228] sm:$0xff] }
 0x5a2   : > { %4457 = vst.msk [vmem:[#allocation2 + $0x180] sm:$0xff] %vm1506_vm0, %v4345_v59  ;;  %5316 = vmatpush.bf16.msra.mxu3 %v4938_v27  ;;  %v8210_v59 = vld [vmem:[%s8443_s20 + $0x1cc] sm:$0xf0] }
 0x5a3   : > { %v4225_v19 = vpop.f32.mrf.mxu0 }
 0x5a4   : > { %v4174_v47 = vpop.f32.mrf.mxu3  ;;  %v4274_v63 = vpop.f32.mrf.mxu1  ;;  %5268 = vmatpush.bf16.msra.mxu2 %v4875_v31  ;;  %v8081_v31 = vld [vmem:[%s8443_s20 + $0x270] sm:$0xf0] }
 0x5a5   : > { %v4175_v49 = vadd.f32 %v4174_v47, %v4125_v60  ;;  %v4275_v53 = vadd.f32 %v4274_v63, %v4225_v19  ;;  %v8209_v60 = vld [vmem:[%s8443_s20 + $0x1ac] sm:$0xf]  ;;  %v4673_v47 = vld [vmem:[%s12827_s3 + $0xc0] sm:$0xff] }
 0x5a6   : > { %v4883_v19 = vpack.c.bf16 %v4673_v47, %v4666_v51  ;;  %5317 = vmatpush.bf16.msra.mxu3 %v4931_v0  ;;  %v4864_v0 = vld [vmem:[%s12827_s3 + $0x6b8] sm:$0xff] }
 0x5a7   : > { %v4344_v13 = vadd.f32 %v4175_v49, %v3114_v12  ;;  %v4352_v55 = vadd.f32 %v4275_v53, %v3122_v15  ;;  %v11368_v49 = vor.u32 %v8210_v59, %v8063_v56  ;;  %v4939_v53 = vpack.c.bf16 %v4785_v57, %v4778_v16  ;;  %v3135_v15 = vld [vmem:[#allocation2 + $0x220] sm:$0xff]  ;;  %v3149_v56 = vld [vmem:[#allocation2 + $0x290] sm:$0xff] }
 0x5a8   : > { %5365 = vmatpush.bf16.msra.mxu0 %v4883_v19  ;;  %v4751_v16 = vld [vmem:[%s12827_s3 + $0x330] sm:$0xff] }
 0x5a9   : > { %4456 = vst [vmem:[#allocation2 + $0x178] sm:$0xff] %v4344_v13  ;;  %v4127_v21 = vpop.f32.mrf.mxu2  ;;  %v11373_v13 = vor.u32 %v8209_v60, %v8065_v44  ;;  %5414 = vmatpush.bf16.msra.mxu1 %v4939_v53  ;;  %v4863_v19 = vld [vmem:[%s12827_s3 + $0x6b0] sm:$0xff] }
 0x5aa   : > { %4464 = vst.msk [vmem:[#allocation2 + $0x1b8] sm:$0xff] %vm1506_vm0, %v4352_v55 }
 0x5ab   : > { %v4228_v35 = vpop.f32.mrf.mxu0 }
 0x5ac   : > { %v4176_v38 = vpop.f32.mrf.mxu3  ;;  %v4277_v23 = vpop.f32.mrf.mxu1 }
 0x5ad   : > { %v4177_v33 = vadd.f32 %v4176_v38, %v4127_v21  ;;  %v4278_v52 = vadd.f32 %v4277_v23, %v4228_v35 }
 0x5ae   : > { %5093 = vmatmul.bf16.gmra.mxu2 %v11330_v28  ;;  %5191 = vmatmul.bf16.gmra.mxu0 %v11330_v28 }
 0x5af   : > { %v4351_v22 = vadd.f32 %v4177_v33, %v3121_v36  ;;  %v4359_v61 = vadd.f32 %v4278_v52, %v3129_v11  ;;  %5240 = vmatmul.bf16.gmra.mxu1 %v11335_v5  ;;  %v3142_v36 = vld [vmem:[#allocation2 + $0x258] sm:$0xff] }
 0x5b0   : > { %v3150_v11 = vld [vmem:[#allocation2 + $0x298] sm:$0xff] }
 0x5b1   : > { %4463 = vst [vmem:[#allocation2 + $0x1b0] sm:$0xff] %v4351_v22  ;;  %5142 = vmatmul.bf16.gmra.mxu3 %v11335_v5  ;;  %v4130_v39 = vpop.f32.mrf.mxu2 }
 0x5b2   : > { %4471 = vst.msk [vmem:[#allocation2 + $0x1f0] sm:$0xff] %vm1506_vm0, %v4359_v61 }
 0x5b3   : > { %v4230_v8 = vpop.f32.mrf.mxu0 }
 0x5b4   : > { %v4179_v54 = vpop.f32.mrf.mxu3  ;;  %v4279_v4 = vpop.f32.mrf.mxu1 }
 0x5b5   : > { %v4180_v43 = vadd.f32 %v4179_v54, %v4130_v39  ;;  %v4280_v6 = vadd.f32 %v4279_v4, %v4230_v8  ;;  %v8071_v39 = vld [vmem:[%s8443_s20 + $0x1f8] sm:$0xf]  ;;  %v4771_v4 = vld [vmem:[%s12827_s3 + $0x3d0] sm:$0xff] }
 0x5b6   : > { %v11406_v27 = vor.u32 %v8212_v1, %v8071_v39 }
 0x5b7   : > { %v4358_v48 = vadd.f32 %v4180_v43, %v3128_v46  ;;  %v4366_v17 = vadd.f32 %v4280_v6, %v3136_v9  ;;  %v4764_v43 = vld [vmem:[%s12827_s3 + $0x398] sm:$0xff]  ;;  %v4876_v46 = vpack.c.bf16 %v4659_v45, %v4652_v41  ;;  %v11411_v9 = vor.u32 %v8211_v40, %v8073_v42  ;;  %v3163_v40 = vld [vmem:[#allocation2 + $0x300] sm:$0xff] }
 0x5b8   : > { %v3171_v45 = vld [vmem:[#allocation2 + $0x340] sm:$0xff] }
 0x5b9   : > { %4470 = vst [vmem:[#allocation2 + $0x1e8] sm:$0xff] %v4358_v48  ;;  %v4132_v2 = vpop.f32.mrf.mxu2  ;;  %5366 = vmatpush.bf16.msra.mxu0 %v4876_v46  ;;  %v4737_v46 = vld [vmem:[%s12827_s3 + $0x2c0] sm:$0xff] }
 0x5ba   : > { %4478 = vst.msk [vmem:[#allocation2 + $0x228] sm:$0xff] %vm1506_vm0, %v4366_v17  ;;  %v4932_v17 = vpack.c.bf16 %v4771_v4, %v4764_v43  ;;  %v4744_v4 = vld [vmem:[%s12827_s3 + $0x2f8] sm:$0xff] }
 0x5bb   : > { %v4233_v63 = vpop.f32.mrf.mxu0 }
 0x5bc   : > { %v4181_v58 = vpop.f32.mrf.mxu3  ;;  %v4282_v55 = vpop.f32.mrf.mxu1  ;;  %5415 = vmatpush.bf16.msra.mxu1 %v4932_v17  ;;  %v4919_v17 = vpack.c.bf16 %v4744_v4, %v4737_v46  ;;  %v4724_v46 = vld [vmem:[%s12827_s3 + $0x258] sm:$0xff]  ;;  %v4731_v4 = vld [vmem:[%s12827_s3 + $0x290] sm:$0xff] }
 0x5bd   : > { %v4182_v12 = vadd.f32 %v4181_v58, %v4132_v2  ;;  %v4283_v32 = vadd.f32 %v4282_v55, %v4233_v63  ;;  %v3157_v2 = vld [vmem:[#allocation2 + $0x2d0] sm:$0xff]  ;;  %v4758_v58 = vld [vmem:[%s12827_s3 + $0x368] sm:$0xff] }
 0x5be   : > { %5098 = vmatmul.bf16.gmra.mxu2 %v11368_v49  ;;  %5196 = vmatmul.bf16.gmra.mxu0 %v11368_v49  ;;  %v4870_v63 = vld [vmem:[%s12827_s3 + $0x6e8] sm:$0xff] }
 0x5bf   : > { %v4365_v25 = vadd.f32 %v4182_v12, %v3135_v15  ;;  %v4373_v29 = vadd.f32 %v4283_v32, %v3143_v18  ;;  %5245 = vmatmul.bf16.gmra.mxu1 %v11373_v13  ;;  %v4926_v12 = vpack.c.bf16 %v4758_v58, %v4751_v16  ;;  %v4982_v55 = vpack.c.bf16 %v4870_v63, %v4863_v19  ;;  %v3178_v58 = vld [vmem:[#allocation2 + $0x378] sm:$0xff]  ;;  %v4745_v63 = vld [vmem:[%s12827_s3 + $0x300] sm:$0xff] }
 0x5c1   : > { %4477 = vst [vmem:[#allocation2 + $0x220] sm:$0xff] %v4365_v25  ;;  %5147 = vmatmul.bf16.gmra.mxu3 %v11373_v13  ;;  %v4135_v21 = vpop.f32.mrf.mxu2  ;;  %v3156_v25 = vld [vmem:[#allocation2 + $0x2c8] sm:$0xff]  ;;  %5457 = vmatpush.bf16.msrb.mxu2 %v4926_v12 }
 0x5c2   : > { %4485 = vst.msk [vmem:[#allocation2 + $0x260] sm:$0xff] %vm1506_vm0, %v4373_v29  ;;  %5506 = vmatpush.bf16.msrb.mxu3 %v4982_v55  ;;  %v4738_v12 = vld [vmem:[%s12827_s3 + $0x2c8] sm:$0xff] }
 0x5c3   : > { %v4235_v35 = vpop.f32.mrf.mxu0  ;;  %v4920_v55 = vpack.c.bf16 %v4745_v63, %v4738_v12  ;;  %v4709_v12 = vld [vmem:[%s12827_s3 + $0x1e0] sm:$0xff]  ;;  %v4716_v63 = vld [vmem:[%s12827_s3 + $0x218] sm:$0xff] }
 0x5c4   : > { %v4184_v38 = vpop.f32.mrf.mxu3  ;;  %v4284_v23 = vpop.f32.mrf.mxu1 }
 0x5c5   : > { %v4185_v33 = vadd.f32 %v4184_v38, %v4135_v21  ;;  %v4285_v52 = vadd.f32 %v4284_v23, %v4235_v35  ;;  %v3164_v21 = vld [vmem:[#allocation2 + $0x308] sm:$0xff]  ;;  %v4759_v35 = vld [vmem:[%s12827_s3 + $0x370] sm:$0xff]  ;;  %v11444_v23 = vor.u32 %v8214_v26, %v8079_v24  ;;  %5458 = vmatpush.bf16.msrb.mxu2 %v4919_v17  ;;  %v4913_v17 = vpack.c.bf16 %v4731_v4, %v4724_v46 }
 0x5c6   : > { %v8213_v38 = vld [vmem:[%s8443_s20 + $0x24c] sm:$0xf]  ;;  %v4695_v46 = vld [vmem:[%s12827_s3 + $0x170] sm:$0xff] }
 0x5c7   : > { %v4372_v22 = vadd.f32 %v4185_v33, %v3142_v36  ;;  %v4380_v61 = vadd.f32 %v4285_v52, %v3150_v11  ;;  %v4752_v33 = vld [vmem:[%s12827_s3 + $0x338] sm:$0xff]  ;;  %v4871_v52 = vld [vmem:[%s12827_s3 + $0x6f0] sm:$0xff]  ;;  %v11449_v39 = vor.u32 %v8213_v38, %v8081_v31  ;;  %v4522_v38 = vld [vmem:[#allocation2 + $0x8] sm:$0xff] }
 0x5c8   : > { %v4983_v1 = vpack.c.bf16 %v4871_v52, %v4864_v0  ;;  %v4835_v0 = vld [vmem:[%s12827_s3 + $0x5d0] sm:$0xff]  ;;  %v4842_v52 = vld [vmem:[%s12827_s3 + $0x608] sm:$0xff] }
 0x5c9   : > { %4484 = vst [vmem:[#allocation2 + $0x258] sm:$0xff] %v4372_v22  ;;  %v4137_v54 = vpop.f32.mrf.mxu2  ;;  %v4927_v22 = vpack.c.bf16 %v4759_v35, %v4752_v33  ;;  %v4723_v33 = vld [vmem:[%s12827_s3 + $0x250] sm:$0xff]  ;;  %v4730_v35 = vld [vmem:[%s12827_s3 + $0x288] sm:$0xff] }
 0x5ca   : > { %4492 = vst.msk [vmem:[#allocation2 + $0x298] sm:$0xff] %vm1506_vm0, %v4380_v61  ;;  %5604 = vmatpush.bf16.msrb.mxu1 %v4983_v1  ;;  %v4968_v1 = vpack.c.bf16 %v4842_v52, %v4835_v0  ;;  %v4822_v0 = vld [vmem:[%s12827_s3 + $0x568] sm:$0xff]  ;;  %v4829_v52 = vld [vmem:[%s12827_s3 + $0x5a0] sm:$0xff] }
 0x5cb   : > { %v4238_v6 = vpop.f32.mrf.mxu0  ;;  %5555 = vmatpush.bf16.msrb.mxu0 %v4927_v22  ;;  %v4912_v22 = vpack.c.bf16 %v4730_v35, %v4723_v33  ;;  %v4710_v33 = vld [vmem:[%s12827_s3 + $0x1e8] sm:$0xff]  ;;  %v4717_v35 = vld [vmem:[%s12827_s3 + $0x220] sm:$0xff] }
 0x5cc   : > { %v4186_v8 = vpop.f32.mrf.mxu3  ;;  %v4287_v59 = vpop.f32.mrf.mxu1  ;;  %v4702_v4 = vld [vmem:[%s12827_s3 + $0x1a8] sm:$0xff] }
 0x5cd   : > { %v4187_v48 = vadd.f32 %v4186_v8, %v4137_v54  ;;  %v4288_v44 = vadd.f32 %v4287_v59, %v4238_v6  ;;  %5459 = vmatpush.bf16.msrb.mxu2 %v4912_v22  ;;  %v4906_v22 = vpack.c.bf16 %v4717_v35, %v4710_v33  ;;  %v4681_v33 = vld [vmem:[%s12827_s3 + $0x100] sm:$0xff]  ;;  %v4688_v35 = vld [vmem:[%s12827_s3 + $0x138] sm:$0xff] }
 0x5ce   : > { %5103 = vmatmul.bf16.gmra.mxu2 %v11406_v27  ;;  %5201 = vmatmul.bf16.gmra.mxu0 %v11406_v27 }
 0x5cf   : > { %v4379_v60 = vadd.f32 %v4187_v48, %v3149_v56  ;;  %v4387_v51 = vadd.f32 %v4288_v44, %v3157_v2  ;;  %5250 = vmatmul.bf16.gmra.mxu1 %v11411_v9  ;;  %v4849_v48 = vld [vmem:[%s12827_s3 + $0x640] sm:$0xff]  ;;  %v4856_v56 = vld [vmem:[%s12827_s3 + $0x678] sm:$0xff]  ;;  %5556 = vmatpush.bf16.msrb.mxu0 %v4920_v55  ;;  %v4905_v55 = vpack.c.bf16 %v4716_v63, %v4709_v12  ;;  %v4703_v63 = vld [vmem:[%s12827_s3 + $0x1b0] sm:$0xff] }
 0x5d0   : > { %v4975_v44 = vpack.c.bf16 %v4856_v56, %v4849_v48  ;;  %v3170_v2 = vld [vmem:[#allocation2 + $0x338] sm:$0xff]  ;;  %v4843_v56 = vld [vmem:[%s12827_s3 + $0x610] sm:$0xff] }
 0x5d1   : > { %4491 = vst [vmem:[#allocation2 + $0x290] sm:$0xff] %v4379_v60  ;;  %5152 = vmatmul.bf16.gmra.mxu3 %v11411_v9  ;;  %v4140_v47 = vpop.f32.mrf.mxu2  ;;  %v4836_v48 = vld [vmem:[%s12827_s3 + $0x5d8] sm:$0xff]  ;;  %5460 = vmatpush.bf16.msrb.mxu2 %v4905_v55 }
 0x5d2   : > { %4499 = vst.msk [vmem:[#allocation2 + $0x2d0] sm:$0xff] %vm1506_vm0, %v4387_v51  ;;  %5507 = vmatpush.bf16.msrb.mxu3 %v4975_v44  ;;  %v4969_v44 = vpack.c.bf16 %v4843_v56, %v4836_v48  ;;  %v4807_v48 = vld [vmem:[%s12827_s3 + $0x4f0] sm:$0xff]  ;;  %v4814_v56 = vld [vmem:[%s12827_s3 + $0x528] sm:$0xff]  ;;  %v4696_v12 = vld [vmem:[%s12827_s3 + $0x178] sm:$0xff] }
 0x5d3   : > { %v4240_v15 = vpop.f32.mrf.mxu0  ;;  %5557 = vmatpush.bf16.msrb.mxu0 %v4913_v17  ;;  %v4898_v17 = vpack.c.bf16 %v4702_v4, %v4695_v46  ;;  %v4899_v55 = vpack.c.bf16 %v4703_v63, %v4696_v12  ;;  %v4682_v46 = vld [vmem:[%s12827_s3 + $0x108] sm:$0xff]  ;;  %v4689_v4 = vld [vmem:[%s12827_s3 + $0x140] sm:$0xff]  ;;  %v4667_v12 = vld [vmem:[%s12827_s3 + $0x90] sm:$0xff] }
 0x5d4   : > { %v4189_v57 = vpop.f32.mrf.mxu3  ;;  %v4289_v32 = vpop.f32.mrf.mxu1  ;;  %v4674_v63 = vld [vmem:[%s12827_s3 + $0xc8] sm:$0xff] }
 0x5d5   : > { %v4190_v53 = vadd.f32 %v4189_v57, %v4140_v47  ;;  %v4290_v29 = vadd.f32 %v4289_v32, %v4240_v15  ;;  %5461 = vmatpush.bf16.msrb.mxu2 %v4898_v17  ;;  %v4892_v17 = vpack.c.bf16 %v4689_v4, %v4682_v46  ;;  %v4653_v46 = vld [vmem:[%s12827_s3 + $0x20] sm:$0xff]  ;;  %v4660_v4 = vld [vmem:[%s12827_s3 + $0x58] sm:$0xff] }
 0x5d6   : > { %5508 = vmatpush.bf16.msrb.mxu3 %v4968_v1  ;;  %v4962_v1 = vpack.c.bf16 %v4829_v52, %v4822_v0  ;;  %v4793_v0 = vld [vmem:[%s12827_s3 + $0x480] sm:$0xff]  ;;  %v4800_v52 = vld [vmem:[%s12827_s3 + $0x4b8] sm:$0xff] }
 0x5d7   : > { %v4386_v18 = vadd.f32 %v4190_v53, %v3156_v25  ;;  %v4394_v34 = vadd.f32 %v4290_v29, %v3164_v21  ;;  %v4850_v53 = vld [vmem:[%s12827_s3 + $0x648] sm:$0xff]  ;;  %v4857_v25 = vld [vmem:[%s12827_s3 + $0x680] sm:$0xff]  ;;  %v3177_v21 = vld [vmem:[#allocation2 + $0x370] sm:$0xff]  ;;  %5558 = vmatpush.bf16.msrb.mxu0 %v4906_v22  ;;  %v4891_v22 = vpack.c.bf16 %v4688_v35, %v4681_v33 }
 0x5d8   : > { %v4976_v29 = vpack.c.bf16 %v4857_v25, %v4850_v53  ;;  %v4821_v53 = vld [vmem:[%s12827_s3 + $0x560] sm:$0xff]  ;;  %v4828_v25 = vld [vmem:[%s12827_s3 + $0x598] sm:$0xff]  ;;  %v4675_v35 = vld [vmem:[%s12827_s3 + $0xd0] sm:$0xff] }
 0x5d9   : > { %4498 = vst [vmem:[#allocation2 + $0x2c8] sm:$0xff] %v4386_v18  ;;  %v4142_v20 = vpop.f32.mrf.mxu2  ;;  %5462 = vmatpush.bf16.msrb.mxu2 %v4891_v22  ;;  %v4668_v33 = vld [vmem:[%s12827_s3 + $0x98] sm:$0xff] }
 0x5da   : > { %4506 = vst.msk [vmem:[#allocation2 + $0x308] sm:$0xff] %vm1506_vm0, %v4394_v34  ;;  %5605 = vmatpush.bf16.msrb.mxu1 %v4976_v29  ;;  %v4961_v29 = vpack.c.bf16 %v4828_v25, %v4821_v53  ;;  %v4808_v53 = vld [vmem:[%s12827_s3 + $0x4f8] sm:$0xff]  ;;  %v4815_v25 = vld [vmem:[%s12827_s3 + $0x530] sm:$0xff]  ;;  %v4885_v22 = vpack.c.bf16 %v4675_v35, %v4668_v33  ;;  %v4753_v33 = vld [vmem:[%s12827_s3 + $0x340] sm:$0xff] }
 0x5db   : > { %v4243_v61 = vpop.f32.mrf.mxu0  ;;  %5559 = vmatpush.bf16.msrb.mxu0 %v4899_v55  ;;  %v4884_v55 = vpack.c.bf16 %v4674_v63, %v4667_v12  ;;  %v4654_v12 = vld [vmem:[%s12827_s3 + $0x28] sm:$0xff]  ;;  %v4661_v63 = vld [vmem:[%s12827_s3 + $0x60] sm:$0xff]  ;;  %v4760_v35 = vld [vmem:[%s12827_s3 + $0x378] sm:$0xff] }
 0x5dc   : > { %v4191_v36 = vpop.f32.mrf.mxu3  ;;  %v4292_v42 = vpop.f32.mrf.mxu1  ;;  %5509 = vmatpush.bf16.msrb.mxu3 %v4961_v29  ;;  %v4955_v29 = vpack.c.bf16 %v4815_v25, %v4808_v53  ;;  %v4779_v53 = vld [vmem:[%s12827_s3 + $0x410] sm:$0xff]  ;;  %v4786_v25 = vld [vmem:[%s12827_s3 + $0x448] sm:$0xff] }
 0x5dd   : > { %v4192_v11 = vadd.f32 %v4191_v36, %v4142_v20  ;;  %v4293_v41 = vadd.f32 %v4292_v42, %v4243_v61  ;;  %5463 = vmatpush.bf16.msrb.mxu2 %v4884_v55  ;;  %v4878_v55 = vpack.c.bf16 %v4661_v63, %v4654_v12  ;;  %v4739_v12 = vld [vmem:[%s12827_s3 + $0x2d0] sm:$0xff]  ;;  %v4746_v63 = vld [vmem:[%s12827_s3 + $0x308] sm:$0xff] }
 0x5de   : > { %5108 = vmatmul.bf16.gmra.mxu2 %v11444_v23  ;;  %5206 = vmatmul.bf16.gmra.mxu0 %v11444_v23 }
 0x5df   : > { %v4393_v54 = vadd.f32 %v4192_v11, %v3163_v40  ;;  %v4401_v43 = vadd.f32 %v4293_v41, %v3171_v45  ;;  %5255 = vmatmul.bf16.gmra.mxu1 %v11449_v39  ;;  %v4521_v40 = vld [vmem:[#allocation2] sm:$0xff]  ;;  %5560 = vmatpush.bf16.msrb.mxu0 %v4892_v17  ;;  %v4877_v17 = vpack.c.bf16 %v4660_v4, %v4653_v46  ;;  %v6201_v46 = vld [vmem:[%s12828_s4 + $0x310] sm:$0xff]  ;;  %v6208_v4 = vld [vmem:[%s12828_s4 + $0x348] sm:$0xff] }
 0x5e0   : > { %v4529_v45 = vld [vmem:[#allocation2 + $0x40] sm:$0xff]  ;;  %5606 = vmatpush.bf16.msrb.mxu1 %v4969_v44  ;;  %v4954_v44 = vpack.c.bf16 %v4814_v56, %v4807_v48  ;;  %v4794_v48 = vld [vmem:[%s12827_s3 + $0x488] sm:$0xff] }
 0x5e1   : > { %4505 = vst [vmem:[#allocation2 + $0x300] sm:$0xff] %v4393_v54  ;;  %5157 = vmatmul.bf16.gmra.mxu3 %v11449_v39  ;;  %v4145_v8 = vpop.f32.mrf.mxu2  ;;  %v4801_v56 = vld [vmem:[%s12827_s3 + $0x4c0] sm:$0xff]  ;;  %5464 = vmatpush.bf16.msrb.mxu2 %v4877_v17  ;;  %v6376_v17 = vpack.c.bf16 %v6208_v4, %v6201_v46  ;;  %v4732_v4 = vld [vmem:[%s12827_s3 + $0x298] sm:$0xff] }
 0x5e2   : > { %4513 = vst.msk [vmem:[#allocation2 + $0x340] sm:$0xff] %vm1506_vm0, %v4401_v43  ;;  %5510 = vmatpush.bf16.msrb.mxu3 %v4954_v44  ;;  %v4948_v44 = vpack.c.bf16 %v4801_v56, %v4794_v48  ;;  %v4765_v48 = vld [vmem:[%s12827_s3 + $0x3a0] sm:$0xff]  ;;  %v4772_v56 = vld [vmem:[%s12827_s3 + $0x3d8] sm:$0xff] }
 0x5e3   : > { %v4245_v60 = vpop.f32.mrf.mxu0  ;;  %5561 = vmatpush.bf16.msrb.mxu0 %v4885_v22  ;;  %v4928_v22 = vpack.c.bf16 %v4760_v35, %v4753_v33  ;;  %v6187_v33 = vld [vmem:[%s12828_s4 + $0x2a0] sm:$0xff]  ;;  %v6194_v35 = vld [vmem:[%s12828_s4 + $0x2d8] sm:$0xff] }
 0x5e4   : > { %v4194_v6 = vpop.f32.mrf.mxu3  ;;  %v4294_v51 = vpop.f32.mrf.mxu1  ;;  %5607 = vmatpush.bf16.msrb.mxu1 %v4962_v1  ;;  %v4947_v1 = vpack.c.bf16 %v4800_v52, %v4793_v0  ;;  %v4780_v0 = vld [vmem:[%s12827_s3 + $0x418] sm:$0xff]  ;;  %v4787_v52 = vld [vmem:[%s12827_s3 + $0x450] sm:$0xff]  ;;  %v4725_v46 = vld [vmem:[%s12827_s3 + $0x260] sm:$0xff] }
 0x5e5   : > { %v4195_v59 = vadd.f32 %v4194_v6, %v4145_v8  ;;  %v4295_v16 = vadd.f32 %v4294_v51, %v4245_v60 }
 0x5e6   : > { %5511 = vmatpush.bf16.msrb.mxu3 %v4947_v1  ;;  %v4941_v1 = vpack.c.bf16 %v4787_v52, %v4780_v0  ;;  %v4865_v0 = vld [vmem:[%s12827_s3 + $0x6c0] sm:$0xff]  ;;  %v4872_v52 = vld [vmem:[%s12827_s3 + $0x6f8] sm:$0xff] }
 0x5e7   : > { %v4400_v47 = vadd.f32 %v4195_v59, %v3170_v2  ;;  %v4408_v19 = vadd.f32 %v4295_v16, %v3178_v58  ;;  %v4528_v2 = vld [vmem:[#allocation2 + $0x38] sm:$0xff]  ;;  %5562 = vmatpush.bf16.msrb.mxu0 %v4878_v55  ;;  %v4921_v55 = vpack.c.bf16 %v4746_v63, %v4739_v12  ;;  %v6173_v12 = vld [vmem:[%s12828_s4 + $0x230] sm:$0xff]  ;;  %v6180_v63 = vld [vmem:[%s12828_s4 + $0x268] sm:$0xff] }
 0x5e8   : > { %v4536_v58 = vld [vmem:[#allocation2 + $0x78] sm:$0xff]  ;;  %5608 = vmatpush.bf16.msrb.mxu1 %v4955_v29  ;;  %v4940_v29 = vpack.c.bf16 %v4786_v25, %v4779_v53  ;;  %v4766_v53 = vld [vmem:[%s12827_s3 + $0x3a8] sm:$0xff]  ;;  %v4773_v25 = vld [vmem:[%s12827_s3 + $0x3e0] sm:$0xff] }
 0x5e9   : > { %4512 = vst [vmem:[#allocation2 + $0x338] sm:$0xff] %v4400_v47  ;;  %v4147_v57 = vpop.f32.mrf.mxu2 }
 0x5ea   : > { %4520 = vst.msk [vmem:[#allocation2 + $0x378] sm:$0xff] %vm1506_vm0, %v4408_v19  ;;  %5512 = vmatpush.bf16.msrb.mxu3 %v4940_v29  ;;  %v4934_v29 = vpack.c.bf16 %v4773_v25, %v4766_v53  ;;  %v4851_v53 = vld [vmem:[%s12827_s3 + $0x650] sm:$0xff]  ;;  %v4858_v25 = vld [vmem:[%s12827_s3 + $0x688] sm:$0xff] }
 0x5eb   : > { %v5172_v18 = vpop.f32.mrf.mxu0 }
 0x5ec   : > { %v4196_v15 = vpop.f32.mrf.mxu3  ;;  %v5221_v34 = vpop.f32.mrf.mxu1  ;;  %5609 = vmatpush.bf16.msrb.mxu1 %v4948_v44  ;;  %v4933_v44 = vpack.c.bf16 %v4772_v56, %v4765_v48  ;;  %v6313_v48 = vld [vmem:[%s12828_s4 + $0x690] sm:$0xff]  ;;  %v6320_v56 = vld [vmem:[%s12828_s4 + $0x6c8] sm:$0xff] }
 0x5ed   : > { %v4197_v32 = vadd.f32 %v4196_v15, %v4147_v57  ;;  %v5222_v26 = vadd.f32 %v5221_v34, %v5172_v18 }
 0x5ee   : > { %5269 = vmatmul.bf16.vlgmr.msra.gmra.mxu2 %v11178_v50  ;;  %5367 = vmatmul.bf16.vlgmr.msra.gmra.mxu0 %v11178_v50 }
 0x5ef   : > { %v4407_v24 = vadd.f32 %v4197_v32, %v3177_v21  ;;  %v5752_v31 = vadd.f32 %v5222_v26, %v4522_v38  ;;  %5416 = vmatmul.bf16.vlgmr.msra.gmra.mxu1 %v11183_v62  ;;  %v4535_v21 = vld [vmem:[#allocation2 + $0x70] sm:$0xff]  ;;  %5513 = vmatpush.bf16.msrb.mxu3 %v4933_v44  ;;  %v6432_v44 = vpack.c.bf16 %v6320_v56, %v6313_v48  ;;  %v4837_v48 = vld [vmem:[%s12827_s3 + $0x5e0] sm:$0xff]  ;;  %v4844_v56 = vld [vmem:[%s12827_s3 + $0x618] sm:$0xff] }
 0x5f0   : > { %v4543_v38 = vld [vmem:[#allocation2 + $0xb0] sm:$0xff]  ;;  %5610 = vmatpush.bf16.msrb.mxu1 %v4941_v1  ;;  %v4984_v1 = vpack.c.bf16 %v4872_v52, %v4865_v0  ;;  %5653 = vmatpush.bf16.msra.mxu2 %v4928_v22  ;;  %v6299_v0 = vld [vmem:[%s12828_s4 + $0x620] sm:$0xff]  ;;  %v6369_v22 = vpack.c.bf16 %v6194_v35, %v6187_v33  ;;  %v6306_v52 = vld [vmem:[%s12828_s4 + $0x658] sm:$0xff] }
 0x5f1   : > { %4519 = vst [vmem:[#allocation2 + $0x370] sm:$0xff] %v4407_v24  ;;  %5318 = vmatmul.bf16.vlgmr.msra.gmra.mxu3 %v11183_v62  ;;  %v5074_v20 = vpop.f32.mrf.mxu2  ;;  %6519 = vmatpush.bf16.msra.mxu0 %v6376_v17  ;;  %v4914_v17 = vpack.c.bf16 %v4732_v4, %v4725_v46  ;;  %v4711_v33 = vld [vmem:[%s12827_s3 + $0x1f0] sm:$0xff]  ;;  %v4718_v35 = vld [vmem:[%s12827_s3 + $0x228] sm:$0xff]  ;;  %v6159_v46 = vld [vmem:[%s12828_s4 + $0x1c0] sm:$0xff] }
 0x5f2   : > { %5864 = vst [vmem:[#allocation2 + $0x8] sm:$0xff] %v5752_v31  ;;  %v6166_v4 = vld [vmem:[%s12828_s4 + $0x1f8] sm:$0xff] }
 0x5f3   : > { %v5174_v61 = vpop.f32.mrf.mxu0  ;;  %5702 = vmatpush.bf16.msra.mxu3 %v4984_v1  ;;  %v6425_v1 = vpack.c.bf16 %v6306_v52, %v6299_v0  ;;  %v4823_v0 = vld [vmem:[%s12827_s3 + $0x570] sm:$0xff]  ;;  %v4830_v52 = vld [vmem:[%s12827_s3 + $0x5a8] sm:$0xff] }
 0x5f4   : > { %v5123_v36 = vpop.f32.mrf.mxu3  ;;  %v5223_v42 = vpop.f32.mrf.mxu1  ;;  %5611 = vmatpush.bf16.msrb.mxu1 %v4934_v29  ;;  %v4977_v29 = vpack.c.bf16 %v4858_v25, %v4851_v53  ;;  %5654 = vmatpush.bf16.msra.mxu2 %v4921_v55  ;;  %v6285_v53 = vld [vmem:[%s12828_s4 + $0x5b0] sm:$0xff]  ;;  %v6362_v55 = vpack.c.bf16 %v6180_v63, %v6173_v12  ;;  %v6292_v25 = vld [vmem:[%s12828_s4 + $0x5e8] sm:$0xff]  ;;  %v4697_v12 = vld [vmem:[%s12827_s3 + $0x180] sm:$0xff] }
 0x5f5   : > { %v5124_v11 = vadd.f32 %v5123_v36, %v5074_v20  ;;  %v5224_v41 = vadd.f32 %v5223_v42, %v5174_v61  ;;  %6520 = vmatpush.bf16.msra.mxu0 %v6369_v22  ;;  %v4907_v22 = vpack.c.bf16 %v4718_v35, %v4711_v33  ;;  %v4704_v63 = vld [vmem:[%s12827_s3 + $0x1b8] sm:$0xff]  ;;  %v6145_v33 = vld [vmem:[%s12828_s4 + $0x150] sm:$0xff]  ;;  %v6152_v35 = vld [vmem:[%s12828_s4 + $0x188] sm:$0xff] }
 0x5f7   : > { %v5751_v54 = vadd.f32 %v5124_v11, %v4521_v40  ;;  %v5759_v43 = vadd.f32 %v5224_v41, %v4529_v45  ;;  %v4542_v40 = vld [vmem:[#allocation2 + $0xa8] sm:$0xff]  ;;  %5703 = vmatpush.bf16.msra.mxu3 %v4977_v29  ;;  %v6418_v29 = vpack.c.bf16 %v6292_v25, %v6285_v53  ;;  %v4809_v53 = vld [vmem:[%s12827_s3 + $0x500] sm:$0xff]  ;;  %v4816_v25 = vld [vmem:[%s12827_s3 + $0x538] sm:$0xff] }
 0x5f8   : > { %v4550_v45 = vld [vmem:[#allocation2 + $0xe8] sm:$0xff]  ;;  %6568 = vmatpush.bf16.msra.mxu1 %v6432_v44  ;;  %v4970_v44 = vpack.c.bf16 %v4844_v56, %v4837_v48  ;;  %5655 = vmatpush.bf16.msra.mxu2 %v4914_v17  ;;  %v6271_v48 = vld [vmem:[%s12828_s4 + $0x540] sm:$0xff]  ;;  %v6355_v17 = vpack.c.bf16 %v6166_v4, %v6159_v46  ;;  %v6278_v56 = vld [vmem:[%s12828_s4 + $0x578] sm:$0xff] }
 0x5f9   : > { %5863 = vst [vmem:[#allocation2] sm:$0xff] %v5751_v54  ;;  %v5076_v8 = vpop.f32.mrf.mxu2  ;;  %6521 = vmatpush.bf16.msra.mxu0 %v6362_v55  ;;  %v4900_v55 = vpack.c.bf16 %v4704_v63, %v4697_v12  ;;  %v4683_v46 = vld [vmem:[%s12827_s3 + $0x110] sm:$0xff]  ;;  %v4690_v4 = vld [vmem:[%s12827_s3 + $0x148] sm:$0xff]  ;;  %v6131_v12 = vld [vmem:[%s12828_s4 + $0xe0] sm:$0xff] }
 0x5fa   : > { %5871 = vst [vmem:[#allocation2 + $0x40] sm:$0xff] %v5759_v43  ;;  %v6138_v63 = vld [vmem:[%s12828_s4 + $0x118] sm:$0xff] }
 0x5fb   : > { %v5177_v60 = vpop.f32.mrf.mxu0  ;;  %5704 = vmatpush.bf16.msra.mxu3 %v4970_v44  ;;  %v6411_v44 = vpack.c.bf16 %v6278_v56, %v6271_v48  ;;  %v4795_v48 = vld [vmem:[%s12827_s3 + $0x490] sm:$0xff]  ;;  %v4802_v56 = vld [vmem:[%s12827_s3 + $0x4c8] sm:$0xff] }
 0x5fc   : > { %v5125_v6 = vpop.f32.mrf.mxu3  ;;  %v5226_v51 = vpop.f32.mrf.mxu1  ;;  %6569 = vmatpush.bf16.msra.mxu1 %v6425_v1  ;;  %v4963_v1 = vpack.c.bf16 %v4830_v52, %v4823_v0  ;;  %5656 = vmatpush.bf16.msra.mxu2 %v4907_v22  ;;  %v6257_v0 = vld [vmem:[%s12828_s4 + $0x4d0] sm:$0xff]  ;;  %v6348_v22 = vpack.c.bf16 %v6152_v35, %v6145_v33  ;;  %v6264_v52 = vld [vmem:[%s12828_s4 + $0x508] sm:$0xff]  ;;  %v4669_v33 = vld [vmem:[%s12827_s3 + $0xa0] sm:$0xff] }
 0x5fd   : > { %v5126_v59 = vadd.f32 %v5125_v6, %v5076_v8  ;;  %v5227_v16 = vadd.f32 %v5226_v51, %v5177_v60  ;;  %6522 = vmatpush.bf16.msra.mxu0 %v6355_v17  ;;  %v4893_v17 = vpack.c.bf16 %v4690_v4, %v4683_v46  ;;  %v4676_v35 = vld [vmem:[%s12827_s3 + $0xd8] sm:$0xff]  ;;  %v6117_v46 = vld [vmem:[%s12828_s4 + $0x70] sm:$0xff]  ;;  %v6124_v4 = vld [vmem:[%s12828_s4 + $0xa8] sm:$0xff] }
 0x5fe   : > { %5274 = vmatmul.bf16.gmra.mxu2 %v11216_v37  ;;  %5372 = vmatmul.bf16.gmra.mxu0 %v11216_v37 }
 0x5ff   : > { %v5758_v47 = vadd.f32 %v5126_v59, %v4528_v2  ;;  %v5766_v19 = vadd.f32 %v5227_v16, %v4536_v58  ;;  %5421 = vmatmul.bf16.gmra.mxu1 %v11221_v7  ;;  %v4549_v2 = vld [vmem:[#allocation2 + $0xe0] sm:$0xff]  ;;  %5705 = vmatpush.bf16.msra.mxu3 %v4963_v1  ;;  %v6404_v1 = vpack.c.bf16 %v6264_v52, %v6257_v0  ;;  %v4788_v52 = vld [vmem:[%s12827_s3 + $0x458] sm:$0xff] }
 0x600   : > { %v4557_v58 = vld [vmem:[#allocation2 + $0x120] sm:$0xff]  ;;  %6570 = vmatpush.bf16.msra.mxu1 %v6418_v29  ;;  %v4956_v29 = vpack.c.bf16 %v4816_v25, %v4809_v53  ;;  %5657 = vmatpush.bf16.msra.mxu2 %v4900_v55  ;;  %v6341_v55 = vpack.c.bf16 %v6138_v63, %v6131_v12  ;;  %v6250_v25 = vld [vmem:[%s12828_s4 + $0x498] sm:$0xff]  ;;  %v4655_v12 = vld [vmem:[%s12827_s3 + $0x30] sm:$0xff] }
 0x601   : > { %5870 = vst [vmem:[#allocation2 + $0x38] sm:$0xff] %v5758_v47  ;;  %5323 = vmatmul.bf16.gmra.mxu3 %v11221_v7  ;;  %v5079_v57 = vpop.f32.mrf.mxu2  ;;  %6523 = vmatpush.bf16.msra.mxu0 %v6348_v22  ;;  %v6243_v53 = vld [vmem:[%s12828_s4 + $0x460] sm:$0xff]  ;;  %v4886_v22 = vpack.c.bf16 %v4676_v35, %v4669_v33  ;;  %v4662_v63 = vld [vmem:[%s12827_s3 + $0x68] sm:$0xff]  ;;  %v6110_v35 = vld [vmem:[%s12828_s4 + $0x38] sm:$0xff] }
 0x602   : > { %5878 = vst [vmem:[#allocation2 + $0x78] sm:$0xff] %v5766_v19  ;;  %v4781_v0 = vld [vmem:[%s12827_s3 + $0x420] sm:$0xff] }
 0x603   : > { %v5179_v18 = vpop.f32.mrf.mxu0  ;;  %5706 = vmatpush.bf16.msra.mxu3 %v4956_v29  ;;  %v6397_v29 = vpack.c.bf16 %v6250_v25, %v6243_v53  ;;  %v4767_v53 = vld [vmem:[%s12827_s3 + $0x3b0] sm:$0xff]  ;;  %v4774_v25 = vld [vmem:[%s12827_s3 + $0x3e8] sm:$0xff]  ;;  %v6103_v33 = vld [vmem:[%s12828_s4] sm:$0xff] }
 0x604   : > { %v5128_v15 = vpop.f32.mrf.mxu3  ;;  %v5228_v34 = vpop.f32.mrf.mxu1  ;;  %6571 = vmatpush.bf16.msra.mxu1 %v6411_v44  ;;  %v4949_v44 = vpack.c.bf16 %v4802_v56, %v4795_v48  ;;  %5658 = vmatpush.bf16.msra.mxu2 %v4893_v17  ;;  %v6229_v48 = vld [vmem:[%s12828_s4 + $0x3f0] sm:$0xff]  ;;  %v6334_v17 = vpack.c.bf16 %v6124_v4, %v6117_v46  ;;  %v6236_v56 = vld [vmem:[%s12828_s4 + $0x428] sm:$0xff]  ;;  %v6202_v46 = vld [vmem:[%s12828_s4 + $0x318] sm:$0xff] }
 0x605   : > { %v5129_v32 = vadd.f32 %v5128_v15, %v5079_v57  ;;  %v5229_v26 = vadd.f32 %v5228_v34, %v5179_v18  ;;  %6524 = vmatpush.bf16.msra.mxu0 %v6341_v55  ;;  %v4879_v55 = vpack.c.bf16 %v4662_v63, %v4655_v12  ;;  %v6209_v4 = vld [vmem:[%s12828_s4 + $0x350] sm:$0xff]  ;;  %v6203_v12 = vld [vmem:[%s12828_s4 + $0x320] sm:$0xff]  ;;  %v6210_v63 = vld [vmem:[%s12828_s4 + $0x358] sm:$0xff] }
 0x607   : > { %v5765_v24 = vadd.f32 %v5129_v32, %v4535_v21  ;;  %v5773_v31 = vadd.f32 %v5229_v26, %v4543_v38  ;;  %v4556_v21 = vld [vmem:[#allocation2 + $0x118] sm:$0xff]  ;;  %5707 = vmatpush.bf16.msra.mxu3 %v4949_v44  ;;  %v6390_v44 = vpack.c.bf16 %v6236_v56, %v6229_v48  ;;  %v6321_v56 = vld [vmem:[%s12828_s4 + $0x6d0] sm:$0xff] }
 0x608   : > { %v4564_v38 = vld [vmem:[#allocation2 + $0x158] sm:$0xff]  ;;  %6572 = vmatpush.bf16.msra.mxu1 %v6404_v1  ;;  %v4942_v1 = vpack.c.bf16 %v4788_v52, %v4781_v0  ;;  %5659 = vmatpush.bf16.msra.mxu2 %v4886_v22  ;;  %v6215_v0 = vld [vmem:[%s12828_s4 + $0x380] sm:$0xff]  ;;  %v6327_v22 = vpack.c.bf16 %v6110_v35, %v6103_v33  ;;  %v6188_v33 = vld [vmem:[%s12828_s4 + $0x2a8] sm:$0xff] }
 0x609   : > { %5877 = vst [vmem:[#allocation2 + $0x70] sm:$0xff] %v5765_v24  ;;  %v5081_v20 = vpop.f32.mrf.mxu2  ;;  %6525 = vmatpush.bf16.msra.mxu0 %v6334_v17  ;;  %v6222_v52 = vld [vmem:[%s12828_s4 + $0x3b8] sm:$0xff]  ;;  %v6377_v17 = vpack.c.bf16 %v6209_v4, %v6202_v46  ;;  %v6195_v35 = vld [vmem:[%s12828_s4 + $0x2e0] sm:$0xff]  ;;  %v8216_v46 = vld [vmem:[%s8443_s20 + $0x44] sm:$0xf0] }
 0x60a   : > { %5885 = vst [vmem:[#allocation2 + $0xb0] sm:$0xff] %v5773_v31  ;;  %v6314_v48 = vld [vmem:[%s12828_s4 + $0x698] sm:$0xff]  ;;  %v8215_v4 = vld [vmem:[%s8443_s20 + $0x24] sm:$0xf] }
 0x60b   : > { %v5182_v61 = vpop.f32.mrf.mxu0  ;;  %5708 = vmatpush.bf16.msra.mxu3 %v4942_v1  ;;  %v6383_v1 = vpack.c.bf16 %v6222_v52, %v6215_v0  ;;  %v6300_v0 = vld [vmem:[%s12828_s4 + $0x628] sm:$0xff]  ;;  %v6307_v52 = vld [vmem:[%s12828_s4 + $0x660] sm:$0xff] }
 0x60c   : > { %v5130_v36 = vpop.f32.mrf.mxu3  ;;  %v5231_v42 = vpop.f32.mrf.mxu1  ;;  %6573 = vmatpush.bf16.msra.mxu1 %v6397_v29  ;;  %v4935_v29 = vpack.c.bf16 %v4774_v25, %v4767_v53  ;;  %5660 = vmatpush.bf16.msra.mxu2 %v4879_v55  ;;  %v6315_v53 = vld [vmem:[%s12828_s4 + $0x6a0] sm:$0xff]  ;;  %v6378_v55 = vpack.c.bf16 %v6210_v63, %v6203_v12  ;;  %v6322_v25 = vld [vmem:[%s12828_s4 + $0x6d8] sm:$0xff] }
 0x60d   : > { %v5131_v11 = vadd.f32 %v5130_v36, %v5081_v20  ;;  %v5232_v41 = vadd.f32 %v5231_v42, %v5182_v61  ;;  %6526 = vmatpush.bf16.msra.mxu0 %v6327_v22  ;;  %v6370_v22 = vpack.c.bf16 %v6195_v35, %v6188_v33  ;;  %v4533_v35 = vld [vmem:[#allocation2 + $0x60] sm:$0xff] }
 0x60e   : > { %5279 = vmatmul.bf16.gmra.mxu2 %v11254_v10  ;;  %5377 = vmatmul.bf16.gmra.mxu0 %v11254_v10 }
 0x60f   : > { %v5772_v54 = vadd.f32 %v5131_v11, %v4542_v40  ;;  %v5780_v43 = vadd.f32 %v5232_v41, %v4550_v45  ;;  %5426 = vmatmul.bf16.gmra.mxu1 %v11259_v14  ;;  %v4563_v40 = vld [vmem:[#allocation2 + $0x150] sm:$0xff]  ;;  %5709 = vmatpush.bf16.msra.mxu3 %v4935_v29  ;;  %v6434_v29 = vpack.c.bf16 %v6322_v25, %v6315_v53 }
 0x610   : > { %v4571_v45 = vld [vmem:[#allocation2 + $0x190] sm:$0xff]  ;;  %6574 = vmatpush.bf16.msra.mxu1 %v6390_v44  ;;  %v6433_v44 = vpack.c.bf16 %v6321_v56, %v6314_v48  ;;  %v8089_v48 = vld [vmem:[%s8443_s20 + $0x48] sm:$0xf0] }
 0x611   : > { %5884 = vst [vmem:[#allocation2 + $0xa8] sm:$0xff] %v5772_v54  ;;  %5328 = vmatmul.bf16.gmra.mxu3 %v11259_v14  ;;  %v5084_v8 = vpop.f32.mrf.mxu2  ;;  %v6196_v56 = vld [vmem:[%s12828_s4 + $0x2e8] sm:$0xff] }
 0x612   : > { %5892 = vst [vmem:[#allocation2 + $0xe8] sm:$0xff] %v5780_v43 }
 0x613   : > { %v5184_v60 = vpop.f32.mrf.mxu0 }
 0x614   : > { %v5133_v6 = vpop.f32.mrf.mxu3  ;;  %v5233_v51 = vpop.f32.mrf.mxu1  ;;  %6575 = vmatpush.bf16.msra.mxu1 %v6383_v1  ;;  %v6426_v1 = vpack.c.bf16 %v6307_v52, %v6300_v0  ;;  %v8217_v52 = vld [vmem:[%s8443_s20 + $0x74] sm:$0xf] }
 0x615   : > { %v5134_v59 = vadd.f32 %v5133_v6, %v5084_v8  ;;  %v5234_v16 = vadd.f32 %v5233_v51, %v5184_v60 }
 0x617   : > { %v5779_v47 = vadd.f32 %v5134_v59, %v4549_v2  ;;  %v5787_v19 = vadd.f32 %v5234_v16, %v4557_v58  ;;  %v4570_v2 = vld [vmem:[#allocation2 + $0x188] sm:$0xff] }
 0x618   : > { %v4578_v58 = vld [vmem:[#allocation2 + $0x1c8] sm:$0xff] }
 0x619   : > { %5891 = vst [vmem:[#allocation2 + $0xe0] sm:$0xff] %v5779_v47  ;;  %v5086_v57 = vpop.f32.mrf.mxu2 }
 0x61a   : > { %5899 = vst [vmem:[#allocation2 + $0x120] sm:$0xff] %v5787_v19 }
 0x61b   : > { %v5187_v18 = vpop.f32.mrf.mxu0 }
 0x61c   : > { %v5135_v15 = vpop.f32.mrf.mxu3  ;;  %v5236_v34 = vpop.f32.mrf.mxu1 }
 0x61d   : > { %v5136_v32 = vadd.f32 %v5135_v15, %v5086_v57  ;;  %v5237_v26 = vadd.f32 %v5236_v34, %v5187_v18 }
 0x61e   : > { %5284 = vmatmul.bf16.gmra.mxu2 %v11292_v3  ;;  %5382 = vmatmul.bf16.gmra.mxu0 %v11292_v3 }
 0x61f   : > { %v5786_v24 = vadd.f32 %v5136_v32, %v4556_v21  ;;  %v5794_v31 = vadd.f32 %v5237_v26, %v4564_v38  ;;  %5431 = vmatmul.bf16.gmra.mxu1 %v11297_v30  ;;  %v4577_v21 = vld [vmem:[#allocation2 + $0x1c0] sm:$0xff] }
 0x620   : > { %v4585_v38 = vld [vmem:[#allocation2 + $0x200] sm:$0xff] }
 0x621   : > { %5898 = vst [vmem:[#allocation2 + $0x118] sm:$0xff] %v5786_v24  ;;  %5333 = vmatmul.bf16.gmra.mxu3 %v11297_v30  ;;  %v5089_v20 = vpop.f32.mrf.mxu2 }
 0x622   : > { %5906 = vst [vmem:[#allocation2 + $0x158] sm:$0xff] %v5794_v31 }
 0x623   : > { %v5189_v61 = vpop.f32.mrf.mxu0 }
 0x624   : > { %v5138_v36 = vpop.f32.mrf.mxu3  ;;  %v5238_v42 = vpop.f32.mrf.mxu1 }
 0x625   : > { %v5139_v11 = vadd.f32 %v5138_v36, %v5089_v20  ;;  %v5239_v41 = vadd.f32 %v5238_v42, %v5189_v61 }
 0x627   : > { %v5793_v54 = vadd.f32 %v5139_v11, %v4563_v40  ;;  %v5801_v43 = vadd.f32 %v5239_v41, %v4571_v45  ;;  %v4584_v40 = vld [vmem:[#allocation2 + $0x1f8] sm:$0xff] }
 0x628   : > { %v4592_v45 = vld [vmem:[#allocation2 + $0x238] sm:$0xff] }
 0x629   : > { %5905 = vst [vmem:[#allocation2 + $0x150] sm:$0xff] %v5793_v54  ;;  %v5091_v8 = vpop.f32.mrf.mxu2 }
 0x62a   : > { %5913 = vst [vmem:[#allocation2 + $0x190] sm:$0xff] %v5801_v43 }
 0x62b   : > { %v5192_v60 = vpop.f32.mrf.mxu0 }
 0x62c   : > { %v5140_v6 = vpop.f32.mrf.mxu3  ;;  %v5241_v51 = vpop.f32.mrf.mxu1 }
 0x62d   : > { %v5141_v59 = vadd.f32 %v5140_v6, %v5091_v8  ;;  %v5242_v16 = vadd.f32 %v5241_v51, %v5192_v60 }
 0x62e   : > { %5289 = vmatmul.bf16.gmra.mxu2 %v11330_v28  ;;  %5387 = vmatmul.bf16.gmra.mxu0 %v11330_v28 }
 0x62f   : > { %v5800_v47 = vadd.f32 %v5141_v59, %v4570_v2  ;;  %v5808_v19 = vadd.f32 %v5242_v16, %v4578_v58  ;;  %5436 = vmatmul.bf16.gmra.mxu1 %v11335_v5  ;;  %v4591_v2 = vld [vmem:[#allocation2 + $0x230] sm:$0xff] }
 0x630   : > { %v4599_v58 = vld [vmem:[#allocation2 + $0x270] sm:$0xff] }
 0x631   : > { %5912 = vst [vmem:[#allocation2 + $0x188] sm:$0xff] %v5800_v47  ;;  %5338 = vmatmul.bf16.gmra.mxu3 %v11335_v5  ;;  %v5094_v57 = vpop.f32.mrf.mxu2 }
 0x632   : > { %5920 = vst [vmem:[#allocation2 + $0x1c8] sm:$0xff] %v5808_v19 }
 0x633   : > { %v5194_v18 = vpop.f32.mrf.mxu0 }
 0x634   : > { %v5143_v15 = vpop.f32.mrf.mxu3  ;;  %v5243_v34 = vpop.f32.mrf.mxu1 }
 0x635   : > { %v5144_v32 = vadd.f32 %v5143_v15, %v5094_v57  ;;  %v5244_v26 = vadd.f32 %v5243_v34, %v5194_v18 }
 0x637   : > { %v5807_v24 = vadd.f32 %v5144_v32, %v4577_v21  ;;  %v5815_v31 = vadd.f32 %v5244_v26, %v4585_v38  ;;  %v4598_v21 = vld [vmem:[#allocation2 + $0x268] sm:$0xff] }
 0x638   : > { %v4606_v38 = vld [vmem:[#allocation2 + $0x2a8] sm:$0xff] }
 0x639   : > { %5919 = vst [vmem:[#allocation2 + $0x1c0] sm:$0xff] %v5807_v24  ;;  %v5096_v20 = vpop.f32.mrf.mxu2 }
 0x63a   : > { %5927 = vst [vmem:[#allocation2 + $0x200] sm:$0xff] %v5815_v31 }
 0x63b   : > { %v5197_v61 = vpop.f32.mrf.mxu0 }
 0x63c   : > { %v5145_v36 = vpop.f32.mrf.mxu3  ;;  %v5246_v42 = vpop.f32.mrf.mxu1 }
 0x63d   : > { %v5146_v11 = vadd.f32 %v5145_v36, %v5096_v20  ;;  %v5247_v41 = vadd.f32 %v5246_v42, %v5197_v61 }
 0x63e   : > { %5294 = vmatmul.bf16.gmra.mxu2 %v11368_v49  ;;  %5392 = vmatmul.bf16.gmra.mxu0 %v11368_v49 }
 0x63f   : > { %v5814_v54 = vadd.f32 %v5146_v11, %v4584_v40  ;;  %v5822_v43 = vadd.f32 %v5247_v41, %v4592_v45  ;;  %5441 = vmatmul.bf16.gmra.mxu1 %v11373_v13  ;;  %v4605_v40 = vld [vmem:[#allocation2 + $0x2a0] sm:$0xff] }
 0x640   : > { %v4613_v45 = vld [vmem:[#allocation2 + $0x2e0] sm:$0xff] }
 0x641   : > { %5926 = vst [vmem:[#allocation2 + $0x1f8] sm:$0xff] %v5814_v54  ;;  %5343 = vmatmul.bf16.gmra.mxu3 %v11373_v13  ;;  %v5099_v8 = vpop.f32.mrf.mxu2 }
 0x642   : > { %5934 = vst [vmem:[#allocation2 + $0x238] sm:$0xff] %v5822_v43 }
 0x643   : > { %v5199_v60 = vpop.f32.mrf.mxu0 }
 0x644   : > { %v5148_v6 = vpop.f32.mrf.mxu3  ;;  %v5248_v51 = vpop.f32.mrf.mxu1 }
 0x645   : > { %v5149_v59 = vadd.f32 %v5148_v6, %v5099_v8  ;;  %v5249_v16 = vadd.f32 %v5248_v51, %v5199_v60 }
 0x647   : > { %v5821_v47 = vadd.f32 %v5149_v59, %v4591_v2  ;;  %v5829_v19 = vadd.f32 %v5249_v16, %v4599_v58  ;;  %v4612_v2 = vld [vmem:[#allocation2 + $0x2d8] sm:$0xff] }
 0x648   : > { %v4620_v58 = vld [vmem:[#allocation2 + $0x318] sm:$0xff] }
 0x649   : > { %5933 = vst [vmem:[#allocation2 + $0x230] sm:$0xff] %v5821_v47  ;;  %v5101_v57 = vpop.f32.mrf.mxu2 }
 0x64a   : > { %5941 = vst [vmem:[#allocation2 + $0x270] sm:$0xff] %v5829_v19 }
 0x64b   : > { %v5202_v18 = vpop.f32.mrf.mxu0 }
 0x64c   : > { %v5150_v15 = vpop.f32.mrf.mxu3  ;;  %v5251_v34 = vpop.f32.mrf.mxu1 }
 0x64d   : > { %v5151_v32 = vadd.f32 %v5150_v15, %v5101_v57  ;;  %v5252_v26 = vadd.f32 %v5251_v34, %v5202_v18 }
 0x64e   : > { %5299 = vmatmul.bf16.gmra.mxu2 %v11406_v27  ;;  %5397 = vmatmul.bf16.gmra.mxu0 %v11406_v27 }
 0x64f   : > { %v5828_v24 = vadd.f32 %v5151_v32, %v4598_v21  ;;  %v5836_v31 = vadd.f32 %v5252_v26, %v4606_v38  ;;  %5446 = vmatmul.bf16.gmra.mxu1 %v11411_v9  ;;  %v4619_v21 = vld [vmem:[#allocation2 + $0x310] sm:$0xff] }
 0x650   : > { %v4627_v38 = vld [vmem:[#allocation2 + $0x350] sm:$0xff] }
 0x651   : > { %5940 = vst [vmem:[#allocation2 + $0x268] sm:$0xff] %v5828_v24  ;;  %5348 = vmatmul.bf16.gmra.mxu3 %v11411_v9  ;;  %v5104_v20 = vpop.f32.mrf.mxu2 }
 0x652   : > { %5948 = vst [vmem:[#allocation2 + $0x2a8] sm:$0xff] %v5836_v31 }
 0x653   : > { %v5204_v61 = vpop.f32.mrf.mxu0 }
 0x654   : > { %v5153_v36 = vpop.f32.mrf.mxu3  ;;  %v5253_v42 = vpop.f32.mrf.mxu1 }
 0x655   : > { %v5154_v11 = vadd.f32 %v5153_v36, %v5104_v20  ;;  %v5254_v41 = vadd.f32 %v5253_v42, %v5204_v61 }
 0x657   : > { %v5835_v54 = vadd.f32 %v5154_v11, %v4605_v40  ;;  %v5843_v43 = vadd.f32 %v5254_v41, %v4613_v45  ;;  %v4626_v40 = vld [vmem:[#allocation2 + $0x348] sm:$0xff]  ;;  %v4524_v45 = vld [vmem:[#allocation2 + $0x18] sm:$0xff] }
 0x659   : > { %5947 = vst [vmem:[#allocation2 + $0x2a0] sm:$0xff] %v5835_v54  ;;  %v5106_v8 = vpop.f32.mrf.mxu2 }
 0x65a   : > { %5955 = vst [vmem:[#allocation2 + $0x2e0] sm:$0xff] %v5843_v43 }
 0x65b   : > { %v5207_v60 = vpop.f32.mrf.mxu0 }
 0x65c   : > { %v5155_v6 = vpop.f32.mrf.mxu3  ;;  %v5256_v51 = vpop.f32.mrf.mxu1 }
 0x65d   : > { %v5156_v59 = vadd.f32 %v5155_v6, %v5106_v8  ;;  %v5257_v16 = vadd.f32 %v5256_v51, %v5207_v60 }
 0x65e   : > { %5304 = vmatmul.bf16.gmra.mxu2 %v11444_v23  ;;  %5402 = vmatmul.bf16.gmra.mxu0 %v11444_v23 }
 0x65f   : > { %v5842_v47 = vadd.f32 %v5156_v59, %v4612_v2  ;;  %v5850_v19 = vadd.f32 %v5257_v16, %v4620_v58  ;;  %5451 = vmatmul.bf16.gmra.mxu1 %v11449_v39  ;;  %v4523_v2 = vld [vmem:[#allocation2 + $0x10] sm:$0xff] }
 0x660   : > { %v4531_v58 = vld [vmem:[#allocation2 + $0x50] sm:$0xff] }
 0x661   : > { %5954 = vst [vmem:[#allocation2 + $0x2d8] sm:$0xff] %v5842_v47  ;;  %5353 = vmatmul.bf16.gmra.mxu3 %v11449_v39  ;;  %v5109_v57 = vpop.f32.mrf.mxu2 }
 0x662   : > { %5962 = vst [vmem:[#allocation2 + $0x318] sm:$0xff] %v5850_v19 }
 0x663   : > { %v5209_v18 = vpop.f32.mrf.mxu0 }
 0x664   : > { %v5158_v15 = vpop.f32.mrf.mxu3  ;;  %v5258_v34 = vpop.f32.mrf.mxu1 }
 0x665   : > { %v5159_v32 = vadd.f32 %v5158_v15, %v5109_v57  ;;  %v5259_v26 = vadd.f32 %v5258_v34, %v5209_v18 }
 0x667   : > { %v5849_v24 = vadd.f32 %v5159_v32, %v4619_v21  ;;  %v5857_v31 = vadd.f32 %v5259_v26, %v4627_v38  ;;  %v4530_v21 = vld [vmem:[#allocation2 + $0x48] sm:$0xff] }
 0x668   : > { %v4538_v38 = vld [vmem:[#allocation2 + $0x88] sm:$0xff] }
 0x669   : > { %5961 = vst [vmem:[#allocation2 + $0x310] sm:$0xff] %v5849_v24  ;;  %v5111_v20 = vpop.f32.mrf.mxu2 }
 0x66a   : > { %5969 = vst [vmem:[#allocation2 + $0x350] sm:$0xff] %v5857_v31 }
 0x66b   : > { %v5368_v61 = vpop.f32.mrf.mxu0 }
 0x66c   : > { %v5160_v36 = vpop.f32.mrf.mxu3  ;;  %v5417_v42 = vpop.f32.mrf.mxu1 }
 0x66d   : > { %v5161_v11 = vadd.f32 %v5160_v36, %v5111_v20  ;;  %v5418_v41 = vadd.f32 %v5417_v42, %v5368_v61 }
 0x66e   : > { %5465 = vmatmul.bf16.vlgmr.msrb.gmra.mxu2 %v11178_v50  ;;  %5563 = vmatmul.bf16.vlgmr.msrb.gmra.mxu0 %v11178_v50 }
 0x66f   : > { %v5856_v54 = vadd.f32 %v5161_v11, %v4626_v40  ;;  %v5754_v43 = vadd.f32 %v5418_v41, %v4524_v45  ;;  %5612 = vmatmul.bf16.vlgmr.msrb.gmra.mxu1 %v11183_v62  ;;  %v4537_v40 = vld [vmem:[#allocation2 + $0x80] sm:$0xff]  ;;  %6617 = vmatpush.bf16.msrb.mxu2 %v6377_v17  ;;  %v6189_v17 = vld [vmem:[%s12828_s4 + $0x2b0] sm:$0xff] }
 0x670   : > { %v4545_v45 = vld [vmem:[#allocation2 + $0xc0] sm:$0xff]  ;;  %6715 = vmatpush.bf16.msrb.mxu0 %v6378_v55  ;;  %6764 = vmatpush.bf16.msrb.mxu1 %v6434_v29 }
 0x671   : > { %5968 = vst [vmem:[#allocation2 + $0x348] sm:$0xff] %v5856_v54  ;;  %5514 = vmatmul.bf16.vlgmr.msrb.gmra.mxu3 %v11183_v62  ;;  %v5270_v8 = vpop.f32.mrf.mxu2 }
 0x672   : > { %5866 = vst [vmem:[#allocation2 + $0x18] sm:$0xff] %v5754_v43  ;;  %6666 = vmatpush.bf16.msrb.mxu3 %v6433_v44 }
 0x673   : > { %v5370_v60 = vpop.f32.mrf.mxu0  ;;  %6618 = vmatpush.bf16.msrb.mxu2 %v6370_v22  ;;  %v8218_v22 = vld [vmem:[%s8443_s20 + $0x94] sm:$0xf0] }
 0x674   : > { %v5319_v6 = vpop.f32.mrf.mxu3  ;;  %v5419_v51 = vpop.f32.mrf.mxu1 }
 0x675   : > { %v5320_v59 = vadd.f32 %v5319_v6, %v5270_v8  ;;  %v5420_v16 = vadd.f32 %v5419_v51, %v5370_v60 }
 0x676   : > { %6667 = vmatpush.bf16.msrb.mxu3 %v6426_v1  ;;  %v6175_v1 = vld [vmem:[%s12828_s4 + $0x240] sm:$0xff] }
 0x677   : > { %v5753_v47 = vadd.f32 %v5320_v59, %v4523_v2  ;;  %v5761_v19 = vadd.f32 %v5420_v16, %v4531_v58  ;;  %v4544_v2 = vld [vmem:[#allocation2 + $0xb8] sm:$0xff] }
 0x678   : > { %v4552_v58 = vld [vmem:[#allocation2 + $0xf8] sm:$0xff] }
 0x679   : > { %5865 = vst [vmem:[#allocation2 + $0x10] sm:$0xff] %v5753_v47  ;;  %v5272_v57 = vpop.f32.mrf.mxu2 }
 0x67a   : > { %5873 = vst [vmem:[#allocation2 + $0x50] sm:$0xff] %v5761_v19 }
 0x67b   : > { %v5373_v18 = vpop.f32.mrf.mxu0 }
 0x67c   : > { %v5321_v15 = vpop.f32.mrf.mxu3  ;;  %v5422_v34 = vpop.f32.mrf.mxu1 }
 0x67d   : > { %v5322_v32 = vadd.f32 %v5321_v15, %v5272_v57  ;;  %v5423_v26 = vadd.f32 %v5422_v34, %v5373_v18 }
 0x67e   : > { %5470 = vmatmul.bf16.gmra.mxu2 %v11216_v37  ;;  %5568 = vmatmul.bf16.gmra.mxu0 %v11216_v37 }
 0x67f   : > { %v5760_v24 = vadd.f32 %v5322_v32, %v4530_v21  ;;  %v5768_v31 = vadd.f32 %v5423_v26, %v4538_v38  ;;  %5617 = vmatmul.bf16.gmra.mxu1 %v11221_v7  ;;  %v4551_v21 = vld [vmem:[#allocation2 + $0xf0] sm:$0xff] }
 0x680   : > { %v4559_v38 = vld [vmem:[#allocation2 + $0x130] sm:$0xff] }
 0x681   : > { %5872 = vst [vmem:[#allocation2 + $0x48] sm:$0xff] %v5760_v24  ;;  %5519 = vmatmul.bf16.gmra.mxu3 %v11221_v7  ;;  %v5275_v20 = vpop.f32.mrf.mxu2 }
 0x682   : > { %5880 = vst [vmem:[#allocation2 + $0x88] sm:$0xff] %v5768_v31 }
 0x683   : > { %v5375_v61 = vpop.f32.mrf.mxu0 }
 0x684   : > { %v5324_v36 = vpop.f32.mrf.mxu3  ;;  %v5424_v42 = vpop.f32.mrf.mxu1 }
 0x685   : > { %v5325_v11 = vadd.f32 %v5324_v36, %v5275_v20  ;;  %v5425_v41 = vadd.f32 %v5424_v42, %v5375_v61 }
 0x687   : > { %v5767_v54 = vadd.f32 %v5325_v11, %v4537_v40  ;;  %v5775_v43 = vadd.f32 %v5425_v41, %v4545_v45  ;;  %v4558_v40 = vld [vmem:[#allocation2 + $0x128] sm:$0xff] }
 0x688   : > { %v4566_v45 = vld [vmem:[#allocation2 + $0x168] sm:$0xff] }
 0x689   : > { %5879 = vst [vmem:[#allocation2 + $0x80] sm:$0xff] %v5767_v54  ;;  %v5277_v8 = vpop.f32.mrf.mxu2 }
 0x68a   : > { %5887 = vst [vmem:[#allocation2 + $0xc0] sm:$0xff] %v5775_v43 }
 0x68b   : > { %v5378_v60 = vpop.f32.mrf.mxu0 }
 0x68c   : > { %v5326_v6 = vpop.f32.mrf.mxu3  ;;  %v5427_v51 = vpop.f32.mrf.mxu1 }
 0x68d   : > { %v5327_v59 = vadd.f32 %v5326_v6, %v5277_v8  ;;  %v5428_v16 = vadd.f32 %v5427_v51, %v5378_v60 }
 0x68e   : > { %5475 = vmatmul.bf16.gmra.mxu2 %v11254_v10  ;;  %5573 = vmatmul.bf16.gmra.mxu0 %v11254_v10 }
 0x68f   : > { %v5774_v47 = vadd.f32 %v5327_v59, %v4544_v2  ;;  %v5782_v19 = vadd.f32 %v5428_v16, %v4552_v58  ;;  %5622 = vmatmul.bf16.gmra.mxu1 %v11259_v14  ;;  %v4565_v2 = vld [vmem:[#allocation2 + $0x160] sm:$0xff] }
 0x690   : > { %v4573_v58 = vld [vmem:[#allocation2 + $0x1a0] sm:$0xff] }
 0x691   : > { %5886 = vst [vmem:[#allocation2 + $0xb8] sm:$0xff] %v5774_v47  ;;  %5524 = vmatmul.bf16.gmra.mxu3 %v11259_v14  ;;  %v5280_v57 = vpop.f32.mrf.mxu2 }
 0x692   : > { %5894 = vst [vmem:[#allocation2 + $0xf8] sm:$0xff] %v5782_v19 }
 0x693   : > { %v5380_v18 = vpop.f32.mrf.mxu0 }
 0x694   : > { %v5329_v15 = vpop.f32.mrf.mxu3  ;;  %v5429_v34 = vpop.f32.mrf.mxu1 }
 0x695   : > { %v5330_v32 = vadd.f32 %v5329_v15, %v5280_v57  ;;  %v5430_v26 = vadd.f32 %v5429_v34, %v5380_v18 }
 0x697   : > { %v5781_v24 = vadd.f32 %v5330_v32, %v4551_v21  ;;  %v5789_v31 = vadd.f32 %v5430_v26, %v4559_v38  ;;  %v4572_v21 = vld [vmem:[#allocation2 + $0x198] sm:$0xff] }
 0x698   : > { %v4580_v38 = vld [vmem:[#allocation2 + $0x1d8] sm:$0xff] }
 0x699   : > { %5893 = vst [vmem:[#allocation2 + $0xf0] sm:$0xff] %v5781_v24  ;;  %v5282_v20 = vpop.f32.mrf.mxu2 }
 0x69a   : > { %5901 = vst [vmem:[#allocation2 + $0x130] sm:$0xff] %v5789_v31 }
 0x69b   : > { %v5383_v61 = vpop.f32.mrf.mxu0 }
 0x69c   : > { %v5331_v36 = vpop.f32.mrf.mxu3  ;;  %v5432_v42 = vpop.f32.mrf.mxu1 }
 0x69d   : > { %v5332_v11 = vadd.f32 %v5331_v36, %v5282_v20  ;;  %v5433_v41 = vadd.f32 %v5432_v42, %v5383_v61 }
 0x69e   : > { %5480 = vmatmul.bf16.gmra.mxu2 %v11292_v3  ;;  %5578 = vmatmul.bf16.gmra.mxu0 %v11292_v3 }
 0x69f   : > { %v5788_v54 = vadd.f32 %v5332_v11, %v4558_v40  ;;  %v5796_v43 = vadd.f32 %v5433_v41, %v4566_v45  ;;  %5627 = vmatmul.bf16.gmra.mxu1 %v11297_v30  ;;  %v4579_v40 = vld [vmem:[#allocation2 + $0x1d0] sm:$0xff] }
 0x6a0   : > { %v4587_v45 = vld [vmem:[#allocation2 + $0x210] sm:$0xff] }
 0x6a1   : > { %5900 = vst [vmem:[#allocation2 + $0x128] sm:$0xff] %v5788_v54  ;;  %5529 = vmatmul.bf16.gmra.mxu3 %v11297_v30  ;;  %v5285_v8 = vpop.f32.mrf.mxu2 }
 0x6a2   : > { %5908 = vst [vmem:[#allocation2 + $0x168] sm:$0xff] %v5796_v43 }
 0x6a3   : > { %v5385_v60 = vpop.f32.mrf.mxu0 }
 0x6a4   : > { %v5334_v6 = vpop.f32.mrf.mxu3  ;;  %v5434_v51 = vpop.f32.mrf.mxu1 }
 0x6a5   : > { %v5335_v59 = vadd.f32 %v5334_v6, %v5285_v8  ;;  %v5435_v16 = vadd.f32 %v5434_v51, %v5385_v60 }
 0x6a7   : > { %v5795_v47 = vadd.f32 %v5335_v59, %v4565_v2  ;;  %v5803_v19 = vadd.f32 %v5435_v16, %v4573_v58  ;;  %v4586_v2 = vld [vmem:[#allocation2 + $0x208] sm:$0xff] }
 0x6a8   : > { %v4594_v58 = vld [vmem:[#allocation2 + $0x248] sm:$0xff] }
 0x6a9   : > { %5907 = vst [vmem:[#allocation2 + $0x160] sm:$0xff] %v5795_v47  ;;  %v5287_v57 = vpop.f32.mrf.mxu2 }
 0x6aa   : > { %5915 = vst [vmem:[#allocation2 + $0x1a0] sm:$0xff] %v5803_v19 }
 0x6ab   : > { %v5388_v18 = vpop.f32.mrf.mxu0 }
 0x6ac   : > { %v5336_v15 = vpop.f32.mrf.mxu3  ;;  %v5437_v34 = vpop.f32.mrf.mxu1 }
 0x6ad   : > { %v5337_v32 = vadd.f32 %v5336_v15, %v5287_v57  ;;  %v5438_v26 = vadd.f32 %v5437_v34, %v5388_v18 }
 0x6ae   : > { %5485 = vmatmul.bf16.gmra.mxu2 %v11330_v28  ;;  %5583 = vmatmul.bf16.gmra.mxu0 %v11330_v28 }
 0x6af   : > { %v5802_v24 = vadd.f32 %v5337_v32, %v4572_v21  ;;  %v5810_v31 = vadd.f32 %v5438_v26, %v4580_v38  ;;  %5632 = vmatmul.bf16.gmra.mxu1 %v11335_v5  ;;  %v4593_v21 = vld [vmem:[#allocation2 + $0x240] sm:$0xff] }
 0x6b0   : > { %v4601_v38 = vld [vmem:[#allocation2 + $0x280] sm:$0xff] }
 0x6b1   : > { %5914 = vst [vmem:[#allocation2 + $0x198] sm:$0xff] %v5802_v24  ;;  %5534 = vmatmul.bf16.gmra.mxu3 %v11335_v5  ;;  %v5290_v20 = vpop.f32.mrf.mxu2 }
 0x6b2   : > { %5922 = vst [vmem:[#allocation2 + $0x1d8] sm:$0xff] %v5810_v31 }
 0x6b3   : > { %v5390_v61 = vpop.f32.mrf.mxu0 }
 0x6b4   : > { %v5339_v36 = vpop.f32.mrf.mxu3  ;;  %v5439_v42 = vpop.f32.mrf.mxu1 }
 0x6b5   : > { %v5340_v11 = vadd.f32 %v5339_v36, %v5290_v20  ;;  %v5440_v41 = vadd.f32 %v5439_v42, %v5390_v61 }
 0x6b7   : > { %v5809_v54 = vadd.f32 %v5340_v11, %v4579_v40  ;;  %v5817_v43 = vadd.f32 %v5440_v41, %v4587_v45  ;;  %v4600_v40 = vld [vmem:[#allocation2 + $0x278] sm:$0xff] }
 0x6b8   : > { %v4608_v45 = vld [vmem:[#allocation2 + $0x2b8] sm:$0xff] }
 0x6b9   : > { %5921 = vst [vmem:[#allocation2 + $0x1d0] sm:$0xff] %v5809_v54  ;;  %v5292_v8 = vpop.f32.mrf.mxu2 }
 0x6ba   : > { %5929 = vst [vmem:[#allocation2 + $0x210] sm:$0xff] %v5817_v43 }
 0x6bb   : > { %v5393_v60 = vpop.f32.mrf.mxu0 }
 0x6bc   : > { %v5341_v6 = vpop.f32.mrf.mxu3  ;;  %v5442_v51 = vpop.f32.mrf.mxu1 }
 0x6bd   : > { %v5342_v59 = vadd.f32 %v5341_v6, %v5292_v8  ;;  %v5443_v16 = vadd.f32 %v5442_v51, %v5393_v60 }
 0x6be   : > { %5490 = vmatmul.bf16.gmra.mxu2 %v11368_v49  ;;  %5588 = vmatmul.bf16.gmra.mxu0 %v11368_v49 }
 0x6bf   : > { %v5816_v47 = vadd.f32 %v5342_v59, %v4586_v2  ;;  %v5824_v19 = vadd.f32 %v5443_v16, %v4594_v58  ;;  %5637 = vmatmul.bf16.gmra.mxu1 %v11373_v13  ;;  %v4607_v2 = vld [vmem:[#allocation2 + $0x2b0] sm:$0xff] }
 0x6c0   : > { %v4615_v58 = vld [vmem:[#allocation2 + $0x2f0] sm:$0xff] }
 0x6c1   : > { %5928 = vst [vmem:[#allocation2 + $0x208] sm:$0xff] %v5816_v47  ;;  %5539 = vmatmul.bf16.gmra.mxu3 %v11373_v13  ;;  %v5295_v57 = vpop.f32.mrf.mxu2 }
 0x6c2   : > { %5936 = vst [vmem:[#allocation2 + $0x248] sm:$0xff] %v5824_v19 }
 0x6c3   : > { %v5395_v18 = vpop.f32.mrf.mxu0 }
 0x6c4   : > { %v5344_v15 = vpop.f32.mrf.mxu3  ;;  %v5444_v34 = vpop.f32.mrf.mxu1 }
 0x6c5   : > { %v5345_v32 = vadd.f32 %v5344_v15, %v5295_v57  ;;  %v5445_v26 = vadd.f32 %v5444_v34, %v5395_v18 }
 0x6c7   : > { %v5823_v24 = vadd.f32 %v5345_v32, %v4593_v21  ;;  %v5831_v31 = vadd.f32 %v5445_v26, %v4601_v38  ;;  %v4614_v21 = vld [vmem:[#allocation2 + $0x2e8] sm:$0xff] }
 0x6c8   : > { %v4622_v38 = vld [vmem:[#allocation2 + $0x328] sm:$0xff] }
 0x6c9   : > { %5935 = vst [vmem:[#allocation2 + $0x240] sm:$0xff] %v5823_v24  ;;  %v5297_v20 = vpop.f32.mrf.mxu2 }
 0x6ca   : > { %5943 = vst [vmem:[#allocation2 + $0x280] sm:$0xff] %v5831_v31 }
 0x6cb   : > { %v5398_v61 = vpop.f32.mrf.mxu0 }
 0x6cc   : > { %v5346_v36 = vpop.f32.mrf.mxu3  ;;  %v5447_v42 = vpop.f32.mrf.mxu1 }
 0x6cd   : > { %v5347_v11 = vadd.f32 %v5346_v36, %v5297_v20  ;;  %v5448_v41 = vadd.f32 %v5447_v42, %v5398_v61 }
 0x6ce   : > { %5495 = vmatmul.bf16.gmra.mxu2 %v11406_v27  ;;  %5593 = vmatmul.bf16.gmra.mxu0 %v11406_v27 }
 0x6cf   : > { %v5830_v54 = vadd.f32 %v5347_v11, %v4600_v40  ;;  %v5838_v43 = vadd.f32 %v5448_v41, %v4608_v45  ;;  %5642 = vmatmul.bf16.gmra.mxu1 %v11411_v9  ;;  %v4621_v40 = vld [vmem:[#allocation2 + $0x320] sm:$0xff] }
 0x6d0   : > { %v4629_v45 = vld [vmem:[#allocation2 + $0x360] sm:$0xff] }
 0x6d1   : > { %5942 = vst [vmem:[#allocation2 + $0x278] sm:$0xff] %v5830_v54  ;;  %5544 = vmatmul.bf16.gmra.mxu3 %v11411_v9  ;;  %v5300_v8 = vpop.f32.mrf.mxu2 }
 0x6d2   : > { %5950 = vst [vmem:[#allocation2 + $0x2b8] sm:$0xff] %v5838_v43 }
 0x6d3   : > { %v5400_v60 = vpop.f32.mrf.mxu0 }
 0x6d4   : > { %v5349_v6 = vpop.f32.mrf.mxu3  ;;  %v5449_v51 = vpop.f32.mrf.mxu1 }
 0x6d5   : > { %v5350_v59 = vadd.f32 %v5349_v6, %v5300_v8  ;;  %v5450_v16 = vadd.f32 %v5449_v51, %v5400_v60  ;;  %v8087_v8 = vld [vmem:[%s8443_s20 + $0x20] sm:$0xf]  ;;  %v6308_v51 = vld [vmem:[%s12828_s4 + $0x668] sm:$0xff] }
 0x6d6   : > { %v11930_v44 = vor.u32 %v8216_v46, %v8087_v8 }
 0x6d7   : > { %v5837_v47 = vadd.f32 %v5350_v59, %v4607_v2  ;;  %v5845_v19 = vadd.f32 %v5450_v16, %v4615_v58  ;;  %v6301_v59 = vld [vmem:[%s12828_s4 + $0x630] sm:$0xff]  ;;  %v6371_v2 = vpack.c.bf16 %v6196_v56, %v6189_v17  ;;  %v11935_v58 = vor.u32 %v8215_v4, %v8089_v48 }
 0x6d9   : > { %5949 = vst [vmem:[#allocation2 + $0x2b0] sm:$0xff] %v5837_v47  ;;  %v5302_v57 = vpop.f32.mrf.mxu2  ;;  %6716 = vmatpush.bf16.msrb.mxu0 %v6371_v2 }
 0x6da   : > { %5957 = vst [vmem:[#allocation2 + $0x2f0] sm:$0xff] %v5845_v19  ;;  %v6427_v19 = vpack.c.bf16 %v6308_v51, %v6301_v59 }
 0x6db   : > { %v5403_v18 = vpop.f32.mrf.mxu0 }
 0x6dc   : > { %v5351_v15 = vpop.f32.mrf.mxu3  ;;  %v5452_v34 = vpop.f32.mrf.mxu1  ;;  %6765 = vmatpush.bf16.msrb.mxu1 %v6427_v19 }
 0x6dd   : > { %v5352_v32 = vadd.f32 %v5351_v15, %v5302_v57  ;;  %v5453_v26 = vadd.f32 %v5452_v34, %v5403_v18  ;;  %v4628_v57 = vld [vmem:[#allocation2 + $0x358] sm:$0xff]  ;;  %v4526_v15 = vld [vmem:[#allocation2 + $0x28] sm:$0xff]  ;;  %v6181_v18 = vld [vmem:[%s12828_s4 + $0x270] sm:$0xff] }
 0x6de   : > { %5500 = vmatmul.bf16.gmra.mxu2 %v11444_v23  ;;  %5598 = vmatmul.bf16.gmra.mxu0 %v11444_v23 }
 0x6df   : > { %v5844_v24 = vadd.f32 %v5352_v32, %v4614_v21  ;;  %v5852_v31 = vadd.f32 %v5453_v26, %v4622_v38  ;;  %5647 = vmatmul.bf16.gmra.mxu1 %v11449_v39  ;;  %v6174_v32 = vld [vmem:[%s12828_s4 + $0x238] sm:$0xff]  ;;  %v6293_v21 = vld [vmem:[%s12828_s4 + $0x5f0] sm:$0xff]  ;;  %v4525_v38 = vld [vmem:[#allocation2 + $0x20] sm:$0xff] }
 0x6e1   : > { %5956 = vst [vmem:[#allocation2 + $0x2e8] sm:$0xff] %v5844_v24  ;;  %5549 = vmatmul.bf16.gmra.mxu3 %v11449_v39  ;;  %v5305_v20 = vpop.f32.mrf.mxu2 }
 0x6e2   : > { %5964 = vst [vmem:[#allocation2 + $0x328] sm:$0xff] %v5852_v31 }
 0x6e3   : > { %v5405_v61 = vpop.f32.mrf.mxu0 }
 0x6e4   : > { %v5354_v36 = vpop.f32.mrf.mxu3  ;;  %v5454_v42 = vpop.f32.mrf.mxu1 }
 0x6e5   : > { %v5355_v11 = vadd.f32 %v5354_v36, %v5305_v20  ;;  %v5455_v41 = vadd.f32 %v5454_v42, %v5405_v61  ;;  %v8095_v36 = vld [vmem:[%s8443_s20 + $0x70] sm:$0xf]  ;;  %v6287_v42 = vld [vmem:[%s12828_s4 + $0x5c0] sm:$0xff] }
 0x6e7   : > { %v5851_v54 = vadd.f32 %v5355_v11, %v4621_v40  ;;  %v5859_v43 = vadd.f32 %v5455_v41, %v4629_v45  ;;  %v8097_v11 = vld [vmem:[%s8443_s20 + $0x98] sm:$0xf0]  ;;  %v11966_v41 = vor.u32 %v8218_v22, %v8095_v36 }
 0x6e8   : > { %v6182_v40 = vld [vmem:[%s12828_s4 + $0x278] sm:$0xff]  ;;  %v11971_v4 = vor.u32 %v8217_v52, %v8097_v11 }
 0x6e9   : > { %5963 = vst [vmem:[#allocation2 + $0x320] sm:$0xff] %v5851_v54  ;;  %v5307_v6 = vpop.f32.mrf.mxu2  ;;  %v6364_v45 = vpack.c.bf16 %v6182_v40, %v6175_v1 }
 0x6ea   : > { %5971 = vst [vmem:[#allocation2 + $0x360] sm:$0xff] %v5859_v43  ;;  %v6294_v43 = vld [vmem:[%s12828_s4 + $0x5f8] sm:$0xff] }
 0x6eb   : > { %v5564_v16 = vpop.f32.mrf.mxu0  ;;  %v6420_v48 = vpack.c.bf16 %v6294_v43, %v6287_v42  ;;  %6717 = vmatpush.bf16.msrb.mxu0 %v6364_v45 }
 0x6ec   : > { %v5356_v60 = vpop.f32.mrf.mxu3  ;;  %v5613_v12 = vpop.f32.mrf.mxu1 }
 0x6ed   : > { %v5357_v47 = vadd.f32 %v5356_v60, %v5307_v6  ;;  %v5614_v53 = vadd.f32 %v5613_v12, %v5564_v16  ;;  %v4532_v6 = vld [vmem:[#allocation2 + $0x58] sm:$0xff]  ;;  %6766 = vmatpush.bf16.msrb.mxu1 %v6420_v48  ;;  %v6167_v16 = vld [vmem:[%s12828_s4 + $0x200] sm:$0xff] }
 0x6ee   : > { %5661 = vmatmul.bf16.vlgmr.msra.gmra.mxu2 %v11178_v50  ;;  %6527 = vmatmul.bf16.vlgmr.msra.gmra.mxu0 %v11930_v44  ;;  %v6286_v50 = vld [vmem:[%s12828_s4 + $0x5b8] sm:$0xff] }
 0x6ef   : > { %v5858_v63 = vadd.f32 %v5357_v47, %v4628_v57  ;;  %v5756_v55 = vadd.f32 %v5614_v53, %v4526_v15  ;;  %6576 = vmatmul.bf16.vlgmr.msra.gmra.mxu1 %v11935_v58  ;;  %v6419_v26 = vpack.c.bf16 %v6293_v21, %v6286_v50  ;;  %v4540_v60 = vld [vmem:[#allocation2 + $0x98] sm:$0xff]  ;;  %v6160_v47 = vld [vmem:[%s12828_s4 + $0x1c8] sm:$0xff]  ;;  %v6279_v57 = vld [vmem:[%s12828_s4 + $0x580] sm:$0xff] }
 0x6f0   : > { %v4539_v15 = vld [vmem:[#allocation2 + $0x90] sm:$0xff]  ;;  %v8219_v21 = vld [vmem:[%s8443_s20 + $0xc4] sm:$0xf] }
 0x6f1   : > { %5970 = vst [vmem:[#allocation2 + $0x358] sm:$0xff] %v5858_v63  ;;  %5710 = vmatmul.bf16.vlgmr.msra.gmra.mxu3 %v11183_v62  ;;  %v5466_v25 = vpop.f32.mrf.mxu2  ;;  %v6363_v62 = vpack.c.bf16 %v6181_v18, %v6174_v32  ;;  %v4547_v18 = vld [vmem:[#allocation2 + $0xd0] sm:$0xff] }
 0x6f2   : > { %5868 = vst [vmem:[#allocation2 + $0x28] sm:$0xff] %v5756_v55  ;;  %6668 = vmatpush.bf16.msrb.mxu3 %v6419_v26  ;;  %v6161_v26 = vld [vmem:[%s12828_s4 + $0x1d0] sm:$0xff] }
 0x6f3   : > { %v5566_v24 = vpop.f32.mrf.mxu0  ;;  %6619 = vmatpush.bf16.msrb.mxu2 %v6363_v62  ;;  %v8220_v62 = vld [vmem:[%s8443_s20 + $0xe4] sm:$0xf0] }
 0x6f4   : > { %v5515_v29 = vpop.f32.mrf.mxu3  ;;  %v5615_v31 = vpop.f32.mrf.mxu1 }
 0x6f5   : > { %v5516_v34 = vadd.f32 %v5515_v29, %v5466_v25  ;;  %v5616_v33 = vadd.f32 %v5615_v31, %v5566_v24  ;;  %v8103_v29 = vld [vmem:[%s8443_s20 + $0xc0] sm:$0xf]  ;;  %v6273_v31 = vld [vmem:[%s12828_s4 + $0x550] sm:$0xff] }
 0x6f7   : > { %v5755_v20 = vadd.f32 %v5516_v34, %v4525_v38  ;;  %v5763_v0 = vadd.f32 %v5616_v33, %v4533_v35  ;;  %v8105_v34 = vld [vmem:[%s8443_s20 + $0xe8] sm:$0xf0]  ;;  %v12002_v33 = vor.u32 %v8220_v62, %v8103_v29 }
 0x6f8   : > { %v6168_v38 = vld [vmem:[%s12828_s4 + $0x208] sm:$0xff]  ;;  %v12007_v52 = vor.u32 %v8219_v21, %v8105_v34 }
 0x6f9   : > { %5867 = vst [vmem:[#allocation2 + $0x20] sm:$0xff] %v5755_v20  ;;  %v5468_v61 = vpop.f32.mrf.mxu2  ;;  %v6357_v35 = vpack.c.bf16 %v6168_v38, %v6161_v26 }
 0x6fa   : > { %5875 = vst [vmem:[#allocation2 + $0x60] sm:$0xff] %v5763_v0  ;;  %v6280_v0 = vld [vmem:[%s12828_s4 + $0x588] sm:$0xff] }
 0x6fb   : > { %v5569_v46 = vpop.f32.mrf.mxu0  ;;  %v6413_v11 = vpack.c.bf16 %v6280_v0, %v6273_v31  ;;  %6718 = vmatpush.bf16.msrb.mxu0 %v6357_v35 }
 0x6fc   : > { %v5517_v54 = vpop.f32.mrf.mxu3  ;;  %v5618_v17 = vpop.f32.mrf.mxu1 }
 0x6fd   : > { %v5518_v8 = vadd.f32 %v5517_v54, %v5468_v61  ;;  %v5619_v59 = vadd.f32 %v5618_v17, %v5569_v46  ;;  %v4546_v61 = vld [vmem:[#allocation2 + $0xc8] sm:$0xff]  ;;  %6767 = vmatpush.bf16.msrb.mxu1 %v6413_v11  ;;  %v6153_v46 = vld [vmem:[%s12828_s4 + $0x190] sm:$0xff] }
 0x6fe   : > { %5666 = vmatmul.bf16.gmra.mxu2 %v11216_v37  ;;  %6532 = vmatmul.bf16.gmra.mxu0 %v11966_v41  ;;  %v6272_v37 = vld [vmem:[%s12828_s4 + $0x548] sm:$0xff] }
 0x6ff   : > { %v5762_v56 = vadd.f32 %v5518_v8, %v4532_v6  ;;  %v5770_v2 = vadd.f32 %v5619_v59, %v4540_v60  ;;  %6581 = vmatmul.bf16.gmra.mxu1 %v11971_v4  ;;  %v6412_v53 = vpack.c.bf16 %v6279_v57, %v6272_v37  ;;  %v4554_v54 = vld [vmem:[#allocation2 + $0x108] sm:$0xff]  ;;  %v6146_v8 = vld [vmem:[%s12828_s4 + $0x158] sm:$0xff]  ;;  %v6265_v6 = vld [vmem:[%s12828_s4 + $0x510] sm:$0xff] }
 0x700   : > { %v4553_v60 = vld [vmem:[#allocation2 + $0x100] sm:$0xff]  ;;  %v8221_v57 = vld [vmem:[%s8443_s20 + $0x114] sm:$0xf] }
 0x701   : > { %5874 = vst [vmem:[#allocation2 + $0x58] sm:$0xff] %v5762_v56  ;;  %5715 = vmatmul.bf16.gmra.mxu3 %v11221_v7  ;;  %v5471_v51 = vpop.f32.mrf.mxu2  ;;  %v6356_v7 = vpack.c.bf16 %v6167_v16, %v6160_v47  ;;  %v4561_v16 = vld [vmem:[#allocation2 + $0x140] sm:$0xff] }
 0x702   : > { %5882 = vst [vmem:[#allocation2 + $0x98] sm:$0xff] %v5770_v2  ;;  %6669 = vmatpush.bf16.msrb.mxu3 %v6412_v53  ;;  %v6147_v53 = vld [vmem:[%s12828_s4 + $0x160] sm:$0xff] }
 0x703   : > { %v5571_v63 = vpop.f32.mrf.mxu0  ;;  %6620 = vmatpush.bf16.msrb.mxu2 %v6356_v7  ;;  %v8222_v7 = vld [vmem:[%s8443_s20 + $0x134] sm:$0xf0] }
 0x704   : > { %v5520_v19 = vpop.f32.mrf.mxu3  ;;  %v5620_v55 = vpop.f32.mrf.mxu1 }
 0x705   : > { %v5521_v12 = vadd.f32 %v5520_v19, %v5471_v51  ;;  %v5621_v32 = vadd.f32 %v5620_v55, %v5571_v63  ;;  %v8111_v19 = vld [vmem:[%s8443_s20 + $0x110] sm:$0xf]  ;;  %v6259_v55 = vld [vmem:[%s12828_s4 + $0x4e0] sm:$0xff] }
 0x707   : > { %v5769_v25 = vadd.f32 %v5521_v12, %v4539_v15  ;;  %v5777_v50 = vadd.f32 %v5621_v32, %v4547_v18  ;;  %v8113_v12 = vld [vmem:[%s8443_s20 + $0x138] sm:$0xf0]  ;;  %v12038_v32 = vor.u32 %v8222_v7, %v8111_v19 }
 0x708   : > { %v6154_v15 = vld [vmem:[%s12828_s4 + $0x198] sm:$0xff]  ;;  %v12043_v21 = vor.u32 %v8221_v57, %v8113_v12 }
 0x709   : > { %5881 = vst [vmem:[#allocation2 + $0x90] sm:$0xff] %v5769_v25  ;;  %v5473_v24 = vpop.f32.mrf.mxu2  ;;  %v6350_v18 = vpack.c.bf16 %v6154_v15, %v6147_v53 }
 0x70a   : > { %5889 = vst [vmem:[#allocation2 + $0xd0] sm:$0xff] %v5777_v50  ;;  %v6266_v50 = vld [vmem:[%s12828_s4 + $0x518] sm:$0xff] }
 0x70b   : > { %v5574_v22 = vpop.f32.mrf.mxu0  ;;  %v6406_v34 = vpack.c.bf16 %v6266_v50, %v6259_v55  ;;  %6719 = vmatpush.bf16.msrb.mxu0 %v6350_v18 }
 0x70c   : > { %v5522_v20 = vpop.f32.mrf.mxu3  ;;  %v5623_v1 = vpop.f32.mrf.mxu1 }
 0x70d   : > { %v5523_v36 = vadd.f32 %v5522_v20, %v5473_v24  ;;  %v5624_v42 = vadd.f32 %v5623_v1, %v5574_v22  ;;  %v4560_v24 = vld [vmem:[#allocation2 + $0x138] sm:$0xff]  ;;  %6768 = vmatpush.bf16.msrb.mxu1 %v6406_v34  ;;  %v6139_v22 = vld [vmem:[%s12828_s4 + $0x120] sm:$0xff] }
 0x70e   : > { %5671 = vmatmul.bf16.gmra.mxu2 %v11254_v10  ;;  %6537 = vmatmul.bf16.gmra.mxu0 %v12002_v33  ;;  %v6258_v10 = vld [vmem:[%s12828_s4 + $0x4d8] sm:$0xff] }
 0x70f   : > { %v5776_v40 = vadd.f32 %v5523_v36, %v4546_v61  ;;  %v5784_v45 = vadd.f32 %v5624_v42, %v4554_v54  ;;  %6586 = vmatmul.bf16.gmra.mxu1 %v12007_v52  ;;  %v6405_v59 = vpack.c.bf16 %v6265_v6, %v6258_v10  ;;  %v4568_v20 = vld [vmem:[#allocation2 + $0x178] sm:$0xff]  ;;  %v6132_v36 = vld [vmem:[%s12828_s4 + $0xe8] sm:$0xff]  ;;  %v6251_v61 = vld [vmem:[%s12828_s4 + $0x4a0] sm:$0xff] }
 0x710   : > { %v4567_v54 = vld [vmem:[#allocation2 + $0x170] sm:$0xff]  ;;  %v8223_v6 = vld [vmem:[%s8443_s20 + $0x164] sm:$0xf] }
 0x711   : > { %5888 = vst [vmem:[#allocation2 + $0xc8] sm:$0xff] %v5776_v40  ;;  %5720 = vmatmul.bf16.gmra.mxu3 %v11259_v14  ;;  %v5476_v43 = vpop.f32.mrf.mxu2  ;;  %v6349_v14 = vpack.c.bf16 %v6153_v46, %v6146_v8  ;;  %v4575_v46 = vld [vmem:[#allocation2 + $0x1b0] sm:$0xff] }
 0x712   : > { %5896 = vst [vmem:[#allocation2 + $0x108] sm:$0xff] %v5784_v45  ;;  %6670 = vmatpush.bf16.msrb.mxu3 %v6405_v59  ;;  %v6133_v59 = vld [vmem:[%s12828_s4 + $0xf0] sm:$0xff] }
 0x713   : > { %v5576_v56 = vpop.f32.mrf.mxu0  ;;  %6621 = vmatpush.bf16.msrb.mxu2 %v6349_v14  ;;  %v8224_v14 = vld [vmem:[%s8443_s20 + $0x184] sm:$0xf0] }
 0x714   : > { %v5525_v48 = vpop.f32.mrf.mxu3  ;;  %v5625_v2 = vpop.f32.mrf.mxu1 }
 0x715   : > { %v5526_v17 = vadd.f32 %v5525_v48, %v5476_v43  ;;  %v5626_v47 = vadd.f32 %v5625_v2, %v5576_v56  ;;  %v8119_v48 = vld [vmem:[%s8443_s20 + $0x160] sm:$0xf]  ;;  %v6245_v2 = vld [vmem:[%s12828_s4 + $0x470] sm:$0xff] }
 0x717   : > { %v5783_v51 = vadd.f32 %v5526_v17, %v4553_v60  ;;  %v5791_v37 = vadd.f32 %v5626_v47, %v4561_v16  ;;  %v8121_v17 = vld [vmem:[%s8443_s20 + $0x188] sm:$0xf0]  ;;  %v12074_v47 = vor.u32 %v8224_v14, %v8119_v48 }
 0x718   : > { %v6140_v60 = vld [vmem:[%s12828_s4 + $0x128] sm:$0xff]  ;;  %v12079_v57 = vor.u32 %v8223_v6, %v8121_v17 }
 0x719   : > { %5895 = vst [vmem:[#allocation2 + $0x100] sm:$0xff] %v5783_v51  ;;  %v5478_v63 = vpop.f32.mrf.mxu2  ;;  %v6343_v16 = vpack.c.bf16 %v6140_v60, %v6133_v59 }
 0x71a   : > { %5903 = vst [vmem:[#allocation2 + $0x140] sm:$0xff] %v5791_v37  ;;  %v6252_v37 = vld [vmem:[%s12828_s4 + $0x4a8] sm:$0xff] }
 0x71b   : > { %v5579_v62 = vpop.f32.mrf.mxu0  ;;  %v6399_v12 = vpack.c.bf16 %v6252_v37, %v6245_v2  ;;  %6720 = vmatpush.bf16.msrb.mxu0 %v6343_v16 }
 0x71c   : > { %v5527_v25 = vpop.f32.mrf.mxu3  ;;  %v5628_v26 = vpop.f32.mrf.mxu1 }
 0x71d   : > { %v5528_v29 = vadd.f32 %v5527_v25, %v5478_v63  ;;  %v5629_v31 = vadd.f32 %v5628_v26, %v5579_v62  ;;  %v4574_v63 = vld [vmem:[#allocation2 + $0x1a8] sm:$0xff]  ;;  %6769 = vmatpush.bf16.msrb.mxu1 %v6399_v12  ;;  %v6125_v62 = vld [vmem:[%s12828_s4 + $0xb0] sm:$0xff] }
 0x71e   : > { %5676 = vmatmul.bf16.gmra.mxu2 %v11292_v3  ;;  %6542 = vmatmul.bf16.gmra.mxu0 %v12038_v32  ;;  %v6244_v3 = vld [vmem:[%s12828_s4 + $0x468] sm:$0xff] }
 0x71f   : > { %v5790_v38 = vadd.f32 %v5528_v29, %v4560_v24  ;;  %v5798_v35 = vadd.f32 %v5629_v31, %v4568_v20  ;;  %6591 = vmatmul.bf16.gmra.mxu1 %v12043_v21  ;;  %v6398_v42 = vpack.c.bf16 %v6251_v61, %v6244_v3  ;;  %v4582_v25 = vld [vmem:[#allocation2 + $0x1e8] sm:$0xff]  ;;  %v6118_v29 = vld [vmem:[%s12828_s4 + $0x78] sm:$0xff]  ;;  %v6237_v24 = vld [vmem:[%s12828_s4 + $0x430] sm:$0xff] }
 0x720   : > { %v4581_v20 = vld [vmem:[#allocation2 + $0x1e0] sm:$0xff]  ;;  %v8225_v61 = vld [vmem:[%s8443_s20 + $0x1b4] sm:$0xf] }
 0x721   : > { %5902 = vst [vmem:[#allocation2 + $0x138] sm:$0xff] %v5790_v38  ;;  %5725 = vmatmul.bf16.gmra.mxu3 %v11297_v30  ;;  %v5481_v0 = vpop.f32.mrf.mxu2  ;;  %v6342_v30 = vpack.c.bf16 %v6139_v22, %v6132_v36  ;;  %v4589_v22 = vld [vmem:[#allocation2 + $0x220] sm:$0xff] }
 0x722   : > { %5910 = vst [vmem:[#allocation2 + $0x178] sm:$0xff] %v5798_v35  ;;  %6671 = vmatpush.bf16.msrb.mxu3 %v6398_v42  ;;  %v6119_v42 = vld [vmem:[%s12828_s4 + $0x80] sm:$0xff] }
 0x723   : > { %v5581_v40 = vpop.f32.mrf.mxu0  ;;  %6622 = vmatpush.bf16.msrb.mxu2 %v6342_v30  ;;  %v8226_v30 = vld [vmem:[%s8443_s20 + $0x1d4] sm:$0xf0] }
 0x724   : > { %v5530_v11 = vpop.f32.mrf.mxu3  ;;  %v5630_v45 = vpop.f32.mrf.mxu1 }
 0x725   : > { %v5531_v1 = vadd.f32 %v5530_v11, %v5481_v0  ;;  %v5631_v8 = vadd.f32 %v5630_v45, %v5581_v40  ;;  %v8127_v11 = vld [vmem:[%s8443_s20 + $0x1b0] sm:$0xf]  ;;  %v6231_v45 = vld [vmem:[%s12828_s4 + $0x400] sm:$0xff] }
 0x727   : > { %v5797_v43 = vadd.f32 %v5531_v1, %v4567_v54  ;;  %v5805_v10 = vadd.f32 %v5631_v8, %v4575_v46  ;;  %v8129_v1 = vld [vmem:[%s8443_s20 + $0x1d8] sm:$0xf0]  ;;  %v12110_v8 = vor.u32 %v8226_v30, %v8127_v11 }
 0x728   : > { %v6126_v54 = vld [vmem:[%s12828_s4 + $0xb8] sm:$0xff]  ;;  %v12115_v6 = vor.u32 %v8225_v61, %v8129_v1 }
 0x729   : > { %5909 = vst [vmem:[#allocation2 + $0x170] sm:$0xff] %v5797_v43  ;;  %v5483_v56 = vpop.f32.mrf.mxu2  ;;  %v6336_v46 = vpack.c.bf16 %v6126_v54, %v6119_v42 }
 0x72a   : > { %5917 = vst [vmem:[#allocation2 + $0x1b0] sm:$0xff] %v5805_v10  ;;  %v6238_v10 = vld [vmem:[%s12828_s4 + $0x438] sm:$0xff] }
 0x72b   : > { %v5584_v7 = vpop.f32.mrf.mxu0  ;;  %v6392_v17 = vpack.c.bf16 %v6238_v10, %v6231_v45  ;;  %6721 = vmatpush.bf16.msrb.mxu0 %v6336_v46 }
 0x72c   : > { %v5532_v51 = vpop.f32.mrf.mxu3  ;;  %v5633_v53 = vpop.f32.mrf.mxu1 }
 0x72d   : > { %v5533_v19 = vadd.f32 %v5532_v51, %v5483_v56  ;;  %v5634_v55 = vadd.f32 %v5633_v53, %v5584_v7  ;;  %v4588_v56 = vld [vmem:[#allocation2 + $0x218] sm:$0xff]  ;;  %6770 = vmatpush.bf16.msrb.mxu1 %v6392_v17  ;;  %v6111_v7 = vld [vmem:[%s12828_s4 + $0x40] sm:$0xff] }
 0x72e   : > { %5681 = vmatmul.bf16.gmra.mxu2 %v11330_v28  ;;  %6547 = vmatmul.bf16.gmra.mxu0 %v12074_v47  ;;  %v6230_v28 = vld [vmem:[%s12828_s4 + $0x3f8] sm:$0xff]  ;;  %v6211_v17 = vld [vmem:[%s12828_s4 + $0x360] sm:$0xff] }
 0x72f   : > { %v5804_v15 = vadd.f32 %v5533_v19, %v4574_v63  ;;  %v5812_v18 = vadd.f32 %v5634_v55, %v4582_v25  ;;  %6596 = vmatmul.bf16.gmra.mxu1 %v12079_v57  ;;  %v6391_v31 = vpack.c.bf16 %v6237_v24, %v6230_v28  ;;  %v4596_v51 = vld [vmem:[#allocation2 + $0x258] sm:$0xff]  ;;  %v6104_v19 = vld [vmem:[%s12828_s4 + $0x8] sm:$0xff]  ;;  %v6223_v63 = vld [vmem:[%s12828_s4 + $0x3c0] sm:$0xff] }
 0x730   : > { %v4595_v25 = vld [vmem:[#allocation2 + $0x250] sm:$0xff]  ;;  %v8227_v24 = vld [vmem:[%s8443_s20 + $0x204] sm:$0xf] }
 0x731   : > { %5916 = vst [vmem:[#allocation2 + $0x1a8] sm:$0xff] %v5804_v15  ;;  %5730 = vmatmul.bf16.gmra.mxu3 %v11335_v5  ;;  %v5486_v50 = vpop.f32.mrf.mxu2  ;;  %v6335_v5 = vpack.c.bf16 %v6125_v62, %v6118_v29  ;;  %v4603_v62 = vld [vmem:[#allocation2 + $0x290] sm:$0xff] }
 0x732   : > { %5924 = vst [vmem:[#allocation2 + $0x1e8] sm:$0xff] %v5812_v18  ;;  %6672 = vmatpush.bf16.msrb.mxu3 %v6391_v31  ;;  %v6105_v31 = vld [vmem:[%s12828_s4 + $0x10] sm:$0xff] }
 0x733   : > { %v5586_v38 = vpop.f32.mrf.mxu0  ;;  %6623 = vmatpush.bf16.msrb.mxu2 %v6335_v5  ;;  %v8228_v5 = vld [vmem:[%s8443_s20 + $0x224] sm:$0xf0] }
 0x734   : > { %v5535_v34 = vpop.f32.mrf.mxu3  ;;  %v5635_v35 = vpop.f32.mrf.mxu1 }
 0x735   : > { %v5536_v26 = vadd.f32 %v5535_v34, %v5486_v50  ;;  %v5636_v36 = vadd.f32 %v5635_v35, %v5586_v38  ;;  %v8135_v34 = vld [vmem:[%s8443_s20 + $0x200] sm:$0xf]  ;;  %v6217_v35 = vld [vmem:[%s12828_s4 + $0x390] sm:$0xff] }
 0x737   : > { %v5811_v0 = vadd.f32 %v5536_v26, %v4581_v20  ;;  %v5819_v3 = vadd.f32 %v5636_v36, %v4589_v22  ;;  %v8137_v26 = vld [vmem:[%s8443_s20 + $0x228] sm:$0xf0]  ;;  %v12146_v36 = vor.u32 %v8228_v5, %v8135_v34 }
 0x738   : > { %v6112_v20 = vld [vmem:[%s12828_s4 + $0x48] sm:$0xff]  ;;  %v12151_v61 = vor.u32 %v8227_v24, %v8137_v26  ;;  %v4616_v26 = vld [vmem:[#allocation2 + $0x2f8] sm:$0xff] }
 0x739   : > { %5923 = vst [vmem:[#allocation2 + $0x1e0] sm:$0xff] %v5811_v0  ;;  %v5488_v40 = vpop.f32.mrf.mxu2  ;;  %v6329_v22 = vpack.c.bf16 %v6112_v20, %v6105_v31  ;;  %v6324_v24 = vld [vmem:[%s12828_s4 + $0x6e8] sm:$0xff] }
 0x73a   : > { %5931 = vst [vmem:[#allocation2 + $0x220] sm:$0xff] %v5819_v3  ;;  %v6224_v3 = vld [vmem:[%s12828_s4 + $0x3c8] sm:$0xff] }
 0x73b   : > { %v5589_v14 = vpop.f32.mrf.mxu0  ;;  %v6385_v1 = vpack.c.bf16 %v6224_v3, %v6217_v35  ;;  %6722 = vmatpush.bf16.msrb.mxu0 %v6329_v22 }
 0x73c   : > { %v5537_v43 = vpop.f32.mrf.mxu3  ;;  %v5638_v59 = vpop.f32.mrf.mxu1 }
 0x73d   : > { %v5538_v48 = vadd.f32 %v5537_v43, %v5488_v40  ;;  %v5639_v2 = vadd.f32 %v5638_v59, %v5589_v14  ;;  %v4602_v40 = vld [vmem:[#allocation2 + $0x288] sm:$0xff]  ;;  %6771 = vmatpush.bf16.msrb.mxu1 %v6385_v1  ;;  %v6302_v1 = vld [vmem:[%s12828_s4 + $0x638] sm:$0xff] }
 0x73e   : > { %5686 = vmatmul.bf16.gmra.mxu2 %v11368_v49  ;;  %6552 = vmatmul.bf16.gmra.mxu0 %v12110_v8  ;;  %v6216_v49 = vld [vmem:[%s12828_s4 + $0x388] sm:$0xff] }
 0x73f   : > { %v5818_v60 = vadd.f32 %v5538_v48, %v4588_v56  ;;  %v5826_v16 = vadd.f32 %v5639_v2, %v4596_v51  ;;  %6601 = vmatmul.bf16.gmra.mxu1 %v12115_v6  ;;  %v6384_v55 = vpack.c.bf16 %v6223_v63, %v6216_v49  ;;  %v4610_v43 = vld [vmem:[#allocation2 + $0x2c8] sm:$0xff]  ;;  %v4609_v2 = vld [vmem:[#allocation2 + $0x2c0] sm:$0xff]  ;;  %v8229_v63 = vld [vmem:[%s8443_s20 + $0x254] sm:$0xf] }
 0x740   : > { %v6204_v14 = vld [vmem:[%s12828_s4 + $0x328] sm:$0xff] }
 0x741   : > { %5930 = vst [vmem:[#allocation2 + $0x218] sm:$0xff] %v5818_v60  ;;  %5735 = vmatmul.bf16.gmra.mxu3 %v11373_v13  ;;  %v5491_v37 = vpop.f32.mrf.mxu2  ;;  %v6328_v13 = vpack.c.bf16 %v6111_v7, %v6104_v19  ;;  %v6379_v59 = vpack.c.bf16 %v6211_v17, %v6204_v14  ;;  %v6323_v60 = vld [vmem:[%s12828_s4 + $0x6e0] sm:$0xff]  ;;  %v4631_v14 = vld [vmem:[#allocation2 + $0x370] sm:$0xff] }
 0x742   : > { %5938 = vst [vmem:[#allocation2 + $0x258] sm:$0xff] %v5826_v16  ;;  %6673 = vmatpush.bf16.msrb.mxu3 %v6384_v55  ;;  %v4617_v7 = vld [vmem:[#allocation2 + $0x300] sm:$0xff] }
 0x743   : > { %v5591_v15 = vpop.f32.mrf.mxu0  ;;  %6624 = vmatpush.bf16.msrb.mxu2 %v6328_v13  ;;  %v8230_v13 = vld [vmem:[%s8443_s20 + $0x274] sm:$0xf0] }
 0x744   : > { %v5540_v12 = vpop.f32.mrf.mxu3  ;;  %v5640_v18 = vpop.f32.mrf.mxu1 }
 0x745   : > { %v5541_v53 = vadd.f32 %v5540_v12, %v5491_v37  ;;  %v5641_v29 = vadd.f32 %v5640_v18, %v5591_v15  ;;  %v8143_v12 = vld [vmem:[%s8443_s20 + $0x250] sm:$0xf] }
 0x746   : > { %v6205_v18 = vld [vmem:[%s12828_s4 + $0x330] sm:$0xff] }
 0x747   : > { %v5825_v50 = vadd.f32 %v5541_v53, %v4595_v25  ;;  %v5833_v28 = vadd.f32 %v5641_v29, %v4603_v62  ;;  %6813 = vmatpush.bf16.msra.mxu2 %v6379_v59  ;;  %v8145_v53 = vld [vmem:[%s8443_s20 + $0x278] sm:$0xf0]  ;;  %v12173_v25 = vor.u32 %v8230_v13, %v8143_v12  ;;  %v6317_v29 = vld [vmem:[%s12828_s4 + $0x6b0] sm:$0xff] }
 0x748   : > { %v12184_v34 = vor.u32 %v8229_v63, %v8145_v53  ;;  %v6436_v31 = vpack.c.bf16 %v6324_v24, %v6317_v29  ;;  %v6198_v59 = vld [vmem:[%s12828_s4 + $0x2f8] sm:$0xff]  ;;  %v5975_v63 = vld [vmem:[#allocation2] sm:$0xff]  ;;  %v6288_v29 = vld [vmem:[%s12828_s4 + $0x5c8] sm:$0xff] }
 0x749   : > { %5937 = vst [vmem:[#allocation2 + $0x250] sm:$0xff] %v5825_v50  ;;  %v5493_v38 = vpop.f32.mrf.mxu2  ;;  %v6212_v50 = vld [vmem:[%s12828_s4 + $0x368] sm:$0xff]  ;;  %v6295_v24 = vld [vmem:[%s12828_s4 + $0x600] sm:$0xff] }
 0x74a   : > { %5945 = vst [vmem:[#allocation2 + $0x290] sm:$0xff] %v5833_v28  ;;  %v6380_v5 = vpack.c.bf16 %v6212_v50, %v6205_v18  ;;  %6960 = vmatpush.bf16.msra.mxu1 %v6436_v31  ;;  %v6176_v18 = vld [vmem:[%s12828_s4 + $0x248] sm:$0xff]  ;;  %v6183_v50 = vld [vmem:[%s12828_s4 + $0x280] sm:$0xff]  ;;  %v6421_v31 = vpack.c.bf16 %v6295_v24, %v6288_v29  ;;  %v6282_v24 = vld [vmem:[%s12828_s4 + $0x598] sm:$0xff] }
 0x74b   : > { %v5594_v30 = vpop.f32.mrf.mxu0  ;;  %v6275_v29 = vld [vmem:[%s12828_s4 + $0x560] sm:$0xff] }
 0x74c   : > { %v5542_v0 = vpop.f32.mrf.mxu3  ;;  %v5643_v42 = vpop.f32.mrf.mxu1  ;;  %6911 = vmatpush.bf16.msra.mxu0 %v6380_v5  ;;  %v6365_v5 = vpack.c.bf16 %v6183_v50, %v6176_v18  ;;  %v6163_v18 = vld [vmem:[%s12828_s4 + $0x1e0] sm:$0xff]  ;;  %v6170_v50 = vld [vmem:[%s12828_s4 + $0x218] sm:$0xff] }
 0x74d   : > { %v5543_v11 = vadd.f32 %v5542_v0, %v5493_v38  ;;  %v5644_v45 = vadd.f32 %v5643_v42, %v5594_v30  ;;  %v4624_v0 = vld [vmem:[#allocation2 + $0x338] sm:$0xff] }
 0x74e   : > { %5691 = vmatmul.bf16.gmra.mxu2 %v11406_v27  ;;  %6557 = vmatmul.bf16.gmra.mxu0 %v12146_v36  ;;  %v6316_v27 = vld [vmem:[%s12828_s4 + $0x6a8] sm:$0xff]  ;;  %v6190_v30 = vld [vmem:[%s12828_s4 + $0x2b8] sm:$0xff] }
 0x74f   : > { %v5832_v54 = vadd.f32 %v5543_v11, %v4602_v40  ;;  %v5840_v46 = vadd.f32 %v5644_v45, %v4610_v43  ;;  %6606 = vmatmul.bf16.gmra.mxu1 %v12151_v61  ;;  %v6435_v16 = vpack.c.bf16 %v6323_v60, %v6316_v27  ;;  %v4623_v45 = vld [vmem:[#allocation2 + $0x330] sm:$0xff]  ;;  %v6303_v60 = vld [vmem:[%s12828_s4 + $0x640] sm:$0xff] }
 0x751   : > { %5944 = vst [vmem:[#allocation2 + $0x288] sm:$0xff] %v5832_v54  ;;  %5740 = vmatmul.bf16.gmra.mxu3 %v11411_v9  ;;  %v5496_v10 = vpop.f32.mrf.mxu2  ;;  %v6309_v54 = vld [vmem:[%s12828_s4 + $0x670] sm:$0xff] }
 0x752   : > { %5952 = vst [vmem:[#allocation2 + $0x2c8] sm:$0xff] %v5840_v46  ;;  %6862 = vmatpush.bf16.msra.mxu3 %v6435_v16  ;;  %v6428_v46 = vpack.c.bf16 %v6309_v54, %v6302_v1  ;;  %v6289_v1 = vld [vmem:[%s12828_s4 + $0x5d0] sm:$0xff]  ;;  %v6296_v54 = vld [vmem:[%s12828_s4 + $0x608] sm:$0xff] }
 0x753   : > { %v5596_v56 = vpop.f32.mrf.mxu0 }
 0x754   : > { %v5545_v48 = vpop.f32.mrf.mxu3  ;;  %v5645_v51 = vpop.f32.mrf.mxu1 }
 0x755   : > { %v5546_v9 = vadd.f32 %v5545_v48, %v5496_v10  ;;  %v5646_v19 = vadd.f32 %v5645_v51, %v5596_v56  ;;  %v6191_v56 = vld [vmem:[%s12828_s4 + $0x2c0] sm:$0xff] }
 0x756   : > { %6863 = vmatpush.bf16.msra.mxu3 %v6428_v46  ;;  %v6373_v16 = vpack.c.bf16 %v6198_v59, %v6191_v56  ;;  %v6422_v46 = vpack.c.bf16 %v6296_v54, %v6289_v1  ;;  %v6162_v56 = vld [vmem:[%s12828_s4 + $0x1d8] sm:$0xff]  ;;  %v6169_v59 = vld [vmem:[%s12828_s4 + $0x210] sm:$0xff]  ;;  %v6260_v1 = vld [vmem:[%s12828_s4 + $0x4e8] sm:$0xff] }
 0x757   : > { %v5839_v37 = vadd.f32 %v5546_v9, %v4609_v2  ;;  %v5847_v49 = vadd.f32 %v5646_v19, %v4617_v7  ;;  %v4630_v19 = vld [vmem:[#allocation2 + $0x368] sm:$0xff]  ;;  %v6267_v54 = vld [vmem:[%s12828_s4 + $0x520] sm:$0xff] }
 0x758   : > { %6912 = vmatpush.bf16.msra.mxu0 %v6373_v16  ;;  %v6358_v16 = vpack.c.bf16 %v6169_v59, %v6162_v56  ;;  %v6149_v56 = vld [vmem:[%s12828_s4 + $0x170] sm:$0xff]  ;;  %v6156_v59 = vld [vmem:[%s12828_s4 + $0x1a8] sm:$0xff] }
 0x759   : > { %5951 = vst [vmem:[#allocation2 + $0x2c0] sm:$0xff] %v5839_v37  ;;  %v5498_v15 = vpop.f32.mrf.mxu2  ;;  %v6310_v37 = vld [vmem:[%s12828_s4 + $0x678] sm:$0xff] }
 0x75a   : > { %5959 = vst [vmem:[#allocation2 + $0x300] sm:$0xff] %v5847_v49  ;;  %v6429_v49 = vpack.c.bf16 %v6310_v37, %v6303_v60  ;;  %6864 = vmatpush.bf16.msra.mxu3 %v6421_v31  ;;  %v6274_v60 = vld [vmem:[%s12828_s4 + $0x558] sm:$0xff]  ;;  %v6281_v37 = vld [vmem:[%s12828_s4 + $0x590] sm:$0xff]  ;;  %v6415_v31 = vpack.c.bf16 %v6282_v24, %v6275_v29 }
 0x75b   : > { %v5599_v28 = vpop.f32.mrf.mxu0  ;;  %v6246_v29 = vld [vmem:[%s12828_s4 + $0x478] sm:$0xff]  ;;  %v6253_v24 = vld [vmem:[%s12828_s4 + $0x4b0] sm:$0xff] }
 0x75c   : > { %v5547_v55 = vpop.f32.mrf.mxu3  ;;  %v5648_v38 = vpop.f32.mrf.mxu1  ;;  %6961 = vmatpush.bf16.msra.mxu1 %v6429_v49  ;;  %v6414_v49 = vpack.c.bf16 %v6281_v37, %v6274_v60  ;;  %v6261_v60 = vld [vmem:[%s12828_s4 + $0x4f0] sm:$0xff]  ;;  %v6268_v37 = vld [vmem:[%s12828_s4 + $0x528] sm:$0xff] }
 0x75d   : > { %v5548_v62 = vadd.f32 %v5547_v55, %v5498_v15  ;;  %v5649_v35 = vadd.f32 %v5648_v38, %v5599_v28 }
 0x75e   : > { %5696 = vmatmul.bf16.gmra.mxu2 %v11444_v23  ;;  %6562 = vmatmul.bf16.gmra.mxu0 %v12173_v25  ;;  %v6197_v23 = vld [vmem:[%s12828_s4 + $0x2f0] sm:$0xff] }
 0x75f   : > { %v5846_v20 = vadd.f32 %v5548_v62, %v4616_v26  ;;  %v5854_v22 = vadd.f32 %v5649_v35, %v4624_v0  ;;  %6611 = vmatmul.bf16.gmra.mxu1 %v12184_v34  ;;  %v6372_v42 = vpack.c.bf16 %v6197_v23, %v6190_v30  ;;  %v4527_v26 = vld [vmem:[#allocation2 + $0x30] sm:$0xff]  ;;  %v5982_v0 = vld [vmem:[#allocation2 + $0x38] sm:$0xff]  ;;  %v6184_v23 = vld [vmem:[%s12828_s4 + $0x288] sm:$0xff]  ;;  %6865 = vmatpush.bf16.msra.mxu3 %v6414_v49 }
 0x760   : > { %v6177_v30 = vld [vmem:[%s12828_s4 + $0x250] sm:$0xff]  ;;  %6962 = vmatpush.bf16.msra.mxu1 %v6422_v46  ;;  %v6407_v46 = vpack.c.bf16 %v6267_v54, %v6260_v1  ;;  %v6408_v49 = vpack.c.bf16 %v6268_v37, %v6261_v60  ;;  %v6247_v1 = vld [vmem:[%s12828_s4 + $0x480] sm:$0xff]  ;;  %v6254_v54 = vld [vmem:[%s12828_s4 + $0x4b8] sm:$0xff] }
 0x761   : > { %5958 = vst [vmem:[#allocation2 + $0x2f8] sm:$0xff] %v5846_v20  ;;  %5745 = vmatmul.bf16.gmra.mxu3 %v11449_v39  ;;  %v5501_v3 = vpop.f32.mrf.mxu2  ;;  %6814 = vmatpush.bf16.msra.mxu2 %v6372_v42  ;;  %v6366_v42 = vpack.c.bf16 %v6184_v23, %v6177_v30  ;;  %v6148_v30 = vld [vmem:[%s12828_s4 + $0x168] sm:$0xff]  ;;  %v6155_v23 = vld [vmem:[%s12828_s4 + $0x1a0] sm:$0xff] }
 0x762   : > { %5966 = vst [vmem:[#allocation2 + $0x338] sm:$0xff] %v5854_v22  ;;  %v6232_v60 = vld [vmem:[%s12828_s4 + $0x408] sm:$0xff]  ;;  %v6239_v37 = vld [vmem:[%s12828_s4 + $0x440] sm:$0xff] }
 0x763   : > { %v5601_v39 = vpop.f32.mrf.mxu0  ;;  %6913 = vmatpush.bf16.msra.mxu0 %v6366_v42  ;;  %v6351_v42 = vpack.c.bf16 %v6155_v23, %v6148_v30  ;;  %6866 = vmatpush.bf16.msra.mxu3 %v6407_v46  ;;  %v6135_v30 = vld [vmem:[%s12828_s4 + $0x100] sm:$0xff]  ;;  %v6142_v23 = vld [vmem:[%s12828_s4 + $0x138] sm:$0xff]  ;;  %v6401_v46 = vpack.c.bf16 %v6254_v54, %v6247_v1  ;;  %v6225_v54 = vld [vmem:[%s12828_s4 + $0x3d0] sm:$0xff] }
 0x764   : > { %v5550_v11 = vpop.f32.mrf.mxu3  ;;  %v5650_v43 = vpop.f32.mrf.mxu1  ;;  %6963 = vmatpush.bf16.msra.mxu1 %v6415_v31  ;;  %v6400_v31 = vpack.c.bf16 %v6253_v24, %v6246_v29  ;;  %v6233_v29 = vld [vmem:[%s12828_s4 + $0x410] sm:$0xff]  ;;  %v6240_v24 = vld [vmem:[%s12828_s4 + $0x448] sm:$0xff]  ;;  %v6218_v1 = vld [vmem:[%s12828_s4 + $0x398] sm:$0xff] }
 0x765   : > { %v5551_v40 = vadd.f32 %v5550_v11, %v5501_v3  ;;  %v5651_v48 = vadd.f32 %v5650_v43, %v5601_v39  ;;  %6815 = vmatpush.bf16.msra.mxu2 %v6365_v5  ;;  %v6359_v5 = vpack.c.bf16 %v6170_v50, %v6163_v18  ;;  %v6134_v18 = vld [vmem:[%s12828_s4 + $0xf8] sm:$0xff]  ;;  %v6141_v50 = vld [vmem:[%s12828_s4 + $0x130] sm:$0xff] }
 0x767   : > { %v5853_v10 = vadd.f32 %v5551_v40, %v4623_v45  ;;  %v5861_v17 = vadd.f32 %v5651_v48, %v4631_v14  ;;  %v4534_v45 = vld [vmem:[#allocation2 + $0x68] sm:$0xff]  ;;  %v5989_v14 = vld [vmem:[#allocation2 + $0x70] sm:$0xff]  ;;  %6914 = vmatpush.bf16.msra.mxu0 %v6359_v5  ;;  %v6344_v5 = vpack.c.bf16 %v6141_v50, %v6134_v18  ;;  %6867 = vmatpush.bf16.msra.mxu3 %v6400_v31 }
 0x768   : > { %6964 = vmatpush.bf16.msra.mxu1 %v6408_v49  ;;  %v6393_v49 = vpack.c.bf16 %v6239_v37, %v6232_v60  ;;  %v6121_v18 = vld [vmem:[%s12828_s4 + $0x90] sm:$0xff]  ;;  %v6128_v50 = vld [vmem:[%s12828_s4 + $0xc8] sm:$0xff]  ;;  %v6394_v31 = vpack.c.bf16 %v6240_v24, %v6233_v29  ;;  %v6219_v60 = vld [vmem:[%s12828_s4 + $0x3a0] sm:$0xff] }
 0x769   : > { %5965 = vst [vmem:[#allocation2 + $0x330] sm:$0xff] %v5853_v10  ;;  %v5503_v27 = vpop.f32.mrf.mxu2  ;;  %6816 = vmatpush.bf16.msra.mxu2 %v6358_v16  ;;  %v6352_v16 = vpack.c.bf16 %v6156_v59, %v6149_v56  ;;  %v6120_v56 = vld [vmem:[%s12828_s4 + $0x88] sm:$0xff]  ;;  %v6127_v59 = vld [vmem:[%s12828_s4 + $0xc0] sm:$0xff]  ;;  %v6226_v37 = vld [vmem:[%s12828_s4 + $0x3d8] sm:$0xff] }
 0x76a   : > { %5973 = vst [vmem:[#allocation2 + $0x370] sm:$0xff] %v5861_v17  ;;  %v6318_v29 = vld [vmem:[%s12828_s4 + $0x6b8] sm:$0xff]  ;;  %v6325_v24 = vld [vmem:[%s12828_s4 + $0x6f0] sm:$0xff] }
 0x76b   : > { %v6528_v51 = vpop.f32.mrf.mxu0  ;;  %6915 = vmatpush.bf16.msra.mxu0 %v6352_v16  ;;  %v6337_v16 = vpack.c.bf16 %v6127_v59, %v6120_v56  ;;  %6868 = vmatpush.bf16.msra.mxu3 %v6393_v49  ;;  %v6107_v56 = vld [vmem:[%s12828_s4 + $0x20] sm:$0xff]  ;;  %v6114_v59 = vld [vmem:[%s12828_s4 + $0x58] sm:$0xff]  ;;  %v6387_v49 = vpack.c.bf16 %v6226_v37, %v6219_v60  ;;  %v6304_v60 = vld [vmem:[%s12828_s4 + $0x648] sm:$0xff] }
 0x76c   : > { %v5552_v9 = vpop.f32.mrf.mxu3  ;;  %v6577_v7 = vpop.f32.mrf.mxu1  ;;  %6965 = vmatpush.bf16.msra.mxu1 %v6401_v46  ;;  %v6386_v46 = vpack.c.bf16 %v6225_v54, %v6218_v1  ;;  %v6319_v1 = vld [vmem:[%s12828_s4 + $0x6c0] sm:$0xff]  ;;  %v6326_v54 = vld [vmem:[%s12828_s4 + $0x6f8] sm:$0xff] }
 0x76d   : > { %v5553_v2 = vadd.f32 %v5552_v9, %v5503_v27  ;;  %v6578_v13 = vadd.f32 %v6577_v7, %v6528_v51  ;;  %6817 = vmatpush.bf16.msra.mxu2 %v6351_v42  ;;  %v6345_v42 = vpack.c.bf16 %v6142_v23, %v6135_v30  ;;  %v6106_v30 = vld [vmem:[%s12828_s4 + $0x18] sm:$0xff]  ;;  %v6113_v23 = vld [vmem:[%s12828_s4 + $0x50] sm:$0xff]  ;;  %v6311_v37 = vld [vmem:[%s12828_s4 + $0x680] sm:$0xff] }
 0x76e   : > { %6625 = vmatmul.bf16.vlgmr.msrb.gmra.mxu2 %v11930_v44  ;;  %6723 = vmatmul.bf16.vlgmr.msrb.gmra.mxu0 %v11930_v44 }
 0x76f   : > { %v5860_v12 = vadd.f32 %v5553_v2, %v4630_v19  ;;  %v7205_v53 = vadd.f32 %v6578_v13, %v5975_v63  ;;  %6772 = vmatmul.bf16.vlgmr.msrb.gmra.mxu1 %v11935_v58  ;;  %v4541_v19 = vld [vmem:[#allocation2 + $0xa0] sm:$0xff]  ;;  %v5996_v63 = vld [vmem:[#allocation2 + $0xa8] sm:$0xff]  ;;  %6916 = vmatpush.bf16.msra.mxu0 %v6345_v42  ;;  %v6330_v42 = vpack.c.bf16 %v6113_v23, %v6106_v30  ;;  %v6214_v23 = vld [vmem:[%s12828_s4 + $0x378] sm:$0xff] }
 0x770   : > { %6966 = vmatpush.bf16.msra.mxu1 %v6394_v31  ;;  %6869 = vmatpush.bf16.msra.mxu3 %v6386_v46  ;;  %v6437_v31 = vpack.c.bf16 %v6325_v24, %v6318_v29  ;;  %v6207_v30 = vld [vmem:[%s12828_s4 + $0x340] sm:$0xff]  ;;  %v6438_v46 = vpack.c.bf16 %v6326_v54, %v6319_v1  ;;  %v6305_v29 = vld [vmem:[%s12828_s4 + $0x650] sm:$0xff]  ;;  %v6312_v24 = vld [vmem:[%s12828_s4 + $0x688] sm:$0xff] }
 0x771   : > { %5972 = vst [vmem:[#allocation2 + $0x368] sm:$0xff] %v5860_v12  ;;  %6674 = vmatmul.bf16.vlgmr.msrb.gmra.mxu3 %v11935_v58  ;;  %v5662_v15 = vpop.f32.mrf.mxu2  ;;  %6818 = vmatpush.bf16.msra.mxu2 %v6344_v5  ;;  %v6338_v5 = vpack.c.bf16 %v6128_v50, %v6121_v18  ;;  %v6206_v18 = vld [vmem:[%s12828_s4 + $0x338] sm:$0xff]  ;;  %v6213_v50 = vld [vmem:[%s12828_s4 + $0x370] sm:$0xff] }
 0x772   : > { %7317 = vst [vmem:[#allocation2] sm:$0xff] %v7205_v53  ;;  %v6290_v1 = vld [vmem:[%s12828_s4 + $0x5d8] sm:$0xff]  ;;  %v6297_v54 = vld [vmem:[%s12828_s4 + $0x610] sm:$0xff] }
 0x773   : > { %7541 = vst [vmem:[%s12223_s29] sm:$0xff] %v7205_v53  ;;  %v6530_v28 = vpop.f32.mrf.mxu0  ;;  %6917 = vmatpush.bf16.msra.mxu0 %v6338_v5  ;;  %v6381_v5 = vpack.c.bf16 %v6213_v50, %v6206_v18  ;;  %v6193_v18 = vld [vmem:[%s12828_s4 + $0x2d0] sm:$0xff]  ;;  %v6200_v50 = vld [vmem:[%s12828_s4 + $0x308] sm:$0xff] }
 0x774   : > { %v5711_v55 = vpop.f32.mrf.mxu3  ;;  %v6579_v38 = vpop.f32.mrf.mxu1  ;;  %6967 = vmatpush.bf16.msra.mxu1 %v6387_v49  ;;  %7058 = vmatpush.bf16.msrb.mxu3 %v6437_v31  ;;  %v6430_v49 = vpack.c.bf16 %v6311_v37, %v6304_v60  ;;  %v6431_v31 = vpack.c.bf16 %v6312_v24, %v6305_v29  ;;  %v6291_v60 = vld [vmem:[%s12828_s4 + $0x5e0] sm:$0xff]  ;;  %v6298_v37 = vld [vmem:[%s12828_s4 + $0x618] sm:$0xff]  ;;  %v6276_v29 = vld [vmem:[%s12828_s4 + $0x568] sm:$0xff] }
 0x775   : > { %v5712_v62 = vadd.f32 %v5711_v55, %v5662_v15  ;;  %v6580_v35 = vadd.f32 %v6579_v38, %v6530_v28  ;;  %6819 = vmatpush.bf16.msra.mxu2 %v6337_v16  ;;  %v6331_v16 = vpack.c.bf16 %v6114_v59, %v6107_v56  ;;  %v6192_v56 = vld [vmem:[%s12828_s4 + $0x2c8] sm:$0xff]  ;;  %v6199_v59 = vld [vmem:[%s12828_s4 + $0x300] sm:$0xff] }
 0x776   : > { %v6283_v24 = vld [vmem:[%s12828_s4 + $0x5a0] sm:$0xff] }
 0x777   : > { %v5757_v20 = vadd.f32 %v5712_v62, %v4527_v26  ;;  %v7212_v22 = vadd.f32 %v6580_v35, %v5982_v0  ;;  %v4548_v26 = vld [vmem:[#allocation2 + $0xd8] sm:$0xff]  ;;  %v6003_v0 = vld [vmem:[#allocation2 + $0xe0] sm:$0xff]  ;;  %6918 = vmatpush.bf16.msra.mxu0 %v6331_v16  ;;  %v6374_v16 = vpack.c.bf16 %v6199_v59, %v6192_v56 }
 0x778   : > { %7156 = vmatpush.bf16.msrb.mxu1 %v6438_v46  ;;  %7059 = vmatpush.bf16.msrb.mxu3 %v6430_v49  ;;  %v6423_v46 = vpack.c.bf16 %v6297_v54, %v6290_v1  ;;  %v6179_v56 = vld [vmem:[%s12828_s4 + $0x260] sm:$0xff]  ;;  %v6186_v59 = vld [vmem:[%s12828_s4 + $0x298] sm:$0xff]  ;;  %v6424_v49 = vpack.c.bf16 %v6298_v37, %v6291_v60  ;;  %v6277_v1 = vld [vmem:[%s12828_s4 + $0x570] sm:$0xff] }
 0x779   : > { %5869 = vst.msk [vmem:[#allocation2 + $0x30] sm:$0xff] %vm1506_vm0, %v5757_v20  ;;  %v5664_v3 = vpop.f32.mrf.mxu2  ;;  %6820 = vmatpush.bf16.msra.mxu2 %v6330_v42  ;;  %v6382_v42 = vpack.c.bf16 %v6214_v23, %v6207_v30  ;;  %v6178_v30 = vld [vmem:[%s12828_s4 + $0x258] sm:$0xff]  ;;  %v6185_v23 = vld [vmem:[%s12828_s4 + $0x290] sm:$0xff]  ;;  %v6284_v54 = vld [vmem:[%s12828_s4 + $0x5a8] sm:$0xff] }
 0x77a   : > { %7324 = vst [vmem:[#allocation2 + $0x38] sm:$0xff] %v7212_v22  ;;  %v6262_v60 = vld [vmem:[%s12828_s4 + $0x4f8] sm:$0xff]  ;;  %v6269_v37 = vld [vmem:[%s12828_s4 + $0x530] sm:$0xff] }
 0x77b   : > { %7548 = vst [vmem:[%s12223_s29 + $0x38] sm:$0xff] %v7212_v22  ;;  %v6533_v39 = vpop.f32.mrf.mxu0  ;;  %7107 = vmatpush.bf16.msrb.mxu0 %v6382_v42  ;;  %v6367_v42 = vpack.c.bf16 %v6185_v23, %v6178_v30  ;;  %v6165_v30 = vld [vmem:[%s12828_s4 + $0x1f0] sm:$0xff]  ;;  %v6172_v23 = vld [vmem:[%s12828_s4 + $0x228] sm:$0xff] }
 0x77c   : > { %v5713_v11 = vpop.f32.mrf.mxu3  ;;  %v6582_v43 = vpop.f32.mrf.mxu1  ;;  %7157 = vmatpush.bf16.msrb.mxu1 %v6431_v31  ;;  %7060 = vmatpush.bf16.msrb.mxu3 %v6423_v46  ;;  %v6416_v31 = vpack.c.bf16 %v6283_v24, %v6276_v29  ;;  %v6417_v46 = vpack.c.bf16 %v6284_v54, %v6277_v1  ;;  %v6263_v29 = vld [vmem:[%s12828_s4 + $0x500] sm:$0xff]  ;;  %v6270_v24 = vld [vmem:[%s12828_s4 + $0x538] sm:$0xff]  ;;  %v6248_v1 = vld [vmem:[%s12828_s4 + $0x488] sm:$0xff] }
 0x77d   : > { %v5714_v40 = vadd.f32 %v5713_v11, %v5664_v3  ;;  %v6583_v48 = vadd.f32 %v6582_v43, %v6533_v39  ;;  %7009 = vmatpush.bf16.msrb.mxu2 %v6381_v5  ;;  %v6375_v5 = vpack.c.bf16 %v6200_v50, %v6193_v18  ;;  %v6164_v18 = vld [vmem:[%s12828_s4 + $0x1e8] sm:$0xff]  ;;  %v6171_v50 = vld [vmem:[%s12828_s4 + $0x220] sm:$0xff] }
 0x77e   : > { %6630 = vmatmul.bf16.gmra.mxu2 %v11966_v41  ;;  %6728 = vmatmul.bf16.gmra.mxu0 %v11966_v41  ;;  %v6255_v54 = vld [vmem:[%s12828_s4 + $0x4c0] sm:$0xff] }
 0x77f   : > { %v5764_v10 = vadd.f32 %v5714_v40, %v4534_v45  ;;  %v7219_v17 = vadd.f32 %v6583_v48, %v5989_v14  ;;  %6777 = vmatmul.bf16.gmra.mxu1 %v11971_v4  ;;  %v4555_v45 = vld [vmem:[#allocation2 + $0x110] sm:$0xff]  ;;  %v6010_v14 = vld [vmem:[#allocation2 + $0x118] sm:$0xff]  ;;  %7108 = vmatpush.bf16.msrb.mxu0 %v6375_v5  ;;  %v6360_v5 = vpack.c.bf16 %v6171_v50, %v6164_v18  ;;  %v6151_v18 = vld [vmem:[%s12828_s4 + $0x180] sm:$0xff] }
 0x780   : > { %7158 = vmatpush.bf16.msrb.mxu1 %v6424_v49  ;;  %7061 = vmatpush.bf16.msrb.mxu3 %v6416_v31  ;;  %v6409_v49 = vpack.c.bf16 %v6269_v37, %v6262_v60  ;;  %v6158_v50 = vld [vmem:[%s12828_s4 + $0x1b8] sm:$0xff]  ;;  %v6410_v31 = vpack.c.bf16 %v6270_v24, %v6263_v29  ;;  %v6249_v60 = vld [vmem:[%s12828_s4 + $0x490] sm:$0xff]  ;;  %v6256_v37 = vld [vmem:[%s12828_s4 + $0x4c8] sm:$0xff] }
 0x781   : > { %5876 = vst.msk [vmem:[#allocation2 + $0x68] sm:$0xff] %vm1506_vm0, %v5764_v10  ;;  %6679 = vmatmul.bf16.gmra.mxu3 %v11971_v4  ;;  %v5667_v27 = vpop.f32.mrf.mxu2  ;;  %7010 = vmatpush.bf16.msrb.mxu2 %v6374_v16  ;;  %v6368_v16 = vpack.c.bf16 %v6186_v59, %v6179_v56  ;;  %v6150_v56 = vld [vmem:[%s12828_s4 + $0x178] sm:$0xff]  ;;  %v6157_v59 = vld [vmem:[%s12828_s4 + $0x1b0] sm:$0xff] }
 0x782   : > { %7331 = vst [vmem:[#allocation2 + $0x70] sm:$0xff] %v7219_v17  ;;  %v6234_v29 = vld [vmem:[%s12828_s4 + $0x418] sm:$0xff]  ;;  %v6241_v24 = vld [vmem:[%s12828_s4 + $0x450] sm:$0xff] }
 0x783   : > { %7555 = vst [vmem:[%s12223_s29 + $0x70] sm:$0xff] %v7219_v17  ;;  %v6535_v51 = vpop.f32.mrf.mxu0  ;;  %7109 = vmatpush.bf16.msrb.mxu0 %v6368_v16  ;;  %v6353_v16 = vpack.c.bf16 %v6157_v59, %v6150_v56  ;;  %v6137_v56 = vld [vmem:[%s12828_s4 + $0x110] sm:$0xff]  ;;  %v6144_v59 = vld [vmem:[%s12828_s4 + $0x148] sm:$0xff] }
 0x784   : > { %v5716_v9 = vpop.f32.mrf.mxu3  ;;  %v6584_v7 = vpop.f32.mrf.mxu1  ;;  %7159 = vmatpush.bf16.msrb.mxu1 %v6417_v46  ;;  %7062 = vmatpush.bf16.msrb.mxu3 %v6409_v49  ;;  %v6402_v46 = vpack.c.bf16 %v6255_v54, %v6248_v1  ;;  %v6403_v49 = vpack.c.bf16 %v6256_v37, %v6249_v60  ;;  %v6235_v1 = vld [vmem:[%s12828_s4 + $0x420] sm:$0xff]  ;;  %v6242_v54 = vld [vmem:[%s12828_s4 + $0x458] sm:$0xff]  ;;  %v6220_v60 = vld [vmem:[%s12828_s4 + $0x3a8] sm:$0xff] }
 0x785   : > { %v5717_v2 = vadd.f32 %v5716_v9, %v5667_v27  ;;  %v6585_v13 = vadd.f32 %v6584_v7, %v6535_v51  ;;  %7011 = vmatpush.bf16.msrb.mxu2 %v6367_v42  ;;  %v6361_v42 = vpack.c.bf16 %v6172_v23, %v6165_v30  ;;  %v6136_v30 = vld [vmem:[%s12828_s4 + $0x108] sm:$0xff]  ;;  %v6143_v23 = vld [vmem:[%s12828_s4 + $0x140] sm:$0xff] }
 0x786   : > { %v6227_v37 = vld [vmem:[%s12828_s4 + $0x3e0] sm:$0xff] }
 0x787   : > { %v5771_v12 = vadd.f32 %v5717_v2, %v4541_v19  ;;  %v7226_v53 = vadd.f32 %v6585_v13, %v5996_v63  ;;  %v4562_v19 = vld [vmem:[#allocation2 + $0x148] sm:$0xff]  ;;  %v6017_v63 = vld [vmem:[#allocation2 + $0x150] sm:$0xff]  ;;  %7110 = vmatpush.bf16.msrb.mxu0 %v6361_v42  ;;  %v6346_v42 = vpack.c.bf16 %v6143_v23, %v6136_v30  ;;  %v6123_v30 = vld [vmem:[%s12828_s4 + $0xa0] sm:$0xff] }
 0x788   : > { %7160 = vmatpush.bf16.msrb.mxu1 %v6410_v31  ;;  %7063 = vmatpush.bf16.msrb.mxu3 %v6402_v46  ;;  %v6395_v31 = vpack.c.bf16 %v6241_v24, %v6234_v29  ;;  %v6130_v23 = vld [vmem:[%s12828_s4 + $0xd8] sm:$0xff]  ;;  %v6396_v46 = vpack.c.bf16 %v6242_v54, %v6235_v1  ;;  %v6221_v29 = vld [vmem:[%s12828_s4 + $0x3b0] sm:$0xff]  ;;  %v6228_v24 = vld [vmem:[%s12828_s4 + $0x3e8] sm:$0xff] }
 0x789   : > { %5883 = vst.msk [vmem:[#allocation2 + $0xa0] sm:$0xff] %vm1506_vm0, %v5771_v12  ;;  %v5669_v15 = vpop.f32.mrf.mxu2  ;;  %7012 = vmatpush.bf16.msrb.mxu2 %v6360_v5  ;;  %v6354_v5 = vpack.c.bf16 %v6158_v50, %v6151_v18  ;;  %v6122_v18 = vld [vmem:[%s12828_s4 + $0x98] sm:$0xff]  ;;  %v6129_v50 = vld [vmem:[%s12828_s4 + $0xd0] sm:$0xff]  ;;  %v6060_v1 = vld [vmem:[#allocation2 + $0x2a8] sm:$0xff] }
 0x78a   : > { %7338 = vst [vmem:[#allocation2 + $0xa8] sm:$0xff] %v7226_v53  ;;  %v6068_v54 = vld [vmem:[#allocation2 + $0x2e8] sm:$0xff] }
 0x78b   : > { %7562 = vst [vmem:[%s12223_s29 + $0xa8] sm:$0xff] %v7226_v53  ;;  %v6538_v28 = vpop.f32.mrf.mxu0  ;;  %7111 = vmatpush.bf16.msrb.mxu0 %v6354_v5  ;;  %v6339_v5 = vpack.c.bf16 %v6129_v50, %v6122_v18  ;;  %v6109_v18 = vld [vmem:[%s12828_s4 + $0x30] sm:$0xff]  ;;  %v6116_v50 = vld [vmem:[%s12828_s4 + $0x68] sm:$0xff] }
 0x78c   : > { %v5718_v55 = vpop.f32.mrf.mxu3  ;;  %v6587_v38 = vpop.f32.mrf.mxu1  ;;  %7161 = vmatpush.bf16.msrb.mxu1 %v6403_v49  ;;  %7064 = vmatpush.bf16.msrb.mxu3 %v6395_v31  ;;  %v6388_v49 = vpack.c.bf16 %v6227_v37, %v6220_v60  ;;  %v6389_v31 = vpack.c.bf16 %v6228_v24, %v6221_v29  ;;  %v6074_v37 = vld [vmem:[#allocation2 + $0x318] sm:$0xff] }
 0x78d   : > { %v5719_v62 = vadd.f32 %v5718_v55, %v5669_v15  ;;  %v6588_v35 = vadd.f32 %v6587_v38, %v6538_v28  ;;  %7013 = vmatpush.bf16.msrb.mxu2 %v6353_v16  ;;  %v6347_v16 = vpack.c.bf16 %v6144_v59, %v6137_v56  ;;  %v6108_v56 = vld [vmem:[%s12828_s4 + $0x28] sm:$0xff]  ;;  %v6115_v59 = vld [vmem:[%s12828_s4 + $0x60] sm:$0xff] }
 0x78e   : > { %6635 = vmatmul.bf16.gmra.mxu2 %v12002_v33  ;;  %6733 = vmatmul.bf16.gmra.mxu0 %v12002_v33 }
 0x78f   : > { %v5778_v20 = vadd.f32 %v5719_v62, %v4548_v26  ;;  %v7233_v22 = vadd.f32 %v6588_v35, %v6003_v0  ;;  %6782 = vmatmul.bf16.gmra.mxu1 %v12007_v52  ;;  %v4569_v26 = vld [vmem:[#allocation2 + $0x180] sm:$0xff]  ;;  %v6024_v0 = vld [vmem:[#allocation2 + $0x188] sm:$0xff]  ;;  %7112 = vmatpush.bf16.msrb.mxu0 %v6347_v16  ;;  %v6332_v16 = vpack.c.bf16 %v6115_v59, %v6108_v56 }
 0x790   : > { %7162 = vmatpush.bf16.msrb.mxu1 %v6396_v46  ;;  %7065 = vmatpush.bf16.msrb.mxu3 %v6388_v49  ;;  %v6075_v56 = vld [vmem:[#allocation2 + $0x320] sm:$0xff] }
 0x791   : > { %5890 = vst.msk [vmem:[#allocation2 + $0xd8] sm:$0xff] %vm1506_vm0, %v5778_v20  ;;  %6684 = vmatmul.bf16.gmra.mxu3 %v12007_v52  ;;  %v5672_v3 = vpop.f32.mrf.mxu2  ;;  %7014 = vmatpush.bf16.msrb.mxu2 %v6346_v42  ;;  %v6340_v42 = vpack.c.bf16 %v6130_v23, %v6123_v30 }
 0x792   : > { %7345 = vst [vmem:[#allocation2 + $0xe0] sm:$0xff] %v7233_v22 }
 0x793   : > { %7569 = vst [vmem:[%s12223_s29 + $0xe0] sm:$0xff] %v7233_v22  ;;  %v6540_v39 = vpop.f32.mrf.mxu0  ;;  %7113 = vmatpush.bf16.msrb.mxu0 %v6340_v42 }
 0x794   : > { %v5721_v11 = vpop.f32.mrf.mxu3  ;;  %v6589_v43 = vpop.f32.mrf.mxu1  ;;  %7163 = vmatpush.bf16.msrb.mxu1 %v6389_v31 }
 0x795   : > { %v5722_v40 = vadd.f32 %v5721_v11, %v5672_v3  ;;  %v6590_v48 = vadd.f32 %v6589_v43, %v6540_v39  ;;  %7015 = vmatpush.bf16.msrb.mxu2 %v6339_v5  ;;  %v6333_v5 = vpack.c.bf16 %v6116_v50, %v6109_v18  ;;  %v6081_v18 = vld [vmem:[#allocation2 + $0x350] sm:$0xff] }
 0x797   : > { %v5785_v10 = vadd.f32 %v5722_v40, %v4555_v45  ;;  %v7240_v17 = vadd.f32 %v6590_v48, %v6010_v14  ;;  %v4576_v45 = vld [vmem:[#allocation2 + $0x1b8] sm:$0xff]  ;;  %v6031_v14 = vld [vmem:[#allocation2 + $0x1c0] sm:$0xff]  ;;  %7114 = vmatpush.bf16.msrb.mxu0 %v6333_v5 }
 0x799   : > { %5897 = vst.msk [vmem:[#allocation2 + $0x110] sm:$0xff] %vm1506_vm0, %v5785_v10  ;;  %v5674_v27 = vpop.f32.mrf.mxu2  ;;  %7016 = vmatpush.bf16.msrb.mxu2 %v6332_v16 }
 0x79a   : > { %7352 = vst [vmem:[#allocation2 + $0x118] sm:$0xff] %v7240_v17 }
 0x79b   : > { %7576 = vst [vmem:[%s12223_s29 + $0x118] sm:$0xff] %v7240_v17  ;;  %v6543_v51 = vpop.f32.mrf.mxu0 }
 0x79c   : > { %v5723_v9 = vpop.f32.mrf.mxu3  ;;  %v6592_v7 = vpop.f32.mrf.mxu1 }
 0x79d   : > { %v5724_v2 = vadd.f32 %v5723_v9, %v5674_v27  ;;  %v6593_v13 = vadd.f32 %v6592_v7, %v6543_v51 }
 0x79e   : > { %6640 = vmatmul.bf16.gmra.mxu2 %v12038_v32  ;;  %6738 = vmatmul.bf16.gmra.mxu0 %v12038_v32 }
 0x79f   : > { %v5792_v12 = vadd.f32 %v5724_v2, %v4562_v19  ;;  %v7247_v53 = vadd.f32 %v6593_v13, %v6017_v63  ;;  %6787 = vmatmul.bf16.gmra.mxu1 %v12043_v21  ;;  %v4583_v19 = vld [vmem:[#allocation2 + $0x1f0] sm:$0xff]  ;;  %v6038_v63 = vld [vmem:[#allocation2 + $0x1f8] sm:$0xff] }
 0x7a1   : > { %5904 = vst.msk [vmem:[#allocation2 + $0x148] sm:$0xff] %vm1506_vm0, %v5792_v12  ;;  %6689 = vmatmul.bf16.gmra.mxu3 %v12043_v21  ;;  %v5677_v15 = vpop.f32.mrf.mxu2 }
 0x7a2   : > { %7359 = vst [vmem:[#allocation2 + $0x150] sm:$0xff] %v7247_v53 }
 0x7a3   : > { %7583 = vst [vmem:[%s12223_s29 + $0x150] sm:$0xff] %v7247_v53  ;;  %v6545_v28 = vpop.f32.mrf.mxu0 }
 0x7a4   : > { %v5726_v55 = vpop.f32.mrf.mxu3  ;;  %v6594_v38 = vpop.f32.mrf.mxu1 }
 0x7a5   : > { %v5727_v62 = vadd.f32 %v5726_v55, %v5677_v15  ;;  %v6595_v35 = vadd.f32 %v6594_v38, %v6545_v28 }
 0x7a7   : > { %v5799_v20 = vadd.f32 %v5727_v62, %v4569_v26  ;;  %v7254_v22 = vadd.f32 %v6595_v35, %v6024_v0  ;;  %v4590_v26 = vld [vmem:[#allocation2 + $0x228] sm:$0xff]  ;;  %v6045_v0 = vld [vmem:[#allocation2 + $0x230] sm:$0xff] }
 0x7a9   : > { %5911 = vst.msk [vmem:[#allocation2 + $0x180] sm:$0xff] %vm1506_vm0, %v5799_v20  ;;  %v5679_v3 = vpop.f32.mrf.mxu2 }
 0x7aa   : > { %7366 = vst [vmem:[#allocation2 + $0x188] sm:$0xff] %v7254_v22 }
 0x7ab   : > { %7590 = vst [vmem:[%s12223_s29 + $0x188] sm:$0xff] %v7254_v22  ;;  %v6548_v39 = vpop.f32.mrf.mxu0 }
 0x7ac   : > { %v5728_v11 = vpop.f32.mrf.mxu3  ;;  %v6597_v43 = vpop.f32.mrf.mxu1 }
 0x7ad   : > { %v5729_v40 = vadd.f32 %v5728_v11, %v5679_v3  ;;  %v6598_v48 = vadd.f32 %v6597_v43, %v6548_v39 }
 0x7ae   : > { %6645 = vmatmul.bf16.gmra.mxu2 %v12074_v47  ;;  %6743 = vmatmul.bf16.gmra.mxu0 %v12074_v47 }
 0x7af   : > { %v5806_v10 = vadd.f32 %v5729_v40, %v4576_v45  ;;  %v7261_v17 = vadd.f32 %v6598_v48, %v6031_v14  ;;  %6792 = vmatmul.bf16.gmra.mxu1 %v12079_v57  ;;  %v4597_v45 = vld [vmem:[#allocation2 + $0x260] sm:$0xff]  ;;  %v6052_v14 = vld [vmem:[#allocation2 + $0x268] sm:$0xff] }
 0x7b1   : > { %5918 = vst.msk [vmem:[#allocation2 + $0x1b8] sm:$0xff] %vm1506_vm0, %v5806_v10  ;;  %6694 = vmatmul.bf16.gmra.mxu3 %v12079_v57  ;;  %v5682_v27 = vpop.f32.mrf.mxu2 }
 0x7b2   : > { %7373 = vst [vmem:[#allocation2 + $0x1c0] sm:$0xff] %v7261_v17 }
 0x7b3   : > { %7597 = vst [vmem:[%s12223_s29 + $0x1c0] sm:$0xff] %v7261_v17  ;;  %v6550_v51 = vpop.f32.mrf.mxu0 }
 0x7b4   : > { %v5731_v9 = vpop.f32.mrf.mxu3  ;;  %v6599_v7 = vpop.f32.mrf.mxu1 }
 0x7b5   : > { %v5732_v2 = vadd.f32 %v5731_v9, %v5682_v27  ;;  %v6600_v13 = vadd.f32 %v6599_v7, %v6550_v51 }
 0x7b7   : > { %v5813_v12 = vadd.f32 %v5732_v2, %v4583_v19  ;;  %v7268_v53 = vadd.f32 %v6600_v13, %v6038_v63  ;;  %v4604_v19 = vld [vmem:[#allocation2 + $0x298] sm:$0xff]  ;;  %v6059_v63 = vld [vmem:[#allocation2 + $0x2a0] sm:$0xff] }
 0x7b9   : > { %5925 = vst.msk [vmem:[#allocation2 + $0x1f0] sm:$0xff] %vm1506_vm0, %v5813_v12  ;;  %v5684_v15 = vpop.f32.mrf.mxu2 }
 0x7ba   : > { %7380 = vst [vmem:[#allocation2 + $0x1f8] sm:$0xff] %v7268_v53 }
 0x7bb   : > { %7604 = vst [vmem:[%s12223_s29 + $0x1f8] sm:$0xff] %v7268_v53  ;;  %v6553_v28 = vpop.f32.mrf.mxu0 }
 0x7bc   : > { %v5733_v55 = vpop.f32.mrf.mxu3  ;;  %v6602_v38 = vpop.f32.mrf.mxu1 }
 0x7bd   : > { %v5734_v62 = vadd.f32 %v5733_v55, %v5684_v15  ;;  %v6603_v35 = vadd.f32 %v6602_v38, %v6553_v28 }
 0x7be   : > { %6650 = vmatmul.bf16.gmra.mxu2 %v12110_v8  ;;  %6748 = vmatmul.bf16.gmra.mxu0 %v12110_v8 }
 0x7bf   : > { %v5820_v20 = vadd.f32 %v5734_v62, %v4590_v26  ;;  %v7275_v22 = vadd.f32 %v6603_v35, %v6045_v0  ;;  %6797 = vmatmul.bf16.gmra.mxu1 %v12115_v6  ;;  %v4611_v26 = vld [vmem:[#allocation2 + $0x2d0] sm:$0xff]  ;;  %v6066_v0 = vld [vmem:[#allocation2 + $0x2d8] sm:$0xff] }
 0x7c1   : > { %5932 = vst.msk [vmem:[#allocation2 + $0x228] sm:$0xff] %vm1506_vm0, %v5820_v20  ;;  %6699 = vmatmul.bf16.gmra.mxu3 %v12115_v6  ;;  %v5687_v3 = vpop.f32.mrf.mxu2 }
 0x7c2   : > { %7387 = vst [vmem:[#allocation2 + $0x230] sm:$0xff] %v7275_v22 }
 0x7c3   : > { %7611 = vst [vmem:[%s12223_s29 + $0x230] sm:$0xff] %v7275_v22  ;;  %v6555_v39 = vpop.f32.mrf.mxu0 }
 0x7c4   : > { %v5736_v11 = vpop.f32.mrf.mxu3  ;;  %v6604_v43 = vpop.f32.mrf.mxu1 }
 0x7c5   : > { %v5737_v40 = vadd.f32 %v5736_v11, %v5687_v3  ;;  %v6605_v48 = vadd.f32 %v6604_v43, %v6555_v39 }
 0x7c7   : > { %v5827_v10 = vadd.f32 %v5737_v40, %v4597_v45  ;;  %v7282_v17 = vadd.f32 %v6605_v48, %v6052_v14  ;;  %v4618_v45 = vld [vmem:[#allocation2 + $0x308] sm:$0xff]  ;;  %v6073_v14 = vld [vmem:[#allocation2 + $0x310] sm:$0xff] }
 0x7c9   : > { %5939 = vst.msk [vmem:[#allocation2 + $0x260] sm:$0xff] %vm1506_vm0, %v5827_v10  ;;  %v5689_v27 = vpop.f32.mrf.mxu2 }
 0x7ca   : > { %7394 = vst [vmem:[#allocation2 + $0x268] sm:$0xff] %v7282_v17 }
 0x7cb   : > { %7618 = vst [vmem:[%s12223_s29 + $0x268] sm:$0xff] %v7282_v17  ;;  %v6558_v51 = vpop.f32.mrf.mxu0 }
 0x7cc   : > { %v5738_v9 = vpop.f32.mrf.mxu3  ;;  %v6607_v7 = vpop.f32.mrf.mxu1 }
 0x7cd   : > { %v5739_v2 = vadd.f32 %v5738_v9, %v5689_v27  ;;  %v6608_v13 = vadd.f32 %v6607_v7, %v6558_v51 }
 0x7ce   : > { %6655 = vmatmul.bf16.gmra.mxu2 %v12146_v36  ;;  %6753 = vmatmul.bf16.gmra.mxu0 %v12146_v36 }
 0x7cf   : > { %v5834_v12 = vadd.f32 %v5739_v2, %v4604_v19  ;;  %v7289_v53 = vadd.f32 %v6608_v13, %v6059_v63  ;;  %6802 = vmatmul.bf16.gmra.mxu1 %v12151_v61  ;;  %v4625_v19 = vld [vmem:[#allocation2 + $0x340] sm:$0xff]  ;;  %v6080_v63 = vld [vmem:[#allocation2 + $0x348] sm:$0xff] }
 0x7d1   : > { %5946 = vst.msk [vmem:[#allocation2 + $0x298] sm:$0xff] %vm1506_vm0, %v5834_v12  ;;  %6704 = vmatmul.bf16.gmra.mxu3 %v12151_v61  ;;  %v5692_v15 = vpop.f32.mrf.mxu2 }
 0x7d2   : > { %7401 = vst [vmem:[#allocation2 + $0x2a0] sm:$0xff] %v7289_v53 }
 0x7d3   : > { %7625 = vst [vmem:[%s12223_s29 + $0x2a0] sm:$0xff] %v7289_v53  ;;  %v6560_v28 = vpop.f32.mrf.mxu0 }
 0x7d4   : > { %v5741_v55 = vpop.f32.mrf.mxu3  ;;  %v6609_v38 = vpop.f32.mrf.mxu1 }
 0x7d5   : > { %v5742_v62 = vadd.f32 %v5741_v55, %v5692_v15  ;;  %v6610_v35 = vadd.f32 %v6609_v38, %v6560_v28 }
 0x7d7   : > { %v5841_v20 = vadd.f32 %v5742_v62, %v4611_v26  ;;  %v7296_v22 = vadd.f32 %v6610_v35, %v6066_v0  ;;  %v4632_v26 = vld [vmem:[#allocation2 + $0x378] sm:$0xff]  ;;  %v5977_v0 = vld [vmem:[#allocation2 + $0x10] sm:$0xff] }
 0x7d9   : > { %5953 = vst.msk [vmem:[#allocation2 + $0x2d0] sm:$0xff] %vm1506_vm0, %v5841_v20  ;;  %v5694_v3 = vpop.f32.mrf.mxu2 }
 0x7da   : > { %7408 = vst [vmem:[#allocation2 + $0x2d8] sm:$0xff] %v7296_v22 }
 0x7db   : > { %7632 = vst [vmem:[%s12223_s29 + $0x2d8] sm:$0xff] %v7296_v22  ;;  %v6563_v39 = vpop.f32.mrf.mxu0 }
 0x7dc   : > { %v5743_v11 = vpop.f32.mrf.mxu3  ;;  %v6612_v43 = vpop.f32.mrf.mxu1 }
 0x7dd   : > { %v5744_v40 = vadd.f32 %v5743_v11, %v5694_v3  ;;  %v6613_v48 = vadd.f32 %v6612_v43, %v6563_v39 }
 0x7de   : > { %6660 = vmatmul.bf16.gmra.mxu2 %v12173_v25  ;;  %6758 = vmatmul.bf16.gmra.mxu0 %v12173_v25 }
 0x7df   : > { %v5848_v10 = vadd.f32 %v5744_v40, %v4618_v45  ;;  %v7303_v17 = vadd.f32 %v6613_v48, %v6073_v14  ;;  %6807 = vmatmul.bf16.gmra.mxu1 %v12184_v34  ;;  %v5976_v45 = vld [vmem:[#allocation2 + $0x8] sm:$0xff] }
 0x7e0   : > { %v5984_v14 = vld [vmem:[#allocation2 + $0x48] sm:$0xff] }
 0x7e1   : > { %5960 = vst.msk [vmem:[#allocation2 + $0x308] sm:$0xff] %vm1506_vm0, %v5848_v10  ;;  %6709 = vmatmul.bf16.gmra.mxu3 %v12184_v34  ;;  %v5697_v27 = vpop.f32.mrf.mxu2 }
 0x7e2   : > { %7415 = vst [vmem:[#allocation2 + $0x310] sm:$0xff] %v7303_v17 }
 0x7e3   : > { %7639 = vst [vmem:[%s12223_s29 + $0x310] sm:$0xff] %v7303_v17  ;;  %v6565_v51 = vpop.f32.mrf.mxu0 }
 0x7e4   : > { %v5746_v9 = vpop.f32.mrf.mxu3  ;;  %v6614_v7 = vpop.f32.mrf.mxu1 }
 0x7e5   : > { %v5747_v2 = vadd.f32 %v5746_v9, %v5697_v27  ;;  %v6615_v13 = vadd.f32 %v6614_v7, %v6565_v51 }
 0x7e7   : > { %v5855_v12 = vadd.f32 %v5747_v2, %v4625_v19  ;;  %v7310_v53 = vadd.f32 %v6615_v13, %v6080_v63  ;;  %v5983_v19 = vld [vmem:[#allocation2 + $0x40] sm:$0xff] }
 0x7e8   : > { %v5991_v63 = vld [vmem:[#allocation2 + $0x80] sm:$0xff] }
 0x7e9   : > { %5967 = vst.msk [vmem:[#allocation2 + $0x340] sm:$0xff] %vm1506_vm0, %v5855_v12  ;;  %v5699_v15 = vpop.f32.mrf.mxu2 }
 0x7ea   : > { %7422 = vst [vmem:[#allocation2 + $0x348] sm:$0xff] %v7310_v53 }
 0x7eb   : > { %7646 = vst [vmem:[%s12223_s29 + $0x348] sm:$0xff] %v7310_v53  ;;  %v6724_v28 = vpop.f32.mrf.mxu0 }
 0x7ec   : > { %v5748_v55 = vpop.f32.mrf.mxu3  ;;  %v6773_v38 = vpop.f32.mrf.mxu1 }
 0x7ed   : > { %v5749_v62 = vadd.f32 %v5748_v55, %v5699_v15  ;;  %v6774_v35 = vadd.f32 %v6773_v38, %v6724_v28 }
 0x7ee   : > { %6821 = vmatmul.bf16.vlgmr.msra.gmra.mxu2 %v11930_v44  ;;  %6919 = vmatmul.bf16.vlgmr.msra.gmra.mxu0 %v11930_v44 }
 0x7ef   : > { %v5862_v20 = vadd.f32 %v5749_v62, %v4632_v26  ;;  %v7207_v22 = vadd.f32 %v6774_v35, %v5977_v0  ;;  %6968 = vmatmul.bf16.vlgmr.msra.gmra.mxu1 %v11935_v58  ;;  %v5990_v26 = vld [vmem:[#allocation2 + $0x78] sm:$0xff] }
 0x7f0   : > { %v5998_v0 = vld [vmem:[#allocation2 + $0xb8] sm:$0xff] }
 0x7f1   : > { %5974 = vst.msk [vmem:[#allocation2 + $0x378] sm:$0xff] %vm1506_vm0, %v5862_v20  ;;  %6870 = vmatmul.bf16.vlgmr.msra.gmra.mxu3 %v11935_v58  ;;  %v6626_v3 = vpop.f32.mrf.mxu2 }
 0x7f2   : > { %7319 = vst [vmem:[#allocation2 + $0x10] sm:$0xff] %v7207_v22 }
 0x7f3   : > { %7543 = vst [vmem:[%s12223_s29 + $0x10] sm:$0xff] %v7207_v22  ;;  %v6726_v39 = vpop.f32.mrf.mxu0 }
 0x7f4   : > { %v6675_v11 = vpop.f32.mrf.mxu3  ;;  %v6775_v43 = vpop.f32.mrf.mxu1 }
 0x7f5   : > { %v6676_v40 = vadd.f32 %v6675_v11, %v6626_v3  ;;  %v6776_v48 = vadd.f32 %v6775_v43, %v6726_v39 }
 0x7f7   : > { %v7206_v10 = vadd.f32 %v6676_v40, %v5976_v45  ;;  %v7214_v17 = vadd.f32 %v6776_v48, %v5984_v14  ;;  %v5997_v45 = vld [vmem:[#allocation2 + $0xb0] sm:$0xff] }
 0x7f8   : > { %v6005_v14 = vld [vmem:[#allocation2 + $0xf0] sm:$0xff] }
 0x7f9   : > { %7318 = vst [vmem:[#allocation2 + $0x8] sm:$0xff] %v7206_v10  ;;  %v6628_v27 = vpop.f32.mrf.mxu2 }
 0x7fa   : > { %7542 = vst [vmem:[%s12223_s29 + $0x8] sm:$0xff] %v7206_v10 }
 0x7fb   : > { %7326 = vst [vmem:[#allocation2 + $0x48] sm:$0xff] %v7214_v17  ;;  %v6729_v51 = vpop.f32.mrf.mxu0 }
 0x7fc   : > { %7550 = vst [vmem:[%s12223_s29 + $0x48] sm:$0xff] %v7214_v17  ;;  %v6677_v9 = vpop.f32.mrf.mxu3  ;;  %v6778_v7 = vpop.f32.mrf.mxu1 }
 0x7fd   : > { %v6678_v2 = vadd.f32 %v6677_v9, %v6628_v27  ;;  %v6779_v13 = vadd.f32 %v6778_v7, %v6729_v51 }
 0x7fe   : > { %6826 = vmatmul.bf16.gmra.mxu2 %v11966_v41  ;;  %6924 = vmatmul.bf16.gmra.mxu0 %v11966_v41 }
 0x7ff   : > { %v7213_v12 = vadd.f32 %v6678_v2, %v5983_v19  ;;  %v7221_v53 = vadd.f32 %v6779_v13, %v5991_v63  ;;  %6973 = vmatmul.bf16.gmra.mxu1 %v11971_v4  ;;  %v6004_v19 = vld [vmem:[#allocation2 + $0xe8] sm:$0xff] }
 0x800   : > { %v6012_v63 = vld [vmem:[#allocation2 + $0x128] sm:$0xff] }
 0x801   : > { %7325 = vst [vmem:[#allocation2 + $0x40] sm:$0xff] %v7213_v12  ;;  %6875 = vmatmul.bf16.gmra.mxu3 %v11971_v4  ;;  %v6631_v15 = vpop.f32.mrf.mxu2 }
 0x802   : > { %7549 = vst [vmem:[%s12223_s29 + $0x40] sm:$0xff] %v7213_v12 }
 0x803   : > { %7333 = vst [vmem:[#allocation2 + $0x80] sm:$0xff] %v7221_v53  ;;  %v6731_v28 = vpop.f32.mrf.mxu0 }
 0x804   : > { %7557 = vst [vmem:[%s12223_s29 + $0x80] sm:$0xff] %v7221_v53  ;;  %v6680_v55 = vpop.f32.mrf.mxu3  ;;  %v6780_v38 = vpop.f32.mrf.mxu1 }
 0x805   : > { %v6681_v62 = vadd.f32 %v6680_v55, %v6631_v15  ;;  %v6781_v35 = vadd.f32 %v6780_v38, %v6731_v28 }
 0x807   : > { %v7220_v20 = vadd.f32 %v6681_v62, %v5990_v26  ;;  %v7228_v22 = vadd.f32 %v6781_v35, %v5998_v0  ;;  %v6011_v26 = vld [vmem:[#allocation2 + $0x120] sm:$0xff] }
 0x808   : > { %v6019_v0 = vld [vmem:[#allocation2 + $0x160] sm:$0xff] }
 0x809   : > { %7332 = vst [vmem:[#allocation2 + $0x78] sm:$0xff] %v7220_v20  ;;  %v6633_v3 = vpop.f32.mrf.mxu2 }
 0x80a   : > { %7556 = vst [vmem:[%s12223_s29 + $0x78] sm:$0xff] %v7220_v20 }
 0x80b   : > { %7340 = vst [vmem:[#allocation2 + $0xb8] sm:$0xff] %v7228_v22  ;;  %v6734_v39 = vpop.f32.mrf.mxu0 }
 0x80c   : > { %7564 = vst [vmem:[%s12223_s29 + $0xb8] sm:$0xff] %v7228_v22  ;;  %v6682_v11 = vpop.f32.mrf.mxu3  ;;  %v6783_v43 = vpop.f32.mrf.mxu1 }
 0x80d   : > { %v6683_v40 = vadd.f32 %v6682_v11, %v6633_v3  ;;  %v6784_v48 = vadd.f32 %v6783_v43, %v6734_v39 }
 0x80e   : > { %6831 = vmatmul.bf16.gmra.mxu2 %v12002_v33  ;;  %6929 = vmatmul.bf16.gmra.mxu0 %v12002_v33 }
 0x80f   : > { %v7227_v10 = vadd.f32 %v6683_v40, %v5997_v45  ;;  %v7235_v17 = vadd.f32 %v6784_v48, %v6005_v14  ;;  %6978 = vmatmul.bf16.gmra.mxu1 %v12007_v52  ;;  %v6018_v45 = vld [vmem:[#allocation2 + $0x158] sm:$0xff] }
 0x810   : > { %v6026_v14 = vld [vmem:[#allocation2 + $0x198] sm:$0xff] }
 0x811   : > { %7339 = vst [vmem:[#allocation2 + $0xb0] sm:$0xff] %v7227_v10  ;;  %6880 = vmatmul.bf16.gmra.mxu3 %v12007_v52  ;;  %v6636_v27 = vpop.f32.mrf.mxu2 }
 0x812   : > { %7563 = vst [vmem:[%s12223_s29 + $0xb0] sm:$0xff] %v7227_v10 }
 0x813   : > { %7347 = vst [vmem:[#allocation2 + $0xf0] sm:$0xff] %v7235_v17  ;;  %v6736_v51 = vpop.f32.mrf.mxu0 }
 0x814   : > { %7571 = vst [vmem:[%s12223_s29 + $0xf0] sm:$0xff] %v7235_v17  ;;  %v6685_v9 = vpop.f32.mrf.mxu3  ;;  %v6785_v7 = vpop.f32.mrf.mxu1 }
 0x815   : > { %v6686_v2 = vadd.f32 %v6685_v9, %v6636_v27  ;;  %v6786_v13 = vadd.f32 %v6785_v7, %v6736_v51 }
 0x817   : > { %v7234_v12 = vadd.f32 %v6686_v2, %v6004_v19  ;;  %v7242_v53 = vadd.f32 %v6786_v13, %v6012_v63  ;;  %v6025_v19 = vld [vmem:[#allocation2 + $0x190] sm:$0xff] }
 0x818   : > { %v6033_v63 = vld [vmem:[#allocation2 + $0x1d0] sm:$0xff] }
 0x819   : > { %7346 = vst [vmem:[#allocation2 + $0xe8] sm:$0xff] %v7234_v12  ;;  %v6638_v15 = vpop.f32.mrf.mxu2 }
 0x81a   : > { %7570 = vst [vmem:[%s12223_s29 + $0xe8] sm:$0xff] %v7234_v12 }
 0x81b   : > { %7354 = vst [vmem:[#allocation2 + $0x128] sm:$0xff] %v7242_v53  ;;  %v6739_v28 = vpop.f32.mrf.mxu0 }
 0x81c   : > { %7578 = vst [vmem:[%s12223_s29 + $0x128] sm:$0xff] %v7242_v53  ;;  %v6687_v55 = vpop.f32.mrf.mxu3  ;;  %v6788_v38 = vpop.f32.mrf.mxu1 }
 0x81d   : > { %v6688_v62 = vadd.f32 %v6687_v55, %v6638_v15  ;;  %v6789_v35 = vadd.f32 %v6788_v38, %v6739_v28 }
 0x81e   : > { %6836 = vmatmul.bf16.gmra.mxu2 %v12038_v32  ;;  %6934 = vmatmul.bf16.gmra.mxu0 %v12038_v32 }
 0x81f   : > { %v7241_v20 = vadd.f32 %v6688_v62, %v6011_v26  ;;  %v7249_v22 = vadd.f32 %v6789_v35, %v6019_v0  ;;  %6983 = vmatmul.bf16.gmra.mxu1 %v12043_v21  ;;  %v6032_v26 = vld [vmem:[#allocation2 + $0x1c8] sm:$0xff] }
 0x820   : > { %v6040_v0 = vld [vmem:[#allocation2 + $0x208] sm:$0xff] }
 0x821   : > { %7353 = vst [vmem:[#allocation2 + $0x120] sm:$0xff] %v7241_v20  ;;  %6885 = vmatmul.bf16.gmra.mxu3 %v12043_v21  ;;  %v6641_v3 = vpop.f32.mrf.mxu2 }
 0x822   : > { %7577 = vst [vmem:[%s12223_s29 + $0x120] sm:$0xff] %v7241_v20 }
 0x823   : > { %7361 = vst [vmem:[#allocation2 + $0x160] sm:$0xff] %v7249_v22  ;;  %v6741_v39 = vpop.f32.mrf.mxu0 }
 0x824   : > { %7585 = vst [vmem:[%s12223_s29 + $0x160] sm:$0xff] %v7249_v22  ;;  %v6690_v11 = vpop.f32.mrf.mxu3  ;;  %v6790_v43 = vpop.f32.mrf.mxu1 }
 0x825   : > { %v6691_v40 = vadd.f32 %v6690_v11, %v6641_v3  ;;  %v6791_v48 = vadd.f32 %v6790_v43, %v6741_v39 }
 0x827   : > { %v7248_v10 = vadd.f32 %v6691_v40, %v6018_v45  ;;  %v7256_v17 = vadd.f32 %v6791_v48, %v6026_v14  ;;  %v6039_v45 = vld [vmem:[#allocation2 + $0x200] sm:$0xff] }
 0x828   : > { %v6047_v14 = vld [vmem:[#allocation2 + $0x240] sm:$0xff] }
 0x829   : > { %7360 = vst [vmem:[#allocation2 + $0x158] sm:$0xff] %v7248_v10  ;;  %v6643_v27 = vpop.f32.mrf.mxu2 }
 0x82a   : > { %7584 = vst [vmem:[%s12223_s29 + $0x158] sm:$0xff] %v7248_v10 }
 0x82b   : > { %7368 = vst [vmem:[#allocation2 + $0x198] sm:$0xff] %v7256_v17  ;;  %v6744_v51 = vpop.f32.mrf.mxu0 }
 0x82c   : > { %7592 = vst [vmem:[%s12223_s29 + $0x198] sm:$0xff] %v7256_v17  ;;  %v6692_v9 = vpop.f32.mrf.mxu3  ;;  %v6793_v7 = vpop.f32.mrf.mxu1 }
 0x82d   : > { %v6693_v2 = vadd.f32 %v6692_v9, %v6643_v27  ;;  %v6794_v13 = vadd.f32 %v6793_v7, %v6744_v51 }
 0x82e   : > { %6841 = vmatmul.bf16.gmra.mxu2 %v12074_v47  ;;  %6939 = vmatmul.bf16.gmra.mxu0 %v12074_v47 }
 0x82f   : > { %v7255_v12 = vadd.f32 %v6693_v2, %v6025_v19  ;;  %v7263_v53 = vadd.f32 %v6794_v13, %v6033_v63  ;;  %6988 = vmatmul.bf16.gmra.mxu1 %v12079_v57  ;;  %v6046_v19 = vld [vmem:[#allocation2 + $0x238] sm:$0xff] }
 0x830   : > { %v6054_v63 = vld [vmem:[#allocation2 + $0x278] sm:$0xff] }
 0x831   : > { %7367 = vst [vmem:[#allocation2 + $0x190] sm:$0xff] %v7255_v12  ;;  %6890 = vmatmul.bf16.gmra.mxu3 %v12079_v57  ;;  %v6646_v15 = vpop.f32.mrf.mxu2 }
 0x832   : > { %7591 = vst [vmem:[%s12223_s29 + $0x190] sm:$0xff] %v7255_v12 }
 0x833   : > { %7375 = vst [vmem:[#allocation2 + $0x1d0] sm:$0xff] %v7263_v53  ;;  %v6746_v28 = vpop.f32.mrf.mxu0 }
 0x834   : > { %7599 = vst [vmem:[%s12223_s29 + $0x1d0] sm:$0xff] %v7263_v53  ;;  %v6695_v55 = vpop.f32.mrf.mxu3  ;;  %v6795_v38 = vpop.f32.mrf.mxu1 }
 0x835   : > { %v6696_v62 = vadd.f32 %v6695_v55, %v6646_v15  ;;  %v6796_v35 = vadd.f32 %v6795_v38, %v6746_v28 }
 0x837   : > { %v7262_v20 = vadd.f32 %v6696_v62, %v6032_v26  ;;  %v7270_v22 = vadd.f32 %v6796_v35, %v6040_v0  ;;  %v6053_v26 = vld [vmem:[#allocation2 + $0x270] sm:$0xff] }
 0x838   : > { %v6061_v0 = vld [vmem:[#allocation2 + $0x2b0] sm:$0xff] }
 0x839   : > { %7374 = vst [vmem:[#allocation2 + $0x1c8] sm:$0xff] %v7262_v20  ;;  %v6648_v3 = vpop.f32.mrf.mxu2 }
 0x83a   : > { %7598 = vst [vmem:[%s12223_s29 + $0x1c8] sm:$0xff] %v7262_v20 }
 0x83b   : > { %7382 = vst [vmem:[#allocation2 + $0x208] sm:$0xff] %v7270_v22  ;;  %v6749_v39 = vpop.f32.mrf.mxu0 }
 0x83c   : > { %7606 = vst [vmem:[%s12223_s29 + $0x208] sm:$0xff] %v7270_v22  ;;  %v6697_v11 = vpop.f32.mrf.mxu3  ;;  %v6798_v43 = vpop.f32.mrf.mxu1 }
 0x83d   : > { %v6698_v40 = vadd.f32 %v6697_v11, %v6648_v3  ;;  %v6799_v48 = vadd.f32 %v6798_v43, %v6749_v39 }
 0x83e   : > { %6846 = vmatmul.bf16.gmra.mxu2 %v12110_v8  ;;  %6944 = vmatmul.bf16.gmra.mxu0 %v12110_v8 }
 0x83f   : > { %v7269_v10 = vadd.f32 %v6698_v40, %v6039_v45  ;;  %v7277_v17 = vadd.f32 %v6799_v48, %v6047_v14  ;;  %6993 = vmatmul.bf16.gmra.mxu1 %v12115_v6  ;;  %v6067_v14 = vld [vmem:[#allocation2 + $0x2e0] sm:$0xff] }
 0x841   : > { %7381 = vst [vmem:[#allocation2 + $0x200] sm:$0xff] %v7269_v10  ;;  %6895 = vmatmul.bf16.gmra.mxu3 %v12115_v6  ;;  %v6651_v27 = vpop.f32.mrf.mxu2 }
 0x842   : > { %7605 = vst [vmem:[%s12223_s29 + $0x200] sm:$0xff] %v7269_v10 }
 0x843   : > { %7389 = vst [vmem:[#allocation2 + $0x240] sm:$0xff] %v7277_v17  ;;  %v6751_v51 = vpop.f32.mrf.mxu0 }
 0x844   : > { %7613 = vst [vmem:[%s12223_s29 + $0x240] sm:$0xff] %v7277_v17  ;;  %v6700_v9 = vpop.f32.mrf.mxu3  ;;  %v6800_v7 = vpop.f32.mrf.mxu1 }
 0x845   : > { %v6701_v2 = vadd.f32 %v6700_v9, %v6651_v27  ;;  %v6801_v13 = vadd.f32 %v6800_v7, %v6751_v51 }
 0x847   : > { %v7276_v12 = vadd.f32 %v6701_v2, %v6046_v19  ;;  %v7284_v53 = vadd.f32 %v6801_v13, %v6054_v63 }
 0x849   : > { %7388 = vst [vmem:[#allocation2 + $0x238] sm:$0xff] %v7276_v12  ;;  %v6653_v15 = vpop.f32.mrf.mxu2 }
 0x84a   : > { %7612 = vst [vmem:[%s12223_s29 + $0x238] sm:$0xff] %v7276_v12  ;;  %v6082_v12 = vld [vmem:[#allocation2 + $0x358] sm:$0xff] }
 0x84b   : > { %7396 = vst [vmem:[#allocation2 + $0x278] sm:$0xff] %v7284_v53  ;;  %v6754_v28 = vpop.f32.mrf.mxu0 }
 0x84c   : > { %7620 = vst [vmem:[%s12223_s29 + $0x278] sm:$0xff] %v7284_v53  ;;  %v6702_v55 = vpop.f32.mrf.mxu3  ;;  %v6803_v38 = vpop.f32.mrf.mxu1 }
 0x84d   : > { %v6703_v62 = vadd.f32 %v6702_v55, %v6653_v15  ;;  %v6804_v35 = vadd.f32 %v6803_v38, %v6754_v28  ;;  %v5979_v28 = vld [vmem:[#allocation2 + $0x20] sm:$0xff] }
 0x84e   : > { %6851 = vmatmul.bf16.gmra.mxu2 %v12146_v36  ;;  %6949 = vmatmul.bf16.gmra.mxu0 %v12146_v36 }
 0x84f   : > { %v7283_v20 = vadd.f32 %v6703_v62, %v6053_v26  ;;  %v7291_v22 = vadd.f32 %v6804_v35, %v6061_v0  ;;  %6998 = vmatmul.bf16.gmra.mxu1 %v12151_v61 }
 0x851   : > { %7395 = vst [vmem:[#allocation2 + $0x270] sm:$0xff] %v7283_v20  ;;  %6900 = vmatmul.bf16.gmra.mxu3 %v12151_v61  ;;  %v6656_v3 = vpop.f32.mrf.mxu2 }
 0x852   : > { %7619 = vst [vmem:[%s12223_s29 + $0x270] sm:$0xff] %v7283_v20  ;;  %v5978_v20 = vld [vmem:[#allocation2 + $0x18] sm:$0xff] }
 0x853   : > { %7403 = vst [vmem:[#allocation2 + $0x2b0] sm:$0xff] %v7291_v22  ;;  %v6756_v23 = vpop.f32.mrf.mxu0 }
 0x854   : > { %7627 = vst [vmem:[%s12223_s29 + $0x2b0] sm:$0xff] %v7291_v22  ;;  %v6705_v11 = vpop.f32.mrf.mxu3  ;;  %v6805_v40 = vpop.f32.mrf.mxu1 }
 0x855   : > { %v6706_v30 = vadd.f32 %v6705_v11, %v6656_v3  ;;  %v6806_v42 = vadd.f32 %v6805_v40, %v6756_v23 }
 0x857   : > { %v7290_v39 = vadd.f32 %v6706_v30, %v6060_v1  ;;  %v7298_v45 = vadd.f32 %v6806_v42, %v6068_v54  ;;  %v5985_v1 = vld [vmem:[#allocation2 + $0x50] sm:$0xff] }
 0x858   : > { %v5993_v54 = vld [vmem:[#allocation2 + $0x90] sm:$0xff] }
 0x859   : > { %7402 = vst [vmem:[#allocation2 + $0x2a8] sm:$0xff] %v7290_v39  ;;  %v6658_v43 = vpop.f32.mrf.mxu2 }
 0x85a   : > { %7626 = vst [vmem:[%s12223_s29 + $0x2a8] sm:$0xff] %v7290_v39 }
 0x85b   : > { %7410 = vst [vmem:[#allocation2 + $0x2e8] sm:$0xff] %v7298_v45  ;;  %v6759_v48 = vpop.f32.mrf.mxu0 }
 0x85c   : > { %7634 = vst [vmem:[%s12223_s29 + $0x2e8] sm:$0xff] %v7298_v45  ;;  %v6707_v46 = vpop.f32.mrf.mxu3  ;;  %v6808_v17 = vpop.f32.mrf.mxu1 }
 0x85d   : > { %v6708_v10 = vadd.f32 %v6707_v46, %v6658_v43  ;;  %v6809_v9 = vadd.f32 %v6808_v17, %v6759_v48 }
 0x85e   : > { %6856 = vmatmul.bf16.gmra.mxu2 %v12173_v25  ;;  %6954 = vmatmul.bf16.gmra.mxu0 %v12173_v25 }
 0x85f   : > { %v7297_v27 = vadd.f32 %v6708_v10, %v6067_v14  ;;  %v7305_v59 = vadd.f32 %v6809_v9, %v6075_v56  ;;  %7003 = vmatmul.bf16.gmra.mxu1 %v12184_v34  ;;  %v5992_v14 = vld [vmem:[#allocation2 + $0x88] sm:$0xff] }
 0x861   : > { %7409 = vst [vmem:[#allocation2 + $0x2e0] sm:$0xff] %v7297_v27  ;;  %6905 = vmatmul.bf16.gmra.mxu3 %v12184_v34  ;;  %v6661_v60 = vpop.f32.mrf.mxu2 }
 0x862   : > { %7633 = vst [vmem:[%s12223_s29 + $0x2e0] sm:$0xff] %v7297_v27 }
 0x863   : > { %7417 = vst [vmem:[#allocation2 + $0x320] sm:$0xff] %v7305_v59  ;;  %v6761_v16 = vpop.f32.mrf.mxu0 }
 0x864   : > { %7641 = vst [vmem:[%s12223_s29 + $0x320] sm:$0xff] %v7305_v59  ;;  %v6710_v2 = vpop.f32.mrf.mxu3  ;;  %v6810_v19 = vpop.f32.mrf.mxu1 }
 0x865   : > { %v6711_v51 = vadd.f32 %v6710_v2, %v6661_v60  ;;  %v6811_v49 = vadd.f32 %v6810_v19, %v6761_v16 }
 0x867   : > { %v7304_v7 = vadd.f32 %v6711_v51, %v6074_v37  ;;  %v7312_v13 = vadd.f32 %v6811_v49, %v6082_v12  ;;  %v5999_v51 = vld [vmem:[#allocation2 + $0xc0] sm:$0xff] }
 0x869   : > { %7416 = vst [vmem:[#allocation2 + $0x318] sm:$0xff] %v7304_v7  ;;  %v6663_v63 = vpop.f32.mrf.mxu2 }
 0x86a   : > { %7640 = vst [vmem:[%s12223_s29 + $0x318] sm:$0xff] %v7304_v7  ;;  %v6007_v7 = vld [vmem:[#allocation2 + $0x100] sm:$0xff] }
 0x86b   : > { %7424 = vst [vmem:[#allocation2 + $0x358] sm:$0xff] %v7312_v13  ;;  %v6920_v55 = vpop.f32.mrf.mxu0 }
 0x86c   : > { %7648 = vst [vmem:[%s12223_s29 + $0x358] sm:$0xff] %v7312_v13  ;;  %v6712_v53 = vpop.f32.mrf.mxu3  ;;  %v6969_v50 = vpop.f32.mrf.mxu1 }
 0x86d   : > { %v6713_v15 = vadd.f32 %v6712_v53, %v6663_v63  ;;  %v6970_v62 = vadd.f32 %v6969_v50, %v6920_v55 }
 0x86e   : > { %7017 = vmatmul.bf16.vlgmr.msrb.gmra.mxu2 %v11930_v44  ;;  %7115 = vmatmul.bf16.vlgmr.msrb.gmra.mxu0 %v11930_v44  ;;  %v5986_v44 = vld [vmem:[#allocation2 + $0x58] sm:$0xff] }
 0x86f   : > { %v7311_v29 = vadd.f32 %v6713_v15, %v6081_v18  ;;  %v7209_v5 = vadd.f32 %v6970_v62, %v5979_v28  ;;  %7164 = vmatmul.bf16.vlgmr.msrb.gmra.mxu1 %v11935_v58  ;;  %v6006_v15 = vld [vmem:[#allocation2 + $0xf8] sm:$0xff] }
 0x871   : > { %7423 = vst [vmem:[#allocation2 + $0x350] sm:$0xff] %v7311_v29  ;;  %7066 = vmatmul.bf16.vlgmr.msrb.gmra.mxu3 %v11935_v58  ;;  %v6822_v24 = vpop.f32.mrf.mxu2 }
 0x872   : > { %7647 = vst [vmem:[%s12223_s29 + $0x350] sm:$0xff] %v7311_v29 }
 0x873   : > { %7321 = vst [vmem:[#allocation2 + $0x20] sm:$0xff] %v7209_v5  ;;  %v6922_v31 = vpop.f32.mrf.mxu0 }
 0x874   : > { %7545 = vst [vmem:[%s12223_s29 + $0x20] sm:$0xff] %v7209_v5  ;;  %v6871_v26 = vpop.f32.mrf.mxu3  ;;  %v6971_v35 = vpop.f32.mrf.mxu1 }
 0x875   : > { %v6872_v38 = vadd.f32 %v6871_v26, %v6822_v24  ;;  %v6972_v22 = vadd.f32 %v6971_v35, %v6922_v31  ;;  %v6013_v24 = vld [vmem:[#allocation2 + $0x130] sm:$0xff] }
 0x877   : > { %v7208_v0 = vadd.f32 %v6872_v38, %v5978_v20  ;;  %v7216_v3 = vadd.f32 %v6972_v22, %v5986_v44  ;;  %v6021_v20 = vld [vmem:[#allocation2 + $0x170] sm:$0xff] }
 0x879   : > { %7320 = vst [vmem:[#allocation2 + $0x18] sm:$0xff] %v7208_v0  ;;  %v6824_v11 = vpop.f32.mrf.mxu2 }
 0x87a   : > { %7544 = vst [vmem:[%s12223_s29 + $0x18] sm:$0xff] %v7208_v0 }
 0x87b   : > { %7328 = vst [vmem:[#allocation2 + $0x58] sm:$0xff] %v7216_v3  ;;  %v6925_v23 = vpop.f32.mrf.mxu0 }
 0x87c   : > { %7552 = vst [vmem:[%s12223_s29 + $0x58] sm:$0xff] %v7216_v3  ;;  %v6873_v58 = vpop.f32.mrf.mxu3  ;;  %v6974_v40 = vpop.f32.mrf.mxu1 }
 0x87d   : > { %v6874_v30 = vadd.f32 %v6873_v58, %v6824_v11  ;;  %v6975_v42 = vadd.f32 %v6974_v40, %v6925_v23  ;;  %v6020_v11 = vld [vmem:[#allocation2 + $0x168] sm:$0xff] }
 0x87e   : > { %7022 = vmatmul.bf16.gmra.mxu2 %v11966_v41  ;;  %7120 = vmatmul.bf16.gmra.mxu0 %v11966_v41  ;;  %v6000_v41 = vld [vmem:[#allocation2 + $0xc8] sm:$0xff] }
 0x87f   : > { %v7215_v39 = vadd.f32 %v6874_v30, %v5985_v1  ;;  %v7223_v45 = vadd.f32 %v6975_v42, %v5993_v54  ;;  %7169 = vmatmul.bf16.gmra.mxu1 %v11971_v4  ;;  %v6027_v54 = vld [vmem:[#allocation2 + $0x1a0] sm:$0xff] }
 0x881   : > { %7327 = vst [vmem:[#allocation2 + $0x50] sm:$0xff] %v7215_v39  ;;  %7071 = vmatmul.bf16.gmra.mxu3 %v11971_v4  ;;  %v6827_v43 = vpop.f32.mrf.mxu2 }
 0x882   : > { %7551 = vst [vmem:[%s12223_s29 + $0x50] sm:$0xff] %v7215_v39 }
 0x883   : > { %7335 = vst [vmem:[#allocation2 + $0x90] sm:$0xff] %v7223_v45  ;;  %v6927_v48 = vpop.f32.mrf.mxu0 }
 0x884   : > { %7559 = vst [vmem:[%s12223_s29 + $0x90] sm:$0xff] %v7223_v45  ;;  %v6876_v46 = vpop.f32.mrf.mxu3  ;;  %v6976_v17 = vpop.f32.mrf.mxu1 }
 0x885   : > { %v6877_v10 = vadd.f32 %v6876_v46, %v6827_v43  ;;  %v6977_v9 = vadd.f32 %v6976_v17, %v6927_v48 }
 0x887   : > { %v7222_v27 = vadd.f32 %v6877_v10, %v5992_v14  ;;  %v7230_v56 = vadd.f32 %v6977_v9, %v6000_v41  ;;  %v6035_v10 = vld [vmem:[#allocation2 + $0x1e0] sm:$0xff]  ;;  %v6034_v41 = vld [vmem:[#allocation2 + $0x1d8] sm:$0xff] }
 0x889   : > { %7334 = vst [vmem:[#allocation2 + $0x88] sm:$0xff] %v7222_v27  ;;  %v6829_v59 = vpop.f32.mrf.mxu2 }
 0x88a   : > { %7558 = vst [vmem:[%s12223_s29 + $0x88] sm:$0xff] %v7222_v27 }
 0x88b   : > { %7342 = vst [vmem:[#allocation2 + $0xc8] sm:$0xff] %v7230_v56  ;;  %v6930_v2 = vpop.f32.mrf.mxu0 }
 0x88c   : > { %7566 = vst [vmem:[%s12223_s29 + $0xc8] sm:$0xff] %v7230_v56  ;;  %v6878_v4 = vpop.f32.mrf.mxu3  ;;  %v6979_v16 = vpop.f32.mrf.mxu1 }
 0x88d   : > { %v6879_v60 = vadd.f32 %v6878_v4, %v6829_v59  ;;  %v6980_v19 = vadd.f32 %v6979_v16, %v6930_v2 }
 0x88e   : > { %7027 = vmatmul.bf16.gmra.mxu2 %v12002_v33  ;;  %7125 = vmatmul.bf16.gmra.mxu0 %v12002_v33  ;;  %v6014_v33 = vld [vmem:[#allocation2 + $0x138] sm:$0xff] }
 0x88f   : > { %v7229_v37 = vadd.f32 %v6879_v60, %v5999_v51  ;;  %v7237_v49 = vadd.f32 %v6980_v19, %v6007_v7  ;;  %7174 = vmatmul.bf16.gmra.mxu1 %v12007_v52 }
 0x891   : > { %7341 = vst [vmem:[#allocation2 + $0xc0] sm:$0xff] %v7229_v37  ;;  %7076 = vmatmul.bf16.gmra.mxu3 %v12007_v52  ;;  %v6832_v12 = vpop.f32.mrf.mxu2 }
 0x892   : > { %7565 = vst [vmem:[%s12223_s29 + $0xc0] sm:$0xff] %v7229_v37  ;;  %v6041_v37 = vld [vmem:[#allocation2 + $0x210] sm:$0xff] }
 0x893   : > { %7349 = vst [vmem:[#allocation2 + $0x100] sm:$0xff] %v7237_v49  ;;  %v6932_v53 = vpop.f32.mrf.mxu0 }
 0x894   : > { %7573 = vst [vmem:[%s12223_s29 + $0x100] sm:$0xff] %v7237_v49  ;;  %v6881_v13 = vpop.f32.mrf.mxu3  ;;  %v6981_v55 = vpop.f32.mrf.mxu1 }
 0x895   : > { %v6882_v63 = vadd.f32 %v6881_v13, %v6832_v12  ;;  %v6982_v50 = vadd.f32 %v6981_v55, %v6932_v53  ;;  %v6049_v12 = vld [vmem:[#allocation2 + $0x250] sm:$0xff] }
 0x897   : > { %v7236_v18 = vadd.f32 %v6882_v63, %v6006_v15  ;;  %v7244_v29 = vadd.f32 %v6982_v50, %v6014_v33 }
 0x899   : > { %7348 = vst [vmem:[#allocation2 + $0xf8] sm:$0xff] %v7236_v18  ;;  %v6834_v62 = vpop.f32.mrf.mxu2 }
 0x89a   : > { %7572 = vst [vmem:[%s12223_s29 + $0xf8] sm:$0xff] %v7236_v18  ;;  %v6048_v18 = vld [vmem:[#allocation2 + $0x248] sm:$0xff] }
 0x89b   : > { %7356 = vst [vmem:[#allocation2 + $0x138] sm:$0xff] %v7244_v29  ;;  %v6935_v5 = vpop.f32.mrf.mxu0 }
 0x89c   : > { %7580 = vst [vmem:[%s12223_s29 + $0x138] sm:$0xff] %v7244_v29  ;;  %v6883_v52 = vpop.f32.mrf.mxu3  ;;  %v6984_v26 = vpop.f32.mrf.mxu1 }
 0x89d   : > { %v6884_v28 = vadd.f32 %v6883_v52, %v6834_v62  ;;  %v6985_v31 = vadd.f32 %v6984_v26, %v6935_v5 }
 0x89e   : > { %7032 = vmatmul.bf16.gmra.mxu2 %v12038_v32  ;;  %7130 = vmatmul.bf16.gmra.mxu0 %v12038_v32  ;;  %v6028_v32 = vld [vmem:[#allocation2 + $0x1a8] sm:$0xff] }
 0x89f   : > { %v7243_v38 = vadd.f32 %v6884_v28, %v6013_v24  ;;  %v7251_v35 = vadd.f32 %v6985_v31, %v6021_v20  ;;  %7179 = vmatmul.bf16.gmra.mxu1 %v12043_v21  ;;  %v6055_v24 = vld [vmem:[#allocation2 + $0x280] sm:$0xff] }
 0x8a0   : > { %v6063_v20 = vld [vmem:[#allocation2 + $0x2c0] sm:$0xff] }
 0x8a1   : > { %7355 = vst [vmem:[#allocation2 + $0x130] sm:$0xff] %v7243_v38  ;;  %7081 = vmatmul.bf16.gmra.mxu3 %v12043_v21  ;;  %v6837_v0 = vpop.f32.mrf.mxu2 }
 0x8a2   : > { %7579 = vst [vmem:[%s12223_s29 + $0x130] sm:$0xff] %v7243_v38 }
 0x8a3   : > { %7363 = vst [vmem:[#allocation2 + $0x170] sm:$0xff] %v7251_v35  ;;  %v6937_v3 = vpop.f32.mrf.mxu0 }
 0x8a4   : > { %7587 = vst [vmem:[%s12223_s29 + $0x170] sm:$0xff] %v7251_v35  ;;  %v6886_v22 = vpop.f32.mrf.mxu3  ;;  %v6986_v58 = vpop.f32.mrf.mxu1 }
 0x8a5   : > { %v6887_v44 = vadd.f32 %v6886_v22, %v6837_v0  ;;  %v6987_v23 = vadd.f32 %v6986_v58, %v6937_v3 }
 0x8a7   : > { %v7250_v30 = vadd.f32 %v6887_v44, %v6020_v11  ;;  %v7258_v1 = vadd.f32 %v6987_v23, %v6028_v32  ;;  %v6062_v11 = vld [vmem:[#allocation2 + $0x2b8] sm:$0xff] }
 0x8a9   : > { %7362 = vst [vmem:[#allocation2 + $0x168] sm:$0xff] %v7250_v30  ;;  %v6839_v40 = vpop.f32.mrf.mxu2 }
 0x8aa   : > { %7586 = vst [vmem:[%s12223_s29 + $0x168] sm:$0xff] %v7250_v30 }
 0x8ab   : > { %7370 = vst [vmem:[#allocation2 + $0x1a8] sm:$0xff] %v7258_v1  ;;  %v6940_v42 = vpop.f32.mrf.mxu0 }
 0x8ac   : > { %7594 = vst [vmem:[%s12223_s29 + $0x1a8] sm:$0xff] %v7258_v1  ;;  %v6888_v21 = vpop.f32.mrf.mxu3  ;;  %v6989_v45 = vpop.f32.mrf.mxu1 }
 0x8ad   : > { %v6889_v39 = vadd.f32 %v6888_v21, %v6839_v40  ;;  %v6990_v46 = vadd.f32 %v6989_v45, %v6940_v42 }
 0x8ae   : > { %7037 = vmatmul.bf16.gmra.mxu2 %v12074_v47  ;;  %7135 = vmatmul.bf16.gmra.mxu0 %v12074_v47  ;;  %v6042_v47 = vld [vmem:[#allocation2 + $0x218] sm:$0xff] }
 0x8af   : > { %v7257_v43 = vadd.f32 %v6889_v39, %v6027_v54  ;;  %v7265_v48 = vadd.f32 %v6990_v46, %v6035_v10  ;;  %7184 = vmatmul.bf16.gmra.mxu1 %v12079_v57  ;;  %v6069_v39 = vld [vmem:[#allocation2 + $0x2f0] sm:$0xff] }
 0x8b1   : > { %7369 = vst [vmem:[#allocation2 + $0x1a0] sm:$0xff] %v7257_v43  ;;  %7086 = vmatmul.bf16.gmra.mxu3 %v12079_v57  ;;  %v6842_v14 = vpop.f32.mrf.mxu2 }
 0x8b2   : > { %7593 = vst [vmem:[%s12223_s29 + $0x1a0] sm:$0xff] %v7257_v43  ;;  %v6077_v43 = vld [vmem:[#allocation2 + $0x330] sm:$0xff] }
 0x8b3   : > { %7377 = vst [vmem:[#allocation2 + $0x1e0] sm:$0xff] %v7265_v48  ;;  %v6942_v9 = vpop.f32.mrf.mxu0 }
 0x8b4   : > { %7601 = vst [vmem:[%s12223_s29 + $0x1e0] sm:$0xff] %v7265_v48  ;;  %v6891_v17 = vpop.f32.mrf.mxu3  ;;  %v6991_v56 = vpop.f32.mrf.mxu1 }
 0x8b5   : > { %v6892_v27 = vadd.f32 %v6891_v17, %v6842_v14  ;;  %v6992_v4 = vadd.f32 %v6991_v56, %v6942_v9 }
 0x8b7   : > { %v7264_v59 = vadd.f32 %v6892_v27, %v6034_v41  ;;  %v7272_v60 = vadd.f32 %v6992_v4, %v6042_v47  ;;  %v6076_v27 = vld [vmem:[#allocation2 + $0x328] sm:$0xff] }
 0x8b9   : > { %7376 = vst [vmem:[#allocation2 + $0x1d8] sm:$0xff] %v7264_v59  ;;  %v6844_v2 = vpop.f32.mrf.mxu2 }
 0x8ba   : > { %7600 = vst [vmem:[%s12223_s29 + $0x1d8] sm:$0xff] %v7264_v59 }
 0x8bb   : > { %7384 = vst [vmem:[#allocation2 + $0x218] sm:$0xff] %v7272_v60  ;;  %v6945_v16 = vpop.f32.mrf.mxu0 }
 0x8bc   : > { %7608 = vst [vmem:[%s12223_s29 + $0x218] sm:$0xff] %v7272_v60  ;;  %v6893_v57 = vpop.f32.mrf.mxu3  ;;  %v6994_v19 = vpop.f32.mrf.mxu1 }
 0x8bd   : > { %v6894_v51 = vadd.f32 %v6893_v57, %v6844_v2  ;;  %v6995_v49 = vadd.f32 %v6994_v19, %v6945_v16  ;;  %v6083_v2 = vld [vmem:[#allocation2 + $0x360] sm:$0xff] }
 0x8be   : > { %7042 = vmatmul.bf16.gmra.mxu2 %v12110_v8  ;;  %7140 = vmatmul.bf16.gmra.mxu0 %v12110_v8  ;;  %v6056_v8 = vld [vmem:[#allocation2 + $0x288] sm:$0xff] }
 0x8bf   : > { %v7271_v7 = vadd.f32 %v6894_v51, %v6041_v37  ;;  %v7279_v13 = vadd.f32 %v6995_v49, %v6049_v12  ;;  %7189 = vmatmul.bf16.gmra.mxu1 %v12115_v6  ;;  %v5981_v37 = vld [vmem:[#allocation2 + $0x30] sm:$0xff] }
 0x8c1   : > { %7383 = vst [vmem:[#allocation2 + $0x210] sm:$0xff] %v7271_v7  ;;  %7091 = vmatmul.bf16.gmra.mxu3 %v12115_v6  ;;  %v6847_v63 = vpop.f32.mrf.mxu2 }
 0x8c2   : > { %7607 = vst [vmem:[%s12223_s29 + $0x210] sm:$0xff] %v7271_v7 }
 0x8c3   : > { %7391 = vst [vmem:[#allocation2 + $0x250] sm:$0xff] %v7279_v13  ;;  %v6947_v55 = vpop.f32.mrf.mxu0 }
 0x8c4   : > { %7615 = vst [vmem:[%s12223_s29 + $0x250] sm:$0xff] %v7279_v13  ;;  %v6896_v53 = vpop.f32.mrf.mxu3  ;;  %v6996_v50 = vpop.f32.mrf.mxu1 }
 0x8c5   : > { %v6897_v15 = vadd.f32 %v6896_v53, %v6847_v63  ;;  %v6997_v29 = vadd.f32 %v6996_v50, %v6947_v55  ;;  %v5980_v63 = vld [vmem:[#allocation2 + $0x28] sm:$0xff] }
 0x8c7   : > { %v7278_v33 = vadd.f32 %v6897_v15, %v6048_v18  ;;  %v7286_v62 = vadd.f32 %v6997_v29, %v6056_v8  ;;  %v5988_v18 = vld [vmem:[#allocation2 + $0x68] sm:$0xff] }
 0x8c9   : > { %7390 = vst [vmem:[#allocation2 + $0x248] sm:$0xff] %v7278_v33  ;;  %v6849_v52 = vpop.f32.mrf.mxu2 }
 0x8ca   : > { %7614 = vst [vmem:[%s12223_s29 + $0x248] sm:$0xff] %v7278_v33 }
 0x8cb   : > { %7398 = vst [vmem:[#allocation2 + $0x288] sm:$0xff] %v7286_v62  ;;  %v6950_v5 = vpop.f32.mrf.mxu0 }
 0x8cc   : > { %7622 = vst [vmem:[%s12223_s29 + $0x288] sm:$0xff] %v7286_v62  ;;  %v6898_v6 = vpop.f32.mrf.mxu3  ;;  %v6999_v26 = vpop.f32.mrf.mxu1 }
 0x8cd   : > { %v6899_v28 = vadd.f32 %v6898_v6, %v6849_v52  ;;  %v7000_v31 = vadd.f32 %v6999_v26, %v6950_v5  ;;  %v5987_v6 = vld [vmem:[#allocation2 + $0x60] sm:$0xff] }
 0x8ce   : > { %7047 = vmatmul.bf16.gmra.mxu2 %v12146_v36  ;;  %7145 = vmatmul.bf16.gmra.mxu0 %v12146_v36  ;;  %v6070_v36 = vld [vmem:[#allocation2 + $0x2f8] sm:$0xff]  ;;  %v5995_v26 = vld [vmem:[#allocation2 + $0xa0] sm:$0xff] }
 0x8cf   : > { %v7285_v38 = vadd.f32 %v6899_v28, %v6055_v24  ;;  %v7293_v35 = vadd.f32 %v7000_v31, %v6063_v20  ;;  %7194 = vmatmul.bf16.gmra.mxu1 %v12151_v61 }
 0x8d1   : > { %7397 = vst [vmem:[#allocation2 + $0x280] sm:$0xff] %v7285_v38  ;;  %7096 = vmatmul.bf16.gmra.mxu3 %v12151_v61  ;;  %v6852_v0 = vpop.f32.mrf.mxu2 }
 0x8d2   : > { %7621 = vst [vmem:[%s12223_s29 + $0x280] sm:$0xff] %v7285_v38 }
 0x8d3   : > { %7405 = vst [vmem:[#allocation2 + $0x2c0] sm:$0xff] %v7293_v35  ;;  %v6952_v3 = vpop.f32.mrf.mxu0 }
 0x8d4   : > { %7629 = vst [vmem:[%s12223_s29 + $0x2c0] sm:$0xff] %v7293_v35  ;;  %v6901_v22 = vpop.f32.mrf.mxu3  ;;  %v7001_v58 = vpop.f32.mrf.mxu1 }
 0x8d5   : > { %v6902_v44 = vadd.f32 %v6901_v22, %v6852_v0  ;;  %v7002_v23 = vadd.f32 %v7001_v58, %v6952_v3 }
 0x8d7   : > { %v7292_v30 = vadd.f32 %v6902_v44, %v6062_v11  ;;  %v7300_v32 = vadd.f32 %v7002_v23, %v6070_v36  ;;  %v5994_v44 = vld [vmem:[#allocation2 + $0x98] sm:$0xff] }
 0x8d9   : > { %7404 = vst [vmem:[#allocation2 + $0x2b8] sm:$0xff] %v7292_v30  ;;  %v6854_v1 = vpop.f32.mrf.mxu2 }
 0x8da   : > { %7628 = vst [vmem:[%s12223_s29 + $0x2b8] sm:$0xff] %v7292_v30  ;;  %v6002_v30 = vld [vmem:[#allocation2 + $0xd8] sm:$0xff] }
 0x8db   : > { %7412 = vst [vmem:[#allocation2 + $0x2f8] sm:$0xff] %v7300_v32  ;;  %v6955_v21 = vpop.f32.mrf.mxu0 }
 0x8dc   : > { %7636 = vst [vmem:[%s12223_s29 + $0x2f8] sm:$0xff] %v7300_v32  ;;  %v6903_v61 = vpop.f32.mrf.mxu3  ;;  %v7004_v42 = vpop.f32.mrf.mxu1 }
 0x8dd   : > { %v6904_v40 = vadd.f32 %v6903_v61, %v6854_v1  ;;  %v7005_v45 = vadd.f32 %v7004_v42, %v6955_v21  ;;  %v6001_v21 = vld [vmem:[#allocation2 + $0xd0] sm:$0xff] }
 0x8de   : > { %7052 = vmatmul.bf16.gmra.mxu2 %v12173_v25  ;;  %7150 = vmatmul.bf16.gmra.mxu0 %v12173_v25  ;;  %v6084_v25 = vld [vmem:[#allocation2 + $0x368] sm:$0xff] }
 0x8df   : > { %v7299_v54 = vadd.f32 %v6904_v40, %v6069_v39  ;;  %v7307_v46 = vadd.f32 %v7005_v45, %v6077_v43  ;;  %7199 = vmatmul.bf16.gmra.mxu1 %v12184_v34  ;;  %v6009_v45 = vld [vmem:[#allocation2 + $0x110] sm:$0xff] }
 0x8e1   : > { %7411 = vst [vmem:[#allocation2 + $0x2f0] sm:$0xff] %v7299_v54  ;;  %7101 = vmatmul.bf16.gmra.mxu3 %v12184_v34  ;;  %v6857_v10 = vpop.f32.mrf.mxu2 }
 0x8e2   : > { %7635 = vst [vmem:[%s12223_s29 + $0x2f0] sm:$0xff] %v7299_v54 }
 0x8e3   : > { %7419 = vst [vmem:[#allocation2 + $0x330] sm:$0xff] %v7307_v46  ;;  %v6957_v17 = vpop.f32.mrf.mxu0 }
 0x8e4   : > { %7643 = vst [vmem:[%s12223_s29 + $0x330] sm:$0xff] %v7307_v46  ;;  %v6906_v48 = vpop.f32.mrf.mxu3  ;;  %v7006_v9 = vpop.f32.mrf.mxu1 }
 0x8e5   : > { %v6907_v14 = vadd.f32 %v6906_v48, %v6857_v10  ;;  %v7007_v56 = vadd.f32 %v7006_v9, %v6957_v17 }
 0x8e7   : > { %v7306_v41 = vadd.f32 %v6907_v14, %v6076_v27  ;;  %v7314_v59 = vadd.f32 %v7007_v56, %v6084_v25  ;;  %v6008_v27 = vld [vmem:[#allocation2 + $0x108] sm:$0xff] }
 0x8e8   : > { %v6016_v25 = vld [vmem:[#allocation2 + $0x148] sm:$0xff] }
 0x8e9   : > { %7418 = vst [vmem:[#allocation2 + $0x328] sm:$0xff] %v7306_v41  ;;  %v6859_v4 = vpop.f32.mrf.mxu2 }
 0x8ea   : > { %7642 = vst [vmem:[%s12223_s29 + $0x328] sm:$0xff] %v7306_v41 }
 0x8eb   : > { %7426 = vst [vmem:[#allocation2 + $0x368] sm:$0xff] %v7314_v59  ;;  %v7116_v60 = vpop.f32.mrf.mxu0 }
 0x8ec   : > { %7650 = vst [vmem:[%s12223_s29 + $0x368] sm:$0xff] %v7314_v59  ;;  %v6908_v34 = vpop.f32.mrf.mxu3  ;;  %v7165_v57 = vpop.f32.mrf.mxu1 }
 0x8ed   : > { %v6909_v47 = vadd.f32 %v6908_v34, %v6859_v4  ;;  %v7166_v16 = vadd.f32 %v7165_v57, %v7116_v60  ;;  %v6015_v57 = vld [vmem:[#allocation2 + $0x140] sm:$0xff] }
 0x8ef   : > { %v7313_v51 = vadd.f32 %v6909_v47, %v6083_v2  ;;  %v7211_v19 = vadd.f32 %v7166_v16, %v5981_v37 }
 0x8f1   : > { %7425 = vst [vmem:[#allocation2 + $0x360] sm:$0xff] %v7313_v51  ;;  %v7018_v7 = vpop.f32.mrf.mxu2 }
 0x8f2   : > { %7649 = vst [vmem:[%s12223_s29 + $0x360] sm:$0xff] %v7313_v51 }
 0x8f3   : > { %7323 = vst.msk [vmem:[#allocation2 + $0x30] sm:$0xff] %vm1506_vm0, %v7211_v19  ;;  %v7118_v13 = vpop.f32.mrf.mxu0  ;;  %v6023_v19 = vld [vmem:[#allocation2 + $0x180] sm:$0xff] }
 0x8f4   : > { %v7067_v49 = vpop.f32.mrf.mxu3  ;;  %v7167_v53 = vpop.f32.mrf.mxu1 }
 0x8f5   : > { %v7068_v12 = vadd.f32 %v7067_v49, %v7018_v7  ;;  %v7168_v55 = vadd.f32 %v7167_v53, %v7118_v13 }
 0x8f7   : > { %v7210_v15 = vadd.f32 %v7068_v12, %v5980_v63  ;;  %v7218_v50 = vadd.f32 %v7168_v55, %v5988_v18 }
 0x8f9   : > { %7322 = vst [vmem:[#allocation2 + $0x28] sm:$0xff] %v7210_v15  ;;  %v7020_v29 = vpop.f32.mrf.mxu2 }
 0x8fa   : > { %v7435_v33 = vld [vmem:[#allocation2 + $0x30] sm:$0xff]  ;;  %7546 = vst [vmem:[%s12223_s29 + $0x28] sm:$0xff] %v7210_v15  ;;  %v6022_v15 = vld [vmem:[#allocation2 + $0x178] sm:$0xff] }
 0x8fb   : > { %7547 = vst.msk [vmem:[%s12223_s29 + $0x30] sm:$0xff] %vm1506_vm0, %v7435_v33  ;;  %v7121_v52 = vpop.f32.mrf.mxu0  ;;  %v6030_v33 = vld [vmem:[#allocation2 + $0x1b8] sm:$0xff] }
 0x8fc   : > { %7330 = vst.msk [vmem:[#allocation2 + $0x68] sm:$0xff] %vm1506_vm0, %v7218_v50  ;;  %v7069_v8 = vpop.f32.mrf.mxu3  ;;  %v7170_v28 = vpop.f32.mrf.mxu1 }
 0x8fd   : > { %v7070_v62 = vadd.f32 %v7069_v8, %v7020_v29  ;;  %v7171_v24 = vadd.f32 %v7170_v28, %v7121_v52 }
 0x8ff   : > { %v7217_v5 = vadd.f32 %v7070_v62, %v5987_v6  ;;  %v7225_v38 = vadd.f32 %v7171_v24, %v5995_v26 }
 0x901   : > { %7329 = vst [vmem:[#allocation2 + $0x60] sm:$0xff] %v7217_v5  ;;  %v7023_v20 = vpop.f32.mrf.mxu2 }
 0x902   : > { %7553 = vst [vmem:[%s12223_s29 + $0x60] sm:$0xff] %v7217_v5  ;;  %v6029_v5 = vld [vmem:[#allocation2 + $0x1b0] sm:$0xff] }
 0x903   : > { %v7442_v31 = vld [vmem:[#allocation2 + $0x68] sm:$0xff]  ;;  %7337 = vst.msk [vmem:[#allocation2 + $0xa0] sm:$0xff] %vm1506_vm0, %v7225_v38  ;;  %v7123_v22 = vpop.f32.mrf.mxu0 }
 0x904   : > { %7554 = vst.msk [vmem:[%s12223_s29 + $0x68] sm:$0xff] %vm1506_vm0, %v7442_v31  ;;  %v7072_v35 = vpop.f32.mrf.mxu3  ;;  %v7172_v3 = vpop.f32.mrf.mxu1  ;;  %v6037_v31 = vld [vmem:[#allocation2 + $0x1f0] sm:$0xff] }
 0x905   : > { %v7073_v0 = vadd.f32 %v7072_v35, %v7023_v20  ;;  %v7173_v58 = vadd.f32 %v7172_v3, %v7123_v22 }
 0x907   : > { %v7224_v11 = vadd.f32 %v7073_v0, %v5994_v44  ;;  %v7232_v23 = vadd.f32 %v7173_v58, %v6002_v30 }
 0x909   : > { %7336 = vst [vmem:[#allocation2 + $0x98] sm:$0xff] %v7224_v11  ;;  %v7025_v32 = vpop.f32.mrf.mxu2 }
 0x90a   : > { %v7449_v36 = vld [vmem:[#allocation2 + $0xa0] sm:$0xff]  ;;  %7560 = vst [vmem:[%s12223_s29 + $0x98] sm:$0xff] %v7224_v11  ;;  %v6036_v11 = vld [vmem:[#allocation2 + $0x1e8] sm:$0xff] }
 0x90b   : > { %7561 = vst.msk [vmem:[%s12223_s29 + $0xa0] sm:$0xff] %vm1506_vm0, %v7449_v36  ;;  %v7126_v40 = vpop.f32.mrf.mxu0  ;;  %v6044_v36 = vld [vmem:[#allocation2 + $0x228] sm:$0xff] }
 0x90c   : > { %7344 = vst.msk [vmem:[#allocation2 + $0xd8] sm:$0xff] %vm1506_vm0, %v7232_v23  ;;  %v7074_v1 = vpop.f32.mrf.mxu3  ;;  %v7175_v39 = vpop.f32.mrf.mxu1 }
 0x90d   : > { %v7075_v61 = vadd.f32 %v7074_v1, %v7025_v32  ;;  %v7176_v54 = vadd.f32 %v7175_v39, %v7126_v40 }
 0x90f   : > { %v7231_v42 = vadd.f32 %v7075_v61, %v6001_v21  ;;  %v7239_v43 = vadd.f32 %v7176_v54, %v6009_v45 }
 0x911   : > { %7343 = vst [vmem:[#allocation2 + $0xd0] sm:$0xff] %v7231_v42  ;;  %v7028_v10 = vpop.f32.mrf.mxu2 }
 0x912   : > { %7567 = vst [vmem:[%s12223_s29 + $0xd0] sm:$0xff] %v7231_v42  ;;  %v6043_v42 = vld [vmem:[#allocation2 + $0x220] sm:$0xff] }
 0x913   : > { %v7456_v46 = vld [vmem:[#allocation2 + $0xd8] sm:$0xff]  ;;  %7351 = vst.msk [vmem:[#allocation2 + $0x110] sm:$0xff] %vm1506_vm0, %v7239_v43  ;;  %v7128_v17 = vpop.f32.mrf.mxu0 }
 0x914   : > { %7568 = vst.msk [vmem:[%s12223_s29 + $0xd8] sm:$0xff] %vm1506_vm0, %v7456_v46  ;;  %v7077_v48 = vpop.f32.mrf.mxu3  ;;  %v7177_v9 = vpop.f32.mrf.mxu1  ;;  %v6051_v46 = vld [vmem:[#allocation2 + $0x260] sm:$0xff] }
 0x915   : > { %v7078_v14 = vadd.f32 %v7077_v48, %v7028_v10  ;;  %v7178_v56 = vadd.f32 %v7177_v9, %v7128_v17 }
 0x917   : > { %v7238_v41 = vadd.f32 %v7078_v14, %v6008_v27  ;;  %v7246_v59 = vadd.f32 %v7178_v56, %v6016_v25 }
 0x919   : > { %7350 = vst [vmem:[#allocation2 + $0x108] sm:$0xff] %v7238_v41  ;;  %v7030_v34 = vpop.f32.mrf.mxu2 }
 0x91a   : > { %v7463_v4 = vld [vmem:[#allocation2 + $0x110] sm:$0xff]  ;;  %7574 = vst [vmem:[%s12223_s29 + $0x108] sm:$0xff] %v7238_v41  ;;  %v6050_v41 = vld [vmem:[#allocation2 + $0x258] sm:$0xff] }
 0x91b   : > { %7575 = vst.msk [vmem:[%s12223_s29 + $0x110] sm:$0xff] %vm1506_vm0, %v7463_v4  ;;  %v7131_v2 = vpop.f32.mrf.mxu0  ;;  %v6058_v4 = vld [vmem:[#allocation2 + $0x298] sm:$0xff] }
 0x91c   : > { %7358 = vst.msk [vmem:[#allocation2 + $0x148] sm:$0xff] %vm1506_vm0, %v7246_v59  ;;  %v7079_v47 = vpop.f32.mrf.mxu3  ;;  %v7180_v51 = vpop.f32.mrf.mxu1 }
 0x91d   : > { %v7080_v60 = vadd.f32 %v7079_v47, %v7030_v34  ;;  %v7181_v37 = vadd.f32 %v7180_v51, %v7131_v2 }
 0x91f   : > { %v7245_v16 = vadd.f32 %v7080_v60, %v6015_v57  ;;  %v7253_v7 = vadd.f32 %v7181_v37, %v6023_v19 }
 0x921   : > { %7357 = vst [vmem:[#allocation2 + $0x140] sm:$0xff] %v7245_v16  ;;  %v7033_v12 = vpop.f32.mrf.mxu2 }
 0x922   : > { %7581 = vst [vmem:[%s12223_s29 + $0x140] sm:$0xff] %v7245_v16  ;;  %v6057_v16 = vld [vmem:[#allocation2 + $0x290] sm:$0xff] }
 0x923   : > { %v7470_v49 = vld [vmem:[#allocation2 + $0x148] sm:$0xff]  ;;  %7365 = vst.msk [vmem:[#allocation2 + $0x180] sm:$0xff] %vm1506_vm0, %v7253_v7  ;;  %v7133_v53 = vpop.f32.mrf.mxu0 }
 0x924   : > { %7582 = vst.msk [vmem:[%s12223_s29 + $0x148] sm:$0xff] %vm1506_vm0, %v7470_v49  ;;  %v7082_v13 = vpop.f32.mrf.mxu3  ;;  %v7182_v55 = vpop.f32.mrf.mxu1  ;;  %v6065_v49 = vld [vmem:[#allocation2 + $0x2d0] sm:$0xff] }
 0x925   : > { %v7083_v63 = vadd.f32 %v7082_v13, %v7033_v12  ;;  %v7183_v50 = vadd.f32 %v7182_v55, %v7133_v53 }
 0x927   : > { %v7252_v18 = vadd.f32 %v7083_v63, %v6022_v15  ;;  %v7260_v29 = vadd.f32 %v7183_v50, %v6030_v33 }
 0x929   : > { %7364 = vst [vmem:[#allocation2 + $0x178] sm:$0xff] %v7252_v18  ;;  %v7035_v62 = vpop.f32.mrf.mxu2 }
 0x92a   : > { %v7477_v8 = vld [vmem:[#allocation2 + $0x180] sm:$0xff]  ;;  %7588 = vst [vmem:[%s12223_s29 + $0x178] sm:$0xff] %v7252_v18  ;;  %v6064_v18 = vld [vmem:[#allocation2 + $0x2c8] sm:$0xff] }
 0x92b   : > { %7589 = vst.msk [vmem:[%s12223_s29 + $0x180] sm:$0xff] %vm1506_vm0, %v7477_v8  ;;  %v7136_v28 = vpop.f32.mrf.mxu0  ;;  %v6072_v8 = vld [vmem:[#allocation2 + $0x308] sm:$0xff] }
 0x92c   : > { %7372 = vst.msk [vmem:[#allocation2 + $0x1b8] sm:$0xff] %vm1506_vm0, %v7260_v29  ;;  %v7084_v52 = vpop.f32.mrf.mxu3  ;;  %v7185_v24 = vpop.f32.mrf.mxu1 }
 0x92d   : > { %v7085_v6 = vadd.f32 %v7084_v52, %v7035_v62  ;;  %v7186_v38 = vadd.f32 %v7185_v24, %v7136_v28 }
 0x92f   : > { %v7259_v26 = vadd.f32 %v7085_v6, %v6029_v5  ;;  %v7267_v20 = vadd.f32 %v7186_v38, %v6037_v31 }
 0x931   : > { %7371 = vst [vmem:[#allocation2 + $0x1b0] sm:$0xff] %v7259_v26  ;;  %v7038_v0 = vpop.f32.mrf.mxu2 }
 0x932   : > { %7595 = vst [vmem:[%s12223_s29 + $0x1b0] sm:$0xff] %v7259_v26  ;;  %v6071_v26 = vld [vmem:[#allocation2 + $0x300] sm:$0xff] }
 0x933   : > { %v7484_v35 = vld [vmem:[#allocation2 + $0x1b8] sm:$0xff]  ;;  %7379 = vst.msk [vmem:[#allocation2 + $0x1f0] sm:$0xff] %vm1506_vm0, %v7267_v20  ;;  %v7138_v3 = vpop.f32.mrf.mxu0 }
 0x934   : > { %7596 = vst.msk [vmem:[%s12223_s29 + $0x1b8] sm:$0xff] %vm1506_vm0, %v7484_v35  ;;  %v7087_v22 = vpop.f32.mrf.mxu3  ;;  %v7187_v58 = vpop.f32.mrf.mxu1  ;;  %v6079_v35 = vld [vmem:[#allocation2 + $0x340] sm:$0xff] }
 0x935   : > { %v7088_v44 = vadd.f32 %v7087_v22, %v7038_v0  ;;  %v7188_v23 = vadd.f32 %v7187_v58, %v7138_v3 }
 0x937   : > { %v7266_v30 = vadd.f32 %v7088_v44, %v6036_v11  ;;  %v7274_v32 = vadd.f32 %v7188_v23, %v6044_v36 }
 0x939   : > { %7378 = vst [vmem:[#allocation2 + $0x1e8] sm:$0xff] %v7266_v30  ;;  %v7040_v61 = vpop.f32.mrf.mxu2 }
 0x93a   : > { %v7491_v1 = vld [vmem:[#allocation2 + $0x1f0] sm:$0xff]  ;;  %7602 = vst [vmem:[%s12223_s29 + $0x1e8] sm:$0xff] %v7266_v30  ;;  %v6078_v30 = vld [vmem:[#allocation2 + $0x338] sm:$0xff] }
 0x93b   : > { %7603 = vst.msk [vmem:[%s12223_s29 + $0x1f0] sm:$0xff] %vm1506_vm0, %v7491_v1  ;;  %v7141_v39 = vpop.f32.mrf.mxu0  ;;  %v6086_v1 = vld [vmem:[#allocation2 + $0x378] sm:$0xff] }
 0x93c   : > { %7386 = vst.msk [vmem:[#allocation2 + $0x228] sm:$0xff] %vm1506_vm0, %v7274_v32  ;;  %v7089_v40 = vpop.f32.mrf.mxu3  ;;  %v7190_v54 = vpop.f32.mrf.mxu1 }
 0x93d   : > { %v7090_v21 = vadd.f32 %v7089_v40, %v7040_v61  ;;  %v7191_v43 = vadd.f32 %v7190_v54, %v7141_v39  ;;  %v6085_v54 = vld [vmem:[#allocation2 + $0x370] sm:$0xff] }
 0x93f   : > { %v7273_v45 = vadd.f32 %v7090_v21, %v6043_v42  ;;  %v7281_v10 = vadd.f32 %v7191_v43, %v6051_v46 }
 0x941   : > { %7385 = vst [vmem:[#allocation2 + $0x220] sm:$0xff] %v7273_v45  ;;  %v7043_v14 = vpop.f32.mrf.mxu2 }
 0x942   : > { %7609 = vst [vmem:[%s12223_s29 + $0x220] sm:$0xff] %v7273_v45 }
 0x943   : > { %v7498_v48 = vld [vmem:[#allocation2 + $0x228] sm:$0xff]  ;;  %7393 = vst.msk [vmem:[#allocation2 + $0x260] sm:$0xff] %vm1506_vm0, %v7281_v10  ;;  %v7143_v9 = vpop.f32.mrf.mxu0 }
 0x944   : > { %7610 = vst.msk [vmem:[%s12223_s29 + $0x228] sm:$0xff] %vm1506_vm0, %v7498_v48  ;;  %v7092_v17 = vpop.f32.mrf.mxu3  ;;  %v7192_v56 = vpop.f32.mrf.mxu1 }
 0x945   : > { %v7093_v27 = vadd.f32 %v7092_v17, %v7043_v14  ;;  %v7193_v59 = vadd.f32 %v7192_v56, %v7143_v9 }
 0x947   : > { %v7280_v25 = vadd.f32 %v7093_v27, %v6050_v41  ;;  %v7288_v34 = vadd.f32 %v7193_v59, %v6058_v4 }
 0x949   : > { %7392 = vst [vmem:[#allocation2 + $0x258] sm:$0xff] %v7280_v25  ;;  %v7045_v60 = vpop.f32.mrf.mxu2 }
 0x94a   : > { %v7505_v47 = vld [vmem:[#allocation2 + $0x260] sm:$0xff]  ;;  %7616 = vst [vmem:[%s12223_s29 + $0x258] sm:$0xff] %v7280_v25 }
 0x94b   : > { %7617 = vst.msk [vmem:[%s12223_s29 + $0x260] sm:$0xff] %vm1506_vm0, %v7505_v47  ;;  %v7146_v51 = vpop.f32.mrf.mxu0 }
 0x94c   : > { %7400 = vst.msk [vmem:[#allocation2 + $0x298] sm:$0xff] %vm1506_vm0, %v7288_v34  ;;  %v7094_v2 = vpop.f32.mrf.mxu3  ;;  %v7195_v37 = vpop.f32.mrf.mxu1 }
 0x94d   : > { %v7095_v57 = vadd.f32 %v7094_v2, %v7045_v60  ;;  %v7196_v7 = vadd.f32 %v7195_v37, %v7146_v51 }
 0x94f   : > { %v7287_v19 = vadd.f32 %v7095_v57, %v6057_v16  ;;  %v7295_v12 = vadd.f32 %v7196_v7, %v6065_v49 }
 0x951   : > { %7399 = vst [vmem:[#allocation2 + $0x290] sm:$0xff] %v7287_v19  ;;  %v7048_v63 = vpop.f32.mrf.mxu2 }
 0x952   : > { %7623 = vst [vmem:[%s12223_s29 + $0x290] sm:$0xff] %v7287_v19 }
 0x953   : > { %v7512_v13 = vld [vmem:[#allocation2 + $0x298] sm:$0xff]  ;;  %7407 = vst.msk [vmem:[#allocation2 + $0x2d0] sm:$0xff] %vm1506_vm0, %v7295_v12  ;;  %v7148_v55 = vpop.f32.mrf.mxu0 }
 0x954   : > { %7624 = vst.msk [vmem:[%s12223_s29 + $0x298] sm:$0xff] %vm1506_vm0, %v7512_v13  ;;  %v7097_v53 = vpop.f32.mrf.mxu3  ;;  %v7197_v50 = vpop.f32.mrf.mxu1 }
 0x955   : > { %v7098_v15 = vadd.f32 %v7097_v53, %v7048_v63  ;;  %v7198_v29 = vadd.f32 %v7197_v50, %v7148_v55 }
 0x957   : > { %v7294_v33 = vadd.f32 %v7098_v15, %v6064_v18  ;;  %v7302_v62 = vadd.f32 %v7198_v29, %v6072_v8 }
 0x959   : > { %7406 = vst [vmem:[#allocation2 + $0x2c8] sm:$0xff] %v7294_v33  ;;  %v7050_v6 = vpop.f32.mrf.mxu2 }
 0x95a   : > { %v7519_v52 = vld [vmem:[#allocation2 + $0x2d0] sm:$0xff]  ;;  %7630 = vst [vmem:[%s12223_s29 + $0x2c8] sm:$0xff] %v7294_v33 }
 0x95b   : > { %7631 = vst.msk [vmem:[%s12223_s29 + $0x2d0] sm:$0xff] %vm1506_vm0, %v7519_v52  ;;  %v7151_v24 = vpop.f32.mrf.mxu0 }
 0x95c   : > { %7414 = vst.msk [vmem:[#allocation2 + $0x308] sm:$0xff] %vm1506_vm0, %v7302_v62  ;;  %v7099_v28 = vpop.f32.mrf.mxu3  ;;  %v7200_v38 = vpop.f32.mrf.mxu1 }
 0x95d   : > { %v7100_v5 = vadd.f32 %v7099_v28, %v7050_v6  ;;  %v7201_v20 = vadd.f32 %v7200_v38, %v7151_v24 }
 0x95f   : > { %v7301_v31 = vadd.f32 %v7100_v5, %v6071_v26  ;;  %v7309_v0 = vadd.f32 %v7201_v20, %v6079_v35 }
 0x961   : > { %7413 = vst [vmem:[#allocation2 + $0x300] sm:$0xff] %v7301_v31  ;;  %v7053_v44 = vpop.f32.mrf.mxu2 }
 0x962   : > { %7637 = vst [vmem:[%s12223_s29 + $0x300] sm:$0xff] %v7301_v31 }
 0x963   : > { %v7526_v22 = vld [vmem:[#allocation2 + $0x308] sm:$0xff]  ;;  %7421 = vst.msk [vmem:[#allocation2 + $0x340] sm:$0xff] %vm1506_vm0, %v7309_v0  ;;  %v7153_v58 = vpop.f32.mrf.mxu0 }
 0x964   : > { %7638 = vst.msk [vmem:[%s12223_s29 + $0x308] sm:$0xff] %vm1506_vm0, %v7526_v22  ;;  %v7102_v3 = vpop.f32.mrf.mxu3  ;;  %v7202_v23 = vpop.f32.mrf.mxu1 }
 0x965   : > { %v7103_v11 = vadd.f32 %v7102_v3, %v7053_v44  ;;  %v7203_v32 = vadd.f32 %v7202_v23, %v7153_v58 }
 0x967   : > { %v7308_v36 = vadd.f32 %v7103_v11, %v6078_v30  ;;  %v7316_v61 = vadd.f32 %v7203_v32, %v6086_v1 }
 0x969   : > { %7420 = vst [vmem:[#allocation2 + $0x338] sm:$0xff] %v7308_v36  ;;  %v7055_v21 = vpop.f32.mrf.mxu2 }
 0x96a   : > { %v7533_v40 = vld [vmem:[#allocation2 + $0x340] sm:$0xff]  ;;  %7644 = vst [vmem:[%s12223_s29 + $0x338] sm:$0xff] %v7308_v36 }
 0x96b   : > { %7645 = vst.msk [vmem:[%s12223_s29 + $0x340] sm:$0xff] %vm1506_vm0, %v7533_v40 }
 0x96c   : > { %7428 = vst.msk [vmem:[#allocation2 + $0x378] sm:$0xff] %vm1506_vm0, %v7316_v61  ;;  %v7104_v39 = vpop.f32.mrf.mxu3 }
 0x96d   : > { %v7105_v42 = vadd.f32 %v7104_v39, %v7055_v21 }
 0x96f   : > { %v7315_v45 = vadd.f32 %v7105_v42, %v6085_v54 }
 0x971   : > { %7427 = vst [vmem:[#allocation2 + $0x370] sm:$0xff] %v7315_v45 }
 0x972   : > { %7651 = vst [vmem:[%s12223_s29 + $0x370] sm:$0xff] %v7315_v45 }
 0x973   : > { %v7540_v43 = vld [vmem:[#allocation2 + $0x378] sm:$0xff] }
 0x974   : > { %7652 = vst.msk [vmem:[%s12223_s29 + $0x378] sm:$0xff] %vm1506_vm0, %v7540_v43 }
 0x975 PF: > { %s16_s23 = sadd.s32 1, %s8295_s23   ;;  %s12831_s21 = smov %s8291_s22 }
 0x976   : > { %p13_p5 = scmp.ge.s32.totalorder %s16_s23, 4   ;;  %s12832_s22 = smov %s12834_s24 }
 0x978   :  { %15 = sbr.rel (!%p13_p5) target bundleno = 2 (0x2), region = 89 }

</bundles_post_ra>
